<compile_context>
chip_gen: v7x
topology: tpu7x:2x2x1
jax: 0.10.0
libtpu: 0.0.40
codegen_flags: <defaults>
</compile_context>

<pallas_src>
import functools

import jax
import jax.numpy as jnp
from jax import lax
from jax.experimental import pallas as pl
from jax.experimental.pallas import tpu as pltpu


def _round_up(x, m):
    return (x + m - 1) // m * m


# ----------------------------- Pallas kernels ---------------------------------------

def _clamp_l1_kernel(x_ref, y_ref, o_ref, acc_ref, *, inv_d):
    # grid = (B [parallel], row-tiles [arbitrary]); per-sample sum |clamp(x)-clamp(y)|
    # accumulated in a VMEM scratch, mean written at the last tile (BatchL1Loss).
    t = pl.program_id(1)

    @pl.when(t == 0)
    def _():
        acc_ref[...] = jnp.zeros_like(acc_ref)

    x = jnp.clip(x_ref[...], -1.0, 1.0)
    y = jnp.clip(y_ref[...], -1.0, 1.0)
    acc_ref[...] += jnp.sum(jnp.abs(x - y))

    @pl.when(t == pl.num_programs(1) - 1)
    def _():
        o_ref[...] = acc_ref[...] * inv_d


def clamp_batch_l1(x, y, *, tr=512):
    """clamp both to [-1,1], then per-sample L1 mean -> (B,)"""
    B = x.shape[0]
    xf = x.reshape(B, -1).astype(jnp.float32)
    yf = y.reshape(B, -1).astype(jnp.float32)
    D = xf.shape[1]
    rows = pl.cdiv(D, 128)                       # lane-dense layout: (B, rows, 128)
    tr = min(tr, _round_up(rows, 8))
    rows_p = _round_up(rows, tr)
    Dp = rows_p * 128
    if Dp != D:                                   # zero pad -> |0-0| contributes 0
        xf = jnp.pad(xf, ((0, 0), (0, Dp - D)))
        yf = jnp.pad(yf, ((0, 0), (0, Dp - D)))
    x3 = xf.reshape(B, rows_p, 128)
    y3 = yf.reshape(B, rows_p, 128)
    out = pl.pallas_call(
        functools.partial(_clamp_l1_kernel, inv_d=1.0 / D),
        grid=(B, rows_p // tr),
        in_specs=[
            pl.BlockSpec((1, tr, 128), lambda b, t: (b, t, 0)),
            pl.BlockSpec((1, tr, 128), lambda b, t: (b, t, 0)),
        ],
        out_specs=pl.BlockSpec((1, 1, 1), lambda b, t: (b, 0, 0)),
        out_shape=jax.ShapeDtypeStruct((B, 1, 1), jnp.float32),
        scratch_shapes=[pltpu.VMEM((1, 1, 1), jnp.float32)],
        compiler_params=pltpu.CompilerParams(
            dimension_semantics=("parallel", "arbitrary")),
    )(x3, y3)
    return out[:, 0, 0]


def _matmul_bias_relu_kernel(a_ref, b_ref, bias_ref, o_ref):
    # single-shot K: the whole (K, N) weight is a resident VMEM block, so no accumulator
    # scratch / K grid axis is needed; bf16 operands feed the MXU with f32 accumulation.
    acc = jnp.dot(a_ref[...], b_ref[...], preferred_element_type=jnp.float32)
    o_ref[...] = jnp.maximum(acc + bias_ref[...], 0.0).astype(o_ref.dtype)


def matmul_bias_relu(a, b, bias, *, tm=512, out_dtype=jnp.bfloat16):
    """relu(a @ b + bias): a (M, K) bf16, b (K, N), bias (N,) -> (M, N) out_dtype.

    The weight is kept fully resident in VMEM (constant index_map); only activation rows
    stream, tiled over an M-parallel grid (megacore / v7x dual-TC)."""
    M, K = a.shape
    N = b.shape[1]
    tm = min(tm, M)                               # full-dim block when M is small
    grid_m = pl.cdiv(M, tm)
    a = a.astype(jnp.bfloat16)
    b = b.astype(jnp.bfloat16)
    bias2 = bias.astype(jnp.float32).reshape(1, N)
    # TODO(synk): on v5e, pipeline_mode=pl.Buffered(3) on the A spec could hide residual DMA.
    return pl.pallas_call(
        _matmul_bias_relu_kernel,
        grid=(grid_m,),
        in_specs=[
            pl.BlockSpec((tm, K), lambda i: (i, 0)),
            pl.BlockSpec((K, N), lambda i: (0, 0)),     # resident weight
            pl.BlockSpec((1, N), lambda i: (0, 0)),
        ],
        out_specs=pl.BlockSpec((tm, N), lambda i: (i, 0)),
        out_shape=jax.ShapeDtypeStruct((M, N), out_dtype),
        compiler_params=pltpu.CompilerParams(
            dimension_semantics=("parallel",),
            vmem_limit_bytes=32 * 1024 * 1024),
    )(a, b, bias2)


def _lpips_layer_kernel(f0_ref, f1_ref, w_ref, o_ref, acc_ref, *, inv_hw):
    # grid = (B [parallel], spatial tiles [arbitrary]); unit-normalize along channels
    # (rsqrt -> EUP slot), squared diff, 1x1 "lin" weights, spatial sum accumulated in VMEM.
    t = pl.program_id(1)

    @pl.when(t == 0)
    def _():
        acc_ref[...] = jnp.zeros_like(acc_ref)

    f0 = f0_ref[...].astype(jnp.float32)
    f1 = f1_ref[...].astype(jnp.float32)
    n0 = f0 * lax.rsqrt(jnp.sum(f0 * f0, axis=2, keepdims=True) + 1e-20)
    n1 = f1 * lax.rsqrt(jnp.sum(f1 * f1, axis=2, keepdims=True) + 1e-20)
    d = (n0 - n1) ** 2 * w_ref[...]                       # (1, thw, Cp)
    acc_ref[...] += jnp.sum(d)

    @pl.when(t == pl.num_programs(1) - 1)
    def _():
        o_ref[...] = acc_ref[...] * inv_hw


def lpips_layer(f_all, w, batch, *, thw=512):
    """per-sample LPIPS contribution of one tap -> (batch,).

    f_all: (2*batch, H, W, C) bf16 feature map holding [inputs; recons]; both halves are
    read from the same array via index_maps (no slicing copies).  Channels are zero-padded
    to a multiple of 128 (zero channels contribute 0 to the norm and the weighted diff)."""
    twoB, H, W, C = f_all.shape
    HW = H * W
    Cp = _round_up(C, 128)
    thw = min(thw, _round_up(HW, 8))
    HWp = _round_up(HW, thw)
    f2 = f_all.reshape(twoB, HW, C)
    if HWp != HW or Cp != C:                      # zero rows/channels contribute 0
        f2 = jnp.pad(f2, ((0, 0), (0, HWp - HW), (0, Cp - C)))
    wp = jnp.pad(w.astype(jnp.float32), (0, Cp - C)).reshape(1, 1, Cp)
    out = pl.pallas_call(
        functools.partial(_lpips_layer_kernel, inv_hw=1.0 / HW),
        grid=(batch, HWp // thw),
        in_specs=[
            pl.BlockSpec((1, thw, Cp), lambda b, t: (b, t, 0)),
            pl.BlockSpec((1, thw, Cp), lambda b, t, _B=batch: (b + _B, t, 0)),
            pl.BlockSpec((1, 1, Cp), lambda b, t: (0, 0, 0)),
        ],
        out_specs=pl.BlockSpec((1, 1, 1), lambda b, t: (b, 0, 0)),
        out_shape=jax.ShapeDtypeStruct((batch, 1, 1), jnp.float32),
        scratch_shapes=[pltpu.VMEM((1, 1, 1), jnp.float32)],
        compiler_params=pltpu.CompilerParams(
            dimension_semantics=("parallel", "arbitrary")),
    )(f2, f2, wp)
    return out[:, 0, 0]


# ----------------------------- JAX glue (data movement only) ------------------------

def _im2col_aligned(x_nhwc, kh, kw, stride, pad):
    """im2col with the tap count zero-padded so K = C*taps is already a multiple of 128.

    TODO(synk): the patch gather still materializes in HBM; fusing it into the matmul kernel
    (per-tap accumulation over the padded NHWC input) would remove the expansion entirely."""
    B, H, W, C = x_nhwc.shape
    xp = jnp.pad(x_nhwc, ((0, 0), (pad, pad), (pad, pad), (0, 0)))
    Hp, Wp = H + 2 * pad, W + 2 * pad
    Ho = (Hp - kh) // stride + 1
    Wo = (Wp - kw) // stride + 1
    cols = []
    for i in range(kh):
        for j in range(kw):
            cols.append(xp[:, i:i + stride * (Ho - 1) + 1:stride,
                           j:j + stride * (Wo - 1) + 1:stride, :])
    taps = kh * kw
    taps_p = taps
    while (C * taps_p) % 128:      # extra zero taps, matched by zero rows in the weights
        taps_p += 1
    cols.extend(jnp.zeros_like(cols[0]) for _ in range(taps_p - taps))
    patches = jnp.stack(cols, axis=3)                    # (B, Ho, Wo, taps_p, C)
    patches = jnp.transpose(patches, (0, 1, 2, 4, 3))    # (B, Ho, Wo, C, taps_p)
    return patches.reshape(B * Ho * Wo, C * taps_p), Ho, Wo, taps_p


def conv2d_relu(x_nhwc, w_oihw, bias, stride, pad):
    B = x_nhwc.shape[0]
    Cout, Cin, kh, kw = w_oihw.shape
    patches, Ho, Wo, taps_p = _im2col_aligned(x_nhwc, kh, kw, stride, pad)
    w3 = jnp.pad(w_oihw.reshape(Cout, Cin, kh * kw),
                 ((0, 0), (0, 0), (0, taps_p - kh * kw)))
    wm = w3.reshape(Cout, Cin * taps_p).T                # (K, Cout), matches patch order
    out = matmul_bias_relu(patches, wm, bias)            # bf16 feature map, exact (M, Cout)
    return out.reshape(B, Ho, Wo, Cout)


def maxpool2d(x_nhwc, k=3, s=2):
    # TODO(synk): folding the pool into the next conv's patch gather would avoid this
    # intermediate; reduce_window already avoids the 9x stacked-slice materialization.
    return lax.reduce_window(x_nhwc, jnp.array(-jnp.inf, x_nhwc.dtype), lax.max,
                             (1, k, k, 1), (1, s, s, 1), "VALID")


# ----------------------------- LPIPS(alex) parameters & features --------------------

_ALEX_CFG = [  # (Cout, Cin, k, stride, pad) -- torchvision AlexNet .features convs
    (64, 3, 11, 4, 2),
    (192, 64, 5, 1, 2),
    (384, 192, 3, 1, 1),
    (256, 384, 3, 1, 1),
    (256, 256, 3, 1, 1),
]
_LPIPS_CHANNELS = [64, 192, 384, 256, 256]


def init_params(key):
    convs = []
    for cout, cin, k, _, _ in _ALEX_CFG:
        key, kw_, kb_ = jax.random.split(key, 3)
        fan_in = cin * k * k
        w = jax.random.normal(kw_, (cout, cin, k, k), jnp.float32) * jnp.sqrt(2.0 / fan_in)
        b = jax.random.normal(kb_, (cout,), jnp.float32) * 0.01
        convs.append((w, b))
    lins = []
    for c in _LPIPS_CHANNELS:
        key, kl = jax.random.split(key)
        lins.append(jnp.abs(jax.random.normal(kl, (c,), jnp.float32)) * 0.1)
    # TODO(synk): LPIPS 'lin' / AlexNet weights are synthetic inits, not checkpoint weights.
    shift = jnp.array([-0.030, -0.088, -0.188], jnp.float32)   # LPIPS ScalingLayer
    scale = jnp.array([0.458, 0.448, 0.450], jnp.float32)
    return {"convs": convs, "lins": lins, "shift": shift, "scale": scale}


def alexnet_features(x_nhwc, convs):
    (w1, b1), (w2, b2), (w3, b3), (w4, b4), (w5, b5) = convs
    feats = []
    h = conv2d_relu(x_nhwc, w1, b1, stride=4, pad=2); feats.append(h)   # relu1
    h = maxpool2d(h)
    h = conv2d_relu(h, w2, b2, stride=1, pad=2); feats.append(h)        # relu2
    h = maxpool2d(h)
    h = conv2d_relu(h, w3, b3, stride=1, pad=1); feats.append(h)        # relu3
    h = conv2d_relu(h, w4, b4, stride=1, pad=1); feats.append(h)        # relu4
    h = conv2d_relu(h, w5, b5, stride=1, pad=1); feats.append(h)        # relu5
    return feats


# ----------------------------- module forward ---------------------------------------

def autoencoder_perceptual_forward(inputs, recons, params,
                                   recon_weight=1.0, perceptual_weight=1.0):
    """inputs/recons: NCHW.  Returns (loss (B,), rec_loss (B,), p_loss (B,)).
    resize_input/resize_target default to False -> no interpolation branch."""
    B = inputs.shape[0]

    # reconstruction (batch-wise L1 on clamped tensors)
    rec_loss = clamp_batch_l1(inputs, recons) * recon_weight            # (B,)

    # LPIPS perceptual loss: run both images through AlexNet in one 2B batch, all in bf16.
    in_nhwc = jnp.transpose(inputs, (0, 2, 3, 1))
    rec_nhwc = jnp.transpose(recons, (0, 2, 3, 1))
    x_all = jnp.clip(jnp.concatenate([in_nhwc, rec_nhwc], axis=0).astype(jnp.float32),
                     -1.0, 1.0).astype(jnp.bfloat16)

    # Fold the LPIPS ScalingLayer ((x - shift) / scale) into conv1's weights and bias.
    (w1, b1) = params["convs"][0]
    scale, shift = params["scale"], params["shift"]
    w1f = w1 / scale[None, :, None, None]
    b1f = b1 - jnp.einsum("ocij,c->o", w1, shift / scale)
    convs = [(w1f, b1f)] + list(params["convs"][1:])

    feats = alexnet_features(x_all, convs)                              # bf16 taps, 2B batch

    p = jnp.zeros((B,), jnp.float32)
    for f, w in zip(feats, params["lins"]):
        p = p + lpips_layer(f, w, B)
    p_loss = jnp.maximum(p, 0.0) * perceptual_weight                    # .relu() * weight

    loss = rec_loss + p_loss
    return loss, rec_loss, p_loss


# ----------------------------- pure-JAX f32 reference --------------------------------

def reference_forward(inputs, recons, params, recon_weight=1.0, perceptual_weight=1.0):
    B = inputs.shape[0]
    xi = jnp.clip(inputs.astype(jnp.float32), -1.0, 1.0)
    xr = jnp.clip(recons.astype(jnp.float32), -1.0, 1.0)
    rec = jnp.mean(jnp.abs(xi - xr).reshape(B, -1), axis=1) * recon_weight

    shift = params["shift"].reshape(1, 1, 1, 3)
    scale = params["scale"].reshape(1, 1, 1, 3)
    strides_pads = [(4, 2), (1, 2), (1, 1), (1, 1), (1, 1)]

    def feats(x_nchw):
        h = (jnp.transpose(x_nchw, (0, 2, 3, 1)) - shift) / scale
        outs = []
        for li, ((w, b), (s, p)) in enumerate(zip(params["convs"], strides_pads)):
            h = lax.conv_general_dilated(h, w, (s, s), [(p, p), (p, p)],
                                         dimension_numbers=("NHWC", "OIHW", "NHWC"))
            h = jax.nn.relu(h + b)
            outs.append(h)
            if li < 2:
                h = lax.reduce_window(h, jnp.array(-jnp.inf, h.dtype), lax.max,
                                      (1, 3, 3, 1), (1, 2, 2, 1), "VALID")
        return outs

    p = jnp.zeros((B,), jnp.float32)
    for f0, f1, w in zip(feats(xi), feats(xr), params["lins"]):
        n0 = f0 * lax.rsqrt(jnp.sum(f0 * f0, axis=-1, keepdims=True) + 1e-20)
        n1 = f1 * lax.rsqrt(jnp.sum(f1 * f1, axis=-1, keepdims=True) + 1e-20)
        d = (n0 - n1) ** 2 * w.reshape(1, 1, 1, -1)
        p = p + jnp.mean(jnp.sum(d, axis=-1), axis=(1, 2))
    p = jnp.maximum(p, 0.0) * perceptual_weight
    return rec + p, rec, p


class EMATracker:
    def __init__(self, steps=64):
        self.alpha = 2.0 / (steps + 1.0)
        self.value = None

    def update(self, x):
        x = float(x)
        self.value = x if self.value is None else self.alpha * x + (1.0 - self.alpha) * self.value


# ----------------------------- demo -------------------------------------------------

if __name__ == "__main__":
    key = jax.random.PRNGKey(0)
    kp, ki, kr = jax.random.split(key, 3)
    params = init_params(kp)

    # NCHW images; LPIPS(alex) needs >= ~32px spatial to survive its pooling stack
    B, C, H, W = 2, 3, 32, 32
    inputs = jax.random.uniform(ki, (B, C, H, W), jnp.float32, -1.2, 1.2)
    recons = jax.random.uniform(kr, (B, C, H, W), jnp.float32, -1.2, 1.2)

    fwd = jax.jit(functools.partial(autoencoder_perceptual_forward, params=params))
    loss, rec_loss, p_loss = fwd(inputs, recons)
    loss = jax.block_until_ready(loss)

    # pure-JAX f32 reference check (kernel path runs features in bf16 -> loose perceptual tol)
    ref_loss, ref_rec, ref_p = jax.jit(
        functools.partial(reference_forward, params=params))(inputs, recons)
    assert bool(jnp.allclose(rec_loss, ref_rec, rtol=1e-3, atol=1e-5))
    assert bool(jnp.allclose(p_loss, ref_p, rtol=2e-1, atol=1e-2))

    # host-side logging / EMA bookkeeping (mirrors log_dict construction)
    t_ema, r_ema, p_ema = EMATracker(64), EMATracker(64), EMATracker(64)
    log_loss = float(jnp.mean(loss))
    log_rec = float(jnp.mean(rec_loss))
    log_p = float(jnp.mean(p_loss))
    t_ema.update(log_loss)
    r_ema.update(log_rec)
    p_ema.update(log_p)
    split = "train"
    log_dict = {
        f"{split}/loss/total": log_loss,
        f"{split}/loss/rec": log_rec,
        f"{split}/loss/p": log_p,
        f"{split}/loss/total_ema": t_ema.value,
        f"{split}/loss/rec_ema": r_ema.value,
        f"{split}/loss/p_ema": p_ema.value,
    }

    assert loss.shape == (B,)
    assert bool(jnp.all(jnp.isfinite(loss)))
    assert len(log_dict) == 6
    print("KERNEL_OK")
</pallas_src>

<mosaic_0001>
module attributes {stable_mosaic.version = 11 : i64} {
  func.func @_matmul_bias_relu_kernel(%arg0: i32, %arg1: memref<196x384xbf16, #tpu.memory_space<vmem>>, %arg2: memref<384x64xbf16, #tpu.memory_space<vmem>>, %arg3: memref<1x64xf32, #tpu.memory_space<vmem>>, %arg4: memref<196x64xbf16, #tpu.memory_space<vmem>>) attributes {dimension_semantics = [#tpu.dimension_semantics<parallel>], iteration_bounds = array<i64: 1>, scalar_prefetch = 0 : i64, scratch_operands = 0 : i64, tpu.core_type = #tpu.core_type<tc>, window_params = [{transform_indices = @transform_0, window_bounds = array<i64: 196, 384>}, {pipeline_mode = #tpu.pipeline_mode<synchronous>, transform_indices = @transform_1, window_bounds = array<i64: 384, 64>}, {pipeline_mode = #tpu.pipeline_mode<synchronous>, transform_indices = @transform_2, window_bounds = array<i64: 1, 64>}, {transform_indices = @transform_3, window_bounds = array<i64: 196, 64>}]} {
    %c0 = arith.constant 0 : index
    %c0_0 = arith.constant 0 : index
    %0 = vector.load %arg1[%c0, %c0_0] : memref<196x384xbf16, #tpu.memory_space<vmem>>, vector<196x384xbf16>
    %c0_1 = arith.constant 0 : index
    %c0_2 = arith.constant 0 : index
    %1 = vector.load %arg2[%c0_1, %c0_2] : memref<384x64xbf16, #tpu.memory_space<vmem>>, vector<384x64xbf16>
    %cst = arith.constant dense<0.000000e+00> : vector<196x64xf32>
    %2 = tpu.matmul %0, %1, %cst {dimension_numbers = #tpu.dot_dimension_numbers<[1], [0], [0], [1], [0, 0, 1, 1], [], []>} : vector<196x384xbf16>, vector<384x64xbf16>, vector<196x64xf32> -> vector<196x64xf32>
    %c0_3 = arith.constant 0 : index
    %c0_4 = arith.constant 0 : index
    %3 = vector.load %arg3[%c0_3, %c0_4] : memref<1x64xf32, #tpu.memory_space<vmem>>, vector<1x64xf32>
    %4 = vector.broadcast %3 : vector<1x64xf32> to vector<196x64xf32>
    %5 = arith.addf %2, %4 : vector<196x64xf32>
    %cst_5 = arith.constant 0.000000e+00 : f32
    %6 = vector.broadcast %cst_5 : f32 to vector<196x64xf32>
    %7 = arith.maximumf %5, %6 : vector<196x64xf32>
    %8 = arith.truncf %7 : vector<196x64xf32> to vector<196x64xbf16>
    %c0_6 = arith.constant 0 : index
    %c0_7 = arith.constant 0 : index
    %9 = vector.load %arg4[%c0_6, %c0_7] : memref<196x64xbf16, #tpu.memory_space<vmem>>, vector<196x64xbf16>
    tpu.vector_store %arg4[%c0_6, %c0_7], %8 {strides = array<i32>} : memref<196x64xbf16, #tpu.memory_space<vmem>>, vector<196x64xbf16>,
    return
  }
  func.func @transform_0(%arg0: i32) -> (i32, i32) {
    %c0_i32 = arith.constant 0 : i32
    %c0_i32_0 = arith.constant 0 : i32
    return %arg0, %c0_i32 : i32, i32
  }
  func.func @transform_1(%arg0: i32) -> (i32, i32) {
    %c0_i32 = arith.constant 0 : i32
    %c0_i32_0 = arith.constant 0 : i32
    %c0_i32_1 = arith.constant 0 : i32
    return %c0_i32, %c0_i32_0 : i32, i32
  }
  func.func @transform_2(%arg0: i32) -> (i32, i32) {
    %c0_i32 = arith.constant 0 : i32
    %c0_i32_0 = arith.constant 0 : i32
    %c0_i32_1 = arith.constant 0 : i32
    return %c0_i32, %c0_i32_0 : i32, i32
  }
  func.func @transform_3(%arg0: i32) -> (i32, i32) {
    %c0_i32 = arith.constant 0 : i32
    %c0_i32_0 = arith.constant 0 : i32
    return %arg0, %c0_i32 : i32, i32
  }
}

module attributes {stable_mosaic.version = 11 : i64} {
  func.func @_matmul_bias_relu_kernel(%arg0: i32, %arg1: memref<36x1664xbf16, #tpu.memory_space<vmem>>, %arg2: memref<1664x192xbf16, #tpu.memory_space<vmem>>, %arg3: memref<1x192xf32, #tpu.memory_space<vmem>>, %arg4: memref<36x192xbf16, #tpu.memory_space<vmem>>) attributes {dimension_semantics = [#tpu.dimension_semantics<parallel>], iteration_bounds = array<i64: 1>, scalar_prefetch = 0 : i64, scratch_operands = 0 : i64, tpu.core_type = #tpu.core_type<tc>, window_params = [{transform_indices = @transform_0, window_bounds = array<i64: 36, 1664>}, {pipeline_mode = #tpu.pipeline_mode<synchronous>, transform_indices = @transform_1, window_bounds = array<i64: 1664, 192>}, {pipeline_mode = #tpu.pipeline_mode<synchronous>, transform_indices = @transform_2, window_bounds = array<i64: 1, 192>}, {transform_indices = @transform_3, window_bounds = array<i64: 36, 192>}]} {
    %c0 = arith.constant 0 : index
    %c0_0 = arith.constant 0 : index
    %0 = vector.load %arg1[%c0, %c0_0] : memref<36x1664xbf16, #tpu.memory_space<vmem>>, vector<36x1664xbf16>
    %c0_1 = arith.constant 0 : index
    %c0_2 = arith.constant 0 : index
    %1 = vector.load %arg2[%c0_1, %c0_2] : memref<1664x192xbf16, #tpu.memory_space<vmem>>, vector<1664x192xbf16>
    %cst = arith.constant dense<0.000000e+00> : vector<36x192xf32>
    %2 = tpu.matmul %0, %1, %cst {dimension_numbers = #tpu.dot_dimension_numbers<[1], [0], [0], [1], [0, 0, 1, 1], [], []>} : vector<36x1664xbf16>, vector<1664x192xbf16>, vector<36x192xf32> -> vector<36x192xf32>
    %c0_3 = arith.constant 0 : index
    %c0_4 = arith.constant 0 : index
    %3 = vector.load %arg3[%c0_3, %c0_4] : memref<1x192xf32, #tpu.memory_space<vmem>>, vector<1x192xf32>
    %4 = vector.broadcast %3 : vector<1x192xf32> to vector<36x192xf32>
    %5 = arith.addf %2, %4 : vector<36x192xf32>
    %cst_5 = arith.constant 0.000000e+00 : f32
    %6 = vector.broadcast %cst_5 : f32 to vector<36x192xf32>
    %7 = arith.maximumf %5, %6 : vector<36x192xf32>
    %8 = arith.truncf %7 : vector<36x192xf32> to vector<36x192xbf16>
    %c0_6 = arith.constant 0 : index
    %c0_7 = arith.constant 0 : index
    %9 = vector.load %arg4[%c0_6, %c0_7] : memref<36x192xbf16, #tpu.memory_space<vmem>>, vector<36x192xbf16>
    tpu.vector_store %arg4[%c0_6, %c0_7], %8 {strides = array<i32>} : memref<36x192xbf16, #tpu.memory_space<vmem>>, vector<36x192xbf16>,
    return
  }
  func.func @transform_0(%arg0: i32) -> (i32, i32) {
    %c0_i32 = arith.constant 0 : i32
    %c0_i32_0 = arith.constant 0 : i32
    return %arg0, %c0_i32 : i32, i32
  }
  func.func @transform_1(%arg0: i32) -> (i32, i32) {
    %c0_i32 = arith.constant 0 : i32
    %c0_i32_0 = arith.constant 0 : i32
    %c0_i32_1 = arith.constant 0 : i32
    return %c0_i32, %c0_i32_0 : i32, i32
  }
  func.func @transform_2(%arg0: i32) -> (i32, i32) {
    %c0_i32 = arith.constant 0 : i32
    %c0_i32_0 = arith.constant 0 : i32
    %c0_i32_1 = arith.constant 0 : i32
    return %c0_i32, %c0_i32_0 : i32, i32
  }
  func.func @transform_3(%arg0: i32) -> (i32, i32) {
    %c0_i32 = arith.constant 0 : i32
    %c0_i32_0 = arith.constant 0 : i32
    return %arg0, %c0_i32 : i32, i32
  }
}

module attributes {stable_mosaic.version = 11 : i64} {
  func.func @_matmul_bias_relu_kernel(%arg0: i32, %arg1: memref<4x1920xbf16, #tpu.memory_space<vmem>>, %arg2: memref<1920x384xbf16, #tpu.memory_space<vmem>>, %arg3: memref<1x384xf32, #tpu.memory_space<vmem>>, %arg4: memref<4x384xbf16, #tpu.memory_space<vmem>>) attributes {dimension_semantics = [#tpu.dimension_semantics<parallel>], iteration_bounds = array<i64: 1>, scalar_prefetch = 0 : i64, scratch_operands = 0 : i64, tpu.core_type = #tpu.core_type<tc>, window_params = [{transform_indices = @transform_0, window_bounds = array<i64: 4, 1920>}, {pipeline_mode = #tpu.pipeline_mode<synchronous>, transform_indices = @transform_1, window_bounds = array<i64: 1920, 384>}, {pipeline_mode = #tpu.pipeline_mode<synchronous>, transform_indices = @transform_2, window_bounds = array<i64: 1, 384>}, {transform_indices = @transform_3, window_bounds = array<i64: 4, 384>}]} {
    %c0 = arith.constant 0 : index
    %c0_0 = arith.constant 0 : index
    %0 = vector.load %arg1[%c0, %c0_0] : memref<4x1920xbf16, #tpu.memory_space<vmem>>, vector<4x1920xbf16>
    %c0_1 = arith.constant 0 : index
    %c0_2 = arith.constant 0 : index
    %1 = vector.load %arg2[%c0_1, %c0_2] : memref<1920x384xbf16, #tpu.memory_space<vmem>>, vector<1920x384xbf16>
    %cst = arith.constant dense<0.000000e+00> : vector<4x384xf32>
    %2 = tpu.matmul %0, %1, %cst {dimension_numbers = #tpu.dot_dimension_numbers<[1], [0], [0], [1], [0, 0, 1, 1], [], []>} : vector<4x1920xbf16>, vector<1920x384xbf16>, vector<4x384xf32> -> vector<4x384xf32>
    %c0_3 = arith.constant 0 : index
    %c0_4 = arith.constant 0 : index
    %3 = vector.load %arg3[%c0_3, %c0_4] : memref<1x384xf32, #tpu.memory_space<vmem>>, vector<1x384xf32>
    %4 = vector.broadcast %3 : vector<1x384xf32> to vector<4x384xf32>
    %5 = arith.addf %2, %4 : vector<4x384xf32>
    %cst_5 = arith.constant 0.000000e+00 : f32
    %6 = vector.broadcast %cst_5 : f32 to vector<4x384xf32>
    %7 = arith.maximumf %5, %6 : vector<4x384xf32>
    %8 = arith.truncf %7 : vector<4x384xf32> to vector<4x384xbf16>
    %c0_6 = arith.constant 0 : index
    %c0_7 = arith.constant 0 : index
    %9 = vector.load %arg4[%c0_6, %c0_7] : memref<4x384xbf16, #tpu.memory_space<vmem>>, vector<4x384xbf16>
    tpu.vector_store %arg4[%c0_6, %c0_7], %8 {strides = array<i32>} : memref<4x384xbf16, #tpu.memory_space<vmem>>, vector<4x384xbf16>,
    return
  }
  func.func @transform_0(%arg0: i32) -> (i32, i32) {
    %c0_i32 = arith.constant 0 : i32
    %c0_i32_0 = arith.constant 0 : i32
    return %arg0, %c0_i32 : i32, i32
  }
  func.func @transform_1(%arg0: i32) -> (i32, i32) {
    %c0_i32 = arith.constant 0 : i32
    %c0_i32_0 = arith.constant 0 : i32
    %c0_i32_1 = arith.constant 0 : i32
    return %c0_i32, %c0_i32_0 : i32, i32
  }
  func.func @transform_2(%arg0: i32) -> (i32, i32) {
    %c0_i32 = arith.constant 0 : i32
    %c0_i32_0 = arith.constant 0 : i32
    %c0_i32_1 = arith.constant 0 : i32
    return %c0_i32, %c0_i32_0 : i32, i32
  }
  func.func @transform_3(%arg0: i32) -> (i32, i32) {
    %c0_i32 = arith.constant 0 : i32
    %c0_i32_0 = arith.constant 0 : i32
    return %arg0, %c0_i32 : i32, i32
  }
}

module attributes {stable_mosaic.version = 11 : i64} {
  func.func @_matmul_bias_relu_kernel(%arg0: i32, %arg1: memref<4x3456xbf16, #tpu.memory_space<vmem>>, %arg2: memref<3456x256xbf16, #tpu.memory_space<vmem>>, %arg3: memref<1x256xf32, #tpu.memory_space<vmem>>, %arg4: memref<4x256xbf16, #tpu.memory_space<vmem>>) attributes {dimension_semantics = [#tpu.dimension_semantics<parallel>], iteration_bounds = array<i64: 1>, scalar_prefetch = 0 : i64, scratch_operands = 0 : i64, tpu.core_type = #tpu.core_type<tc>, window_params = [{transform_indices = @transform_0, window_bounds = array<i64: 4, 3456>}, {pipeline_mode = #tpu.pipeline_mode<synchronous>, transform_indices = @transform_1, window_bounds = array<i64: 3456, 256>}, {pipeline_mode = #tpu.pipeline_mode<synchronous>, transform_indices = @transform_2, window_bounds = array<i64: 1, 256>}, {transform_indices = @transform_3, window_bounds = array<i64: 4, 256>}]} {
    %c0 = arith.constant 0 : index
    %c0_0 = arith.constant 0 : index
    %0 = vector.load %arg1[%c0, %c0_0] : memref<4x3456xbf16, #tpu.memory_space<vmem>>, vector<4x3456xbf16>
    %c0_1 = arith.constant 0 : index
    %c0_2 = arith.constant 0 : index
    %1 = vector.load %arg2[%c0_1, %c0_2] : memref<3456x256xbf16, #tpu.memory_space<vmem>>, vector<3456x256xbf16>
    %cst = arith.constant dense<0.000000e+00> : vector<4x256xf32>
    %2 = tpu.matmul %0, %1, %cst {dimension_numbers = #tpu.dot_dimension_numbers<[1], [0], [0], [1], [0, 0, 1, 1], [], []>} : vector<4x3456xbf16>, vector<3456x256xbf16>, vector<4x256xf32> -> vector<4x256xf32>
    %c0_3 = arith.constant 0 : index
    %c0_4 = arith.constant 0 : index
    %3 = vector.load %arg3[%c0_3, %c0_4] : memref<1x256xf32, #tpu.memory_space<vmem>>, vector<1x256xf32>
    %4 = vector.broadcast %3 : vector<1x256xf32> to vector<4x256xf32>
    %5 = arith.addf %2, %4 : vector<4x256xf32>
    %cst_5 = arith.constant 0.000000e+00 : f32
    %6 = vector.broadcast %cst_5 : f32 to vector<4x256xf32>
    %7 = arith.maximumf %5, %6 : vector<4x256xf32>
    %8 = arith.truncf %7 : vector<4x256xf32> to vector<4x256xbf16>
    %c0_6 = arith.constant 0 : index
    %c0_7 = arith.constant 0 : index
    %9 = vector.load %arg4[%c0_6, %c0_7] : memref<4x256xbf16, #tpu.memory_space<vmem>>, vector<4x256xbf16>
    tpu.vector_store %arg4[%c0_6, %c0_7], %8 {strides = array<i32>} : memref<4x256xbf16, #tpu.memory_space<vmem>>, vector<4x256xbf16>,
    return
  }
  func.func @transform_0(%arg0: i32) -> (i32, i32) {
    %c0_i32 = arith.constant 0 : i32
    %c0_i32_0 = arith.constant 0 : i32
    return %arg0, %c0_i32 : i32, i32
  }
  func.func @transform_1(%arg0: i32) -> (i32, i32) {
    %c0_i32 = arith.constant 0 : i32
    %c0_i32_0 = arith.constant 0 : i32
    %c0_i32_1 = arith.constant 0 : i32
    return %c0_i32, %c0_i32_0 : i32, i32
  }
  func.func @transform_2(%arg0: i32) -> (i32, i32) {
    %c0_i32 = arith.constant 0 : i32
    %c0_i32_0 = arith.constant 0 : i32
    %c0_i32_1 = arith.constant 0 : i32
    return %c0_i32, %c0_i32_0 : i32, i32
  }
  func.func @transform_3(%arg0: i32) -> (i32, i32) {
    %c0_i32 = arith.constant 0 : i32
    %c0_i32_0 = arith.constant 0 : i32
    return %arg0, %c0_i32 : i32, i32
  }
}

module attributes {stable_mosaic.version = 11 : i64} {
  func.func @_matmul_bias_relu_kernel(%arg0: i32, %arg1: memref<4x2304xbf16, #tpu.memory_space<vmem>>, %arg2: memref<2304x256xbf16, #tpu.memory_space<vmem>>, %arg3: memref<1x256xf32, #tpu.memory_space<vmem>>, %arg4: memref<4x256xbf16, #tpu.memory_space<vmem>>) attributes {dimension_semantics = [#tpu.dimension_semantics<parallel>], iteration_bounds = array<i64: 1>, scalar_prefetch = 0 : i64, scratch_operands = 0 : i64, tpu.core_type = #tpu.core_type<tc>, window_params = [{transform_indices = @transform_0, window_bounds = array<i64: 4, 2304>}, {pipeline_mode = #tpu.pipeline_mode<synchronous>, transform_indices = @transform_1, window_bounds = array<i64: 2304, 256>}, {pipeline_mode = #tpu.pipeline_mode<synchronous>, transform_indices = @transform_2, window_bounds = array<i64: 1, 256>}, {transform_indices = @transform_3, window_bounds = array<i64: 4, 256>}]} {
    %c0 = arith.constant 0 : index
    %c0_0 = arith.constant 0 : index
    %0 = vector.load %arg1[%c0, %c0_0] : memref<4x2304xbf16, #tpu.memory_space<vmem>>, vector<4x2304xbf16>
    %c0_1 = arith.constant 0 : index
    %c0_2 = arith.constant 0 : index
    %1 = vector.load %arg2[%c0_1, %c0_2] : memref<2304x256xbf16, #tpu.memory_space<vmem>>, vector<2304x256xbf16>
    %cst = arith.constant dense<0.000000e+00> : vector<4x256xf32>
    %2 = tpu.matmul %0, %1, %cst {dimension_numbers = #tpu.dot_dimension_numbers<[1], [0], [0], [1], [0, 0, 1, 1], [], []>} : vector<4x2304xbf16>, vector<2304x256xbf16>, vector<4x256xf32> -> vector<4x256xf32>
    %c0_3 = arith.constant 0 : index
    %c0_4 = arith.constant 0 : index
    %3 = vector.load %arg3[%c0_3, %c0_4] : memref<1x256xf32, #tpu.memory_space<vmem>>, vector<1x256xf32>
    %4 = vector.broadcast %3 : vector<1x256xf32> to vector<4x256xf32>
    %5 = arith.addf %2, %4 : vector<4x256xf32>
    %cst_5 = arith.constant 0.000000e+00 : f32
    %6 = vector.broadcast %cst_5 : f32 to vector<4x256xf32>
    %7 = arith.maximumf %5, %6 : vector<4x256xf32>
    %8 = arith.truncf %7 : vector<4x256xf32> to vector<4x256xbf16>
    %c0_6 = arith.constant 0 : index
    %c0_7 = arith.constant 0 : index
    %9 = vector.load %arg4[%c0_6, %c0_7] : memref<4x256xbf16, #tpu.memory_space<vmem>>, vector<4x256xbf16>
    tpu.vector_store %arg4[%c0_6, %c0_7], %8 {strides = array<i32>} : memref<4x256xbf16, #tpu.memory_space<vmem>>, vector<4x256xbf16>,
    return
  }
  func.func @transform_0(%arg0: i32) -> (i32, i32) {
    %c0_i32 = arith.constant 0 : i32
    %c0_i32_0 = arith.constant 0 : i32
    return %arg0, %c0_i32 : i32, i32
  }
  func.func @transform_1(%arg0: i32) -> (i32, i32) {
    %c0_i32 = arith.constant 0 : i32
    %c0_i32_0 = arith.constant 0 : i32
    %c0_i32_1 = arith.constant 0 : i32
    return %c0_i32, %c0_i32_0 : i32, i32
  }
  func.func @transform_2(%arg0: i32) -> (i32, i32) {
    %c0_i32 = arith.constant 0 : i32
    %c0_i32_0 = arith.constant 0 : i32
    %c0_i32_1 = arith.constant 0 : i32
    return %c0_i32, %c0_i32_0 : i32, i32
  }
  func.func @transform_3(%arg0: i32) -> (i32, i32) {
    %c0_i32 = arith.constant 0 : i32
    %c0_i32_0 = arith.constant 0 : i32
    return %arg0, %c0_i32 : i32, i32
  }
}

module attributes {stable_mosaic.version = 11 : i64} {
  func.func @_lpips_layer_kernel(%arg0: i32, %arg1: i32, %arg2: memref<1x8x256xbf16, #tpu.memory_space<vmem>>, %arg3: memref<1x8x256xbf16, #tpu.memory_space<vmem>>, %arg4: memref<1x1x256xf32, #tpu.memory_space<vmem>>, %arg5: memref<1x1x1xf32, #tpu.memory_space<vmem>>, %arg6: memref<1x1x1xf32, #tpu.memory_space<vmem>>) attributes {dimension_semantics = [#tpu.dimension_semantics<parallel>, #tpu.dimension_semantics<arbitrary>], iteration_bounds = array<i64: 2, 1>, scalar_prefetch = 0 : i64, scratch_operands = 1 : i64, tpu.core_type = #tpu.core_type<tc>, window_params = [{transform_indices = @transform_0, window_bounds = array<i64: 1, 8, 256>}, {transform_indices = @transform_1, window_bounds = array<i64: 1, 8, 256>}, {pipeline_mode = #tpu.pipeline_mode<synchronous>, transform_indices = @transform_2, window_bounds = array<i64: 1, 1, 256>}, {transform_indices = @transform_3, window_bounds = array<i64: 1, 1, 1>}]} {
    %c0_i32 = arith.constant 0 : i32
    %0 = arith.cmpi eq, %arg1, %c0_i32 : i32
    %1 = arith.extui %0 : i1 to i32
    %c0_i32_0 = arith.constant 0 : i32
    %2 = arith.cmpi ne, %1, %c0_i32_0 : i32
    scf.if %2 {
      %cst_21 = arith.constant 0.000000e+00 : f32
      %39 = vector.broadcast %cst_21 : f32 to vector<1x1x1xf32>
      %c0_22 = arith.constant 0 : index
      %c0_23 = arith.constant 0 : index
      %c0_24 = arith.constant 0 : index
      %40 = vector.load %arg6[%c0_22, %c0_23, %c0_24] : memref<1x1x1xf32, #tpu.memory_space<vmem>>, vector<1x1x1xf32>
      tpu.vector_store %arg6[%c0_22, %c0_23, %c0_24], %39 {strides = array<i32>} : memref<1x1x1xf32, #tpu.memory_space<vmem>>, vector<1x1x1xf32>,
    } else {
    }
    %c0 = arith.constant 0 : index
    %c0_1 = arith.constant 0 : index
    %c0_2 = arith.constant 0 : index
    %3 = vector.load %arg2[%c0, %c0_1, %c0_2] : memref<1x8x256xbf16, #tpu.memory_space<vmem>>, vector<1x8x256xbf16>
    %4 = arith.extf %3 : vector<1x8x256xbf16> to vector<1x8x256xf32>
    %c0_3 = arith.constant 0 : index
    %c0_4 = arith.constant 0 : index
    %c0_5 = arith.constant 0 : index
    %5 = vector.load %arg3[%c0_3, %c0_4, %c0_5] : memref<1x8x256xbf16, #tpu.memory_space<vmem>>, vector<1x8x256xbf16>
    %6 = arith.extf %5 : vector<1x8x256xbf16> to vector<1x8x256xf32>
    %7 = arith.mulf %4, %4 : vector<1x8x256xf32>
    %cst = arith.constant dense<0.000000e+00> : vector<1x8xf32>
    %8 = vector.multi_reduction <add>, %7, %cst [2] : vector<1x8x256xf32> to vector<1x8xf32>
    %9 = vector.shape_cast %8 : vector<1x8xf32> to vector<1x8x1xf32>
    %cst_6 = arith.constant 9.99999968E-21 : f32
    %10 = vector.broadcast %cst_6 : f32 to vector<1x8x1xf32>
    %11 = arith.addf %9, %10 : vector<1x8x1xf32>
    %12 = math.rsqrt %11 : vector<1x8x1xf32>
    %13 = vector.broadcast %12 : vector<1x8x1xf32> to vector<1x8x256xf32>
    %14 = arith.mulf %4, %13 : vector<1x8x256xf32>
    %15 = arith.mulf %6, %6 : vector<1x8x256xf32>
    %cst_7 = arith.constant dense<0.000000e+00> : vector<1x8xf32>
    %16 = vector.multi_reduction <add>, %15, %cst_7 [2] : vector<1x8x256xf32> to vector<1x8xf32>
    %17 = vector.shape_cast %16 : vector<1x8xf32> to vector<1x8x1xf32>
    %cst_8 = arith.constant 9.99999968E-21 : f32
    %18 = vector.broadcast %cst_8 : f32 to vector<1x8x1xf32>
    %19 = arith.addf %17, %18 : vector<1x8x1xf32>
    %20 = math.rsqrt %19 : vector<1x8x1xf32>
    %21 = vector.broadcast %20 : vector<1x8x1xf32> to vector<1x8x256xf32>
    %22 = arith.mulf %6, %21 : vector<1x8x256xf32>
    %23 = arith.subf %14, %22 : vector<1x8x256xf32>
    %24 = arith.mulf %23, %23 : vector<1x8x256xf32>
    %c0_9 = arith.constant 0 : index
    %c0_10 = arith.constant 0 : index
    %c0_11 = arith.constant 0 : index
    %25 = vector.load %arg4[%c0_9, %c0_10, %c0_11] : memref<1x1x256xf32, #tpu.memory_space<vmem>>, vector<1x1x256xf32>
    %26 = vector.broadcast %25 : vector<1x1x256xf32> to vector<1x8x256xf32>
    %27 = arith.mulf %24, %26 : vector<1x8x256xf32>
    %c0_12 = arith.constant 0 : index
    %c0_13 = arith.constant 0 : index
    %c0_14 = arith.constant 0 : index
    %28 = vector.load %arg6[%c0_12, %c0_13, %c0_14] : memref<1x1x1xf32, #tpu.memory_space<vmem>>, vector<1x1x1xf32>
    %29 = vector.shape_cast %27 : vector<1x8x256xf32> to vector<1x1x8x256xf32>
    %cst_15 = arith.constant dense<0.000000e+00> : vector<1xf32>
    %30 = vector.multi_reduction <add>, %29, %cst_15 [1, 2, 3] : vector<1x1x8x256xf32> to vector<1xf32>
    %31 = vector.shape_cast %30 : vector<1xf32> to vector<1x1x1x1xf32>
    %32 = vector.extract %31[0, 0, 0, 0] : f32 from vector<1x1x1x1xf32>
    %33 = vector.broadcast %32 : f32 to vector<1x1x1xf32>
    %34 = arith.addf %28, %33 : vector<1x1x1xf32>
    %c0_16 = arith.constant 0 : index
    %c0_17 = arith.constant 0 : index
    %c0_18 = arith.constant 0 : index
    %35 = vector.load %arg6[%c0_16, %c0_17, %c0_18] : memref<1x1x1xf32, #tpu.memory_space<vmem>>, vector<1x1x1xf32>
    tpu.vector_store %arg6[%c0_16, %c0_17, %c0_18], %34 {strides = array<i32>} : memref<1x1x1xf32, #tpu.memory_space<vmem>>, vector<1x1x1xf32>,
    %c0_i32_19 = arith.constant 0 : i32
    %36 = arith.cmpi eq, %arg1, %c0_i32_19 : i32
    %37 = arith.extui %36 : i1 to i32
    %c0_i32_20 = arith.constant 0 : i32
    %38 = arith.cmpi ne, %37, %c0_i32_20 : i32
    scf.if %38 {
      %c0_21 = arith.constant 0 : index
      %c0_22 = arith.constant 0 : index
      %c0_23 = arith.constant 0 : index
      %39 = vector.load %arg6[%c0_21, %c0_22, %c0_23] : memref<1x1x1xf32, #tpu.memory_space<vmem>>, vector<1x1x1xf32>
      %cst_24 = arith.constant 1.000000e+00 : f32
      %40 = vector.broadcast %cst_24 : f32 to vector<1x1x1xf32>
      %41 = arith.mulf %39, %40 : vector<1x1x1xf32>
      %c0_25 = arith.constant 0 : index
      %c0_26 = arith.constant 0 : index
      %c0_27 = arith.constant 0 : index
      %42 = vector.load %arg5[%c0_25, %c0_26, %c0_27] : memref<1x1x1xf32, #tpu.memory_space<vmem>>, vector<1x1x1xf32>
      tpu.vector_store %arg5[%c0_25, %c0_26, %c0_27], %41 {strides = array<i32>} : memref<1x1x1xf32, #tpu.memory_space<vmem>>, vector<1x1x1xf32>,
    } else {
    }
    return
  }
  func.func @transform_0(%arg0: i32, %arg1: i32) -> (i32, i32, i32) {
    %c0_i32 = arith.constant 0 : i32
    %c0_i32_0 = arith.constant 0 : i32
    return %arg0, %arg1, %c0_i32 : i32, i32, i32
  }
  func.func @transform_1(%arg0: i32, %arg1: i32) -> (i32, i32, i32) {
    %c2_i32 = arith.constant 2 : i32
    %0 = arith.addi %arg0, %c2_i32 : i32
    %c0_i32 = arith.constant 0 : i32
    %c0_i32_0 = arith.constant 0 : i32
    return %0, %arg1, %c0_i32 : i32, i32, i32
  }
  func.func @transform_2(%arg0: i32, %arg1: i32) -> (i32, i32, i32) {
    %c0_i32 = arith.constant 0 : i32
    %c0_i32_0 = arith.constant 0 : i32
    %c0_i32_1 = arith.constant 0 : i32
    %c0_i32_2 = arith.constant 0 : i32
    return %c0_i32, %c0_i32_0, %c0_i32_1 : i32, i32, i32
  }
  func.func @transform_3(%arg0: i32, %arg1: i32) -> (i32, i32, i32) {
    %c0_i32 = arith.constant 0 : i32
    %c0_i32_0 = arith.constant 0 : i32
    %c0_i32_1 = arith.constant 0 : i32
    return %arg0, %c0_i32, %c0_i32_0 : i32, i32, i32
  }
}

module attributes {stable_mosaic.version = 11 : i64} {
  func.func @_lpips_layer_kernel(%arg0: i32, %arg1: i32, %arg2: memref<1x8x384xbf16, #tpu.memory_space<vmem>>, %arg3: memref<1x8x384xbf16, #tpu.memory_space<vmem>>, %arg4: memref<1x1x384xf32, #tpu.memory_space<vmem>>, %arg5: memref<1x1x1xf32, #tpu.memory_space<vmem>>, %arg6: memref<1x1x1xf32, #tpu.memory_space<vmem>>) attributes {dimension_semantics = [#tpu.dimension_semantics<parallel>, #tpu.dimension_semantics<arbitrary>], iteration_bounds = array<i64: 2, 1>, scalar_prefetch = 0 : i64, scratch_operands = 1 : i64, tpu.core_type = #tpu.core_type<tc>, window_params = [{transform_indices = @transform_0, window_bounds = array<i64: 1, 8, 384>}, {transform_indices = @transform_1, window_bounds = array<i64: 1, 8, 384>}, {pipeline_mode = #tpu.pipeline_mode<synchronous>, transform_indices = @transform_2, window_bounds = array<i64: 1, 1, 384>}, {transform_indices = @transform_3, window_bounds = array<i64: 1, 1, 1>}]} {
    %c0_i32 = arith.constant 0 : i32
    %0 = arith.cmpi eq, %arg1, %c0_i32 : i32
    %1 = arith.extui %0 : i1 to i32
    %c0_i32_0 = arith.constant 0 : i32
    %2 = arith.cmpi ne, %1, %c0_i32_0 : i32
    scf.if %2 {
      %cst_21 = arith.constant 0.000000e+00 : f32
      %39 = vector.broadcast %cst_21 : f32 to vector<1x1x1xf32>
      %c0_22 = arith.constant 0 : index
      %c0_23 = arith.constant 0 : index
      %c0_24 = arith.constant 0 : index
      %40 = vector.load %arg6[%c0_22, %c0_23, %c0_24] : memref<1x1x1xf32, #tpu.memory_space<vmem>>, vector<1x1x1xf32>
      tpu.vector_store %arg6[%c0_22, %c0_23, %c0_24], %39 {strides = array<i32>} : memref<1x1x1xf32, #tpu.memory_space<vmem>>, vector<1x1x1xf32>,
    } else {
    }
    %c0 = arith.constant 0 : index
    %c0_1 = arith.constant 0 : index
    %c0_2 = arith.constant 0 : index
    %3 = vector.load %arg2[%c0, %c0_1, %c0_2] : memref<1x8x384xbf16, #tpu.memory_space<vmem>>, vector<1x8x384xbf16>
    %4 = arith.extf %3 : vector<1x8x384xbf16> to vector<1x8x384xf32>
    %c0_3 = arith.constant 0 : index
    %c0_4 = arith.constant 0 : index
    %c0_5 = arith.constant 0 : index
    %5 = vector.load %arg3[%c0_3, %c0_4, %c0_5] : memref<1x8x384xbf16, #tpu.memory_space<vmem>>, vector<1x8x384xbf16>
    %6 = arith.extf %5 : vector<1x8x384xbf16> to vector<1x8x384xf32>
    %7 = arith.mulf %4, %4 : vector<1x8x384xf32>
    %cst = arith.constant dense<0.000000e+00> : vector<1x8xf32>
    %8 = vector.multi_reduction <add>, %7, %cst [2] : vector<1x8x384xf32> to vector<1x8xf32>
    %9 = vector.shape_cast %8 : vector<1x8xf32> to vector<1x8x1xf32>
    %cst_6 = arith.constant 9.99999968E-21 : f32
    %10 = vector.broadcast %cst_6 : f32 to vector<1x8x1xf32>
    %11 = arith.addf %9, %10 : vector<1x8x1xf32>
    %12 = math.rsqrt %11 : vector<1x8x1xf32>
    %13 = vector.broadcast %12 : vector<1x8x1xf32> to vector<1x8x384xf32>
    %14 = arith.mulf %4, %13 : vector<1x8x384xf32>
    %15 = arith.mulf %6, %6 : vector<1x8x384xf32>
    %cst_7 = arith.constant dense<0.000000e+00> : vector<1x8xf32>
    %16 = vector.multi_reduction <add>, %15, %cst_7 [2] : vector<1x8x384xf32> to vector<1x8xf32>
    %17 = vector.shape_cast %16 : vector<1x8xf32> to vector<1x8x1xf32>
    %cst_8 = arith.constant 9.99999968E-21 : f32
    %18 = vector.broadcast %cst_8 : f32 to vector<1x8x1xf32>
    %19 = arith.addf %17, %18 : vector<1x8x1xf32>
    %20 = math.rsqrt %19 : vector<1x8x1xf32>
    %21 = vector.broadcast %20 : vector<1x8x1xf32> to vector<1x8x384xf32>
    %22 = arith.mulf %6, %21 : vector<1x8x384xf32>
    %23 = arith.subf %14, %22 : vector<1x8x384xf32>
    %24 = arith.mulf %23, %23 : vector<1x8x384xf32>
    %c0_9 = arith.constant 0 : index
    %c0_10 = arith.constant 0 : index
    %c0_11 = arith.constant 0 : index
    %25 = vector.load %arg4[%c0_9, %c0_10, %c0_11] : memref<1x1x384xf32, #tpu.memory_space<vmem>>, vector<1x1x384xf32>
    %26 = vector.broadcast %25 : vector<1x1x384xf32> to vector<1x8x384xf32>
    %27 = arith.mulf %24, %26 : vector<1x8x384xf32>
    %c0_12 = arith.constant 0 : index
    %c0_13 = arith.constant 0 : index
    %c0_14 = arith.constant 0 : index
    %28 = vector.load %arg6[%c0_12, %c0_13, %c0_14] : memref<1x1x1xf32, #tpu.memory_space<vmem>>, vector<1x1x1xf32>
    %29 = vector.shape_cast %27 : vector<1x8x384xf32> to vector<1x1x8x384xf32>
    %cst_15 = arith.constant dense<0.000000e+00> : vector<1xf32>
    %30 = vector.multi_reduction <add>, %29, %cst_15 [1, 2, 3] : vector<1x1x8x384xf32> to vector<1xf32>
    %31 = vector.shape_cast %30 : vector<1xf32> to vector<1x1x1x1xf32>
    %32 = vector.extract %31[0, 0, 0, 0] : f32 from vector<1x1x1x1xf32>
    %33 = vector.broadcast %32 : f32 to vector<1x1x1xf32>
    %34 = arith.addf %28, %33 : vector<1x1x1xf32>
    %c0_16 = arith.constant 0 : index
    %c0_17 = arith.constant 0 : index
    %c0_18 = arith.constant 0 : index
    %35 = vector.load %arg6[%c0_16, %c0_17, %c0_18] : memref<1x1x1xf32, #tpu.memory_space<vmem>>, vector<1x1x1xf32>
    tpu.vector_store %arg6[%c0_16, %c0_17, %c0_18], %34 {strides = array<i32>} : memref<1x1x1xf32, #tpu.memory_space<vmem>>, vector<1x1x1xf32>,
    %c0_i32_19 = arith.constant 0 : i32
    %36 = arith.cmpi eq, %arg1, %c0_i32_19 : i32
    %37 = arith.extui %36 : i1 to i32
    %c0_i32_20 = arith.constant 0 : i32
    %38 = arith.cmpi ne, %37, %c0_i32_20 : i32
    scf.if %38 {
      %c0_21 = arith.constant 0 : index
      %c0_22 = arith.constant 0 : index
      %c0_23 = arith.constant 0 : index
      %39 = vector.load %arg6[%c0_21, %c0_22, %c0_23] : memref<1x1x1xf32, #tpu.memory_space<vmem>>, vector<1x1x1xf32>
      %cst_24 = arith.constant 1.000000e+00 : f32
      %40 = vector.broadcast %cst_24 : f32 to vector<1x1x1xf32>
      %41 = arith.mulf %39, %40 : vector<1x1x1xf32>
      %c0_25 = arith.constant 0 : index
      %c0_26 = arith.constant 0 : index
      %c0_27 = arith.constant 0 : index
      %42 = vector.load %arg5[%c0_25, %c0_26, %c0_27] : memref<1x1x1xf32, #tpu.memory_space<vmem>>, vector<1x1x1xf32>
      tpu.vector_store %arg5[%c0_25, %c0_26, %c0_27], %41 {strides = array<i32>} : memref<1x1x1xf32, #tpu.memory_space<vmem>>, vector<1x1x1xf32>,
    } else {
    }
    return
  }
  func.func @transform_0(%arg0: i32, %arg1: i32) -> (i32, i32, i32) {
    %c0_i32 = arith.constant 0 : i32
    %c0_i32_0 = arith.constant 0 : i32
    return %arg0, %arg1, %c0_i32 : i32, i32, i32
  }
  func.func @transform_1(%arg0: i32, %arg1: i32) -> (i32, i32, i32) {
    %c2_i32 = arith.constant 2 : i32
    %0 = arith.addi %arg0, %c2_i32 : i32
    %c0_i32 = arith.constant 0 : i32
    %c0_i32_0 = arith.constant 0 : i32
    return %0, %arg1, %c0_i32 : i32, i32, i32
  }
  func.func @transform_2(%arg0: i32, %arg1: i32) -> (i32, i32, i32) {
    %c0_i32 = arith.constant 0 : i32
    %c0_i32_0 = arith.constant 0 : i32
    %c0_i32_1 = arith.constant 0 : i32
    %c0_i32_2 = arith.constant 0 : i32
    return %c0_i32, %c0_i32_0, %c0_i32_1 : i32, i32, i32
  }
  func.func @transform_3(%arg0: i32, %arg1: i32) -> (i32, i32, i32) {
    %c0_i32 = arith.constant 0 : i32
    %c0_i32_0 = arith.constant 0 : i32
    %c0_i32_1 = arith.constant 0 : i32
    return %arg0, %c0_i32, %c0_i32_0 : i32, i32, i32
  }
}

module attributes {stable_mosaic.version = 11 : i64} {
  func.func @_lpips_layer_kernel(%arg0: i32, %arg1: i32, %arg2: memref<1x16x256xbf16, #tpu.memory_space<vmem>>, %arg3: memref<1x16x256xbf16, #tpu.memory_space<vmem>>, %arg4: memref<1x1x256xf32, #tpu.memory_space<vmem>>, %arg5: memref<1x1x1xf32, #tpu.memory_space<vmem>>, %arg6: memref<1x1x1xf32, #tpu.memory_space<vmem>>) attributes {dimension_semantics = [#tpu.dimension_semantics<parallel>, #tpu.dimension_semantics<arbitrary>], iteration_bounds = array<i64: 2, 1>, scalar_prefetch = 0 : i64, scratch_operands = 1 : i64, tpu.core_type = #tpu.core_type<tc>, window_params = [{transform_indices = @transform_0, window_bounds = array<i64: 1, 16, 256>}, {transform_indices = @transform_1, window_bounds = array<i64: 1, 16, 256>}, {pipeline_mode = #tpu.pipeline_mode<synchronous>, transform_indices = @transform_2, window_bounds = array<i64: 1, 1, 256>}, {transform_indices = @transform_3, window_bounds = array<i64: 1, 1, 1>}]} {
    %c0_i32 = arith.constant 0 : i32
    %0 = arith.cmpi eq, %arg1, %c0_i32 : i32
    %1 = arith.extui %0 : i1 to i32
    %c0_i32_0 = arith.constant 0 : i32
    %2 = arith.cmpi ne, %1, %c0_i32_0 : i32
    scf.if %2 {
      %cst_21 = arith.constant 0.000000e+00 : f32
      %39 = vector.broadcast %cst_21 : f32 to vector<1x1x1xf32>
      %c0_22 = arith.constant 0 : index
      %c0_23 = arith.constant 0 : index
      %c0_24 = arith.constant 0 : index
      %40 = vector.load %arg6[%c0_22, %c0_23, %c0_24] : memref<1x1x1xf32, #tpu.memory_space<vmem>>, vector<1x1x1xf32>
      tpu.vector_store %arg6[%c0_22, %c0_23, %c0_24], %39 {strides = array<i32>} : memref<1x1x1xf32, #tpu.memory_space<vmem>>, vector<1x1x1xf32>,
    } else {
    }
    %c0 = arith.constant 0 : index
    %c0_1 = arith.constant 0 : index
    %c0_2 = arith.constant 0 : index
    %3 = vector.load %arg2[%c0, %c0_1, %c0_2] : memref<1x16x256xbf16, #tpu.memory_space<vmem>>, vector<1x16x256xbf16>
    %4 = arith.extf %3 : vector<1x16x256xbf16> to vector<1x16x256xf32>
    %c0_3 = arith.constant 0 : index
    %c0_4 = arith.constant 0 : index
    %c0_5 = arith.constant 0 : index
    %5 = vector.load %arg3[%c0_3, %c0_4, %c0_5] : memref<1x16x256xbf16, #tpu.memory_space<vmem>>, vector<1x16x256xbf16>
    %6 = arith.extf %5 : vector<1x16x256xbf16> to vector<1x16x256xf32>
    %7 = arith.mulf %4, %4 : vector<1x16x256xf32>
    %cst = arith.constant dense<0.000000e+00> : vector<1x16xf32>
    %8 = vector.multi_reduction <add>, %7, %cst [2] : vector<1x16x256xf32> to vector<1x16xf32>
    %9 = vector.shape_cast %8 : vector<1x16xf32> to vector<1x16x1xf32>
    %cst_6 = arith.constant 9.99999968E-21 : f32
    %10 = vector.broadcast %cst_6 : f32 to vector<1x16x1xf32>
    %11 = arith.addf %9, %10 : vector<1x16x1xf32>
    %12 = math.rsqrt %11 : vector<1x16x1xf32>
    %13 = vector.broadcast %12 : vector<1x16x1xf32> to vector<1x16x256xf32>
    %14 = arith.mulf %4, %13 : vector<1x16x256xf32>
    %15 = arith.mulf %6, %6 : vector<1x16x256xf32>
    %cst_7 = arith.constant dense<0.000000e+00> : vector<1x16xf32>
    %16 = vector.multi_reduction <add>, %15, %cst_7 [2] : vector<1x16x256xf32> to vector<1x16xf32>
    %17 = vector.shape_cast %16 : vector<1x16xf32> to vector<1x16x1xf32>
    %cst_8 = arith.constant 9.99999968E-21 : f32
    %18 = vector.broadcast %cst_8 : f32 to vector<1x16x1xf32>
    %19 = arith.addf %17, %18 : vector<1x16x1xf32>
    %20 = math.rsqrt %19 : vector<1x16x1xf32>
    %21 = vector.broadcast %20 : vector<1x16x1xf32> to vector<1x16x256xf32>
    %22 = arith.mulf %6, %21 : vector<1x16x256xf32>
    %23 = arith.subf %14, %22 : vector<1x16x256xf32>
    %24 = arith.mulf %23, %23 : vector<1x16x256xf32>
    %c0_9 = arith.constant 0 : index
    %c0_10 = arith.constant 0 : index
    %c0_11 = arith.constant 0 : index
    %25 = vector.load %arg4[%c0_9, %c0_10, %c0_11] : memref<1x1x256xf32, #tpu.memory_space<vmem>>, vector<1x1x256xf32>
    %26 = vector.broadcast %25 : vector<1x1x256xf32> to vector<1x16x256xf32>
    %27 = arith.mulf %24, %26 : vector<1x16x256xf32>
    %c0_12 = arith.constant 0 : index
    %c0_13 = arith.constant 0 : index
    %c0_14 = arith.constant 0 : index
    %28 = vector.load %arg6[%c0_12, %c0_13, %c0_14] : memref<1x1x1xf32, #tpu.memory_space<vmem>>, vector<1x1x1xf32>
    %29 = vector.shape_cast %27 : vector<1x16x256xf32> to vector<1x1x16x256xf32>
    %cst_15 = arith.constant dense<0.000000e+00> : vector<1xf32>
    %30 = vector.multi_reduction <add>, %29, %cst_15 [1, 2, 3] : vector<1x1x16x256xf32> to vector<1xf32>
    %31 = vector.shape_cast %30 : vector<1xf32> to vector<1x1x1x1xf32>
    %32 = vector.extract %31[0, 0, 0, 0] : f32 from vector<1x1x1x1xf32>
    %33 = vector.broadcast %32 : f32 to vector<1x1x1xf32>
    %34 = arith.addf %28, %33 : vector<1x1x1xf32>
    %c0_16 = arith.constant 0 : index
    %c0_17 = arith.constant 0 : index
    %c0_18 = arith.constant 0 : index
    %35 = vector.load %arg6[%c0_16, %c0_17, %c0_18] : memref<1x1x1xf32, #tpu.memory_space<vmem>>, vector<1x1x1xf32>
    tpu.vector_store %arg6[%c0_16, %c0_17, %c0_18], %34 {strides = array<i32>} : memref<1x1x1xf32, #tpu.memory_space<vmem>>, vector<1x1x1xf32>,
    %c0_i32_19 = arith.constant 0 : i32
    %36 = arith.cmpi eq, %arg1, %c0_i32_19 : i32
    %37 = arith.extui %36 : i1 to i32
    %c0_i32_20 = arith.constant 0 : i32
    %38 = arith.cmpi ne, %37, %c0_i32_20 : i32
    scf.if %38 {
      %c0_21 = arith.constant 0 : index
      %c0_22 = arith.constant 0 : index
      %c0_23 = arith.constant 0 : index
      %39 = vector.load %arg6[%c0_21, %c0_22, %c0_23] : memref<1x1x1xf32, #tpu.memory_space<vmem>>, vector<1x1x1xf32>
      %cst_24 = arith.constant 0.111111112 : f32
      %40 = vector.broadcast %cst_24 : f32 to vector<1x1x1xf32>
      %41 = arith.mulf %39, %40 : vector<1x1x1xf32>
      %c0_25 = arith.constant 0 : index
      %c0_26 = arith.constant 0 : index
      %c0_27 = arith.constant 0 : index
      %42 = vector.load %arg5[%c0_25, %c0_26, %c0_27] : memref<1x1x1xf32, #tpu.memory_space<vmem>>, vector<1x1x1xf32>
      tpu.vector_store %arg5[%c0_25, %c0_26, %c0_27], %41 {strides = array<i32>} : memref<1x1x1xf32, #tpu.memory_space<vmem>>, vector<1x1x1xf32>,
    } else {
    }
    return
  }
  func.func @transform_0(%arg0: i32, %arg1: i32) -> (i32, i32, i32) {
    %c0_i32 = arith.constant 0 : i32
    %c0_i32_0 = arith.constant 0 : i32
    return %arg0, %arg1, %c0_i32 : i32, i32, i32
  }
  func.func @transform_1(%arg0: i32, %arg1: i32) -> (i32, i32, i32) {
    %c2_i32 = arith.constant 2 : i32
    %0 = arith.addi %arg0, %c2_i32 : i32
    %c0_i32 = arith.constant 0 : i32
    %c0_i32_0 = arith.constant 0 : i32
    return %0, %arg1, %c0_i32 : i32, i32, i32
  }
  func.func @transform_2(%arg0: i32, %arg1: i32) -> (i32, i32, i32) {
    %c0_i32 = arith.constant 0 : i32
    %c0_i32_0 = arith.constant 0 : i32
    %c0_i32_1 = arith.constant 0 : i32
    %c0_i32_2 = arith.constant 0 : i32
    return %c0_i32, %c0_i32_0, %c0_i32_1 : i32, i32, i32
  }
  func.func @transform_3(%arg0: i32, %arg1: i32) -> (i32, i32, i32) {
    %c0_i32 = arith.constant 0 : i32
    %c0_i32_0 = arith.constant 0 : i32
    %c0_i32_1 = arith.constant 0 : i32
    return %arg0, %c0_i32, %c0_i32_0 : i32, i32, i32
  }
}

module attributes {stable_mosaic.version = 11 : i64} {
  func.func @_lpips_layer_kernel(%arg0: i32, %arg1: i32, %arg2: memref<1x56x128xbf16, #tpu.memory_space<vmem>>, %arg3: memref<1x56x128xbf16, #tpu.memory_space<vmem>>, %arg4: memref<1x1x128xf32, #tpu.memory_space<vmem>>, %arg5: memref<1x1x1xf32, #tpu.memory_space<vmem>>, %arg6: memref<1x1x1xf32, #tpu.memory_space<vmem>>) attributes {dimension_semantics = [#tpu.dimension_semantics<parallel>, #tpu.dimension_semantics<arbitrary>], iteration_bounds = array<i64: 2, 1>, scalar_prefetch = 0 : i64, scratch_operands = 1 : i64, tpu.core_type = #tpu.core_type<tc>, window_params = [{transform_indices = @transform_0, window_bounds = array<i64: 1, 56, 128>}, {transform_indices = @transform_1, window_bounds = array<i64: 1, 56, 128>}, {pipeline_mode = #tpu.pipeline_mode<synchronous>, transform_indices = @transform_2, window_bounds = array<i64: 1, 1, 128>}, {transform_indices = @transform_3, window_bounds = array<i64: 1, 1, 1>}]} {
    %c0_i32 = arith.constant 0 : i32
    %0 = arith.cmpi eq, %arg1, %c0_i32 : i32
    %1 = arith.extui %0 : i1 to i32
    %c0_i32_0 = arith.constant 0 : i32
    %2 = arith.cmpi ne, %1, %c0_i32_0 : i32
    scf.if %2 {
      %cst_21 = arith.constant 0.000000e+00 : f32
      %39 = vector.broadcast %cst_21 : f32 to vector<1x1x1xf32>
      %c0_22 = arith.constant 0 : index
      %c0_23 = arith.constant 0 : index
      %c0_24 = arith.constant 0 : index
      %40 = vector.load %arg6[%c0_22, %c0_23, %c0_24] : memref<1x1x1xf32, #tpu.memory_space<vmem>>, vector<1x1x1xf32>
      tpu.vector_store %arg6[%c0_22, %c0_23, %c0_24], %39 {strides = array<i32>} : memref<1x1x1xf32, #tpu.memory_space<vmem>>, vector<1x1x1xf32>,
    } else {
    }
    %c0 = arith.constant 0 : index
    %c0_1 = arith.constant 0 : index
    %c0_2 = arith.constant 0 : index
    %3 = vector.load %arg2[%c0, %c0_1, %c0_2] : memref<1x56x128xbf16, #tpu.memory_space<vmem>>, vector<1x56x128xbf16>
    %4 = arith.extf %3 : vector<1x56x128xbf16> to vector<1x56x128xf32>
    %c0_3 = arith.constant 0 : index
    %c0_4 = arith.constant 0 : index
    %c0_5 = arith.constant 0 : index
    %5 = vector.load %arg3[%c0_3, %c0_4, %c0_5] : memref<1x56x128xbf16, #tpu.memory_space<vmem>>, vector<1x56x128xbf16>
    %6 = arith.extf %5 : vector<1x56x128xbf16> to vector<1x56x128xf32>
    %7 = arith.mulf %4, %4 : vector<1x56x128xf32>
    %cst = arith.constant dense<0.000000e+00> : vector<1x56xf32>
    %8 = vector.multi_reduction <add>, %7, %cst [2] : vector<1x56x128xf32> to vector<1x56xf32>
    %9 = vector.shape_cast %8 : vector<1x56xf32> to vector<1x56x1xf32>
    %cst_6 = arith.constant 9.99999968E-21 : f32
    %10 = vector.broadcast %cst_6 : f32 to vector<1x56x1xf32>
    %11 = arith.addf %9, %10 : vector<1x56x1xf32>
    %12 = math.rsqrt %11 : vector<1x56x1xf32>
    %13 = vector.broadcast %12 : vector<1x56x1xf32> to vector<1x56x128xf32>
    %14 = arith.mulf %4, %13 : vector<1x56x128xf32>
    %15 = arith.mulf %6, %6 : vector<1x56x128xf32>
    %cst_7 = arith.constant dense<0.000000e+00> : vector<1x56xf32>
    %16 = vector.multi_reduction <add>, %15, %cst_7 [2] : vector<1x56x128xf32> to vector<1x56xf32>
    %17 = vector.shape_cast %16 : vector<1x56xf32> to vector<1x56x1xf32>
    %cst_8 = arith.constant 9.99999968E-21 : f32
    %18 = vector.broadcast %cst_8 : f32 to vector<1x56x1xf32>
    %19 = arith.addf %17, %18 : vector<1x56x1xf32>
    %20 = math.rsqrt %19 : vector<1x56x1xf32>
    %21 = vector.broadcast %20 : vector<1x56x1xf32> to vector<1x56x128xf32>
    %22 = arith.mulf %6, %21 : vector<1x56x128xf32>
    %23 = arith.subf %14, %22 : vector<1x56x128xf32>
    %24 = arith.mulf %23, %23 : vector<1x56x128xf32>
    %c0_9 = arith.constant 0 : index
    %c0_10 = arith.constant 0 : index
    %c0_11 = arith.constant 0 : index
    %25 = vector.load %arg4[%c0_9, %c0_10, %c0_11] : memref<1x1x128xf32, #tpu.memory_space<vmem>>, vector<1x1x128xf32>
    %26 = vector.broadcast %25 : vector<1x1x128xf32> to vector<1x56x128xf32>
    %27 = arith.mulf %24, %26 : vector<1x56x128xf32>
    %c0_12 = arith.constant 0 : index
    %c0_13 = arith.constant 0 : index
    %c0_14 = arith.constant 0 : index
    %28 = vector.load %arg6[%c0_12, %c0_13, %c0_14] : memref<1x1x1xf32, #tpu.memory_space<vmem>>, vector<1x1x1xf32>
    %29 = vector.shape_cast %27 : vector<1x56x128xf32> to vector<1x1x56x128xf32>
    %cst_15 = arith.constant dense<0.000000e+00> : vector<1xf32>
    %30 = vector.multi_reduction <add>, %29, %cst_15 [1, 2, 3] : vector<1x1x56x128xf32> to vector<1xf32>
    %31 = vector.shape_cast %30 : vector<1xf32> to vector<1x1x1x1xf32>
    %32 = vector.extract %31[0, 0, 0, 0] : f32 from vector<1x1x1x1xf32>
    %33 = vector.broadcast %32 : f32 to vector<1x1x1xf32>
    %34 = arith.addf %28, %33 : vector<1x1x1xf32>
    %c0_16 = arith.constant 0 : index
    %c0_17 = arith.constant 0 : index
    %c0_18 = arith.constant 0 : index
    %35 = vector.load %arg6[%c0_16, %c0_17, %c0_18] : memref<1x1x1xf32, #tpu.memory_space<vmem>>, vector<1x1x1xf32>
    tpu.vector_store %arg6[%c0_16, %c0_17, %c0_18], %34 {strides = array<i32>} : memref<1x1x1xf32, #tpu.memory_space<vmem>>, vector<1x1x1xf32>,
    %c0_i32_19 = arith.constant 0 : i32
    %36 = arith.cmpi eq, %arg1, %c0_i32_19 : i32
    %37 = arith.extui %36 : i1 to i32
    %c0_i32_20 = arith.constant 0 : i32
    %38 = arith.cmpi ne, %37, %c0_i32_20 : i32
    scf.if %38 {
      %c0_21 = arith.constant 0 : index
      %c0_22 = arith.constant 0 : index
      %c0_23 = arith.constant 0 : index
      %39 = vector.load %arg6[%c0_21, %c0_22, %c0_23] : memref<1x1x1xf32, #tpu.memory_space<vmem>>, vector<1x1x1xf32>
      %cst_24 = arith.constant 0.0204081628 : f32
      %40 = vector.broadcast %cst_24 : f32 to vector<1x1x1xf32>
      %41 = arith.mulf %39, %40 : vector<1x1x1xf32>
      %c0_25 = arith.constant 0 : index
      %c0_26 = arith.constant 0 : index
      %c0_27 = arith.constant 0 : index
      %42 = vector.load %arg5[%c0_25, %c0_26, %c0_27] : memref<1x1x1xf32, #tpu.memory_space<vmem>>, vector<1x1x1xf32>
      tpu.vector_store %arg5[%c0_25, %c0_26, %c0_27], %41 {strides = array<i32>} : memref<1x1x1xf32, #tpu.memory_space<vmem>>, vector<1x1x1xf32>,
    } else {
    }
    return
  }
  func.func @transform_0(%arg0: i32, %arg1: i32) -> (i32, i32, i32) {
    %c0_i32 = arith.constant 0 : i32
    %c0_i32_0 = arith.constant 0 : i32
    return %arg0, %arg1, %c0_i32 : i32, i32, i32
  }
  func.func @transform_1(%arg0: i32, %arg1: i32) -> (i32, i32, i32) {
    %c2_i32 = arith.constant 2 : i32
    %0 = arith.addi %arg0, %c2_i32 : i32
    %c0_i32 = arith.constant 0 : i32
    %c0_i32_0 = arith.constant 0 : i32
    return %0, %arg1, %c0_i32 : i32, i32, i32
  }
  func.func @transform_2(%arg0: i32, %arg1: i32) -> (i32, i32, i32) {
    %c0_i32 = arith.constant 0 : i32
    %c0_i32_0 = arith.constant 0 : i32
    %c0_i32_1 = arith.constant 0 : i32
    %c0_i32_2 = arith.constant 0 : i32
    return %c0_i32, %c0_i32_0, %c0_i32_1 : i32, i32, i32
  }
  func.func @transform_3(%arg0: i32, %arg1: i32) -> (i32, i32, i32) {
    %c0_i32 = arith.constant 0 : i32
    %c0_i32_0 = arith.constant 0 : i32
    %c0_i32_1 = arith.constant 0 : i32
    return %arg0, %c0_i32, %c0_i32_0 : i32, i32, i32
  }
}

module attributes {stable_mosaic.version = 11 : i64} {
  func.func @_clamp_l1_kernel(%arg0: i32, %arg1: i32, %arg2: memref<1x24x128xf32, #tpu.memory_space<vmem>>, %arg3: memref<1x24x128xf32, #tpu.memory_space<vmem>>, %arg4: memref<1x1x1xf32, #tpu.memory_space<vmem>>, %arg5: memref<1x1x1xf32, #tpu.memory_space<vmem>>) attributes {dimension_semantics = [#tpu.dimension_semantics<parallel>, #tpu.dimension_semantics<arbitrary>], iteration_bounds = array<i64: 2, 1>, scalar_prefetch = 0 : i64, scratch_operands = 1 : i64, tpu.core_type = #tpu.core_type<tc>, window_params = [{transform_indices = @transform_0, window_bounds = array<i64: 1, 24, 128>}, {transform_indices = @transform_1, window_bounds = array<i64: 1, 24, 128>}, {transform_indices = @transform_2, window_bounds = array<i64: 1, 1, 1>}]} {
    %c0_i32 = arith.constant 0 : i32
    %0 = arith.cmpi eq, %arg1, %c0_i32 : i32
    %1 = arith.extui %0 : i1 to i32
    %c0_i32_0 = arith.constant 0 : i32
    %2 = arith.cmpi ne, %1, %c0_i32_0 : i32
    scf.if %2 {
      %cst_18 = arith.constant 0.000000e+00 : f32
      %26 = vector.broadcast %cst_18 : f32 to vector<1x1x1xf32>
      %c0_19 = arith.constant 0 : index
      %c0_20 = arith.constant 0 : index
      %c0_21 = arith.constant 0 : index
      %27 = vector.load %arg5[%c0_19, %c0_20, %c0_21] : memref<1x1x1xf32, #tpu.memory_space<vmem>>, vector<1x1x1xf32>
      tpu.vector_store %arg5[%c0_19, %c0_20, %c0_21], %26 {strides = array<i32>} : memref<1x1x1xf32, #tpu.memory_space<vmem>>, vector<1x1x1xf32>,
    } else {
    }
    %c0 = arith.constant 0 : index
    %c0_1 = arith.constant 0 : index
    %c0_2 = arith.constant 0 : index
    %3 = vector.load %arg2[%c0, %c0_1, %c0_2] : memref<1x24x128xf32, #tpu.memory_space<vmem>>, vector<1x24x128xf32>
    %cst = arith.constant -1.000000e+00 : f32
    %cst_3 = arith.constant 1.000000e+00 : f32
    %4 = vector.broadcast %cst : f32 to vector<1x24x128xf32>
    %5 = arith.maximumf %4, %3 : vector<1x24x128xf32>
    %6 = vector.broadcast %cst_3 : f32 to vector<1x24x128xf32>
    %7 = arith.minimumf %6, %5 : vector<1x24x128xf32>
    %c0_4 = arith.constant 0 : index
    %c0_5 = arith.constant 0 : index
    %c0_6 = arith.constant 0 : index
    %8 = vector.load %arg3[%c0_4, %c0_5, %c0_6] : memref<1x24x128xf32, #tpu.memory_space<vmem>>, vector<1x24x128xf32>
    %cst_7 = arith.constant -1.000000e+00 : f32
    %cst_8 = arith.constant 1.000000e+00 : f32
    %9 = vector.broadcast %cst_7 : f32 to vector<1x24x128xf32>
    %10 = arith.maximumf %9, %8 : vector<1x24x128xf32>
    %11 = vector.broadcast %cst_8 : f32 to vector<1x24x128xf32>
    %12 = arith.minimumf %11, %10 : vector<1x24x128xf32>
    %c0_9 = arith.constant 0 : index
    %c0_10 = arith.constant 0 : index
    %c0_11 = arith.constant 0 : index
    %13 = vector.load %arg5[%c0_9, %c0_10, %c0_11] : memref<1x1x1xf32, #tpu.memory_space<vmem>>, vector<1x1x1xf32>
    %14 = arith.subf %7, %12 : vector<1x24x128xf32>
    %15 = math.absf %14 : vector<1x24x128xf32>
    %16 = vector.shape_cast %15 : vector<1x24x128xf32> to vector<1x1x24x128xf32>
    %cst_12 = arith.constant dense<0.000000e+00> : vector<1xf32>
    %17 = vector.multi_reduction <add>, %16, %cst_12 [1, 2, 3] : vector<1x1x24x128xf32> to vector<1xf32>
    %18 = vector.shape_cast %17 : vector<1xf32> to vector<1x1x1x1xf32>
    %19 = vector.extract %18[0, 0, 0, 0] : f32 from vector<1x1x1x1xf32>
    %20 = vector.broadcast %19 : f32 to vector<1x1x1xf32>
    %21 = arith.addf %13, %20 : vector<1x1x1xf32>
    %c0_13 = arith.constant 0 : index
    %c0_14 = arith.constant 0 : index
    %c0_15 = arith.constant 0 : index
    %22 = vector.load %arg5[%c0_13, %c0_14, %c0_15] : memref<1x1x1xf32, #tpu.memory_space<vmem>>, vector<1x1x1xf32>
    tpu.vector_store %arg5[%c0_13, %c0_14, %c0_15], %21 {strides = array<i32>} : memref<1x1x1xf32, #tpu.memory_space<vmem>>, vector<1x1x1xf32>,
    %c0_i32_16 = arith.constant 0 : i32
    %23 = arith.cmpi eq, %arg1, %c0_i32_16 : i32
    %24 = arith.extui %23 : i1 to i32
    %c0_i32_17 = arith.constant 0 : i32
    %25 = arith.cmpi ne, %24, %c0_i32_17 : i32
    scf.if %25 {
      %c0_18 = arith.constant 0 : index
      %c0_19 = arith.constant 0 : index
      %c0_20 = arith.constant 0 : index
      %26 = vector.load %arg5[%c0_18, %c0_19, %c0_20] : memref<1x1x1xf32, #tpu.memory_space<vmem>>, vector<1x1x1xf32>
      %cst_21 = arith.constant 3.25520843E-4 : f32
      %27 = vector.broadcast %cst_21 : f32 to vector<1x1x1xf32>
      %28 = arith.mulf %26, %27 : vector<1x1x1xf32>
      %c0_22 = arith.constant 0 : index
      %c0_23 = arith.constant 0 : index
      %c0_24 = arith.constant 0 : index
      %29 = vector.load %arg4[%c0_22, %c0_23, %c0_24] : memref<1x1x1xf32, #tpu.memory_space<vmem>>, vector<1x1x1xf32>
      tpu.vector_store %arg4[%c0_22, %c0_23, %c0_24], %28 {strides = array<i32>} : memref<1x1x1xf32, #tpu.memory_space<vmem>>, vector<1x1x1xf32>,
    } else {
    }
    return
  }
  func.func @transform_0(%arg0: i32, %arg1: i32) -> (i32, i32, i32) {
    %c0_i32 = arith.constant 0 : i32
    %c0_i32_0 = arith.constant 0 : i32
    return %arg0, %arg1, %c0_i32 : i32, i32, i32
  }
  func.func @transform_1(%arg0: i32, %arg1: i32) -> (i32, i32, i32) {
    %c0_i32 = arith.constant 0 : i32
    %c0_i32_0 = arith.constant 0 : i32
    return %arg0, %arg1, %c0_i32 : i32, i32, i32
  }
  func.func @transform_2(%arg0: i32, %arg1: i32) -> (i32, i32, i32) {
    %c0_i32 = arith.constant 0 : i32
    %c0_i32_0 = arith.constant 0 : i32
    %c0_i32_1 = arith.constant 0 : i32
    return %arg0, %c0_i32, %c0_i32_0 : i32, i32, i32
  }
}

</mosaic_0001>

<bundles_post_ra>
// kernel: autoencoder_perceptual_forward.12
= control target key start
LH: loop header
LB: loop body
LE: loop exit
PB: predicated region body
PF: predicated region fallthrough
CT: control target
= control target key end

     0   :  { %v1270_v1 = vmov 0.0   ;;  %vm1271_vm0 = vmmov 0   ;;  %vm865_vm1 = vcmask 519168   ;;  %vm890_vm2 = vcmask 517120   ;;  %s1641_s1 = inlined_call_operand.vmem [shape: bf16[384,64], index: 1, kind: input, shape index: {}]   ;;  %s1642_s0 = inlined_call_operand.vmem [shape: bf16[196,384], index: 0, kind: input, shape index: {}]   ;;  %s1643_s2 = inlined_call_operand.vmem [shape: f32[1,64], index: 2, kind: input, shape index: {}]   ;;  %s1644_s3 = inlined_call_operand.vmem [shape: bf16[196,64], index: 3, kind: output, shape index: {}]  }
   0x1   :  { %v1195_v0 = vld [vmem:[%s1641_s1 + $0x40] sm:$0xff]   ;;  %1125 = vmatprep.subr.bf16.mxu1 %v1270_v1  ;;  %1141 = vmatprep.mubr.msk.bf16.mxu1 %vm1271_vm0, %v1270_v1  ;;  %v1198_v4 = vld [vmem:[%s1641_s1 + $0x48] sm:$0xff]   ;;  %v1201_v7 = vld [vmem:[%s1641_s1 + $0x50] sm:$0xff]  }
   0x2   :  { %v1196_v2 = vld [vmem:[%s1641_s1] sm:$0xff]   ;;  %1010 = vmatprep.subr.bf16.mxu0 %v1195_v0  ;;  %v1199_v5 = vld [vmem:[%s1641_s1 + $0x8] sm:$0xff]   ;;  %v1202_v8 = vld [vmem:[%s1641_s1 + $0x10] sm:$0xff]  }
   0x3   :  { %v1197_v3 = vld [vmem:[%s1641_s1 + $0x80] sm:$0xff]   ;;  %1011 = vmatpush3.bf16.msra.mxu0 %v1196_v2  ;;  %v1200_v6 = vld [vmem:[%s1641_s1 + $0x88] sm:$0xff]   ;;  %v1203_v9 = vld [vmem:[%s1641_s1 + $0x90] sm:$0xff]  }
   0x4   :  { %1126 = vmatpush3.bf16.msra.mxu1 %v1197_v3  ;;  %1012 = vmatprep.subr.bf16.mxu0 %v1198_v4  ;;  %v1204_v10 = vld [vmem:[%s1641_s1 + $0x58] sm:$0xff]   ;;  %v1207_v13 = vld [vmem:[%s1641_s1 + $0x60] sm:$0xff]   ;;  %v1210_v16 = vld [vmem:[%s1641_s1 + $0x68] sm:$0xff]  }
   0x5   :  { %1127 = vmatprep.subr.bf16.mxu1 %v1270_v1  ;;  %v1205_v11 = vld [vmem:[%s1641_s1 + $0x18] sm:$0xff]   ;;  %v1208_v14 = vld [vmem:[%s1641_s1 + $0x20] sm:$0xff]   ;;  %v1211_v17 = vld [vmem:[%s1641_s1 + $0x28] sm:$0xff]  }
   0x6   :  { %v1206_v12 = vld [vmem:[%s1641_s1 + $0x98] sm:$0xff]   ;;  %v1209_v15 = vld [vmem:[%s1641_s1 + $0xa0] sm:$0xff]   ;;  %v1212_v18 = vld [vmem:[%s1641_s1 + $0xa8] sm:$0xff]  }
   0x7   :  { %1013 = vmatpush3.bf16.msra.mxu0 %v1199_v5  ;;  %v1213_v19 = vld [vmem:[%s1641_s1 + $0x70] sm:$0xff]   ;;  %v1216_v22 = vld [vmem:[%s1641_s1 + $0x78] sm:$0xff]   ;;  %v1218_v26 = vld [vmem:[%s1642_s0] ss:$12 sps:$4 sm:$0xff]  }
   0x8   :  { %1128 = vmatpush3.bf16.msra.mxu1 %v1200_v6  ;;  %1014 = vmatprep.subr.bf16.mxu0 %v1201_v7  ;;  %v1214_v20 = vld [vmem:[%s1641_s1 + $0x30] sm:$0xff]   ;;  %v1217_v24 = vld [vmem:[%s1641_s1 + $0x38] sm:$0xff]   ;;  %v1226_v30 = vld [vmem:[%s1642_s0 + $0x20] ss:$12 sps:$4 sm:$0xff]  }
   0x9   :  { %1129 = vmatprep.subr.bf16.mxu1 %v1270_v1  ;;  %v1215_v21 = vld [vmem:[%s1641_s1 + $0xb0] sm:$0xff]   ;;  %v1221_v25 = vld [vmem:[%s1641_s1 + $0xb8] sm:$0xff]   ;;  %v1237_v38 = vld [vmem:[%s1642_s0 + $0x60] ss:$12 sps:$4 sm:$0xff]  }
   0xa   :  { %v1220_v23 = vld [vmem:[%s1642_s0 + $0x4] ss:$12 sps:$4 sm:$0xff]   ;;  %v1222_v27 = vld [vmem:[%s1642_s0 + $0x8] ss:$12 sps:$4 sm:$0xff]   ;;  %v1231_v34 = vld [vmem:[%s1642_s0 + $0x4c] ss:$12 sps:$4 sm:$0xff]  }
   0xb   :  { %1015 = vmatpush3.bf16.msra.mxu0 %v1202_v8  ;;  %499 = vmatprep.mubr.bf16.mxu0 %v1220_v23  ;;  %v1223_v28 = vld [vmem:[%s1642_s0 + $0x1c] ss:$12 sps:$4 sm:$0xff]   ;;  %v1225_v29 = vld [vmem:[%s1642_s0 + $0x18] ss:$12 sps:$4 sm:$0xff]   ;;  %v1227_v31 = vld [vmem:[%s1642_s0 + $0x34] ss:$12 sps:$4 sm:$0xff]  }
   0xc   :  { %1130 = vmatpush3.bf16.msra.mxu1 %v1203_v9  ;;  %1016 = vmatprep.subr.bf16.mxu0 %v1204_v10  ;;  %v1229_v32 = vld [vmem:[%s1642_s0 + $0x30] ss:$12 sps:$4 sm:$0xff]   ;;  %v1230_v33 = vld [vmem:[%s1642_s0 + $0x38] ss:$12 sps:$4 sm:$0xff]   ;;  %v1233_v35 = vld [vmem:[%s1642_s0 + $0x48] ss:$12 sps:$4 sm:$0xff]  }
   0xd   :  { %1131 = vmatprep.subr.bf16.mxu1 %v1270_v1  ;;  %v1234_v36 = vld [vmem:[%s1642_s0 + $0x50] ss:$12 sps:$4 sm:$0xff]   ;;  %v1238_v39 = vld [vmem:[%s1642_s0 + $0x68] ss:$12 sps:$4 sm:$0xff]   ;;  %v1241_v41 = vld [vmem:[%s1642_s0 + $0x78] ss:$12 sps:$4 sm:$0xff]  }
   0xe   :  { %v1235_v37 = vld [vmem:[%s1642_s0 + $0x64] ss:$12 sps:$4 sm:$0xff]   ;;  %v1239_v40 = vld [vmem:[%s1642_s0 + $0x7c] ss:$12 sps:$4 sm:$0xff]   ;;  %v1242_v42 = vld [vmem:[%s1642_s0 + $0x80] ss:$12 sps:$4 sm:$0xff]  }
   0xf   :  { %1017 = vmatpush3.bf16.msra.mxu0 %v1205_v11  ;;  %v1243_v43 = vld [vmem:[%s1642_s0 + $0x94] ss:$12 sps:$4 sm:$0xff]   ;;  %v1245_v44 = vld [vmem:[%s1642_s0 + $0x90] ss:$12 sps:$4 sm:$0xff]   ;;  %v1246_v45 = vld [vmem:[%s1642_s0 + $0x98] ss:$12 sps:$4 sm:$0xff]  }
  0x10   :  { %1132 = vmatpush3.bf16.msra.mxu1 %v1206_v12  ;;  %1018 = vmatprep.subr.bf16.mxu0 %v1207_v13  ;;  %v1247_v46 = vld [vmem:[%s1642_s0 + $0xac] ss:$12 sps:$4 sm:$0xff]   ;;  %v1249_v47 = vld [vmem:[%s1642_s0 + $0xa8] ss:$12 sps:$4 sm:$0xff]   ;;  %v1250_v48 = vld [vmem:[%s1642_s0 + $0xb0] ss:$12 sps:$4 sm:$0xff]  }
  0x11   :  { %1133 = vmatprep.subr.bf16.mxu1 %v1270_v1  ;;  %v1251_v49 = vld [vmem:[%s1642_s0 + $0xc4] ss:$12 sps:$4 sm:$0xff]   ;;  %v1253_v50 = vld [vmem:[%s1642_s0 + $0xc0] ss:$12 sps:$4 sm:$0xff]   ;;  %v1254_v51 = vld [vmem:[%s1642_s0 + $0xc8] ss:$12 sps:$4 sm:$0xff]  }
  0x12   :  { %v1255_v52 = vld [vmem:[%s1642_s0 + $0xdc] ss:$12 sps:$4 sm:$0xff]   ;;  %v1257_v53 = vld [vmem:[%s1642_s0 + $0xd8] ss:$12 sps:$4 sm:$0xff]   ;;  %v1258_v54 = vld [vmem:[%s1642_s0 + $0xe0] ss:$12 sps:$4 sm:$0xff]  }
  0x13   :  { %1019 = vmatpush3.bf16.msra.mxu0 %v1208_v14  ;;  %v1259_v55 = vld [vmem:[%s1642_s0 + $0xf4] ss:$12 sps:$4 sm:$0xff]   ;;  %v1261_v56 = vld [vmem:[%s1642_s0 + $0xf0] ss:$12 sps:$4 sm:$0xff]   ;;  %v1262_v57 = vld [vmem:[%s1642_s0 + $0xf8] ss:$12 sps:$4 sm:$0xff]  }
  0x14   :  { %1134 = vmatpush3.bf16.msra.mxu1 %v1209_v15  ;;  %1020 = vmatprep.subr.bf16.mxu0 %v1210_v16  ;;  %v1263_v58 = vld [vmem:[%s1642_s0 + $0x10c] ss:$12 sps:$4 sm:$0xff]   ;;  %v63_v59 = vld [vmem:[%s1642_s0 + $0x120] sm:$0x33]  ;;  %v1265_v60 = vld [vmem:[%s1642_s0 + $0x108] ss:$12 sps:$4 sm:$0xff]  }
  0x15   :  { %1135 = vmatprep.subr.bf16.mxu1 %v1270_v1  ;;  %v1266_v61 = vld [vmem:[%s1642_s0 + $0x110] ss:$12 sps:$4 sm:$0xff]   ;;  %v934_v62 = vcombine.high %v63_v59, %v63_v59  ;;  %v933_v63 = vcombine.low %v63_v59, %v63_v59  ;;  %v1269_v0 = vld [vmem:[%s1642_s0 + $0x128] ss:$0 sps:$4 sm:$0x33]  }
  0x16   :  { %v1515_v4 = vld [vmem:[%s1643_s2] ss:$0 sm:$0xff] }
  0x17   :  { %1021 = vmatpush3.bf16.msra.mxu0 %v1211_v17 }
  0x18   :  { %1136 = vmatpush3.bf16.msra.mxu1 %v1212_v18  ;;  %1022 = vmatprep.subr.bf16.mxu0 %v1213_v19 }
  0x19   :  { %1137 = vmatprep.subr.bf16.mxu1 %v1270_v1 }
  0x1b   :  { %1023 = vmatpush3.bf16.msra.mxu0 %v1214_v20 }
  0x1c   :  { %1138 = vmatpush3.bf16.msra.mxu1 %v1215_v21  ;;  %1024 = vmatprep.subr.bf16.mxu0 %v1216_v22 }
  0x1d   :  { %1139 = vmatprep.subr.bf16.mxu1 %v1270_v1 }
  0x1f   :  { %1025 = vmatpush3.bf16.msra.mxu0 %v1217_v24 }
  0x20   :  { %1140 = vmatpush3.bf16.msra.mxu1 %v1221_v25 }
  0x22   :  { %500 = vmatmul.mubr.bf16.vlgmr.msra.gmra.mrb[0].mxu0 %v1218_v26 }
  0x23   :  { %1142 = vmatmul.mubr.bf16.vlgmr.msra.gmra.mrb[0].mxu1 %v1222_v27  ;;  %507 = vmatprep.mubr.bf16.mxu0 %v1223_v28 }
  0x24   :  { %1145 = vmatprep.mubr.msk.bf16.mxu1 %vm1271_vm0, %v1270_v1 }
  0x2a   :  { %508 = vmatmul.mubr.bf16.gmra.mrb[4].mxu0 %v1225_v29 }
  0x2b   :  { %1146 = vmatmul.mubr.bf16.gmra.mrb[4].mxu1 %v1226_v30  ;;  %515 = vmatprep.mubr.bf16.mxu0 %v1227_v31 }
  0x2c   :  { %1149 = vmatprep.mubr.msk.bf16.mxu1 %vm1271_vm0, %v1270_v1 }
  0x32   :  { %516 = vmatmul.mubr.bf16.gmra.mrb[8].mxu0 %v1229_v32 }
  0x33   :  { %1150 = vmatmul.mubr.bf16.gmra.mrb[8].mxu1 %v1230_v33  ;;  %523 = vmatprep.mubr.bf16.mxu0 %v1231_v34 }
  0x34   :  { %1153 = vmatprep.mubr.msk.bf16.mxu1 %vm1271_vm0, %v1270_v1 }
  0x3a   :  { %524 = vmatmul.mubr.bf16.gmra.mrb[12].mxu0 %v1233_v35 }
  0x3b   :  { %1154 = vmatmul.mubr.bf16.gmra.mrb[12].mxu1 %v1234_v36  ;;  %531 = vmatprep.mubr.bf16.mxu0 %v1235_v37 }
  0x3c   :  { %1157 = vmatprep.mubr.msk.bf16.mxu1 %vm1271_vm0, %v1270_v1 }
  0x42   :  { %532 = vmatmul.mubr.bf16.gmra.mrb[16].mxu0 %v1237_v38 }
  0x43   :  { %1158 = vmatmul.mubr.bf16.gmra.mrb[16].mxu1 %v1238_v39  ;;  %539 = vmatprep.mubr.bf16.mxu0 %v1239_v40 }
  0x44   :  { %1161 = vmatprep.mubr.msk.bf16.mxu1 %vm1271_vm0, %v1270_v1 }
  0x4a   :  { %540 = vmatmul.mubr.bf16.gmra.mrb[20].mxu0 %v1241_v41 }
  0x4b   :  { %1162 = vmatmul.mubr.bf16.gmra.mrb[20].mxu1 %v1242_v42  ;;  %547 = vmatprep.mubr.bf16.mxu0 %v1243_v43 }
  0x4c   :  { %1165 = vmatprep.mubr.msk.bf16.mxu1 %vm1271_vm0, %v1270_v1 }
  0x52   :  { %548 = vmatmul.mubr.bf16.gmra.mrb[24].mxu0 %v1245_v44 }
  0x53   :  { %1166 = vmatmul.mubr.bf16.gmra.mrb[24].mxu1 %v1246_v45  ;;  %555 = vmatprep.mubr.bf16.mxu0 %v1247_v46 }
  0x54   :  { %1169 = vmatprep.mubr.msk.bf16.mxu1 %vm1271_vm0, %v1270_v1 }
  0x5a   :  { %556 = vmatmul.mubr.bf16.gmra.mrb[28].mxu0 %v1249_v47 }
  0x5b   :  { %1170 = vmatmul.mubr.bf16.gmra.mrb[28].mxu1 %v1250_v48  ;;  %563 = vmatprep.mubr.bf16.mxu0 %v1251_v49 }
  0x5c   :  { %1173 = vmatprep.mubr.msk.bf16.mxu1 %vm1271_vm0, %v1270_v1 }
  0x62   :  { %564 = vmatmul.mubr.bf16.gmra.mrb[32].mxu0 %v1253_v50 }
  0x63   :  { %1174 = vmatmul.mubr.bf16.gmra.mrb[32].mxu1 %v1254_v51  ;;  %571 = vmatprep.mubr.bf16.mxu0 %v1255_v52 }
  0x64   :  { %1177 = vmatprep.mubr.msk.bf16.mxu1 %vm1271_vm0, %v1270_v1 }
  0x6a   :  { %572 = vmatmul.mubr.bf16.gmra.mrb[36].mxu0 %v1257_v53 }
  0x6b   :  { %1178 = vmatmul.mubr.bf16.gmra.mrb[36].mxu1 %v1258_v54  ;;  %579 = vmatprep.mubr.bf16.mxu0 %v1259_v55 }
  0x6c   :  { %1181 = vmatprep.mubr.msk.bf16.mxu1 %vm1271_vm0, %v1270_v1 }
  0x72   :  { %580 = vmatmul.mubr.bf16.gmra.mrb[40].mxu0 %v1261_v56 }
  0x73   :  { %1182 = vmatmul.mubr.bf16.gmra.mrb[40].mxu1 %v1262_v57  ;;  %587 = vmatprep.mubr.bf16.mxu0 %v1263_v58 }
  0x74   :  { %1185 = vmatprep.mubr.msk.bf16.mxu1 %vm1271_vm0, %v1270_v1 }
  0x7a   :  { %588 = vmatmul.mubr.bf16.gmra.mrb[44].mxu0 %v1265_v60 }
  0x7b   :  { %1186 = vmatmul.mubr.bf16.gmra.mrb[44].mxu1 %v1266_v61  ;;  %595 = vmatprep.mubr.bf16.mxu0 %v934_v62 }
  0x7c   :  { %1189 = vmatprep.mubr.msk.bf16.mxu1 %vm1271_vm0, %v1270_v1 }
  0x82   :  { %596 = vmatmul.mubr.bf16.gmra.mrb[48].mxu0 %v933_v63 }
  0x83   :  { %1190 = vmatmul.mubr.bf16.gmra.mrb[48].mxu1 %v1269_v0 }
  0xf5   :  { %v1026_v2 = vpop.f32.mrb[0].mxu0 }
  0xf6   :  { %v1027_v3 = vpop.f32.mrb[1].mxu0  ;;  %v637_v5 = vpop.f32.mrb[0].mxu1 }
  0xf7   :  { %v1028_v6 = vadd.f32 %v1027_v3, %v1026_v2  ;;  %v1029_v7 = vpop.f32.mrb[2].mxu0  ;;  %v1143_v8 = vpop.f32.mrb[1].mxu1 }
  0xf8   :  { %v1030_v9 = vpop.f32.mrb[3].mxu0  ;;  %v640_v1 = vpop.f32.mrb[2].mxu1 }
  0xf9   :  { %v502_v10 = vadd.f32 %v1028_v6, %v1515_v4  ;;  %v1031_v11 = vadd.f32 %v1030_v9, %v1029_v7  ;;  %v1144_v12 = vpop.f32.mrb[3].mxu1 }
  0xfb   :  { %v638_v13 = vadd.f32 %v637_v5, %v502_v10  ;;  %v505_v14 = vadd.f32 %v1031_v11, %v1515_v4 }
  0xfd   :  { %v739_v15 = vmax.f32 %v638_v13, 0.0  ;;  %v641_v16 = vadd.f32 %v640_v1, %v505_v14  ;;  %v1032_v17 = vpop.f32.mrb[4].mxu0 }
  0xfe   :  { %v1033_v18 = vpop.f32.mrb[5].mxu0  ;;  %v645_v19 = vpop.f32.mrb[4].mxu1 }
  0xff   :  { %v985_v20 = vpack.c.bf16 %v739_v15, %v739_v15  ;;  %v740_v21 = vmax.f32 %v641_v16, 0.0  ;;  %v1034_v22 = vadd.f32 %v1033_v18, %v1032_v17  ;;  %v1035_v23 = vpop.f32.mrb[6].mxu0  ;;  %v1147_v24 = vpop.f32.mrb[5].mxu1 }
 0x100   :  { %v1036_v25 = vpop.f32.mrb[7].mxu0  ;;  %v648_v26 = vpop.f32.mrb[6].mxu1 }
 0x101   :  { %866 = vst.msk [vmem:[%s1644_s3] sm:$0xf] %vm865_vm1, %v985_v20  ;;  %v986_v27 = vpack.c.bf16 %v740_v21, %v740_v21  ;;  %v510_v28 = vadd.f32 %v1034_v22, %v1515_v4  ;;  %v1037_v29 = vadd.f32 %v1036_v25, %v1035_v23  ;;  %v1148_v30 = vpop.f32.mrb[7].mxu1 }
 0x103   :  { %867 = vst.msk [vmem:[%s1644_s3 + $0x4] sm:$0xf] %vm865_vm1, %v986_v27  ;;  %v646_v31 = vadd.f32 %v645_v19, %v510_v28  ;;  %v513_v32 = vadd.f32 %v1037_v29, %v1515_v4 }
 0x105   :  { %v741_v33 = vmax.f32 %v646_v31, 0.0  ;;  %v649_v34 = vadd.f32 %v648_v26, %v513_v32  ;;  %v1038_v35 = vpop.f32.mrb[8].mxu0 }
 0x106   :  { %v1039_v36 = vpop.f32.mrb[9].mxu0  ;;  %v653_v37 = vpop.f32.mrb[8].mxu1 }
 0x107   :  { %v987_v38 = vpack.c.bf16 %v741_v33, %v741_v33  ;;  %v742_v39 = vmax.f32 %v649_v34, 0.0  ;;  %v1040_v40 = vadd.f32 %v1039_v36, %v1038_v35  ;;  %v1041_v41 = vpop.f32.mrb[10].mxu0  ;;  %v1151_v42 = vpop.f32.mrb[9].mxu1 }
 0x108   :  { %v1042_v43 = vpop.f32.mrb[11].mxu0  ;;  %v656_v44 = vpop.f32.mrb[10].mxu1 }
 0x109   :  { %868 = vst.msk [vmem:[%s1644_s3 + $0x8] sm:$0xf] %vm865_vm1, %v987_v38  ;;  %v988_v45 = vpack.c.bf16 %v742_v39, %v742_v39  ;;  %v518_v46 = vadd.f32 %v1040_v40, %v1515_v4  ;;  %v1043_v47 = vadd.f32 %v1042_v43, %v1041_v41  ;;  %v1152_v48 = vpop.f32.mrb[11].mxu1 }
 0x10b   :  { %869 = vst.msk [vmem:[%s1644_s3 + $0xc] sm:$0xf] %vm865_vm1, %v988_v45  ;;  %v654_v49 = vadd.f32 %v653_v37, %v518_v46  ;;  %v521_v50 = vadd.f32 %v1043_v47, %v1515_v4 }
 0x10d   :  { %v743_v51 = vmax.f32 %v654_v49, 0.0  ;;  %v657_v52 = vadd.f32 %v656_v44, %v521_v50  ;;  %v1044_v53 = vpop.f32.mrb[12].mxu0 }
 0x10e   :  { %v1045_v54 = vpop.f32.mrb[13].mxu0  ;;  %v661_v55 = vpop.f32.mrb[12].mxu1 }
 0x10f   :  { %v989_v56 = vpack.c.bf16 %v743_v51, %v743_v51  ;;  %v744_v57 = vmax.f32 %v657_v52, 0.0  ;;  %v1046_v58 = vadd.f32 %v1045_v54, %v1044_v53  ;;  %v1047_v59 = vpop.f32.mrb[14].mxu0  ;;  %v1155_v60 = vpop.f32.mrb[13].mxu1 }
 0x110   :  { %v1048_v61 = vpop.f32.mrb[15].mxu0  ;;  %v664_v62 = vpop.f32.mrb[14].mxu1 }
 0x111   :  { %870 = vst.msk [vmem:[%s1644_s3 + $0x10] sm:$0xf] %vm865_vm1, %v989_v56  ;;  %v990_v63 = vpack.c.bf16 %v744_v57, %v744_v57  ;;  %v526_v0 = vadd.f32 %v1046_v58, %v1515_v4  ;;  %v1049_v2 = vadd.f32 %v1048_v61, %v1047_v59  ;;  %v1156_v3 = vpop.f32.mrb[15].mxu1 }
 0x113   :  { %871 = vst.msk [vmem:[%s1644_s3 + $0x14] sm:$0xf] %vm865_vm1, %v990_v63  ;;  %v662_v5 = vadd.f32 %v661_v55, %v526_v0  ;;  %v529_v6 = vadd.f32 %v1049_v2, %v1515_v4 }
 0x115   :  { %v745_v7 = vmax.f32 %v662_v5, 0.0  ;;  %v665_v8 = vadd.f32 %v664_v62, %v529_v6  ;;  %v1050_v9 = vpop.f32.mrb[16].mxu0 }
 0x116   :  { %v1051_v1 = vpop.f32.mrb[17].mxu0  ;;  %v669_v10 = vpop.f32.mrb[16].mxu1 }
 0x117   :  { %v991_v11 = vpack.c.bf16 %v745_v7, %v745_v7  ;;  %v746_v12 = vmax.f32 %v665_v8, 0.0  ;;  %v1052_v13 = vadd.f32 %v1051_v1, %v1050_v9  ;;  %v1053_v14 = vpop.f32.mrb[18].mxu0  ;;  %v1159_v15 = vpop.f32.mrb[17].mxu1 }
 0x118   :  { %v1054_v16 = vpop.f32.mrb[19].mxu0  ;;  %v672_v17 = vpop.f32.mrb[18].mxu1 }
 0x119   :  { %872 = vst.msk [vmem:[%s1644_s3 + $0x18] sm:$0xf] %vm865_vm1, %v991_v11  ;;  %v992_v18 = vpack.c.bf16 %v746_v12, %v746_v12  ;;  %v534_v19 = vadd.f32 %v1052_v13, %v1515_v4  ;;  %v1055_v20 = vadd.f32 %v1054_v16, %v1053_v14  ;;  %v1160_v21 = vpop.f32.mrb[19].mxu1 }
 0x11b   :  { %873 = vst.msk [vmem:[%s1644_s3 + $0x1c] sm:$0xf] %vm865_vm1, %v992_v18  ;;  %v670_v22 = vadd.f32 %v669_v10, %v534_v19  ;;  %v537_v23 = vadd.f32 %v1055_v20, %v1515_v4 }
 0x11d   :  { %v747_v24 = vmax.f32 %v670_v22, 0.0  ;;  %v673_v25 = vadd.f32 %v672_v17, %v537_v23  ;;  %v1056_v26 = vpop.f32.mrb[20].mxu0 }
 0x11e   :  { %v1057_v27 = vpop.f32.mrb[21].mxu0  ;;  %v677_v28 = vpop.f32.mrb[20].mxu1 }
 0x11f   :  { %v993_v29 = vpack.c.bf16 %v747_v24, %v747_v24  ;;  %v748_v30 = vmax.f32 %v673_v25, 0.0  ;;  %v1058_v31 = vadd.f32 %v1057_v27, %v1056_v26  ;;  %v1059_v32 = vpop.f32.mrb[22].mxu0  ;;  %v1163_v33 = vpop.f32.mrb[21].mxu1 }
 0x120   :  { %v1060_v34 = vpop.f32.mrb[23].mxu0  ;;  %v680_v35 = vpop.f32.mrb[22].mxu1 }
 0x121   :  { %874 = vst.msk [vmem:[%s1644_s3 + $0x20] sm:$0xf] %vm865_vm1, %v993_v29  ;;  %v994_v36 = vpack.c.bf16 %v748_v30, %v748_v30  ;;  %v542_v37 = vadd.f32 %v1058_v31, %v1515_v4  ;;  %v1061_v38 = vadd.f32 %v1060_v34, %v1059_v32  ;;  %v1164_v39 = vpop.f32.mrb[23].mxu1 }
 0x123   :  { %875 = vst.msk [vmem:[%s1644_s3 + $0x24] sm:$0xf] %vm865_vm1, %v994_v36  ;;  %v678_v40 = vadd.f32 %v677_v28, %v542_v37  ;;  %v545_v41 = vadd.f32 %v1061_v38, %v1515_v4 }
 0x125   :  { %v749_v42 = vmax.f32 %v678_v40, 0.0  ;;  %v681_v43 = vadd.f32 %v680_v35, %v545_v41  ;;  %v1062_v44 = vpop.f32.mrb[24].mxu0 }
 0x126   :  { %v1063_v45 = vpop.f32.mrb[25].mxu0  ;;  %v685_v46 = vpop.f32.mrb[24].mxu1 }
 0x127   :  { %v995_v47 = vpack.c.bf16 %v749_v42, %v749_v42  ;;  %v750_v48 = vmax.f32 %v681_v43, 0.0  ;;  %v1064_v49 = vadd.f32 %v1063_v45, %v1062_v44  ;;  %v1065_v50 = vpop.f32.mrb[26].mxu0  ;;  %v1167_v51 = vpop.f32.mrb[25].mxu1 }
 0x128   :  { %v1066_v52 = vpop.f32.mrb[27].mxu0  ;;  %v688_v53 = vpop.f32.mrb[26].mxu1 }
 0x129   :  { %876 = vst.msk [vmem:[%s1644_s3 + $0x28] sm:$0xf] %vm865_vm1, %v995_v47  ;;  %v996_v54 = vpack.c.bf16 %v750_v48, %v750_v48  ;;  %v550_v55 = vadd.f32 %v1064_v49, %v1515_v4  ;;  %v1067_v56 = vadd.f32 %v1066_v52, %v1065_v50  ;;  %v1168_v57 = vpop.f32.mrb[27].mxu1 }
 0x12b   :  { %877 = vst.msk [vmem:[%s1644_s3 + $0x2c] sm:$0xf] %vm865_vm1, %v996_v54  ;;  %v686_v58 = vadd.f32 %v685_v46, %v550_v55  ;;  %v553_v59 = vadd.f32 %v1067_v56, %v1515_v4 }
 0x12d   :  { %v751_v60 = vmax.f32 %v686_v58, 0.0  ;;  %v689_v61 = vadd.f32 %v688_v53, %v553_v59  ;;  %v1068_v62 = vpop.f32.mrb[28].mxu0 }
 0x12e   :  { %v1069_v63 = vpop.f32.mrb[29].mxu0  ;;  %v693_v0 = vpop.f32.mrb[28].mxu1 }
 0x12f   :  { %v997_v2 = vpack.c.bf16 %v751_v60, %v751_v60  ;;  %v752_v3 = vmax.f32 %v689_v61, 0.0  ;;  %v1070_v5 = vadd.f32 %v1069_v63, %v1068_v62  ;;  %v1071_v6 = vpop.f32.mrb[30].mxu0  ;;  %v1171_v7 = vpop.f32.mrb[29].mxu1 }
 0x130   :  { %v1072_v8 = vpop.f32.mrb[31].mxu0  ;;  %v696_v9 = vpop.f32.mrb[30].mxu1 }
 0x131   :  { %878 = vst.msk [vmem:[%s1644_s3 + $0x30] sm:$0xf] %vm865_vm1, %v997_v2  ;;  %v998_v1 = vpack.c.bf16 %v752_v3, %v752_v3  ;;  %v558_v10 = vadd.f32 %v1070_v5, %v1515_v4  ;;  %v1073_v11 = vadd.f32 %v1072_v8, %v1071_v6  ;;  %v1172_v12 = vpop.f32.mrb[31].mxu1 }
 0x133   :  { %879 = vst.msk [vmem:[%s1644_s3 + $0x34] sm:$0xf] %vm865_vm1, %v998_v1  ;;  %v694_v13 = vadd.f32 %v693_v0, %v558_v10  ;;  %v561_v14 = vadd.f32 %v1073_v11, %v1515_v4 }
 0x135   :  { %v753_v15 = vmax.f32 %v694_v13, 0.0  ;;  %v697_v16 = vadd.f32 %v696_v9, %v561_v14  ;;  %v1074_v17 = vpop.f32.mrb[32].mxu0 }
 0x136   :  { %v1075_v18 = vpop.f32.mrb[33].mxu0  ;;  %v701_v19 = vpop.f32.mrb[32].mxu1 }
 0x137   :  { %v999_v20 = vpack.c.bf16 %v753_v15, %v753_v15  ;;  %v754_v21 = vmax.f32 %v697_v16, 0.0  ;;  %v1076_v22 = vadd.f32 %v1075_v18, %v1074_v17  ;;  %v1077_v23 = vpop.f32.mrb[34].mxu0  ;;  %v1175_v24 = vpop.f32.mrb[33].mxu1 }
 0x138   :  { %v1078_v25 = vpop.f32.mrb[35].mxu0  ;;  %v704_v26 = vpop.f32.mrb[34].mxu1 }
 0x139   :  { %880 = vst.msk [vmem:[%s1644_s3 + $0x38] sm:$0xf] %vm865_vm1, %v999_v20  ;;  %v1000_v27 = vpack.c.bf16 %v754_v21, %v754_v21  ;;  %v566_v28 = vadd.f32 %v1076_v22, %v1515_v4  ;;  %v1079_v29 = vadd.f32 %v1078_v25, %v1077_v23  ;;  %v1176_v30 = vpop.f32.mrb[35].mxu1 }
 0x13b   :  { %881 = vst.msk [vmem:[%s1644_s3 + $0x3c] sm:$0xf] %vm865_vm1, %v1000_v27  ;;  %v702_v31 = vadd.f32 %v701_v19, %v566_v28  ;;  %v569_v32 = vadd.f32 %v1079_v29, %v1515_v4 }
 0x13d   :  { %v755_v33 = vmax.f32 %v702_v31, 0.0  ;;  %v705_v34 = vadd.f32 %v704_v26, %v569_v32  ;;  %v1080_v35 = vpop.f32.mrb[36].mxu0 }
 0x13e   :  { %v1081_v36 = vpop.f32.mrb[37].mxu0  ;;  %v709_v37 = vpop.f32.mrb[36].mxu1 }
 0x13f   :  { %v1001_v38 = vpack.c.bf16 %v755_v33, %v755_v33  ;;  %v756_v39 = vmax.f32 %v705_v34, 0.0  ;;  %v1082_v40 = vadd.f32 %v1081_v36, %v1080_v35  ;;  %v1083_v41 = vpop.f32.mrb[38].mxu0  ;;  %v1179_v42 = vpop.f32.mrb[37].mxu1 }
 0x140   :  { %v1084_v43 = vpop.f32.mrb[39].mxu0  ;;  %v712_v44 = vpop.f32.mrb[38].mxu1 }
 0x141   :  { %882 = vst.msk [vmem:[%s1644_s3 + $0x40] sm:$0xf] %vm865_vm1, %v1001_v38  ;;  %v1002_v45 = vpack.c.bf16 %v756_v39, %v756_v39  ;;  %v574_v46 = vadd.f32 %v1082_v40, %v1515_v4  ;;  %v1085_v47 = vadd.f32 %v1084_v43, %v1083_v41  ;;  %v1180_v48 = vpop.f32.mrb[39].mxu1 }
 0x143   :  { %883 = vst.msk [vmem:[%s1644_s3 + $0x44] sm:$0xf] %vm865_vm1, %v1002_v45  ;;  %v710_v49 = vadd.f32 %v709_v37, %v574_v46  ;;  %v577_v50 = vadd.f32 %v1085_v47, %v1515_v4 }
 0x145   :  { %v757_v51 = vmax.f32 %v710_v49, 0.0  ;;  %v713_v52 = vadd.f32 %v712_v44, %v577_v50  ;;  %v1086_v53 = vpop.f32.mrb[40].mxu0 }
 0x146   :  { %v1087_v54 = vpop.f32.mrb[41].mxu0  ;;  %v717_v55 = vpop.f32.mrb[40].mxu1 }
 0x147   :  { %v1003_v56 = vpack.c.bf16 %v757_v51, %v757_v51  ;;  %v758_v57 = vmax.f32 %v713_v52, 0.0  ;;  %v1088_v58 = vadd.f32 %v1087_v54, %v1086_v53  ;;  %v1089_v59 = vpop.f32.mrb[42].mxu0  ;;  %v1183_v60 = vpop.f32.mrb[41].mxu1 }
 0x148   :  { %v1090_v61 = vpop.f32.mrb[43].mxu0  ;;  %v720_v62 = vpop.f32.mrb[42].mxu1 }
 0x149   :  { %884 = vst.msk [vmem:[%s1644_s3 + $0x48] sm:$0xf] %vm865_vm1, %v1003_v56  ;;  %v1004_v63 = vpack.c.bf16 %v758_v57, %v758_v57  ;;  %v582_v0 = vadd.f32 %v1088_v58, %v1515_v4  ;;  %v1091_v2 = vadd.f32 %v1090_v61, %v1089_v59  ;;  %v1184_v3 = vpop.f32.mrb[43].mxu1 }
 0x14b   :  { %885 = vst.msk [vmem:[%s1644_s3 + $0x4c] sm:$0xf] %vm865_vm1, %v1004_v63  ;;  %v718_v5 = vadd.f32 %v717_v55, %v582_v0  ;;  %v585_v6 = vadd.f32 %v1091_v2, %v1515_v4 }
 0x14d   :  { %v759_v7 = vmax.f32 %v718_v5, 0.0  ;;  %v721_v8 = vadd.f32 %v720_v62, %v585_v6  ;;  %v1092_v9 = vpop.f32.mrb[44].mxu0 }
 0x14e   :  { %v1093_v1 = vpop.f32.mrb[45].mxu0  ;;  %v725_v10 = vpop.f32.mrb[44].mxu1 }
 0x14f   :  { %v1005_v11 = vpack.c.bf16 %v759_v7, %v759_v7  ;;  %v760_v12 = vmax.f32 %v721_v8, 0.0  ;;  %v1094_v13 = vadd.f32 %v1093_v1, %v1092_v9  ;;  %v1095_v14 = vpop.f32.mrb[46].mxu0  ;;  %v1187_v15 = vpop.f32.mrb[45].mxu1 }
 0x150   :  { %v1096_v16 = vpop.f32.mrb[47].mxu0  ;;  %v728_v17 = vpop.f32.mrb[46].mxu1 }
 0x151   :  { %886 = vst.msk [vmem:[%s1644_s3 + $0x50] sm:$0xf] %vm865_vm1, %v1005_v11  ;;  %v1006_v18 = vpack.c.bf16 %v760_v12, %v760_v12  ;;  %v590_v19 = vadd.f32 %v1094_v13, %v1515_v4  ;;  %v1097_v20 = vadd.f32 %v1096_v16, %v1095_v14  ;;  %v1188_v21 = vpop.f32.mrb[47].mxu1 }
 0x153   :  { %887 = vst.msk [vmem:[%s1644_s3 + $0x54] sm:$0xf] %vm865_vm1, %v1006_v18  ;;  %v726_v22 = vadd.f32 %v725_v10, %v590_v19  ;;  %v593_v23 = vadd.f32 %v1097_v20, %v1515_v4 }
 0x155   :  { %v761_v24 = vmax.f32 %v726_v22, 0.0  ;;  %v729_v25 = vadd.f32 %v728_v17, %v593_v23  ;;  %v1098_v26 = vpop.f32.mrb[48].mxu0 }
 0x156   :  { %v1099_v27 = vpop.f32.mrb[49].mxu0  ;;  %v733_v28 = vpop.f32.mrb[48].mxu1 }
 0x157   :  { %v1007_v29 = vpack.c.bf16 %v761_v24, %v761_v24  ;;  %v762_v30 = vmax.f32 %v729_v25, 0.0  ;;  %v1100_v31 = vadd.f32 %v1099_v27, %v1098_v26  ;;  %v1101_v32 = vpop.f32.mrb[50].mxu0  ;;  %v1191_v33 = vpop.f32.mrb[49].mxu1 }
 0x158   :  { %v1102_v34 = vpop.f32.mrb[51].mxu0  ;;  %v736_v35 = vpop.f32.mrb[50].mxu1 }
 0x159   :  { %888 = vst.msk [vmem:[%s1644_s3 + $0x58] sm:$0xf] %vm865_vm1, %v1007_v29  ;;  %v1008_v36 = vpack.c.bf16 %v762_v30, %v762_v30  ;;  %v598_v37 = vadd.f32 %v1100_v31, %v1515_v4  ;;  %v1192_v38 = vpop.f32.mrb[51].mxu1 }
 0x15b   :  { %889 = vst.msk [vmem:[%s1644_s3 + $0x5c] sm:$0xf] %vm865_vm1, %v1008_v36  ;;  %v734_v39 = vadd.f32 %v733_v28, %v598_v37 }
 0x15d   :  { %v763_v40 = vmax.f32 %v734_v39, 0.0 }
 0x15f   :  { %v1009_v41 = vpack.c.bf16 %v763_v40, %v763_v40 }
 0x161   :  { %891 = vst.msk [vmem:[%s1644_s3 + $0x60] sm:$0x3] %vm890_vm2, %v1009_v41 }

// kernel: autoencoder_perceptual_forward.13
= control target key start
LH: loop header
LB: loop body
LE: loop exit
PB: predicated region body
PF: predicated region fallthrough
CT: control target
= control target key end

     0   :  { %vm1957_vm0 = vcmask 1043456   ;;  %vm1958_vm1 = vcmask 523268   ;;  %vm1964_vm3 = vcmask 1041408   ;;  %vm1965_vm4 = vcmask 521220   ;;  %s3451_s1 = inlined_call_operand.vmem [shape: bf16[1664,192], index: 1, kind: input, shape index: {}]   ;;  %s3452_s0 = inlined_call_operand.vmem [shape: bf16[36,1664], index: 0, kind: input, shape index: {}]   ;;  %s3453_s2 = inlined_call_operand.vmem [shape: f32[1,192], index: 2, kind: input, shape index: {}]   ;;  %s3454_s3 = inlined_call_operand.vmem [shape: bf16[36,192], index: 3, kind: output, shape index: {}]  }
   0x1   :  { %v2324_v0 = vld [vmem:[%s3451_s1 + $0x4] ss:$8 sps:$4 sm:$0xff]   ;;  %v2328_v2 = vld [vmem:[%s3451_s1] ss:$8 sps:$4 sm:$0xff]   ;;  %v2330_v4 = vld [vmem:[%s3451_s1 + $0x14] ss:$8 sps:$4 sm:$0xff]  }
   0x2   :  { %v2326_v1 = vld [vmem:[%s3451_s1 + $0x304] ss:$8 sps:$4 sm:$0xff]   ;;  %1488 = vmatprep.subr.bf16.mxu1 %v2324_v0  ;;  %v2329_v3 = vld [vmem:[%s3451_s1 + $0x300] ss:$8 sps:$4 sm:$0xff]   ;;  %v2332_v5 = vld [vmem:[%s3451_s1 + $0x314] ss:$8 sps:$4 sm:$0xff]  }
   0x3   :  { %1671 = vmatprep.subr.bf16.mxu0 %v2326_v1  ;;  %1489 = vmatpush1.bf16.msra.mxu1 %v2328_v2  ;;  %v2334_v6 = vld [vmem:[%s3451_s1 + $0x10] ss:$8 sps:$4 sm:$0xff]   ;;  %v2336_v8 = vld [vmem:[%s3451_s1 + $0x24] ss:$8 sps:$4 sm:$0xff]   ;;  %v2340_v10 = vld [vmem:[%s3451_s1 + $0x20] ss:$8 sps:$4 sm:$0xff]  }
   0x4   :  { %1672 = vmatpush1.bf16.msra.mxu0 %v2329_v3  ;;  %1490 = vmatprep.subr.bf16.mxu1 %v2330_v4  ;;  %v2335_v7 = vld [vmem:[%s3451_s1 + $0x310] ss:$8 sps:$4 sm:$0xff]   ;;  %v2338_v9 = vld [vmem:[%s3451_s1 + $0x324] ss:$8 sps:$4 sm:$0xff]   ;;  %v2341_v11 = vld [vmem:[%s3451_s1 + $0x320] ss:$8 sps:$4 sm:$0xff]  }
   0x5   :  { %1673 = vmatprep.subr.bf16.mxu0 %v2332_v5  ;;  %v2342_v12 = vld [vmem:[%s3451_s1 + $0x34] ss:$8 sps:$4 sm:$0xff]   ;;  %v2346_v14 = vld [vmem:[%s3451_s1 + $0x30] ss:$8 sps:$4 sm:$0xff]   ;;  %v2348_v16 = vld [vmem:[%s3451_s1 + $0x44] ss:$8 sps:$4 sm:$0xff]  }
   0x6   :  { %v2344_v13 = vld [vmem:[%s3451_s1 + $0x334] ss:$8 sps:$4 sm:$0xff]   ;;  %v2347_v15 = vld [vmem:[%s3451_s1 + $0x330] ss:$8 sps:$4 sm:$0xff]   ;;  %v2350_v17 = vld [vmem:[%s3451_s1 + $0x344] ss:$8 sps:$4 sm:$0xff]  }
   0x7   :  { %1491 = vmatpush1.bf16.msra.mxu1 %v2334_v6  ;;  %v2352_v18 = vld [vmem:[%s3451_s1 + $0x40] ss:$8 sps:$4 sm:$0xff]   ;;  %v2354_v20 = vld [vmem:[%s3451_s1 + $0x54] ss:$8 sps:$4 sm:$0xff]   ;;  %v2358_v22 = vld [vmem:[%s3451_s1 + $0x50] ss:$8 sps:$4 sm:$0xff]  }
   0x8   :  { %1674 = vmatpush1.bf16.msra.mxu0 %v2335_v7  ;;  %1492 = vmatprep.subr.bf16.mxu1 %v2336_v8  ;;  %v2353_v19 = vld [vmem:[%s3451_s1 + $0x340] ss:$8 sps:$4 sm:$0xff]   ;;  %v2356_v21 = vld [vmem:[%s3451_s1 + $0x354] ss:$8 sps:$4 sm:$0xff]   ;;  %v2359_v23 = vld [vmem:[%s3451_s1 + $0x350] ss:$8 sps:$4 sm:$0xff]  }
   0x9   :  { %1675 = vmatprep.subr.bf16.mxu0 %v2338_v9  ;;  %v2360_v24 = vld [vmem:[%s3451_s1 + $0x64] ss:$8 sps:$4 sm:$0xff]   ;;  %v2364_v26 = vld [vmem:[%s3451_s1 + $0x60] ss:$8 sps:$4 sm:$0xff]   ;;  %v2366_v28 = vld [vmem:[%s3451_s1 + $0x74] ss:$8 sps:$4 sm:$0xff]  }
   0xa   :  { %v2362_v25 = vld [vmem:[%s3451_s1 + $0x364] ss:$8 sps:$4 sm:$0xff]   ;;  %v2365_v27 = vld [vmem:[%s3451_s1 + $0x360] ss:$8 sps:$4 sm:$0xff]   ;;  %v2368_v29 = vld [vmem:[%s3451_s1 + $0x374] ss:$8 sps:$4 sm:$0xff]  }
   0xb   :  { %1493 = vmatpush1.bf16.msra.mxu1 %v2340_v10  ;;  %v2370_v30 = vld [vmem:[%s3451_s1 + $0x70] ss:$8 sps:$4 sm:$0xff]   ;;  %v2372_v32 = vld [vmem:[%s3451_s1 + $0x84] ss:$8 sps:$4 sm:$0xff]   ;;  %v2376_v34 = vld [vmem:[%s3451_s1 + $0x80] ss:$8 sps:$4 sm:$0xff]  }
   0xc   :  { %1676 = vmatpush1.bf16.msra.mxu0 %v2341_v11  ;;  %1494 = vmatprep.subr.bf16.mxu1 %v2342_v12  ;;  %v2371_v31 = vld [vmem:[%s3451_s1 + $0x370] ss:$8 sps:$4 sm:$0xff]   ;;  %v2374_v33 = vld [vmem:[%s3451_s1 + $0x384] ss:$8 sps:$4 sm:$0xff]   ;;  %v2377_v35 = vld [vmem:[%s3451_s1 + $0x380] ss:$8 sps:$4 sm:$0xff]  }
   0xd   :  { %1677 = vmatprep.subr.bf16.mxu0 %v2344_v13  ;;  %v2378_v36 = vld [vmem:[%s3451_s1 + $0x94] ss:$8 sps:$4 sm:$0xff]   ;;  %v2382_v38 = vld [vmem:[%s3451_s1 + $0x90] ss:$8 sps:$4 sm:$0xff]   ;;  %v2384_v40 = vld [vmem:[%s3451_s1 + $0xa4] ss:$8 sps:$4 sm:$0xff]  }
   0xe   :  { %v2380_v37 = vld [vmem:[%s3451_s1 + $0x394] ss:$8 sps:$4 sm:$0xff]   ;;  %v2383_v39 = vld [vmem:[%s3451_s1 + $0x390] ss:$8 sps:$4 sm:$0xff]   ;;  %v2386_v41 = vld [vmem:[%s3451_s1 + $0x3a4] ss:$8 sps:$4 sm:$0xff]  }
   0xf   :  { %1495 = vmatpush1.bf16.msra.mxu1 %v2346_v14  ;;  %v2388_v42 = vld [vmem:[%s3451_s1 + $0xa0] ss:$8 sps:$4 sm:$0xff]   ;;  %v2390_v44 = vld [vmem:[%s3451_s1 + $0xb4] ss:$8 sps:$4 sm:$0xff]   ;;  %v2394_v46 = vld [vmem:[%s3451_s1 + $0xb0] ss:$8 sps:$4 sm:$0xff]  }
  0x10   :  { %1678 = vmatpush1.bf16.msra.mxu0 %v2347_v15  ;;  %1496 = vmatprep.subr.bf16.mxu1 %v2348_v16  ;;  %v2389_v43 = vld [vmem:[%s3451_s1 + $0x3a0] ss:$8 sps:$4 sm:$0xff]   ;;  %v2392_v45 = vld [vmem:[%s3451_s1 + $0x3b4] ss:$8 sps:$4 sm:$0xff]   ;;  %v2395_v47 = vld [vmem:[%s3451_s1 + $0x3b0] ss:$8 sps:$4 sm:$0xff]  }
  0x11   :  { %1679 = vmatprep.subr.bf16.mxu0 %v2350_v17  ;;  %v2422_v48 = vld [vmem:[%s3452_s0 + $0x4] ss:$52 sps:$4 sm:$0xff]   ;;  %v2428_v51 = vld [vmem:[%s3452_s0 + $0x1c] ss:$52 sps:$4 sm:$0xff]   ;;  %v2400_v52 = vld [vmem:[%s3451_s1 + $0xc0] ss:$8 sps:$4 sm:$0xff]  }
  0x12   :  { %v2396_v49 = vld [vmem:[%s3451_s1 + $0xc4] ss:$8 sps:$4 sm:$0xff]   ;;  %1520 = vmatprep.mubr.bf16.mxu1 %v2422_v48  ;;  %v2401_v53 = vld [vmem:[%s3451_s1 + $0x3c0] ss:$8 sps:$4 sm:$0xff]   ;;  %v2402_v54 = vld [vmem:[%s3451_s1 + $0xd4] ss:$8 sps:$4 sm:$0xff]   ;;  %1703 = vmatprep.mubr.bf16.mxu0 %v2428_v51 }
  0x13   :  { %1497 = vmatpush1.bf16.msra.mxu1 %v2352_v18  ;;  %v2398_v50 = vld [vmem:[%s3451_s1 + $0x3c4] ss:$8 sps:$4 sm:$0xff]   ;;  %v2404_v55 = vld [vmem:[%s3451_s1 + $0x3d4] ss:$8 sps:$4 sm:$0xff]   ;;  %v2406_v56 = vld [vmem:[%s3451_s1 + $0xd0] ss:$8 sps:$4 sm:$0xff]  }
  0x14   :  { %1680 = vmatpush1.bf16.msra.mxu0 %v2353_v19  ;;  %1498 = vmatprep.subr.bf16.mxu1 %v2354_v20  ;;  %v2407_v57 = vld [vmem:[%s3451_s1 + $0x3d0] ss:$8 sps:$4 sm:$0xff]   ;;  %v2408_v58 = vld [vmem:[%s3451_s1 + $0xe4] ss:$8 sps:$4 sm:$0xff]   ;;  %v2412_v60 = vld [vmem:[%s3451_s1 + $0xe0] ss:$8 sps:$4 sm:$0xff]  }
  0x15   :  { %1681 = vmatprep.subr.bf16.mxu0 %v2356_v21  ;;  %v2410_v59 = vld [vmem:[%s3451_s1 + $0x3e4] ss:$8 sps:$4 sm:$0xff]   ;;  %v2413_v61 = vld [vmem:[%s3451_s1 + $0x3e0] ss:$8 sps:$4 sm:$0xff]   ;;  %v2414_v62 = vld [vmem:[%s3451_s1 + $0xf4] ss:$8 sps:$4 sm:$0xff]  }
  0x16   :  { %v2416_v63 = vld [vmem:[%s3451_s1 + $0x3f4] ss:$8 sps:$4 sm:$0xff]   ;;  %v2418_v0 = vld [vmem:[%s3451_s1 + $0xf0] ss:$8 sps:$4 sm:$0xff]   ;;  %v2425_v2 = vld [vmem:[%s3451_s1 + $0x104] ss:$8 sps:$4 sm:$0xff]  }
  0x17   :  { %1499 = vmatpush1.bf16.msra.mxu1 %v2358_v22  ;;  %v2419_v1 = vld [vmem:[%s3451_s1 + $0x3f0] ss:$8 sps:$4 sm:$0xff]   ;;  %v2431_v3 = vld [vmem:[%s3451_s1 + $0x404] ss:$8 sps:$4 sm:$0xff]   ;;  %v2420_v4 = vld [vmem:[%s3452_s0] ss:$52 sps:$4 sm:$0xff]  }
  0x18   :  { %1682 = vmatpush1.bf16.msra.mxu0 %v2359_v23  ;;  %1500 = vmatprep.subr.bf16.mxu1 %v2360_v24  ;;  %v2423_v5 = vld [vmem:[%s3451_s1 + $0x100] ss:$8 sps:$4 sm:$0xff]   ;;  %v2426_v6 = vld [vmem:[%s3452_s0 + $0x18] ss:$52 sps:$4 sm:$0xff]   ;;  %v2434_v8 = vld [vmem:[%s3451_s1 + $0x114] ss:$8 sps:$4 sm:$0xff]  }
  0x19   :  { %1683 = vmatprep.subr.bf16.mxu0 %v2362_v25  ;;  %v2429_v7 = vld [vmem:[%s3451_s1 + $0x400] ss:$8 sps:$4 sm:$0xff]   ;;  %v2437_v9 = vld [vmem:[%s3451_s1 + $0x414] ss:$8 sps:$4 sm:$0xff]   ;;  %v2432_v10 = vld [vmem:[%s3451_s1 + $0x110] ss:$8 sps:$4 sm:$0xff]  }
  0x1a   :  { %v2435_v11 = vld [vmem:[%s3451_s1 + $0x410] ss:$8 sps:$4 sm:$0xff]   ;;  %v2440_v12 = vld [vmem:[%s3451_s1 + $0x124] ss:$8 sps:$4 sm:$0xff]   ;;  %v2438_v14 = vld [vmem:[%s3451_s1 + $0x120] ss:$8 sps:$4 sm:$0xff]  }
  0x1b   :  { %1501 = vmatpush1.bf16.msra.mxu1 %v2364_v26  ;;  %v2443_v13 = vld [vmem:[%s3451_s1 + $0x424] ss:$8 sps:$4 sm:$0xff]   ;;  %v2441_v15 = vld [vmem:[%s3451_s1 + $0x420] ss:$8 sps:$4 sm:$0xff]   ;;  %v2446_v16 = vld [vmem:[%s3451_s1 + $0x134] ss:$8 sps:$4 sm:$0xff]  }
  0x1c   :  { %1684 = vmatpush1.bf16.msra.mxu0 %v2365_v27  ;;  %1502 = vmatprep.subr.bf16.mxu1 %v2366_v28  ;;  %v2449_v17 = vld [vmem:[%s3451_s1 + $0x434] ss:$8 sps:$4 sm:$0xff]   ;;  %v2444_v18 = vld [vmem:[%s3451_s1 + $0x130] ss:$8 sps:$4 sm:$0xff]   ;;  %v2452_v20 = vld [vmem:[%s3451_s1 + $0x144] ss:$8 sps:$4 sm:$0xff]  }
  0x1d   :  { %1685 = vmatprep.subr.bf16.mxu0 %v2368_v29  ;;  %v2447_v19 = vld [vmem:[%s3451_s1 + $0x430] ss:$8 sps:$4 sm:$0xff]   ;;  %v2455_v21 = vld [vmem:[%s3451_s1 + $0x444] ss:$8 sps:$4 sm:$0xff]   ;;  %v2450_v23 = vld [vmem:[%s3451_s1 + $0x140] ss:$8 sps:$4 sm:$0xff]  }
  0x1e   :  { %v2498_v22 = vld [vmem:[%s3452_s0 + $0x6c] ss:$52 sps:$4 sm:$0xff]   ;;  %v2503_v25 = vld [vmem:[%s3452_s0 + $0x84] ss:$52 sps:$4 sm:$0xff]   ;;  %v2458_v26 = vld [vmem:[%s3451_s1 + $0x154] ss:$8 sps:$4 sm:$0xff]  }
  0x1f   :  { %1503 = vmatpush1.bf16.msra.mxu1 %v2370_v30  ;;  %v2453_v24 = vld [vmem:[%s3451_s1 + $0x440] ss:$8 sps:$4 sm:$0xff]   ;;  %v2461_v27 = vld [vmem:[%s3451_s1 + $0x454] ss:$8 sps:$4 sm:$0xff]   ;;  %v2456_v30 = vld [vmem:[%s3451_s1 + $0x150] ss:$8 sps:$4 sm:$0xff]  }
  0x20   :  { %1686 = vmatpush1.bf16.msra.mxu0 %v2371_v31  ;;  %1504 = vmatprep.subr.bf16.mxu1 %v2372_v32  ;;  %v2508_v28 = vld [vmem:[%s3452_s0 + $0x68] ss:$52 sps:$4 sm:$0xff]   ;;  %v2509_v29 = vld [vmem:[%s3452_s0 + $0x80] ss:$52 sps:$4 sm:$0xff]   ;;  %v2459_v31 = vld [vmem:[%s3451_s1 + $0x450] ss:$8 sps:$4 sm:$0xff]  }
  0x21   :  { %1687 = vmatprep.subr.bf16.mxu0 %v2374_v33  ;;  %v2464_v32 = vld [vmem:[%s3451_s1 + $0x164] ss:$8 sps:$4 sm:$0xff]   ;;  %v2477_v51 = vld [vmem:[%s3451_s1 + $0x480] ss:$8 sps:$4 sm:$0xff]   ;;  %vm1959_vm2 = vmor %vm1958_vm1, %vm1957_vm0 }
  0x22   :  { %v2467_v33 = vld [vmem:[%s3451_s1 + $0x464] ss:$8 sps:$4 sm:$0xff]   ;;  %vm1966_vm5 = vmor %vm1965_vm4, %vm1964_vm3 }
  0x23   :  { %1505 = vmatpush1.bf16.msra.mxu1 %v2376_v34  ;;  %v43_v34 = vld [vmem:[%s3452_s0 + $0xd0] sm:$0x33]  ;;  %v2479_v48 = vld [vmem:[%s3451_s1 + $0x484] ss:$8 sps:$4 sm:$0xff]  }
  0x24   :  { %1688 = vmatpush1.bf16.msra.mxu0 %v2377_v35  ;;  %1506 = vmatprep.subr.bf16.mxu1 %v2378_v36  ;;  %v1999_v35 = vcombine.high %v43_v34, %v43_v34  ;;  %v46_v36 = vld [vmem:[%s3452_s0 + $0xe8] sm:$0x33] }
  0x25   :  { %1689 = vmatprep.subr.bf16.mxu0 %v2380_v37  ;;  %v2462_v37 = vld [vmem:[%s3451_s1 + $0x160] ss:$8 sps:$4 sm:$0xff]  }
  0x27   :  { %1507 = vmatpush1.bf16.msra.mxu1 %v2382_v38  ;;  %v2465_v38 = vld [vmem:[%s3451_s1 + $0x460] ss:$8 sps:$4 sm:$0xff]  }
  0x28   :  { %1690 = vmatpush1.bf16.msra.mxu0 %v2383_v39  ;;  %1508 = vmatprep.subr.bf16.mxu1 %v2384_v40  ;;  %v2005_v39 = vcombine.high %v46_v36, %v46_v36  ;;  %v2470_v40 = vld [vmem:[%s3451_s1 + $0x174] ss:$8 sps:$4 sm:$0xff]  }
  0x29   :  { %1691 = vmatprep.subr.bf16.mxu0 %v2386_v41  ;;  %v2473_v41 = vld [vmem:[%s3451_s1 + $0x474] ss:$8 sps:$4 sm:$0xff]  }
  0x2b   :  { %1509 = vmatpush1.bf16.msra.mxu1 %v2388_v42  ;;  %v1998_v42 = vcombine.low %v43_v34, %v43_v34  ;;  %v44_v34 = vld [vmem:[%s3452_s0 + $0xd8] sm:$0x33] }
  0x2c   :  { %1692 = vmatpush1.bf16.msra.mxu0 %v2389_v43  ;;  %1510 = vmatprep.subr.bf16.mxu1 %v2390_v44  ;;  %v2004_v43 = vcombine.low %v46_v36, %v46_v36  ;;  %v2468_v44 = vld [vmem:[%s3451_s1 + $0x170] ss:$8 sps:$4 sm:$0xff]   ;;  %v2558_v36 = vld [vmem:[%s3451_s1 + $0x234] ss:$8 sps:$4 sm:$0xff]  }
  0x2d   :  { %1693 = vmatprep.subr.bf16.mxu0 %v2392_v45  ;;  %v2471_v45 = vld [vmem:[%s3451_s1 + $0x470] ss:$8 sps:$4 sm:$0xff]  }
  0x2f   :  { %1511 = vmatpush1.bf16.msra.mxu1 %v2394_v46  ;;  %v2534_v46 = vld [vmem:[%s3452_s0 + $0xc] ss:$52 sps:$4 sm:$0xff]  }
  0x30   :  { %1694 = vmatpush1.bf16.msra.mxu0 %v2395_v47  ;;  %1512 = vmatprep.subr.bf16.mxu1 %v2396_v49  ;;  %v2476_v47 = vld [vmem:[%s3451_s1 + $0x184] ss:$8 sps:$4 sm:$0xff]  }
  0x31   :  { %1695 = vmatprep.subr.bf16.mxu0 %v2398_v50  ;;  %v2540_v49 = vld [vmem:[%s3452_s0 + $0x24] ss:$52 sps:$4 sm:$0xff]   ;;  %v2474_v50 = vld [vmem:[%s3451_s1 + $0x180] ss:$8 sps:$4 sm:$0xff]  }
  0x33   :  { %1513 = vmatpush1.bf16.msra.mxu1 %v2400_v52  ;;  %v2482_v52 = vld [vmem:[%s3451_s1 + $0x194] ss:$8 sps:$4 sm:$0xff]  }
  0x34   :  { %1696 = vmatpush1.bf16.msra.mxu0 %v2401_v53  ;;  %1514 = vmatprep.subr.bf16.mxu1 %v2402_v54  ;;  %v2485_v53 = vld [vmem:[%s3451_s1 + $0x494] ss:$8 sps:$4 sm:$0xff]   ;;  %v2480_v54 = vld [vmem:[%s3451_s1 + $0x190] ss:$8 sps:$4 sm:$0xff]  }
  0x35   :  { %1697 = vmatprep.subr.bf16.mxu0 %v2404_v55  ;;  %v2483_v55 = vld [vmem:[%s3451_s1 + $0x490] ss:$8 sps:$4 sm:$0xff]  }
  0x37   :  { %1515 = vmatpush1.bf16.msra.mxu1 %v2406_v56  ;;  %v2488_v56 = vld [vmem:[%s3451_s1 + $0x1a4] ss:$8 sps:$4 sm:$0xff]  }
  0x38   :  { %1698 = vmatpush1.bf16.msra.mxu0 %v2407_v57  ;;  %1516 = vmatprep.subr.bf16.mxu1 %v2408_v58  ;;  %v2491_v57 = vld [vmem:[%s3451_s1 + $0x4a4] ss:$8 sps:$4 sm:$0xff]   ;;  %v2486_v58 = vld [vmem:[%s3451_s1 + $0x1a0] ss:$8 sps:$4 sm:$0xff]  }
  0x39   :  { %1699 = vmatprep.subr.bf16.mxu0 %v2410_v59  ;;  %v2489_v59 = vld [vmem:[%s3451_s1 + $0x4a0] ss:$8 sps:$4 sm:$0xff]  }
  0x3b   :  { %1517 = vmatpush1.bf16.msra.mxu1 %v2412_v60  ;;  %v2494_v60 = vld [vmem:[%s3451_s1 + $0x1b4] ss:$8 sps:$4 sm:$0xff]  }
  0x3c   :  { %1700 = vmatpush1.bf16.msra.mxu0 %v2413_v61  ;;  %1518 = vmatprep.subr.bf16.mxu1 %v2414_v62  ;;  %v2497_v61 = vld [vmem:[%s3451_s1 + $0x4b4] ss:$8 sps:$4 sm:$0xff]   ;;  %v2492_v62 = vld [vmem:[%s3451_s1 + $0x1b0] ss:$8 sps:$4 sm:$0xff]  }
  0x3d   :  { %1701 = vmatprep.subr.bf16.mxu0 %v2416_v63  ;;  %v2495_v63 = vld [vmem:[%s3451_s1 + $0x4b0] ss:$8 sps:$4 sm:$0xff]  }
  0x3f   :  { %1519 = vmatpush1.bf16.msra.mxu1 %v2418_v0  ;;  %v2502_v0 = vld [vmem:[%s3451_s1 + $0x1c4] ss:$8 sps:$4 sm:$0xff]  }
  0x40   :  { %1702 = vmatpush1.bf16.msra.mxu0 %v2419_v1  ;;  %1549 = vmatprep.subr.bf16.mxu1 %v2425_v2  ;;  %v2507_v1 = vld [vmem:[%s3451_s1 + $0x4c4] ss:$8 sps:$4 sm:$0xff]   ;;  %v2500_v2 = vld [vmem:[%s3451_s1 + $0x1c0] ss:$8 sps:$4 sm:$0xff]  }
  0x41   :  { %1732 = vmatprep.subr.bf16.mxu0 %v2431_v3  ;;  %v2505_v3 = vld [vmem:[%s3451_s1 + $0x4c0] ss:$8 sps:$4 sm:$0xff]  }
  0x42   :  { %1521 = vmatmul.mubr.bf16.vlgmr.msra.gmra.mrb[0].mxu1 %v2420_v4  ;;  %v2512_v4 = vld [vmem:[%s3451_s1 + $0x1d4] ss:$8 sps:$4 sm:$0xff]  }
  0x43   :  { %1704 = vmatmul.mubr.bf16.vlgmr.msra.gmra.mrb[0].mxu0 %v2426_v6  ;;  %1550 = vmatpush1.bf16.msra.mxu1 %v2423_v5  ;;  %v2515_v5 = vld [vmem:[%s3451_s1 + $0x4d4] ss:$8 sps:$4 sm:$0xff]   ;;  %v2510_v6 = vld [vmem:[%s3451_s1 + $0x1d0] ss:$8 sps:$4 sm:$0xff]  }
  0x44   :  { %1733 = vmatpush1.bf16.msra.mxu0 %v2429_v7  ;;  %1551 = vmatprep.subr.bf16.mxu1 %v2434_v8  ;;  %v2513_v7 = vld [vmem:[%s3451_s1 + $0x4d0] ss:$8 sps:$4 sm:$0xff]   ;;  %v2519_v8 = vld [vmem:[%s3451_s1 + $0x1e4] ss:$8 sps:$4 sm:$0xff]  }
  0x45   :  { %1734 = vmatprep.subr.bf16.mxu0 %v2437_v9  ;;  %1530 = vmatprep.mubr.bf16.mxu1 %v2498_v22  ;;  %v2523_v9 = vld [vmem:[%s3451_s1 + $0x4e4] ss:$8 sps:$4 sm:$0xff]   ;;  %v2546_v22 = vld [vmem:[%s3451_s1 + $0x214] ss:$8 sps:$4 sm:$0xff]  }
  0x46   :  { %1713 = vmatprep.mubr.bf16.mxu0 %v2503_v25  ;;  %v2612_v25 = vld [vmem:[%s3452_s0 + $0x8c] ss:$52 sps:$4 sm:$0xff]  }
  0x47   :  { %1552 = vmatpush1.bf16.msra.mxu1 %v2432_v10  ;;  %v2517_v10 = vld [vmem:[%s3451_s1 + $0x1e0] ss:$8 sps:$4 sm:$0xff]  }
  0x48   :  { %1735 = vmatpush1.bf16.msra.mxu0 %v2435_v11  ;;  %1553 = vmatprep.subr.bf16.mxu1 %v2440_v12  ;;  %v2521_v11 = vld [vmem:[%s3451_s1 + $0x4e0] ss:$8 sps:$4 sm:$0xff]   ;;  %v2528_v12 = vld [vmem:[%s3451_s1 + $0x1f4] ss:$8 sps:$4 sm:$0xff]  }
  0x49   :  { %1736 = vmatprep.subr.bf16.mxu0 %v2443_v13  ;;  %v2531_v13 = vld [vmem:[%s3451_s1 + $0x4f4] ss:$8 sps:$4 sm:$0xff]  }
  0x4a   :  { %1531 = vmatmul.mubr.bf16.gmra.mrb[4].mxu1 %v2508_v28  ;;  %v2552_v28 = vld [vmem:[%s3451_s1 + $0x224] ss:$8 sps:$4 sm:$0xff]  }
  0x4b   :  { %1554 = vmatpush1.bf16.msra.mxu1 %v2438_v14  ;;  %1714 = vmatmul.mubr.bf16.gmra.mrb[4].mxu0 %v2509_v29  ;;  %v2526_v14 = vld [vmem:[%s3451_s1 + $0x1f0] ss:$8 sps:$4 sm:$0xff]   ;;  %v2555_v29 = vld [vmem:[%s3451_s1 + $0x524] ss:$8 sps:$4 sm:$0xff]  }
  0x4c   :  { %1737 = vmatpush1.bf16.msra.mxu0 %v2441_v15  ;;  %1555 = vmatprep.subr.bf16.mxu1 %v2446_v16  ;;  %v2529_v15 = vld [vmem:[%s3451_s1 + $0x4f0] ss:$8 sps:$4 sm:$0xff]   ;;  %v2532_v16 = vld [vmem:[%s3452_s0 + $0x8] ss:$52 sps:$4 sm:$0xff]  }
  0x4d   :  { %1738 = vmatprep.subr.bf16.mxu0 %v2449_v17  ;;  %1540 = vmatprep.mubr.bf16.mxu1 %v1999_v35  ;;  %v2537_v17 = vld [vmem:[%s3451_s1 + $0x204] ss:$8 sps:$4 sm:$0xff]   ;;  %v47_v35 = vld [vmem:[%s3452_s0 + $0xf0] sm:$0x33] }
  0x4e   :  { %1723 = vmatprep.mubr.bf16.mxu0 %v2005_v39  ;;  %v2007_v39 = vcombine.high %v47_v35, %v47_v35 }
  0x4f   :  { %1556 = vmatpush1.bf16.msra.mxu1 %v2444_v18  ;;  %v2543_v18 = vld [vmem:[%s3451_s1 + $0x504] ss:$8 sps:$4 sm:$0xff]  }
  0x50   :  { %1739 = vmatpush1.bf16.msra.mxu0 %v2447_v19  ;;  %1557 = vmatprep.subr.bf16.mxu1 %v2452_v20  ;;  %v2535_v19 = vld [vmem:[%s3451_s1 + $0x200] ss:$8 sps:$4 sm:$0xff]  }
  0x51   :  { %1740 = vmatprep.subr.bf16.mxu0 %v2455_v21  ;;  %v2538_v20 = vld [vmem:[%s3452_s0 + $0x20] ss:$52 sps:$4 sm:$0xff]  }
  0x52   :  { %1541 = vmatmul.mubr.bf16.gmra.mrb[8].mxu1 %v1998_v42  ;;  %v2541_v21 = vld [vmem:[%s3451_s1 + $0x500] ss:$8 sps:$4 sm:$0xff]   ;;  %v2564_v42 = vld [vmem:[%s3451_s1 + $0x244] ss:$8 sps:$4 sm:$0xff]  }
  0x53   :  { %1558 = vmatpush1.bf16.msra.mxu1 %v2450_v23  ;;  %1724 = vmatmul.mubr.bf16.gmra.mrb[8].mxu0 %v2004_v43  ;;  %v2549_v23 = vld [vmem:[%s3451_s1 + $0x514] ss:$8 sps:$4 sm:$0xff]   ;;  %v2567_v43 = vld [vmem:[%s3451_s1 + $0x544] ss:$8 sps:$4 sm:$0xff]  }
  0x54   :  { %1741 = vmatpush1.bf16.msra.mxu0 %v2453_v24  ;;  %1559 = vmatprep.subr.bf16.mxu1 %v2458_v26  ;;  %v2610_v24 = vld [vmem:[%s3452_s0 + $0x74] ss:$52 sps:$4 sm:$0xff]   ;;  %v2544_v26 = vld [vmem:[%s3451_s1 + $0x210] ss:$8 sps:$4 sm:$0xff]  }
  0x55   :  { %1742 = vmatprep.subr.bf16.mxu0 %v2461_v27  ;;  %1581 = vmatprep.mubr.bf16.mxu1 %v2534_v46  ;;  %v2547_v27 = vld [vmem:[%s3451_s1 + $0x510] ss:$8 sps:$4 sm:$0xff]   ;;  %v2570_v46 = vld [vmem:[%s3451_s1 + $0x254] ss:$8 sps:$4 sm:$0xff]  }
  0x56   :  { %1764 = vmatprep.mubr.bf16.mxu0 %v2540_v49  ;;  %v2573_v49 = vld [vmem:[%s3451_s1 + $0x554] ss:$8 sps:$4 sm:$0xff]  }
  0x57   :  { %1560 = vmatpush1.bf16.msra.mxu1 %v2456_v30  ;;  %v2550_v30 = vld [vmem:[%s3451_s1 + $0x220] ss:$8 sps:$4 sm:$0xff]  }
  0x58   :  { %1743 = vmatpush1.bf16.msra.mxu0 %v2459_v31  ;;  %1561 = vmatprep.subr.bf16.mxu1 %v2464_v32  ;;  %v2553_v31 = vld [vmem:[%s3451_s1 + $0x520] ss:$8 sps:$4 sm:$0xff]   ;;  %v2614_v32 = vld [vmem:[%s3452_s0 + $0x70] ss:$52 sps:$4 sm:$0xff]  }
  0x59   :  { %1744 = vmatprep.subr.bf16.mxu0 %v2467_v33  ;;  %v2618_v33 = vld [vmem:[%s3452_s0 + $0x88] ss:$52 sps:$4 sm:$0xff]  }
  0x5b   :  { %1562 = vmatpush1.bf16.msra.mxu1 %v2462_v37  ;;  %v2561_v37 = vld [vmem:[%s3451_s1 + $0x534] ss:$8 sps:$4 sm:$0xff]  }
  0x5c   :  { %1745 = vmatpush1.bf16.msra.mxu0 %v2465_v38  ;;  %1563 = vmatprep.subr.bf16.mxu1 %v2470_v40  ;;  %v2001_v38 = vcombine.high %v44_v34, %v44_v34  ;;  %v2556_v40 = vld [vmem:[%s3451_s1 + $0x230] ss:$8 sps:$4 sm:$0xff]  }
  0x5d   :  { %1746 = vmatprep.subr.bf16.mxu0 %v2473_v41  ;;  %v2559_v41 = vld [vmem:[%s3451_s1 + $0x530] ss:$8 sps:$4 sm:$0xff]  }
  0x5f   :  { %1564 = vmatpush1.bf16.msra.mxu1 %v2468_v44  ;;  %v2562_v44 = vld [vmem:[%s3451_s1 + $0x240] ss:$8 sps:$4 sm:$0xff]  }
  0x60   :  { %1747 = vmatpush1.bf16.msra.mxu0 %v2471_v45  ;;  %1565 = vmatprep.subr.bf16.mxu1 %v2476_v47  ;;  %v2565_v45 = vld [vmem:[%s3451_s1 + $0x540] ss:$8 sps:$4 sm:$0xff]   ;;  %v2000_v47 = vcombine.low %v44_v34, %v44_v34  ;;  %v2655_v34 = vld [vmem:[%s3451_s1 + $0x614] ss:$8 sps:$4 sm:$0xff]  }
  0x61   :  { %1748 = vmatprep.subr.bf16.mxu0 %v2479_v48  ;;  %v2006_v48 = vcombine.low %v47_v35, %v47_v35  ;;  %v2656_v35 = vld [vmem:[%s3452_s0 + $0x7c] ss:$52 sps:$4 sm:$0xff]  }
  0x63   :  { %1566 = vmatpush1.bf16.msra.mxu1 %v2474_v50  ;;  %v2646_v50 = vld [vmem:[%s3452_s0 + $0x14] ss:$52 sps:$4 sm:$0xff]  }
  0x64   :  { %1749 = vmatpush1.bf16.msra.mxu0 %v2477_v51  ;;  %1567 = vmatprep.subr.bf16.mxu1 %v2482_v52  ;;  %v2649_v51 = vld [vmem:[%s3452_s0 + $0x2c] ss:$52 sps:$4 sm:$0xff]   ;;  %v2568_v52 = vld [vmem:[%s3451_s1 + $0x250] ss:$8 sps:$4 sm:$0xff]  }
  0x65   :  { %1750 = vmatprep.subr.bf16.mxu0 %v2485_v53  ;;  %v2571_v53 = vld [vmem:[%s3451_s1 + $0x550] ss:$8 sps:$4 sm:$0xff]  }
  0x67   :  { %1568 = vmatpush1.bf16.msra.mxu1 %v2480_v54  ;;  %v2576_v54 = vld [vmem:[%s3451_s1 + $0x264] ss:$8 sps:$4 sm:$0xff]  }
  0x68   :  { %1751 = vmatpush1.bf16.msra.mxu0 %v2483_v55  ;;  %1569 = vmatprep.subr.bf16.mxu1 %v2488_v56  ;;  %v2579_v55 = vld [vmem:[%s3451_s1 + $0x564] ss:$8 sps:$4 sm:$0xff]   ;;  %v2574_v56 = vld [vmem:[%s3451_s1 + $0x260] ss:$8 sps:$4 sm:$0xff]  }
  0x69   :  { %1752 = vmatprep.subr.bf16.mxu0 %v2491_v57  ;;  %v2577_v57 = vld [vmem:[%s3451_s1 + $0x560] ss:$8 sps:$4 sm:$0xff]  }
  0x6b   :  { %1570 = vmatpush1.bf16.msra.mxu1 %v2486_v58  ;;  %v2582_v58 = vld [vmem:[%s3451_s1 + $0x274] ss:$8 sps:$4 sm:$0xff]  }
  0x6c   :  { %1753 = vmatpush1.bf16.msra.mxu0 %v2489_v59  ;;  %1571 = vmatprep.subr.bf16.mxu1 %v2494_v60  ;;  %v2585_v59 = vld [vmem:[%s3451_s1 + $0x574] ss:$8 sps:$4 sm:$0xff]   ;;  %v2580_v60 = vld [vmem:[%s3451_s1 + $0x270] ss:$8 sps:$4 sm:$0xff]  }
  0x6d   :  { %1754 = vmatprep.subr.bf16.mxu0 %v2497_v61  ;;  %v2583_v61 = vld [vmem:[%s3451_s1 + $0x570] ss:$8 sps:$4 sm:$0xff]  }
  0x6f   :  { %1572 = vmatpush1.bf16.msra.mxu1 %v2492_v62  ;;  %v2588_v62 = vld [vmem:[%s3451_s1 + $0x284] ss:$8 sps:$4 sm:$0xff]  }
  0x70   :  { %1755 = vmatpush1.bf16.msra.mxu0 %v2495_v63  ;;  %1573 = vmatprep.subr.bf16.mxu1 %v2502_v0  ;;  %v2591_v63 = vld [vmem:[%s3451_s1 + $0x584] ss:$8 sps:$4 sm:$0xff]   ;;  %v2586_v0 = vld [vmem:[%s3451_s1 + $0x280] ss:$8 sps:$4 sm:$0xff]  }
  0x71   :  { %1756 = vmatprep.subr.bf16.mxu0 %v2507_v1  ;;  %v2589_v1 = vld [vmem:[%s3451_s1 + $0x580] ss:$8 sps:$4 sm:$0xff]  }
  0x73   :  { %1574 = vmatpush1.bf16.msra.mxu1 %v2500_v2  ;;  %v2594_v2 = vld [vmem:[%s3451_s1 + $0x294] ss:$8 sps:$4 sm:$0xff]  }
  0x74   :  { %1757 = vmatpush1.bf16.msra.mxu0 %v2505_v3  ;;  %1575 = vmatprep.subr.bf16.mxu1 %v2512_v4  ;;  %v2597_v3 = vld [vmem:[%s3451_s1 + $0x594] ss:$8 sps:$4 sm:$0xff]   ;;  %v2592_v4 = vld [vmem:[%s3451_s1 + $0x290] ss:$8 sps:$4 sm:$0xff]  }
  0x75   :  { %1758 = vmatprep.subr.bf16.mxu0 %v2515_v5  ;;  %v2595_v5 = vld [vmem:[%s3451_s1 + $0x590] ss:$8 sps:$4 sm:$0xff]  }
  0x77   :  { %1576 = vmatpush1.bf16.msra.mxu1 %v2510_v6  ;;  %v2600_v6 = vld [vmem:[%s3451_s1 + $0x2a4] ss:$8 sps:$4 sm:$0xff]  }
  0x78   :  { %1759 = vmatpush1.bf16.msra.mxu0 %v2513_v7  ;;  %1577 = vmatprep.subr.bf16.mxu1 %v2519_v8  ;;  %v2603_v7 = vld [vmem:[%s3451_s1 + $0x5a4] ss:$8 sps:$4 sm:$0xff]   ;;  %v2598_v8 = vld [vmem:[%s3451_s1 + $0x2a0] ss:$8 sps:$4 sm:$0xff]  }
  0x79   :  { %1760 = vmatprep.subr.bf16.mxu0 %v2523_v9  ;;  %v2601_v9 = vld [vmem:[%s3451_s1 + $0x5a0] ss:$8 sps:$4 sm:$0xff]  }
  0x7b   :  { %1578 = vmatpush1.bf16.msra.mxu1 %v2517_v10  ;;  %v2606_v10 = vld [vmem:[%s3451_s1 + $0x2b4] ss:$8 sps:$4 sm:$0xff]  }
  0x7c   :  { %1761 = vmatpush1.bf16.msra.mxu0 %v2521_v11  ;;  %1579 = vmatprep.subr.bf16.mxu1 %v2528_v12  ;;  %v2609_v11 = vld [vmem:[%s3451_s1 + $0x5b4] ss:$8 sps:$4 sm:$0xff]   ;;  %v2604_v12 = vld [vmem:[%s3451_s1 + $0x2b0] ss:$8 sps:$4 sm:$0xff]  }
  0x7d   :  { %1762 = vmatprep.subr.bf16.mxu0 %v2531_v13  ;;  %v2607_v13 = vld [vmem:[%s3451_s1 + $0x5b0] ss:$8 sps:$4 sm:$0xff]  }
  0x7f   :  { %1580 = vmatpush1.bf16.msra.mxu1 %v2526_v14  ;;  %v2617_v14 = vld [vmem:[%s3451_s1 + $0x2c4] ss:$8 sps:$4 sm:$0xff]  }
  0x80   :  { %1763 = vmatpush1.bf16.msra.mxu0 %v2529_v15  ;;  %1610 = vmatprep.subr.bf16.mxu1 %v2537_v17  ;;  %v2621_v15 = vld [vmem:[%s3451_s1 + $0x5c4] ss:$8 sps:$4 sm:$0xff]   ;;  %v2619_v17 = vld [vmem:[%s3451_s1 + $0x5c0] ss:$8 sps:$4 sm:$0xff]  }
  0x81   :  { %1793 = vmatprep.subr.bf16.mxu0 %v2543_v18  ;;  %v2624_v18 = vld [vmem:[%s3451_s1 + $0x2d4] ss:$8 sps:$4 sm:$0xff]  }
  0x82   :  { %1582 = vmatmul.mubr.bf16.vlgmr.msra.gmra.mrb[0].mxu1 %v2532_v16  ;;  %v2615_v16 = vld [vmem:[%s3451_s1 + $0x2c0] ss:$8 sps:$4 sm:$0xff]  }
  0x83   :  { %1765 = vmatmul.mubr.bf16.vlgmr.msra.gmra.mrb[0].mxu0 %v2538_v20  ;;  %1611 = vmatpush1.bf16.msra.mxu1 %v2535_v19  ;;  %v2627_v19 = vld [vmem:[%s3451_s1 + $0x5d4] ss:$8 sps:$4 sm:$0xff]   ;;  %v2622_v20 = vld [vmem:[%s3451_s1 + $0x2d0] ss:$8 sps:$4 sm:$0xff]  }
  0x84   :  { %1794 = vmatpush1.bf16.msra.mxu0 %v2541_v21  ;;  %1612 = vmatprep.subr.bf16.mxu1 %v2546_v22  ;;  %v2625_v21 = vld [vmem:[%s3451_s1 + $0x5d0] ss:$8 sps:$4 sm:$0xff]   ;;  %v2633_v22 = vld [vmem:[%s3451_s1 + $0x2e4] ss:$8 sps:$4 sm:$0xff]  }
  0x85   :  { %1795 = vmatprep.subr.bf16.mxu0 %v2549_v23  ;;  %1591 = vmatprep.mubr.bf16.mxu1 %v2610_v24  ;;  %v2637_v23 = vld [vmem:[%s3451_s1 + $0x5e4] ss:$8 sps:$4 sm:$0xff]   ;;  %v2631_v24 = vld [vmem:[%s3451_s1 + $0x2e0] ss:$8 sps:$4 sm:$0xff]  }
  0x86   :  { %1774 = vmatprep.mubr.bf16.mxu0 %v2612_v25  ;;  %v2635_v25 = vld [vmem:[%s3451_s1 + $0x5e0] ss:$8 sps:$4 sm:$0xff]  }
  0x87   :  { %1613 = vmatpush1.bf16.msra.mxu1 %v2544_v26  ;;  %v2640_v26 = vld [vmem:[%s3451_s1 + $0x2f4] ss:$8 sps:$4 sm:$0xff]  }
  0x88   :  { %1796 = vmatpush1.bf16.msra.mxu0 %v2547_v27  ;;  %1614 = vmatprep.subr.bf16.mxu1 %v2552_v28  ;;  %v2643_v27 = vld [vmem:[%s3451_s1 + $0x5f4] ss:$8 sps:$4 sm:$0xff]   ;;  %v2638_v28 = vld [vmem:[%s3451_s1 + $0x2f0] ss:$8 sps:$4 sm:$0xff]  }
  0x89   :  { %1797 = vmatprep.subr.bf16.mxu0 %v2555_v29  ;;  %v2641_v29 = vld [vmem:[%s3451_s1 + $0x5f0] ss:$8 sps:$4 sm:$0xff]  }
  0x8a   :  { %1592 = vmatmul.mubr.bf16.gmra.mrb[4].mxu1 %v2614_v32  ;;  %v2647_v32 = vld [vmem:[%s3452_s0 + $0x28] ss:$52 sps:$4 sm:$0xff]  }
  0x8b   :  { %1775 = vmatmul.mubr.bf16.gmra.mrb[4].mxu0 %v2618_v33  ;;  %1615 = vmatpush1.bf16.msra.mxu1 %v2550_v30  ;;  %v2652_v30 = vld [vmem:[%s3451_s1 + $0x604] ss:$8 sps:$4 sm:$0xff]   ;;  %v2650_v33 = vld [vmem:[%s3451_s1 + $0x600] ss:$8 sps:$4 sm:$0xff]  }
  0x8c   :  { %1798 = vmatpush1.bf16.msra.mxu0 %v2553_v31  ;;  %1616 = vmatprep.subr.bf16.mxu1 %v2558_v36  ;;  %v2644_v31 = vld [vmem:[%s3452_s0 + $0x10] ss:$52 sps:$4 sm:$0xff]   ;;  %v2658_v36 = vld [vmem:[%s3452_s0 + $0x94] ss:$52 sps:$4 sm:$0xff]  }
  0x8d   :  { %1799 = vmatprep.subr.bf16.mxu0 %v2561_v37  ;;  %1601 = vmatprep.mubr.bf16.mxu1 %v2001_v38  ;;  %v2653_v37 = vld [vmem:[%s3451_s1 + $0x610] ss:$8 sps:$4 sm:$0xff]   ;;  %v2664_v38 = vld [vmem:[%s3451_s1 + $0x624] ss:$8 sps:$4 sm:$0xff]  }
  0x8e   :  { %1784 = vmatprep.mubr.bf16.mxu0 %v2007_v39  ;;  %v2660_v39 = vld [vmem:[%s3452_s0 + $0x78] ss:$52 sps:$4 sm:$0xff]  }
  0x8f   :  { %1617 = vmatpush1.bf16.msra.mxu1 %v2556_v40  ;;  %v2661_v40 = vld [vmem:[%s3452_s0 + $0x90] ss:$52 sps:$4 sm:$0xff]  }
  0x90   :  { %1800 = vmatpush1.bf16.msra.mxu0 %v2559_v41  ;;  %1618 = vmatprep.subr.bf16.mxu1 %v2564_v42  ;;  %v45_v41 = vld [vmem:[%s3452_s0 + $0xe0] sm:$0x33]  ;;  %v48_v42 = vld [vmem:[%s3452_s0 + $0xf8] sm:$0x33] }
  0x91   :  { %1801 = vmatprep.subr.bf16.mxu0 %v2567_v43  ;;  %v2662_v43 = vld [vmem:[%s3451_s1 + $0x620] ss:$8 sps:$4 sm:$0xff]  }
  0x92   :  { %1602 = vmatmul.mubr.bf16.gmra.mrb[8].mxu1 %v2000_v47  ;;  %v2665_v47 = vld [vmem:[%s3451_s1 + $0x630] ss:$8 sps:$4 sm:$0xff]  }
  0x93   :  { %1785 = vmatmul.mubr.bf16.gmra.mrb[8].mxu0 %v2006_v48  ;;  %1619 = vmatpush1.bf16.msra.mxu1 %v2562_v44  ;;  %v2667_v44 = vld [vmem:[%s3451_s1 + $0x634] ss:$8 sps:$4 sm:$0xff]   ;;  %v2674_v48 = vld [vmem:[%s3451_s1 + $0x644] ss:$8 sps:$4 sm:$0xff]  }
  0x94   :  { %1802 = vmatpush1.bf16.msra.mxu0 %v2565_v45  ;;  %1620 = vmatprep.subr.bf16.mxu1 %v2570_v46  ;;  %v2003_v45 = vcombine.high %v45_v41, %v45_v41  ;;  %v2009_v46 = vcombine.high %v48_v42, %v48_v42 }
  0x95   :  { %1803 = vmatprep.subr.bf16.mxu0 %v2573_v49  ;;  %1642 = vmatprep.mubr.bf16.mxu1 %v2646_v50  ;;  %v2002_v49 = vcombine.low %v45_v41, %v45_v41  ;;  %v2008_v50 = vcombine.low %v48_v42, %v48_v42 }
  0x96   :  { %1825 = vmatprep.mubr.bf16.mxu0 %v2649_v51  ;;  %v2672_v51 = vld [vmem:[%s3451_s1 + $0x640] ss:$8 sps:$4 sm:$0xff]  }
  0x97   :  { %1621 = vmatpush1.bf16.msra.mxu1 %v2568_v52  ;;  %v2677_v52 = vld [vmem:[%s3451_s1 + $0x654] ss:$8 sps:$4 sm:$0xff]  }
  0x98   :  { %1804 = vmatpush1.bf16.msra.mxu0 %v2571_v53  ;;  %1622 = vmatprep.subr.bf16.mxu1 %v2576_v54  ;;  %v2675_v53 = vld [vmem:[%s3451_s1 + $0x650] ss:$8 sps:$4 sm:$0xff]   ;;  %v2680_v54 = vld [vmem:[%s3451_s1 + $0x664] ss:$8 sps:$4 sm:$0xff]  }
  0x99   :  { %1805 = vmatprep.subr.bf16.mxu0 %v2579_v55  ;;  %v2687_v55 = vmov 0  }
  0x9b   :  { %1623 = vmatpush1.bf16.msra.mxu1 %v2574_v56  ;;  %v2678_v56 = vld [vmem:[%s3451_s1 + $0x660] ss:$8 sps:$4 sm:$0xff]  }
  0x9c   :  { %1806 = vmatpush1.bf16.msra.mxu0 %v2577_v57  ;;  %1624 = vmatprep.subr.bf16.mxu1 %v2582_v58  ;;  %v2683_v57 = vld [vmem:[%s3451_s1 + $0x674] ss:$8 sps:$4 sm:$0xff]   ;;  %v2681_v58 = vld [vmem:[%s3451_s1 + $0x670] ss:$8 sps:$4 sm:$0xff]  }
  0x9d   :  { %1807 = vmatprep.subr.bf16.mxu0 %v2585_v59  ;;  %v2684_v59 = vld [vmem:[%s3452_s0 + $0x30] ss:$52 sps:$4 sm:$0xff]  }
  0x9f   :  { %1625 = vmatpush1.bf16.msra.mxu1 %v2580_v60  ;;  %v2685_v60 = vld [vmem:[%s3452_s0 + $0x98] ss:$52 sps:$4 sm:$0xff]  }
  0xa0   :  { %1808 = vmatpush1.bf16.msra.mxu0 %v2583_v61  ;;  %1626 = vmatprep.subr.bf16.mxu1 %v2588_v62  ;;  %v2686_v61 = vld [vmem:[%s3452_s0 + $0x100] ss:$0 sps:$4 sm:$0x33]   ;;  %v260_v62 = vlaneseq }
  0xa1   :  { %1809 = vmatprep.subr.bf16.mxu0 %v2591_v63 }
  0xa2   :  { %v261_v63 = vshrl.u32 %v260_v62, 7 }
  0xa3   :  { %1627 = vmatpush1.bf16.msra.mxu1 %v2586_v0 }
  0xa4   :  { %1810 = vmatpush1.bf16.msra.mxu0 %v2589_v1  ;;  %1628 = vmatprep.subr.bf16.mxu1 %v2594_v2 }
  0xa5   :  { %1811 = vmatprep.subr.bf16.mxu0 %v2597_v3  ;;  %v262_v3 = vsub.s32 0, %v261_v63 }
  0xa7   :  { %1629 = vmatpush1.bf16.msra.mxu1 %v2592_v4 }
  0xa8   :  { %1812 = vmatpush1.bf16.msra.mxu0 %v2595_v5  ;;  %1630 = vmatprep.subr.bf16.mxu1 %v2600_v6  ;;  %v258_v5 = vld [vmem:[%s3453_s2] sm:$0x3]  ;;  %v266_v6 = vsub.s32 1, %v261_v63 }
  0xa9   :  { %1813 = vmatprep.subr.bf16.mxu0 %v2603_v7  ;;  %v263_v7 = vrot.slane %v258_v5, %v262_v3 }
  0xab   :  { %1631 = vmatpush1.bf16.msra.mxu1 %v2598_v8  ;;  %v267_v8 = vrot.slane %v258_v5, %v266_v6 }
  0xac   :  { %1814 = vmatpush1.bf16.msra.mxu0 %v2601_v9  ;;  %1632 = vmatprep.subr.bf16.mxu1 %v2606_v10 }
  0xad   :  { %1815 = vmatprep.subr.bf16.mxu0 %v2609_v11 }
  0xaf   :  { %1633 = vmatpush1.bf16.msra.mxu1 %v2604_v12 }
  0xb0   :  { %1816 = vmatpush1.bf16.msra.mxu0 %v2607_v13  ;;  %1634 = vmatprep.subr.bf16.mxu1 %v2617_v14 }
  0xb1   :  { %1817 = vmatprep.subr.bf16.mxu0 %v2621_v15 }
  0xb3   :  { %1635 = vmatpush1.bf16.msra.mxu1 %v2615_v16 }
  0xb4   :  { %1818 = vmatpush1.bf16.msra.mxu0 %v2619_v17  ;;  %1636 = vmatprep.subr.bf16.mxu1 %v2624_v18 }
  0xb5   :  { %1819 = vmatprep.subr.bf16.mxu0 %v2627_v19 }
  0xb7   :  { %1637 = vmatpush1.bf16.msra.mxu1 %v2622_v20 }
  0xb8   :  { %1820 = vmatpush1.bf16.msra.mxu0 %v2625_v21  ;;  %1638 = vmatprep.subr.bf16.mxu1 %v2633_v22 }
  0xb9   :  { %1821 = vmatprep.subr.bf16.mxu0 %v2637_v23 }
  0xbb   :  { %1639 = vmatpush1.bf16.msra.mxu1 %v2631_v24 }
  0xbc   :  { %1822 = vmatpush1.bf16.msra.mxu0 %v2635_v25  ;;  %1640 = vmatprep.subr.bf16.mxu1 %v2640_v26 }
  0xbd   :  { %1823 = vmatprep.subr.bf16.mxu0 %v2643_v27 }
  0xbf   :  { %1641 = vmatpush1.bf16.msra.mxu1 %v2638_v28 }
  0xc0   :  { %1824 = vmatpush1.bf16.msra.mxu0 %v2641_v29  ;;  %2229 = vmatprep.subr.bf16.mxu1 %v2652_v30 }
  0xc1   :  { %1854 = vmatprep.subr.bf16.mxu0 %v2652_v30 }
  0xc2   :  { %1643 = vmatmul.mubr.bf16.vlgmr.msra.gmra.mrb[0].mxu1 %v2644_v31 }
  0xc3   :  { %1826 = vmatmul.mubr.bf16.vlgmr.msra.gmra.mrb[0].mxu0 %v2647_v32  ;;  %2237 = vmatpush1.bf16.msra.mxu1 %v2650_v33 }
  0xc4   :  { %1855 = vmatpush1.bf16.msra.mxu0 %v2650_v33  ;;  %2230 = vmatprep.subr.bf16.mxu1 %v2655_v34 }
  0xc5   :  { %1856 = vmatprep.subr.bf16.mxu0 %v2655_v34  ;;  %1652 = vmatprep.mubr.bf16.mxu1 %v2656_v35 }
  0xc6   :  { %1835 = vmatprep.mubr.bf16.mxu0 %v2658_v36 }
  0xc7   :  { %2238 = vmatpush1.bf16.msra.mxu1 %v2653_v37 }
  0xc8   :  { %1857 = vmatpush1.bf16.msra.mxu0 %v2653_v37  ;;  %2231 = vmatprep.subr.bf16.mxu1 %v2664_v38 }
  0xc9   :  { %1858 = vmatprep.subr.bf16.mxu0 %v2664_v38 }
  0xca   :  { %1653 = vmatmul.mubr.bf16.gmra.mrb[4].mxu1 %v2660_v39 }
  0xcb   :  { %1836 = vmatmul.mubr.bf16.gmra.mrb[4].mxu0 %v2661_v40  ;;  %2239 = vmatpush1.bf16.msra.mxu1 %v2662_v43 }
  0xcc   :  { %1859 = vmatpush1.bf16.msra.mxu0 %v2662_v43  ;;  %2232 = vmatprep.subr.bf16.mxu1 %v2667_v44 }
  0xcd   :  { %1860 = vmatprep.subr.bf16.mxu0 %v2667_v44  ;;  %1662 = vmatprep.mubr.bf16.mxu1 %v2003_v45 }
  0xce   :  { %1845 = vmatprep.mubr.bf16.mxu0 %v2009_v46 }
  0xcf   :  { %2240 = vmatpush1.bf16.msra.mxu1 %v2665_v47 }
  0xd0   :  { %1861 = vmatpush1.bf16.msra.mxu0 %v2665_v47  ;;  %2233 = vmatprep.subr.bf16.mxu1 %v2674_v48 }
  0xd1   :  { %1862 = vmatprep.subr.bf16.mxu0 %v2674_v48 }
  0xd2   :  { %1663 = vmatmul.mubr.bf16.gmra.mrb[8].mxu1 %v2002_v49 }
  0xd3   :  { %1846 = vmatmul.mubr.bf16.gmra.mrb[8].mxu0 %v2008_v50  ;;  %2241 = vmatpush1.bf16.msra.mxu1 %v2672_v51 }
  0xd4   :  { %1863 = vmatpush1.bf16.msra.mxu0 %v2672_v51  ;;  %2234 = vmatprep.subr.bf16.mxu1 %v2677_v52 }
  0xd5   :  { %1864 = vmatprep.subr.bf16.mxu0 %v2677_v52  ;;  %1886 = vmatprep.mubr.bf16.mxu0 %v2687_v55 }
  0xd6   :  { %1896 = vmatprep.mubr.bf16.mxu1 %v2687_v55 }
  0xd7   :  { %2242 = vmatpush1.bf16.msra.mxu1 %v2675_v53 }
  0xd8   :  { %1865 = vmatpush1.bf16.msra.mxu0 %v2675_v53  ;;  %2235 = vmatprep.subr.bf16.mxu1 %v2680_v54 }
  0xd9   :  { %1866 = vmatprep.subr.bf16.mxu0 %v2680_v54 }
  0xdb   :  { %2243 = vmatpush1.bf16.msra.mxu1 %v2678_v56 }
  0xdc   :  { %1867 = vmatpush1.bf16.msra.mxu0 %v2678_v56  ;;  %2236 = vmatprep.subr.bf16.mxu1 %v2683_v57 }
  0xdd   :  { %1868 = vmatprep.subr.bf16.mxu0 %v2683_v57 }
  0xdf   :  { %2244 = vmatpush1.bf16.msra.mxu1 %v2681_v58 }
  0xe0   :  { %1869 = vmatpush1.bf16.msra.mxu0 %v2681_v58 }
  0xe2   :  { %1897 = vmatmul.mubr.bf16.vlgmr.msra.gmra.mrb[12].mxu1 %v2685_v60 }
  0xe3   :  { %1887 = vmatmul.mubr.bf16.vlgmr.msra.gmra.mrb[0].mxu0 %v2684_v59  ;;  %1906 = vmatprep.mubr.bf16.mxu1 %v2687_v55 }
  0xea   :  { %1907 = vmatmul.mubr.bf16.gmra.mrb[16].mxu1 %v2686_v61 }
 0x195   :  { %v1644_v0 = vpop.f32.mrb[0].mxu1 }
 0x196   :  { %v1646_v1 = vpop.f32.mrb[1].mxu1  ;;  %v2245_v37 = vadd.f32 %v1644_v0, %v263_v7 }
 0x197   :  { %v1648_v2 = vpop.f32.mrb[2].mxu1  ;;  %v2247_v38 = vadd.f32 %v1646_v1, %v267_v8 }
 0x198   :  { %v1650_v4 = vpop.f32.mrb[3].mxu1  ;;  %v2249_v41 = vadd.f32 %v1648_v2, %v263_v7 }
 0x199   :  { %v2251_v46 = vadd.f32 %v1650_v4, %v267_v8 }
 0x19d   :  { %v1654_v9 = vpop.f32.mrb[4].mxu1 }
 0x19e   :  { %v1837_v10 = vpop.f32.mrb[4].mxu0  ;;  %v2253_v11 = vadd.f32 %v1654_v9, %v263_v7  ;;  %v1656_v12 = vpop.f32.mrb[5].mxu1 }
 0x19f   :  { %v1839_v13 = vpop.f32.mrb[5].mxu0  ;;  %v2256_v14 = vadd.f32 %v1656_v12, %v267_v8  ;;  %v1658_v15 = vpop.f32.mrb[6].mxu1 }
 0x1a0   :  { %v1841_v16 = vpop.f32.mrb[6].mxu0  ;;  %v2254_v17 = vadd.f32 %v2253_v11, %v1837_v10  ;;  %v2259_v18 = vadd.f32 %v1658_v15, %v263_v7  ;;  %v1660_v19 = vpop.f32.mrb[7].mxu1 }
 0x1a1   :  { %v1843_v20 = vpop.f32.mrb[7].mxu0  ;;  %v2257_v21 = vadd.f32 %v2256_v14, %v1839_v13  ;;  %v2262_v22 = vadd.f32 %v1660_v19, %v267_v8 }
 0x1a2   :  { %v2260_v23 = vadd.f32 %v2259_v18, %v1841_v16 }
 0x1a3   :  { %v2263_v24 = vadd.f32 %v2262_v22, %v1843_v20 }
 0x1a5   :  { %v1664_v25 = vpop.f32.mrb[8].mxu1 }
 0x1a6   :  { %v1847_v26 = vpop.f32.mrb[8].mxu0  ;;  %v2265_v27 = vadd.f32 %v1664_v25, %v263_v7  ;;  %v1666_v28 = vpop.f32.mrb[9].mxu1 }
 0x1a7   :  { %v1849_v29 = vpop.f32.mrb[9].mxu0  ;;  %v2268_v30 = vadd.f32 %v1666_v28, %v267_v8  ;;  %v1668_v31 = vpop.f32.mrb[10].mxu1 }
 0x1a8   :  { %v1851_v32 = vpop.f32.mrb[10].mxu0  ;;  %v2266_v33 = vadd.f32 %v2265_v27, %v1847_v26  ;;  %v1669_v34 = vpop.f32.mrb[11].mxu1 }
 0x1a9   :  { %v1852_v35 = vpop.f32.mrb[11].mxu0  ;;  %v2269_v36 = vadd.f32 %v2268_v30, %v1849_v29 }
 0x1b5   :  { %v1898_v40 = vpop.f32.mrb[12].mxu1 }
 0x1b6   :  { %v1888_v39 = vpop.f32.mrb[0].mxu0  ;;  %v2255_v43 = vadd.f32 %v2254_v17, %v1898_v40  ;;  %v1900_v45 = vpop.f32.mrb[13].mxu1 }
 0x1b7   :  { %v2246_v42 = vadd.f32 %v2245_v37, %v1888_v39  ;;  %v1890_v44 = vpop.f32.mrb[1].mxu0  ;;  %v2258_v48 = vadd.f32 %v2257_v21, %v1900_v45  ;;  %v1902_v50 = vpop.f32.mrb[14].mxu1 }
 0x1b8   :  { %v2248_v47 = vadd.f32 %v2247_v38, %v1890_v44  ;;  %v1892_v49 = vpop.f32.mrb[2].mxu0  ;;  %v1919_v52 = vmax.f32 %v2255_v43, 0.0  ;;  %v2261_v54 = vadd.f32 %v2260_v23, %v1902_v50  ;;  %v1904_v56 = vpop.f32.mrb[15].mxu1 }
 0x1b9   :  { %v1915_v51 = vmax.f32 %v2246_v42, 0.0  ;;  %v2250_v53 = vadd.f32 %v2249_v41, %v1892_v49  ;;  %v1894_v55 = vpop.f32.mrb[3].mxu0  ;;  %v1920_v58 = vmax.f32 %v2258_v48, 0.0  ;;  %v2264_v60 = vadd.f32 %v2263_v24, %v1904_v56 }
 0x1ba   :  { %v1916_v57 = vmax.f32 %v2248_v47, 0.0  ;;  %v2252_v59 = vadd.f32 %v2251_v46, %v1894_v55  ;;  %v1921_v62 = vmax.f32 %v2261_v54, 0.0 }
 0x1bb   :  { %v1917_v61 = vmax.f32 %v2250_v53, 0.0  ;;  %v2226_v0 = vpack.c.bf16 %v1920_v58, %v1919_v52  ;;  %v1922_v2 = vmax.f32 %v2264_v60, 0.0 }
 0x1bc   :  { %v2224_v63 = vpack.c.bf16 %v1916_v57, %v1915_v51  ;;  %v1918_v1 = vmax.f32 %v2252_v59, 0.0 }
 0x1bd   :  { %1962 = vst.msk [vmem:[%s3454_s3 + $0x10] sm:$0xff] %vm1959_vm2, %v2226_v0  ;;  %v2227_v4 = vpack.c.bf16 %v1922_v2, %v1921_v62  ;;  %v1908_v5 = vpop.f32.mrb[16].mxu1 }
 0x1be   :  { %1960 = vst.msk [vmem:[%s3454_s3] sm:$0xff] %vm1959_vm2, %v2224_v63  ;;  %v2225_v3 = vpack.c.bf16 %v1918_v1, %v1917_v61  ;;  %v2267_v6 = vadd.f32 %v2266_v33, %v1908_v5  ;;  %v1910_v7 = vpop.f32.mrb[17].mxu1 }
 0x1bf   :  { %1963 = vst.msk [vmem:[%s3454_s3 + $0x18] sm:$0xff] %vm1959_vm2, %v2227_v4  ;;  %v2270_v8 = vadd.f32 %v2269_v36, %v1910_v7  ;;  %v1912_v9 = vpop.f32.mrb[18].mxu1 }
 0x1c0   :  { %1961 = vst.msk [vmem:[%s3454_s3 + $0x8] sm:$0xff] %vm1959_vm2, %v2225_v3  ;;  %v1923_v10 = vmax.f32 %v2267_v6, 0.0  ;;  %v1913_v11 = vpop.f32.mrb[19].mxu1 }
 0x1c1   :  { %v1924_v12 = vmax.f32 %v2270_v8, 0.0 }
 0x1c3   :  { %v2228_v13 = vpack.c.bf16 %v1924_v12, %v1923_v10 }
 0x1c5   :  { %1967 = vst.msk [vmem:[%s3454_s3 + $0x20] sm:$0x33] %vm1966_vm5, %v2228_v13 }

// kernel: autoencoder_perceptual_forward.14
= control target key start
LH: loop header
LB: loop body
LE: loop exit
PB: predicated region body
PF: predicated region fallthrough
CT: control target
= control target key end

     0   :  { %v501_v36 = vlaneseq  ;;  %v4261_v37 = vmov 1983009808   ;;  %vm4264_vm0 = vmmov 0   ;;  %s5487_s1 = inlined_call_operand.vmem [shape: bf16[1920,384], index: 1, kind: input, shape index: {}]   ;;  %s5488_s0 = inlined_call_operand.vmem [shape: bf16[4,1920], index: 0, kind: input, shape index: {}]   ;;  %s5489_s2 = inlined_call_operand.vmem [shape: f32[1,384], index: 2, kind: input, shape index: {}]   ;;  %s5490_s3 = inlined_call_operand.vmem [shape: bf16[4,384], index: 3, kind: output, shape index: {}]  }
   0x1   :  { %v3777_v0 = vld [vmem:[%s5487_s1 + $0x4] ss:$12 sps:$4 sm:$0xff]   ;;  %v3781_v2 = vld [vmem:[%s5487_s1] ss:$12 sps:$4 sm:$0xff]   ;;  %v3783_v4 = vld [vmem:[%s5487_s1 + $0x1c] ss:$12 sps:$4 sm:$0xff]   ;;  %v522_v38 = vunpack.c.l.s4 %v4261_v37 }
   0x2   :  { %v3779_v1 = vld [vmem:[%s5487_s1 + $0x304] ss:$12 sps:$4 sm:$0xff]   ;;  %2522 = vmatprep.subr.bf16.mxu1 %v3777_v0  ;;  %v3782_v3 = vld [vmem:[%s5487_s1 + $0x300] ss:$12 sps:$4 sm:$0xff]   ;;  %v3785_v5 = vld [vmem:[%s5487_s1 + $0x31c] ss:$12 sps:$4 sm:$0xff]  }
   0x3   :  { %2604 = vmatprep.subr.bf16.mxu0 %v3779_v1  ;;  %2523 = vmatpush1.bf16.msra.mxu1 %v3781_v2  ;;  %v3787_v6 = vld [vmem:[%s5487_s1 + $0x18] ss:$12 sps:$4 sm:$0xff]   ;;  %v3789_v8 = vld [vmem:[%s5487_s1 + $0x34] ss:$12 sps:$4 sm:$0xff]   ;;  %v3793_v10 = vld [vmem:[%s5487_s1 + $0x30] ss:$12 sps:$4 sm:$0xff]   ;;  %v523_v43 = vunpack.c.0.s8 %v522_v38 }
   0x4   :  { %2605 = vmatpush1.bf16.msra.mxu0 %v3782_v3  ;;  %2524 = vmatprep.subr.bf16.mxu1 %v3783_v4  ;;  %v3788_v7 = vld [vmem:[%s5487_s1 + $0x318] ss:$12 sps:$4 sm:$0xff]   ;;  %v3791_v9 = vld [vmem:[%s5487_s1 + $0x334] ss:$12 sps:$4 sm:$0xff]   ;;  %v3794_v11 = vld [vmem:[%s5487_s1 + $0x330] ss:$12 sps:$4 sm:$0xff]  }
   0x5   :  { %2606 = vmatprep.subr.bf16.mxu0 %v3785_v5  ;;  %v3795_v12 = vld [vmem:[%s5487_s1 + $0x4c] ss:$12 sps:$4 sm:$0xff]   ;;  %v3799_v14 = vld [vmem:[%s5487_s1 + $0x48] ss:$12 sps:$4 sm:$0xff]   ;;  %v3801_v16 = vld [vmem:[%s5487_s1 + $0x64] ss:$12 sps:$4 sm:$0xff]  }
   0x6   :  { %v3797_v13 = vld [vmem:[%s5487_s1 + $0x34c] ss:$12 sps:$4 sm:$0xff]   ;;  %v3800_v15 = vld [vmem:[%s5487_s1 + $0x348] ss:$12 sps:$4 sm:$0xff]   ;;  %v3803_v17 = vld [vmem:[%s5487_s1 + $0x364] ss:$12 sps:$4 sm:$0xff]  }
   0x7   :  { %2525 = vmatpush1.bf16.msra.mxu1 %v3787_v6  ;;  %v3805_v18 = vld [vmem:[%s5487_s1 + $0x60] ss:$12 sps:$4 sm:$0xff]   ;;  %v3807_v20 = vld [vmem:[%s5487_s1 + $0x7c] ss:$12 sps:$4 sm:$0xff]   ;;  %v3811_v22 = vld [vmem:[%s5487_s1 + $0x78] ss:$12 sps:$4 sm:$0xff]  }
   0x8   :  { %2607 = vmatpush1.bf16.msra.mxu0 %v3788_v7  ;;  %2526 = vmatprep.subr.bf16.mxu1 %v3789_v8  ;;  %v3806_v19 = vld [vmem:[%s5487_s1 + $0x360] ss:$12 sps:$4 sm:$0xff]   ;;  %v3809_v21 = vld [vmem:[%s5487_s1 + $0x37c] ss:$12 sps:$4 sm:$0xff]   ;;  %v3812_v23 = vld [vmem:[%s5487_s1 + $0x378] ss:$12 sps:$4 sm:$0xff]  }
   0x9   :  { %2608 = vmatprep.subr.bf16.mxu0 %v3791_v9  ;;  %v3813_v24 = vld [vmem:[%s5487_s1 + $0x94] ss:$12 sps:$4 sm:$0xff]   ;;  %v3817_v26 = vld [vmem:[%s5487_s1 + $0x90] ss:$12 sps:$4 sm:$0xff]   ;;  %v3819_v28 = vld [vmem:[%s5487_s1 + $0xac] ss:$12 sps:$4 sm:$0xff]  }
   0xa   :  { %v3815_v25 = vld [vmem:[%s5487_s1 + $0x394] ss:$12 sps:$4 sm:$0xff]   ;;  %v3818_v27 = vld [vmem:[%s5487_s1 + $0x390] ss:$12 sps:$4 sm:$0xff]   ;;  %v3821_v29 = vld [vmem:[%s5487_s1 + $0x3ac] ss:$12 sps:$4 sm:$0xff]  }
   0xb   :  { %2527 = vmatpush1.bf16.msra.mxu1 %v3793_v10  ;;  %v3823_v30 = vld [vmem:[%s5487_s1 + $0xa8] ss:$12 sps:$4 sm:$0xff]   ;;  %v3825_v32 = vld [vmem:[%s5487_s1 + $0xc4] ss:$12 sps:$4 sm:$0xff]   ;;  %v3829_v34 = vld [vmem:[%s5487_s1 + $0xc0] ss:$12 sps:$4 sm:$0xff]  }
   0xc   :  { %2609 = vmatpush1.bf16.msra.mxu0 %v3794_v11  ;;  %2528 = vmatprep.subr.bf16.mxu1 %v3795_v12  ;;  %v3824_v31 = vld [vmem:[%s5487_s1 + $0x3a8] ss:$12 sps:$4 sm:$0xff]   ;;  %v3827_v33 = vld [vmem:[%s5487_s1 + $0x3c4] ss:$12 sps:$4 sm:$0xff]   ;;  %v3830_v35 = vld [vmem:[%s5487_s1 + $0x3c0] ss:$12 sps:$4 sm:$0xff]  }
   0xd   :  { %2610 = vmatprep.subr.bf16.mxu0 %v3797_v13  ;;  %v3831_v39 = vld [vmem:[%s5487_s1 + $0xdc] ss:$12 sps:$4 sm:$0xff]   ;;  %v3835_v41 = vld [vmem:[%s5487_s1 + $0xd8] ss:$12 sps:$4 sm:$0xff]   ;;  %v4402_v42 = vshrl.u32 %v501_v36, 7 }
   0xe   :  { %v3833_v40 = vld [vmem:[%s5487_s1 + $0x3dc] ss:$12 sps:$4 sm:$0xff]   ;;  %v3836_v44 = vld [vmem:[%s5487_s1 + $0x3d8] ss:$12 sps:$4 sm:$0xff]   ;;  %v3837_v45 = vld [vmem:[%s5487_s1 + $0xf4] ss:$12 sps:$4 sm:$0xff]  }
   0xf   :  { %2529 = vmatpush1.bf16.msra.mxu1 %v3799_v14  ;;  %v3839_v46 = vld [vmem:[%s5487_s1 + $0x3f4] ss:$12 sps:$4 sm:$0xff]   ;;  %v3841_v47 = vld [vmem:[%s5487_s1 + $0xf0] ss:$12 sps:$4 sm:$0xff]   ;;  %v4420_v49 = vsub.s32 %v523_v43, %v4402_v42  ;;  %v3843_v50 = vld [vmem:[%s5487_s1 + $0x10c] ss:$12 sps:$4 sm:$0xff]  }
  0x10   :  { %2611 = vmatpush1.bf16.msra.mxu0 %v3800_v15  ;;  %2530 = vmatprep.subr.bf16.mxu1 %v3801_v16  ;;  %v3842_v48 = vld [vmem:[%s5487_s1 + $0x3f0] ss:$12 sps:$4 sm:$0xff]   ;;  %v3845_v51 = vld [vmem:[%s5487_s1 + $0x40c] ss:$12 sps:$4 sm:$0xff]   ;;  %v15_v52 = vld [vmem:[%s5488_s0] sm:$0xff] }
  0x11   :  { %2612 = vmatprep.subr.bf16.mxu0 %v3803_v17  ;;  %v3847_v53 = vld [vmem:[%s5487_s1 + $0x108] ss:$12 sps:$4 sm:$0xff]   ;;  %v4435_v54 = vrot.slane %v15_v52, %v4420_v49  ;;  %v3849_v57 = vld [vmem:[%s5487_s1 + $0x124] ss:$12 sps:$4 sm:$0xff]   ;;  %v3853_v62 = vld [vmem:[%s5487_s1 + $0x120] ss:$12 sps:$4 sm:$0xff]   ;;  %v520_v10 = vcombine.high %v15_v52, %v15_v52 }
  0x12   :  { %v3848_v55 = vld [vmem:[%s5487_s1 + $0x408] ss:$12 sps:$4 sm:$0xff]   ;;  %v3851_v58 = vld [vmem:[%s5487_s1 + $0x424] ss:$12 sps:$4 sm:$0xff]   ;;  %v3854_v63 = vld [vmem:[%s5487_s1 + $0x420] ss:$12 sps:$4 sm:$0xff]  }
  0x13   :  { %2531 = vmatpush1.bf16.msra.mxu1 %v3805_v18  ;;  %v16_v56 = vld [vmem:[%s5488_s0 + $0x8] sm:$0xff]  ;;  %v4451_v59 = vcombine.high %v4435_v54, %v4435_v54  ;;  %v3859_v2 = vld [vmem:[%s5487_s1 + $0x138] ss:$12 sps:$4 sm:$0xff]   ;;  %v3861_v4 = vld [vmem:[%s5487_s1 + $0x154] ss:$12 sps:$4 sm:$0xff]   ;;  %v4511_v16 = vrot.slane %v520_v10, %v4420_v49 }
  0x14   :  { %2613 = vmatpush1.bf16.msra.mxu0 %v3806_v19  ;;  %2532 = vmatprep.subr.bf16.mxu1 %v3807_v20  ;;  %v4454_v60 = vrot.slane %v16_v56, %v4420_v49  ;;  %v3855_v0 = vld [vmem:[%s5487_s1 + $0x13c] ss:$12 sps:$4 sm:$0xff]   ;;  %v3860_v3 = vld [vmem:[%s5487_s1 + $0x438] ss:$12 sps:$4 sm:$0xff]   ;;  %v3863_v5 = vld [vmem:[%s5487_s1 + $0x454] ss:$12 sps:$4 sm:$0xff]   ;;  %v537_v11 = vcombine.high %v16_v56, %v16_v56 }
  0x15   :  { %2614 = vmatprep.subr.bf16.mxu0 %v3809_v21  ;;  %2554 = vmatprep.mubr.bf16.mxu1 %v4451_v59  ;;  %v3857_v1 = vld [vmem:[%s5487_s1 + $0x43c] ss:$12 sps:$4 sm:$0xff]   ;;  %v3867_v8 = vld [vmem:[%s5487_s1 + $0x16c] ss:$12 sps:$4 sm:$0xff]   ;;  %v3876_v14 = vld [vmem:[%s5487_s1 + $0x184] ss:$12 sps:$4 sm:$0xff]  }
  0x16   :  { %v4459_v61 = vcombine.high %v4454_v60, %v4454_v60  ;;  %v3865_v6 = vld [vmem:[%s5487_s1 + $0x150] ss:$12 sps:$4 sm:$0xff]   ;;  %v3869_v9 = vld [vmem:[%s5487_s1 + $0x46c] ss:$12 sps:$4 sm:$0xff]   ;;  %v3871_v12 = vld [vmem:[%s5487_s1 + $0x168] ss:$12 sps:$4 sm:$0xff]   ;;  %v4514_v17 = vrot.slane %v537_v11, %v4420_v49 }
  0x17   :  { %2533 = vmatpush1.bf16.msra.mxu1 %v3811_v22  ;;  %v3866_v7 = vld [vmem:[%s5487_s1 + $0x450] ss:$12 sps:$4 sm:$0xff]   ;;  %v3872_v13 = vld [vmem:[%s5487_s1 + $0x468] ss:$12 sps:$4 sm:$0xff]   ;;  %v3874_v18 = vld [vmem:[%s5487_s1 + $0x180] ss:$12 sps:$4 sm:$0xff]   ;;  %v4530_v22 = vcombine.high %v4511_v16, %v4511_v16 }
  0x18   :  { %2615 = vmatpush1.bf16.msra.mxu0 %v3812_v23  ;;  %2534 = vmatprep.subr.bf16.mxu1 %v3813_v24  ;;  %v3880_v15 = vld [vmem:[%s5487_s1 + $0x484] ss:$12 sps:$4 sm:$0xff]   ;;  %v3878_v19 = vld [vmem:[%s5487_s1 + $0x480] ss:$12 sps:$4 sm:$0xff]   ;;  %v3883_v20 = vld [vmem:[%s5487_s1 + $0x19c] ss:$12 sps:$4 sm:$0xff]   ;;  %v4534_v23 = vcombine.high %v4514_v17, %v4514_v17 }
  0x19   :  { %2616 = vmatprep.subr.bf16.mxu0 %v3815_v25  ;;  %2636 = vmatprep.mubr.bf16.mxu0 %v4459_v61  ;;  %v3886_v21 = vld [vmem:[%s5487_s1 + $0x49c] ss:$12 sps:$4 sm:$0xff]   ;;  %v3881_v24 = vld [vmem:[%s5487_s1 + $0x198] ss:$12 sps:$4 sm:$0xff]   ;;  %v3899_v36 = vld [vmem:[%s5487_s1 + $0x1e0] ss:$12 sps:$4 sm:$0xff]  }
  0x1a   :  { %v3884_v25 = vld [vmem:[%s5487_s1 + $0x498] ss:$12 sps:$4 sm:$0xff]   ;;  %v3902_v37 = vld [vmem:[%s5487_s1 + $0x4e0] ss:$12 sps:$4 sm:$0xff]   ;;  %v3907_v38 = vld [vmem:[%s5487_s1 + $0x1fc] ss:$12 sps:$4 sm:$0xff]  }
  0x1b   :  { %2535 = vmatpush1.bf16.msra.mxu1 %v3817_v26  ;;  %v3889_v26 = vld [vmem:[%s5487_s1 + $0x1b4] ss:$12 sps:$4 sm:$0xff]   ;;  %v3925_v52 = vld [vmem:[%s5487_s1 + $0x244] ss:$12 sps:$4 sm:$0xff]  }
  0x1c   :  { %2617 = vmatpush1.bf16.msra.mxu0 %v3818_v27  ;;  %2536 = vmatprep.subr.bf16.mxu1 %v3819_v28  ;;  %v3892_v27 = vld [vmem:[%s5487_s1 + $0x4b4] ss:$12 sps:$4 sm:$0xff]   ;;  %v3887_v28 = vld [vmem:[%s5487_s1 + $0x1b0] ss:$12 sps:$4 sm:$0xff]  }
  0x1d   :  { %2618 = vmatprep.subr.bf16.mxu0 %v3821_v29  ;;  %v3890_v29 = vld [vmem:[%s5487_s1 + $0x4b0] ss:$12 sps:$4 sm:$0xff]   ;;  %v3913_v43 = vld [vmem:[%s5487_s1 + $0x214] ss:$12 sps:$4 sm:$0xff]  }
  0x1e   :  { %v3926_v56 = vld [vmem:[%s5487_s1 + $0x540] ss:$12 sps:$4 sm:$0xff]  }
  0x1f   :  { %2537 = vmatpush1.bf16.msra.mxu1 %v3823_v30  ;;  %v3895_v30 = vld [vmem:[%s5487_s1 + $0x1cc] ss:$12 sps:$4 sm:$0xff]  }
  0x20   :  { %2619 = vmatpush1.bf16.msra.mxu0 %v3824_v31  ;;  %2538 = vmatprep.subr.bf16.mxu1 %v3825_v32  ;;  %v3898_v31 = vld [vmem:[%s5487_s1 + $0x4cc] ss:$12 sps:$4 sm:$0xff]   ;;  %v3893_v32 = vld [vmem:[%s5487_s1 + $0x1c8] ss:$12 sps:$4 sm:$0xff]  }
  0x21   :  { %2620 = vmatprep.subr.bf16.mxu0 %v3827_v33  ;;  %v3896_v33 = vld [vmem:[%s5487_s1 + $0x4c8] ss:$12 sps:$4 sm:$0xff]   ;;  %v3947_v10 = vld [vmem:[%s5487_s1 + $0x2a0] ss:$12 sps:$4 sm:$0xff]  }
  0x22   :  { %v3950_v11 = vld [vmem:[%s5487_s1 + $0x5a0] ss:$12 sps:$4 sm:$0xff]  }
  0x23   :  { %2539 = vmatpush1.bf16.msra.mxu1 %v3829_v34  ;;  %v3901_v34 = vld [vmem:[%s5487_s1 + $0x1e4] ss:$12 sps:$4 sm:$0xff]  }
  0x24   :  { %2621 = vmatpush1.bf16.msra.mxu0 %v3830_v35  ;;  %2540 = vmatprep.subr.bf16.mxu1 %v3831_v39  ;;  %v3904_v35 = vld [vmem:[%s5487_s1 + $0x4e4] ss:$12 sps:$4 sm:$0xff]   ;;  %v3910_v39 = vld [vmem:[%s5487_s1 + $0x4fc] ss:$12 sps:$4 sm:$0xff]  }
  0x25   :  { %2622 = vmatprep.subr.bf16.mxu0 %v3833_v40  ;;  %v3905_v40 = vld [vmem:[%s5487_s1 + $0x1f8] ss:$12 sps:$4 sm:$0xff]  }
  0x27   :  { %2541 = vmatpush1.bf16.msra.mxu1 %v3835_v41  ;;  %v3908_v41 = vld [vmem:[%s5487_s1 + $0x4f8] ss:$12 sps:$4 sm:$0xff]  }
  0x28   :  { %2623 = vmatpush1.bf16.msra.mxu0 %v3836_v44  ;;  %2542 = vmatprep.subr.bf16.mxu1 %v3837_v45  ;;  %v3916_v44 = vld [vmem:[%s5487_s1 + $0x514] ss:$12 sps:$4 sm:$0xff]   ;;  %v3911_v45 = vld [vmem:[%s5487_s1 + $0x210] ss:$12 sps:$4 sm:$0xff]  }
  0x29   :  { %2624 = vmatprep.subr.bf16.mxu0 %v3839_v46  ;;  %v3914_v46 = vld [vmem:[%s5487_s1 + $0x510] ss:$12 sps:$4 sm:$0xff]  }
  0x2b   :  { %2543 = vmatpush1.bf16.msra.mxu1 %v3841_v47  ;;  %v3919_v47 = vld [vmem:[%s5487_s1 + $0x22c] ss:$12 sps:$4 sm:$0xff]  }
  0x2c   :  { %2625 = vmatpush1.bf16.msra.mxu0 %v3842_v48  ;;  %2544 = vmatprep.subr.bf16.mxu1 %v3843_v50  ;;  %v3922_v48 = vld [vmem:[%s5487_s1 + $0x52c] ss:$12 sps:$4 sm:$0xff]   ;;  %v3917_v50 = vld [vmem:[%s5487_s1 + $0x228] ss:$12 sps:$4 sm:$0xff]  }
  0x2d   :  { %2626 = vmatprep.subr.bf16.mxu0 %v3845_v51  ;;  %v3920_v51 = vld [vmem:[%s5487_s1 + $0x528] ss:$12 sps:$4 sm:$0xff]  }
  0x2f   :  { %2545 = vmatpush1.bf16.msra.mxu1 %v3847_v53  ;;  %v3928_v53 = vld [vmem:[%s5487_s1 + $0x544] ss:$12 sps:$4 sm:$0xff]  }
  0x30   :  { %2627 = vmatpush1.bf16.msra.mxu0 %v3848_v55  ;;  %2546 = vmatprep.subr.bf16.mxu1 %v3849_v57  ;;  %v3923_v55 = vld [vmem:[%s5487_s1 + $0x240] ss:$12 sps:$4 sm:$0xff]   ;;  %v3931_v57 = vld [vmem:[%s5487_s1 + $0x25c] ss:$12 sps:$4 sm:$0xff]  }
  0x31   :  { %2628 = vmatprep.subr.bf16.mxu0 %v3851_v58  ;;  %v3934_v58 = vld [vmem:[%s5487_s1 + $0x55c] ss:$12 sps:$4 sm:$0xff]  }
  0x33   :  { %2547 = vmatpush1.bf16.msra.mxu1 %v3853_v62  ;;  %v3929_v62 = vld [vmem:[%s5487_s1 + $0x258] ss:$12 sps:$4 sm:$0xff]  }
  0x34   :  { %2629 = vmatpush1.bf16.msra.mxu0 %v3854_v63  ;;  %2548 = vmatprep.subr.bf16.mxu1 %v3855_v0  ;;  %v3932_v63 = vld [vmem:[%s5487_s1 + $0x558] ss:$12 sps:$4 sm:$0xff]   ;;  %v3937_v0 = vld [vmem:[%s5487_s1 + $0x274] ss:$12 sps:$4 sm:$0xff]  }
  0x35   :  { %2630 = vmatprep.subr.bf16.mxu0 %v3857_v1  ;;  %v3940_v1 = vld [vmem:[%s5487_s1 + $0x574] ss:$12 sps:$4 sm:$0xff]  }
  0x37   :  { %2549 = vmatpush1.bf16.msra.mxu1 %v3859_v2  ;;  %v3935_v2 = vld [vmem:[%s5487_s1 + $0x270] ss:$12 sps:$4 sm:$0xff]  }
  0x38   :  { %2631 = vmatpush1.bf16.msra.mxu0 %v3860_v3  ;;  %2550 = vmatprep.subr.bf16.mxu1 %v3861_v4  ;;  %v3938_v3 = vld [vmem:[%s5487_s1 + $0x570] ss:$12 sps:$4 sm:$0xff]   ;;  %v3943_v4 = vld [vmem:[%s5487_s1 + $0x28c] ss:$12 sps:$4 sm:$0xff]  }
  0x39   :  { %2632 = vmatprep.subr.bf16.mxu0 %v3863_v5  ;;  %v3946_v5 = vld [vmem:[%s5487_s1 + $0x58c] ss:$12 sps:$4 sm:$0xff]  }
  0x3b   :  { %2551 = vmatpush1.bf16.msra.mxu1 %v3865_v6  ;;  %v3941_v6 = vld [vmem:[%s5487_s1 + $0x288] ss:$12 sps:$4 sm:$0xff]  }
  0x3c   :  { %2633 = vmatpush1.bf16.msra.mxu0 %v3866_v7  ;;  %2552 = vmatprep.subr.bf16.mxu1 %v3867_v8  ;;  %v3944_v7 = vld [vmem:[%s5487_s1 + $0x588] ss:$12 sps:$4 sm:$0xff]   ;;  %v3949_v8 = vld [vmem:[%s5487_s1 + $0x2a4] ss:$12 sps:$4 sm:$0xff]  }
  0x3d   :  { %2634 = vmatprep.subr.bf16.mxu0 %v3869_v9  ;;  %v3952_v9 = vld [vmem:[%s5487_s1 + $0x5a4] ss:$12 sps:$4 sm:$0xff]  }
  0x3f   :  { %2553 = vmatpush1.bf16.msra.mxu1 %v3871_v12  ;;  %v3955_v12 = vld [vmem:[%s5487_s1 + $0x2bc] ss:$12 sps:$4 sm:$0xff]  }
  0x40   :  { %2635 = vmatpush1.bf16.msra.mxu0 %v3872_v13  ;;  %2563 = vmatprep.subr.bf16.mxu1 %v3876_v14  ;;  %v3958_v13 = vld [vmem:[%s5487_s1 + $0x5bc] ss:$12 sps:$4 sm:$0xff]   ;;  %v3953_v14 = vld [vmem:[%s5487_s1 + $0x2b8] ss:$12 sps:$4 sm:$0xff]  }
  0x41   :  { %2645 = vmatprep.subr.bf16.mxu0 %v3880_v15  ;;  %v3956_v15 = vld [vmem:[%s5487_s1 + $0x5b8] ss:$12 sps:$4 sm:$0xff]  }
  0x42   :  { %2555 = vmatmul.mubr.bf16.vlgmr.msra.gmra.mrb[0].mxu1 %v4435_v54 }
  0x43   :  { %2637 = vmatmul.mubr.bf16.vlgmr.msra.gmra.mrb[0].mxu0 %v4454_v60  ;;  %2564 = vmatpush1.bf16.msra.mxu1 %v3874_v18  ;;  %v3961_v18 = vld [vmem:[%s5487_s1 + $0x2d4] ss:$12 sps:$4 sm:$0xff]  }
  0x44   :  { %2646 = vmatpush1.bf16.msra.mxu0 %v3878_v19  ;;  %2565 = vmatprep.subr.bf16.mxu1 %v3883_v20  ;;  %v3964_v19 = vld [vmem:[%s5487_s1 + $0x5d4] ss:$12 sps:$4 sm:$0xff]   ;;  %v3959_v20 = vld [vmem:[%s5487_s1 + $0x2d0] ss:$12 sps:$4 sm:$0xff]  }
  0x45   :  { %2647 = vmatprep.subr.bf16.mxu0 %v3886_v21  ;;  %2595 = vmatprep.mubr.bf16.mxu1 %v4530_v22  ;;  %v3962_v21 = vld [vmem:[%s5487_s1 + $0x5d0] ss:$12 sps:$4 sm:$0xff]  }
  0x46   :  { %2677 = vmatprep.mubr.bf16.mxu0 %v4534_v23 }
  0x47   :  { %2566 = vmatpush1.bf16.msra.mxu1 %v3881_v24  ;;  %v3967_v24 = vld [vmem:[%s5487_s1 + $0x2ec] ss:$12 sps:$4 sm:$0xff]  }
  0x48   :  { %2648 = vmatpush1.bf16.msra.mxu0 %v3884_v25  ;;  %2567 = vmatprep.subr.bf16.mxu1 %v3889_v26  ;;  %v3970_v25 = vld [vmem:[%s5487_s1 + $0x5ec] ss:$12 sps:$4 sm:$0xff]   ;;  %v3965_v26 = vld [vmem:[%s5487_s1 + $0x2e8] ss:$12 sps:$4 sm:$0xff]  }
  0x49   :  { %2649 = vmatprep.subr.bf16.mxu0 %v3892_v27  ;;  %v3968_v27 = vld [vmem:[%s5487_s1 + $0x5e8] ss:$12 sps:$4 sm:$0xff]  }
  0x4b   :  { %2568 = vmatpush1.bf16.msra.mxu1 %v3887_v28  ;;  %v3973_v28 = vld [vmem:[%s5487_s1 + $0x604] ss:$12 sps:$4 sm:$0xff]  }
  0x4c   :  { %2650 = vmatpush1.bf16.msra.mxu0 %v3890_v29  ;;  %2569 = vmatprep.subr.bf16.mxu1 %v3895_v30  ;;  %v3974_v29 = vld [vmem:[%s5487_s1 + $0xc8] ss:$12 sps:$4 sm:$0xff]   ;;  %v3971_v30 = vld [vmem:[%s5487_s1 + $0x600] ss:$12 sps:$4 sm:$0xff]  }
  0x4d   :  { %2651 = vmatprep.subr.bf16.mxu0 %v3898_v31  ;;  %v3975_v31 = vld [vmem:[%s5487_s1 + $0x8] ss:$12 sps:$4 sm:$0xff]  }
  0x4f   :  { %2570 = vmatpush1.bf16.msra.mxu1 %v3893_v32  ;;  %v3978_v32 = vld [vmem:[%s5487_s1 + $0x61c] ss:$12 sps:$4 sm:$0xff]  }
  0x50   :  { %2652 = vmatpush1.bf16.msra.mxu0 %v3896_v33  ;;  %2571 = vmatprep.subr.bf16.mxu1 %v3901_v34  ;;  %v3979_v33 = vld [vmem:[%s5487_s1 + $0xe0] ss:$12 sps:$4 sm:$0xff]   ;;  %v3976_v34 = vld [vmem:[%s5487_s1 + $0x618] ss:$12 sps:$4 sm:$0xff]  }
  0x51   :  { %2653 = vmatprep.subr.bf16.mxu0 %v3904_v35  ;;  %v3980_v35 = vld [vmem:[%s5487_s1 + $0x20] ss:$12 sps:$4 sm:$0xff]  }
  0x53   :  { %2572 = vmatpush1.bf16.msra.mxu1 %v3899_v36  ;;  %v3983_v36 = vld [vmem:[%s5487_s1 + $0x634] ss:$12 sps:$4 sm:$0xff]  }
  0x54   :  { %2654 = vmatpush1.bf16.msra.mxu0 %v3902_v37  ;;  %2573 = vmatprep.subr.bf16.mxu1 %v3907_v38  ;;  %v3984_v37 = vld [vmem:[%s5487_s1 + $0xf8] ss:$12 sps:$4 sm:$0xff]   ;;  %v3981_v38 = vld [vmem:[%s5487_s1 + $0x630] ss:$12 sps:$4 sm:$0xff]  }
  0x55   :  { %2655 = vmatprep.subr.bf16.mxu0 %v3910_v39  ;;  %v3985_v39 = vld [vmem:[%s5487_s1 + $0x38] ss:$12 sps:$4 sm:$0xff]  }
  0x57   :  { %2574 = vmatpush1.bf16.msra.mxu1 %v3905_v40  ;;  %v3988_v40 = vld [vmem:[%s5487_s1 + $0x64c] ss:$12 sps:$4 sm:$0xff]  }
  0x58   :  { %2656 = vmatpush1.bf16.msra.mxu0 %v3908_v41  ;;  %2575 = vmatprep.subr.bf16.mxu1 %v3913_v43  ;;  %v3989_v41 = vld [vmem:[%s5487_s1 + $0x110] ss:$12 sps:$4 sm:$0xff]  }
  0x59   :  { %2657 = vmatprep.subr.bf16.mxu0 %v3916_v44  ;;  %v4765_v43 = vld [vmem:[%s5488_s0 + $0x10] sm:$0xff] }
  0x5a   :  { %v3990_v44 = vld [vmem:[%s5487_s1 + $0x50] ss:$12 sps:$4 sm:$0xff]  }
  0x5b   :  { %2576 = vmatpush1.bf16.msra.mxu1 %v3911_v45  ;;  %v3993_v45 = vld [vmem:[%s5487_s1 + $0x664] ss:$12 sps:$4 sm:$0xff]  }
  0x5c   :  { %2658 = vmatpush1.bf16.msra.mxu0 %v3914_v46  ;;  %2577 = vmatprep.subr.bf16.mxu1 %v3919_v47  ;;  %v4775_v46 = vrot.slane %v4765_v43, %v4420_v49  ;;  %v3994_v47 = vld [vmem:[%s5487_s1 + $0x128] ss:$12 sps:$4 sm:$0xff]  }
  0x5d   :  { %2659 = vmatprep.subr.bf16.mxu0 %v3922_v48  ;;  %v3991_v48 = vld [vmem:[%s5487_s1 + $0x660] ss:$12 sps:$4 sm:$0xff]  }
  0x5f   :  { %2578 = vmatpush1.bf16.msra.mxu1 %v3917_v50  ;;  %v4785_v50 = vcombine.high %v4775_v46, %v4775_v46 }
  0x60   :  { %2660 = vmatpush1.bf16.msra.mxu0 %v3920_v51  ;;  %2579 = vmatprep.subr.bf16.mxu1 %v3925_v52  ;;  %v3995_v51 = vld [vmem:[%s5487_s1 + $0x68] ss:$12 sps:$4 sm:$0xff]  }
  0x61   :  { %2661 = vmatprep.subr.bf16.mxu0 %v3928_v53  ;;  %v3998_v52 = vld [vmem:[%s5487_s1 + $0x67c] ss:$12 sps:$4 sm:$0xff]   ;;  %v3999_v53 = vld [vmem:[%s5487_s1 + $0x140] ss:$12 sps:$4 sm:$0xff]  }
  0x63   :  { %2580 = vmatpush1.bf16.msra.mxu1 %v3923_v55  ;;  %v3996_v55 = vld [vmem:[%s5487_s1 + $0x678] ss:$12 sps:$4 sm:$0xff]  }
  0x64   :  { %2662 = vmatpush1.bf16.msra.mxu0 %v3926_v56  ;;  %2581 = vmatprep.subr.bf16.mxu1 %v3931_v57  ;;  %v4000_v56 = vld [vmem:[%s5487_s1 + $0x80] ss:$12 sps:$4 sm:$0xff]  }
  0x65   :  { %2663 = vmatprep.subr.bf16.mxu0 %v3934_v58  ;;  %v4003_v57 = vld [vmem:[%s5487_s1 + $0x694] ss:$12 sps:$4 sm:$0xff]   ;;  %v4004_v58 = vld [vmem:[%s5487_s1 + $0x158] ss:$12 sps:$4 sm:$0xff]  }
  0x67   :  { %2582 = vmatpush1.bf16.msra.mxu1 %v3929_v62  ;;  %v4001_v62 = vld [vmem:[%s5487_s1 + $0x690] ss:$12 sps:$4 sm:$0xff]  }
  0x68   :  { %2664 = vmatpush1.bf16.msra.mxu0 %v3932_v63  ;;  %2583 = vmatprep.subr.bf16.mxu1 %v3937_v0  ;;  %v4005_v63 = vld [vmem:[%s5487_s1 + $0x98] ss:$12 sps:$4 sm:$0xff]  }
  0x69   :  { %2665 = vmatprep.subr.bf16.mxu0 %v3940_v1  ;;  %v4008_v0 = vld [vmem:[%s5487_s1 + $0x6ac] ss:$12 sps:$4 sm:$0xff]   ;;  %v4009_v1 = vld [vmem:[%s5487_s1 + $0x170] ss:$12 sps:$4 sm:$0xff]  }
  0x6b   :  { %2584 = vmatpush1.bf16.msra.mxu1 %v3935_v2  ;;  %v4006_v2 = vld [vmem:[%s5487_s1 + $0x6a8] ss:$12 sps:$4 sm:$0xff]  }
  0x6c   :  { %2666 = vmatpush1.bf16.msra.mxu0 %v3938_v3  ;;  %2585 = vmatprep.subr.bf16.mxu1 %v3943_v4  ;;  %v4010_v3 = vld [vmem:[%s5487_s1 + $0xb0] ss:$12 sps:$4 sm:$0xff]  }
  0x6d   :  { %2667 = vmatprep.subr.bf16.mxu0 %v3946_v5  ;;  %v4013_v4 = vld [vmem:[%s5487_s1 + $0x6c4] ss:$12 sps:$4 sm:$0xff]   ;;  %v4014_v5 = vld [vmem:[%s5487_s1 + $0x248] ss:$12 sps:$4 sm:$0xff]  }
  0x6f   :  { %2586 = vmatpush1.bf16.msra.mxu1 %v3941_v6  ;;  %v4011_v6 = vld [vmem:[%s5487_s1 + $0x6c0] ss:$12 sps:$4 sm:$0xff]  }
  0x70   :  { %2668 = vmatpush1.bf16.msra.mxu0 %v3944_v7  ;;  %2587 = vmatprep.subr.bf16.mxu1 %v3949_v8  ;;  %v4015_v7 = vld [vmem:[%s5487_s1 + $0x188] ss:$12 sps:$4 sm:$0xff]  }
  0x71   :  { %2669 = vmatprep.subr.bf16.mxu0 %v3952_v9  ;;  %v4018_v8 = vld [vmem:[%s5487_s1 + $0x6dc] ss:$12 sps:$4 sm:$0xff]   ;;  %v4019_v9 = vld [vmem:[%s5487_s1 + $0x260] ss:$12 sps:$4 sm:$0xff]  }
  0x73   :  { %2588 = vmatpush1.bf16.msra.mxu1 %v3947_v10  ;;  %v4016_v10 = vld [vmem:[%s5487_s1 + $0x6d8] ss:$12 sps:$4 sm:$0xff]  }
  0x74   :  { %2670 = vmatpush1.bf16.msra.mxu0 %v3950_v11  ;;  %2589 = vmatprep.subr.bf16.mxu1 %v3955_v12  ;;  %v4020_v11 = vld [vmem:[%s5487_s1 + $0x1a0] ss:$12 sps:$4 sm:$0xff]  }
  0x75   :  { %2671 = vmatprep.subr.bf16.mxu0 %v3958_v13  ;;  %v4023_v12 = vld [vmem:[%s5487_s1 + $0x6f4] ss:$12 sps:$4 sm:$0xff]   ;;  %v4024_v13 = vld [vmem:[%s5487_s1 + $0x278] ss:$12 sps:$4 sm:$0xff]  }
  0x77   :  { %2590 = vmatpush1.bf16.msra.mxu1 %v3953_v14  ;;  %v4025_v14 = vld [vmem:[%s5487_s1 + $0x1b8] ss:$12 sps:$4 sm:$0xff]  }
  0x78   :  { %2672 = vmatpush1.bf16.msra.mxu0 %v3956_v15  ;;  %2591 = vmatprep.subr.bf16.mxu1 %v3961_v18  ;;  %v4028_v15 = vld [vmem:[%s5487_s1 + $0x70c] ss:$12 sps:$4 sm:$0xff]   ;;  %v4026_v18 = vld [vmem:[%s5487_s1 + $0x708] ss:$12 sps:$4 sm:$0xff]  }
  0x79   :  { %2673 = vmatprep.subr.bf16.mxu0 %v3964_v19  ;;  %v4030_v19 = vld [vmem:[%s5487_s1 + $0x1d0] ss:$12 sps:$4 sm:$0xff]  }
  0x7b   :  { %2592 = vmatpush1.bf16.msra.mxu1 %v3959_v20  ;;  %v4033_v20 = vld [vmem:[%s5487_s1 + $0x724] ss:$12 sps:$4 sm:$0xff]  }
  0x7c   :  { %2674 = vmatpush1.bf16.msra.mxu0 %v3962_v21  ;;  %2593 = vmatprep.subr.bf16.mxu1 %v3967_v24  ;;  %v4034_v21 = vld [vmem:[%s5487_s1 + $0x2a8] ss:$12 sps:$4 sm:$0xff]   ;;  %v4031_v24 = vld [vmem:[%s5487_s1 + $0x720] ss:$12 sps:$4 sm:$0xff]  }
  0x7d   :  { %2675 = vmatprep.subr.bf16.mxu0 %v3970_v25  ;;  %v4035_v25 = vld [vmem:[%s5487_s1 + $0x1e8] ss:$12 sps:$4 sm:$0xff]  }
  0x7f   :  { %2594 = vmatpush1.bf16.msra.mxu1 %v3965_v26  ;;  %v4038_v26 = vld [vmem:[%s5487_s1 + $0x73c] ss:$12 sps:$4 sm:$0xff]  }
  0x80   :  { %2676 = vmatpush1.bf16.msra.mxu0 %v3968_v27  ;;  %3562 = vmatprep.subr.bf16.mxu1 %v3974_v29  ;;  %v4039_v27 = vld [vmem:[%s5487_s1 + $0x2c0] ss:$12 sps:$4 sm:$0xff]  }
  0x81   :  { %2686 = vmatprep.subr.bf16.mxu0 %v3973_v28  ;;  %v4036_v28 = vld [vmem:[%s5487_s1 + $0x738] ss:$12 sps:$4 sm:$0xff]   ;;  %v4040_v29 = vld [vmem:[%s5487_s1 + $0x200] ss:$12 sps:$4 sm:$0xff]  }
  0x82   :  { %2596 = vmatmul.mubr.bf16.vlgmr.msra.gmra.mrb[0].mxu1 %v4511_v16 }
  0x83   :  { %2678 = vmatmul.mubr.bf16.vlgmr.msra.gmra.mrb[0].mxu0 %v4514_v17  ;;  %3563 = vmatpush3.bf16.msra.mxu1 %v3975_v31  ;;  %v4044_v31 = vld [vmem:[%s5487_s1 + $0x2d8] ss:$12 sps:$4 sm:$0xff]  }
  0x84   :  { %2687 = vmatpush1.bf16.msra.mxu0 %v3971_v30  ;;  %3564 = vmatprep.subr.bf16.mxu1 %v3979_v33  ;;  %v4043_v30 = vld [vmem:[%s5487_s1 + $0x754] ss:$12 sps:$4 sm:$0xff]   ;;  %v4045_v33 = vld [vmem:[%s5487_s1 + $0x218] ss:$12 sps:$4 sm:$0xff]  }
  0x85   :  { %2688 = vmatprep.subr.bf16.mxu0 %v3978_v32  ;;  %2882 = vmatprep.mubr.bf16.mxu1 %v4451_v59  ;;  %v3986_v59 = vld [vmem:[%s5487_s1 + $0x648] ss:$12 sps:$4 sm:$0xff]   ;;  %v4041_v32 = vld [vmem:[%s5487_s1 + $0x750] ss:$12 sps:$4 sm:$0xff]  }
  0x86   :  { %2718 = vmatprep.mubr.bf16.mxu0 %v4785_v50 }
  0x87   :  { %3565 = vmatpush3.bf16.msra.mxu1 %v3980_v35  ;;  %v4049_v35 = vld [vmem:[%s5487_s1 + $0x2f0] ss:$12 sps:$4 sm:$0xff]  }
  0x88   :  { %2689 = vmatpush1.bf16.msra.mxu0 %v3976_v34  ;;  %3566 = vmatprep.subr.bf16.mxu1 %v3984_v37  ;;  %v4048_v34 = vld [vmem:[%s5487_s1 + $0x76c] ss:$12 sps:$4 sm:$0xff]   ;;  %v4046_v37 = vld [vmem:[%s5487_s1 + $0x768] ss:$12 sps:$4 sm:$0xff]  }
  0x89   :  { %2690 = vmatprep.subr.bf16.mxu0 %v3983_v36  ;;  %v554_v36 = vcombine.high %v4765_v43, %v4765_v43  ;;  %v4055_v43 = vld [vmem:[%s5487_s1 + $0x308] ss:$12 sps:$4 sm:$0xff]  }
  0x8b   :  { %3567 = vmatpush3.bf16.msra.mxu1 %v3985_v39  ;;  %v4053_v39 = vld [vmem:[%s5487_s1 + $0x784] ss:$12 sps:$4 sm:$0xff]  }
  0x8c   :  { %2691 = vmatpush1.bf16.msra.mxu0 %v3981_v38  ;;  %3568 = vmatprep.subr.bf16.mxu1 %v3989_v41  ;;  %v4050_v38 = vld [vmem:[%s5487_s1 + $0x230] ss:$12 sps:$4 sm:$0xff]   ;;  %v4051_v41 = vld [vmem:[%s5487_s1 + $0x780] ss:$12 sps:$4 sm:$0xff]  }
  0x8d   :  { %2692 = vmatprep.subr.bf16.mxu0 %v3988_v40  ;;  %v4054_v40 = vld [vmem:[%s5487_s1 + $0x3c8] ss:$12 sps:$4 sm:$0xff]  }
  0x8f   :  { %3569 = vmatpush3.bf16.msra.mxu1 %v3990_v44  ;;  %v4058_v44 = vld [vmem:[%s5487_s1 + $0x79c] ss:$12 sps:$4 sm:$0xff]  }
  0x90   :  { %2693 = vmatpush1.bf16.msra.mxu0 %v3986_v59  ;;  %3570 = vmatprep.subr.bf16.mxu1 %v3994_v47  ;;  %v4937_v59 = vrot.slane %v554_v36, %v4420_v49  ;;  %v4116_v36 = vld [vmem:[%s5487_s1 + $0x8b8] ss:$12 sps:$4 sm:$0xff]  }
  0x91   :  { %2694 = vmatprep.subr.bf16.mxu0 %v3993_v45  ;;  %v4059_v45 = vld [vmem:[%s5487_s1 + $0x3e0] ss:$12 sps:$4 sm:$0xff]  }
  0x92   :  { %v4950_v47 = vcombine.high %v4937_v59, %v4937_v59 }
  0x93   :  { %3571 = vmatpush3.bf16.msra.mxu1 %v3995_v51  ;;  %v4060_v51 = vld [vmem:[%s5487_s1 + $0x320] ss:$12 sps:$4 sm:$0xff]  }
  0x94   :  { %2695 = vmatpush1.bf16.msra.mxu0 %v3991_v48  ;;  %3572 = vmatprep.subr.bf16.mxu1 %v3999_v53  ;;  %v4056_v48 = vld [vmem:[%s5487_s1 + $0x798] ss:$12 sps:$4 sm:$0xff]   ;;  %v4061_v53 = vld [vmem:[%s5487_s1 + $0x7b0] ss:$12 sps:$4 sm:$0xff]  }
  0x95   :  { %2696 = vmatprep.subr.bf16.mxu0 %v3998_v52  ;;  %v4063_v52 = vld [vmem:[%s5487_s1 + $0x7b4] ss:$12 sps:$4 sm:$0xff]  }
  0x97   :  { %3573 = vmatpush3.bf16.msra.mxu1 %v4000_v56  ;;  %v4068_v56 = vld [vmem:[%s5487_s1 + $0x7cc] ss:$12 sps:$4 sm:$0xff]  }
  0x98   :  { %2697 = vmatpush1.bf16.msra.mxu0 %v3996_v55  ;;  %3574 = vmatprep.subr.bf16.mxu1 %v4004_v58  ;;  %v4065_v55 = vld [vmem:[%s5487_s1 + $0x338] ss:$12 sps:$4 sm:$0xff]   ;;  %v4070_v58 = vld [vmem:[%s5487_s1 + $0x350] ss:$12 sps:$4 sm:$0xff]  }
  0x99   :  { %2698 = vmatprep.subr.bf16.mxu0 %v4003_v57  ;;  %v4066_v57 = vld [vmem:[%s5487_s1 + $0x7c8] ss:$12 sps:$4 sm:$0xff]  }
  0x9b   :  { %3575 = vmatpush3.bf16.msra.mxu1 %v4005_v63  ;;  %v4074_v63 = vld [vmem:[%s5487_s1 + $0x428] ss:$12 sps:$4 sm:$0xff]  }
  0x9c   :  { %2699 = vmatpush1.bf16.msra.mxu0 %v4001_v62  ;;  %3576 = vmatprep.subr.bf16.mxu1 %v4009_v1  ;;  %v4073_v62 = vld [vmem:[%s5487_s1 + $0x7e4] ss:$12 sps:$4 sm:$0xff]   ;;  %v4075_v1 = vld [vmem:[%s5487_s1 + $0x368] ss:$12 sps:$4 sm:$0xff]  }
  0x9d   :  { %2700 = vmatprep.subr.bf16.mxu0 %v4008_v0  ;;  %v4071_v0 = vld [vmem:[%s5487_s1 + $0x7e0] ss:$12 sps:$4 sm:$0xff]  }
  0x9f   :  { %3577 = vmatpush3.bf16.msra.mxu1 %v4010_v3  ;;  %v4079_v3 = vld [vmem:[%s5487_s1 + $0x440] ss:$12 sps:$4 sm:$0xff]  }
  0xa0   :  { %2701 = vmatpush1.bf16.msra.mxu0 %v4006_v2  ;;  %3584 = vmatprep.subr.bf16.mxu1 %v4014_v5  ;;  %v4078_v2 = vld [vmem:[%s5487_s1 + $0x7fc] ss:$12 sps:$4 sm:$0xff]   ;;  %v4080_v5 = vld [vmem:[%s5487_s1 + $0x380] ss:$12 sps:$4 sm:$0xff]  }
  0xa1   :  { %2702 = vmatprep.subr.bf16.mxu0 %v4013_v4  ;;  %v4076_v4 = vld [vmem:[%s5487_s1 + $0x7f8] ss:$12 sps:$4 sm:$0xff]  }
  0xa2   :  { %2883 = vmatmul.mubr.bf16.vlgmr.msra.gmra.mrb[4].mxu1 %v4435_v54  ;;  %v4021_v54 = vld [vmem:[%s5487_s1 + $0x6f0] ss:$12 sps:$4 sm:$0xff]  }
  0xa3   :  { %3585 = vmatpush3.bf16.msra.mxu1 %v4015_v7  ;;  %2922 = vmatprep.mubr.bf16.mxu1 %v4530_v22  ;;  %v4029_v22 = vld [vmem:[%s5487_s1 + $0x290] ss:$12 sps:$4 sm:$0xff]   ;;  %v4084_v7 = vld [vmem:[%s5487_s1 + $0x458] ss:$12 sps:$4 sm:$0xff]  }
  0xa4   :  { %2703 = vmatpush1.bf16.msra.mxu0 %v4011_v6  ;;  %3586 = vmatprep.subr.bf16.mxu1 %v4019_v9  ;;  %v4083_v6 = vld [vmem:[%s5487_s1 + $0x814] ss:$12 sps:$4 sm:$0xff]   ;;  %v4085_v9 = vld [vmem:[%s5487_s1 + $0x398] ss:$12 sps:$4 sm:$0xff]  }
  0xa5   :  { %2704 = vmatprep.subr.bf16.mxu0 %v4018_v8  ;;  %v4081_v8 = vld [vmem:[%s5487_s1 + $0x810] ss:$12 sps:$4 sm:$0xff]  }
  0xa7   :  { %3587 = vmatpush3.bf16.msra.mxu1 %v4020_v11  ;;  %v4089_v11 = vld [vmem:[%s5487_s1 + $0x470] ss:$12 sps:$4 sm:$0xff]  }
  0xa8   :  { %2705 = vmatpush1.bf16.msra.mxu0 %v4016_v10  ;;  %3588 = vmatprep.subr.bf16.mxu1 %v4024_v13  ;;  %v4088_v10 = vld [vmem:[%s5487_s1 + $0x82c] ss:$12 sps:$4 sm:$0xff]   ;;  %v4090_v13 = vld [vmem:[%s5487_s1 + $0x3b0] ss:$12 sps:$4 sm:$0xff]  }
  0xa9   :  { %2706 = vmatprep.subr.bf16.mxu0 %v4023_v12  ;;  %v4086_v12 = vld [vmem:[%s5487_s1 + $0x828] ss:$12 sps:$4 sm:$0xff]  }
  0xab   :  { %3589 = vmatpush3.bf16.msra.mxu1 %v4025_v14  ;;  %v4094_v14 = vld [vmem:[%s5487_s1 + $0x548] ss:$12 sps:$4 sm:$0xff]  }
  0xac   :  { %2707 = vmatpush1.bf16.msra.mxu0 %v4021_v54  ;;  %3590 = vmatprep.subr.bf16.mxu1 %v4029_v22  ;;  %v4093_v54 = vld [vmem:[%s5487_s1 + $0x844] ss:$12 sps:$4 sm:$0xff]   ;;  %v4095_v22 = vld [vmem:[%s5487_s1 + $0x488] ss:$12 sps:$4 sm:$0xff]  }
  0xad   :  { %2708 = vmatprep.subr.bf16.mxu0 %v4028_v15  ;;  %v4091_v15 = vld [vmem:[%s5487_s1 + $0x840] ss:$12 sps:$4 sm:$0xff]  }
  0xaf   :  { %3591 = vmatpush3.bf16.msra.mxu1 %v4030_v19  ;;  %v4099_v19 = vld [vmem:[%s5487_s1 + $0x560] ss:$12 sps:$4 sm:$0xff]  }
  0xb0   :  { %2709 = vmatpush1.bf16.msra.mxu0 %v4026_v18  ;;  %3592 = vmatprep.subr.bf16.mxu1 %v4034_v21  ;;  %v4098_v18 = vld [vmem:[%s5487_s1 + $0x85c] ss:$12 sps:$4 sm:$0xff]   ;;  %v4100_v21 = vld [vmem:[%s5487_s1 + $0x4a0] ss:$12 sps:$4 sm:$0xff]  }
  0xb1   :  { %2710 = vmatprep.subr.bf16.mxu0 %v4033_v20  ;;  %v4096_v20 = vld [vmem:[%s5487_s1 + $0x858] ss:$12 sps:$4 sm:$0xff]  }
  0xb3   :  { %3593 = vmatpush3.bf16.msra.mxu1 %v4035_v25  ;;  %v4101_v25 = vld [vmem:[%s5487_s1 + $0x870] ss:$12 sps:$4 sm:$0xff]  }
  0xb4   :  { %2711 = vmatpush1.bf16.msra.mxu0 %v4031_v24  ;;  %3594 = vmatprep.subr.bf16.mxu1 %v4039_v27  ;;  %v4103_v24 = vld [vmem:[%s5487_s1 + $0x874] ss:$12 sps:$4 sm:$0xff]   ;;  %v4108_v27 = vld [vmem:[%s5487_s1 + $0x88c] ss:$12 sps:$4 sm:$0xff]  }
  0xb5   :  { %2712 = vmatprep.subr.bf16.mxu0 %v4038_v26  ;;  %v4105_v26 = vld [vmem:[%s5487_s1 + $0x4b8] ss:$12 sps:$4 sm:$0xff]  }
  0xb7   :  { %3595 = vmatpush3.bf16.msra.mxu1 %v4040_v29  ;;  %v4110_v29 = vld [vmem:[%s5487_s1 + $0x4d0] ss:$12 sps:$4 sm:$0xff]  }
  0xb8   :  { %2713 = vmatpush1.bf16.msra.mxu0 %v4036_v28  ;;  %3596 = vmatprep.subr.bf16.mxu1 %v4044_v31  ;;  %v4109_v28 = vld [vmem:[%s5487_s1 + $0x590] ss:$12 sps:$4 sm:$0xff]   ;;  %v4114_v31 = vld [vmem:[%s5487_s1 + $0x5a8] ss:$12 sps:$4 sm:$0xff]  }
  0xb9   :  { %2714 = vmatprep.subr.bf16.mxu0 %v4043_v30  ;;  %v4113_v30 = vld [vmem:[%s5487_s1 + $0x8a4] ss:$12 sps:$4 sm:$0xff]  }
  0xbb   :  { %3597 = vmatpush3.bf16.msra.mxu1 %v4045_v33  ;;  %v4115_v33 = vld [vmem:[%s5487_s1 + $0x4e8] ss:$12 sps:$4 sm:$0xff]  }
  0xbc   :  { %2715 = vmatpush1.bf16.msra.mxu0 %v4041_v32  ;;  %3598 = vmatprep.subr.bf16.mxu1 %v4049_v35  ;;  %v4111_v32 = vld [vmem:[%s5487_s1 + $0x8a0] ss:$12 sps:$4 sm:$0xff]  }
  0xbd   :  { %2716 = vmatprep.subr.bf16.mxu0 %v4048_v34  ;;  %v4118_v34 = vld [vmem:[%s5487_s1 + $0x8bc] ss:$12 sps:$4 sm:$0xff]   ;;  %v4119_v35 = vld [vmem:[%s5487_s1 + $0x5c0] ss:$12 sps:$4 sm:$0xff]  }
  0xbf   :  { %3599 = vmatpush3.bf16.msra.mxu1 %v4050_v38  ;;  %v4123_v38 = vld [vmem:[%s5487_s1 + $0x8d4] ss:$12 sps:$4 sm:$0xff]  }
  0xc0   :  { %2717 = vmatpush1.bf16.msra.mxu0 %v4046_v37  ;;  %3606 = vmatprep.subr.bf16.mxu1 %v4054_v40  ;;  %v4120_v37 = vld [vmem:[%s5487_s1 + $0x500] ss:$12 sps:$4 sm:$0xff]   ;;  %v4121_v40 = vld [vmem:[%s5487_s1 + $0x8d0] ss:$12 sps:$4 sm:$0xff]  }
  0xc1   :  { %2727 = vmatprep.subr.bf16.mxu0 %v4053_v39  ;;  %v4124_v39 = vld [vmem:[%s5487_s1 + $0x5d8] ss:$12 sps:$4 sm:$0xff]  }
  0xc2   :  { %2923 = vmatmul.mubr.bf16.vlgmr.msra.gmra.mrb[8].mxu1 %v4511_v16  ;;  %v4064_v16 = vld [vmem:[%s5487_s1 + $0x3f8] ss:$12 sps:$4 sm:$0xff]  }
  0xc3   :  { %2719 = vmatmul.mubr.bf16.vlgmr.msra.gmra.mrb[0].mxu0 %v4775_v46  ;;  %3607 = vmatpush3.bf16.msra.mxu1 %v4055_v43  ;;  %v4128_v43 = vld [vmem:[%s5487_s1 + $0x8ec] ss:$12 sps:$4 sm:$0xff]  }
  0xc4   :  { %2728 = vmatpush1.bf16.msra.mxu0 %v4051_v41  ;;  %3608 = vmatprep.subr.bf16.mxu1 %v4059_v45  ;;  %v4125_v41 = vld [vmem:[%s5487_s1 + $0x518] ss:$12 sps:$4 sm:$0xff]   ;;  %v4126_v45 = vld [vmem:[%s5487_s1 + $0x8e8] ss:$12 sps:$4 sm:$0xff]  }
  0xc5   :  { %2729 = vmatprep.subr.bf16.mxu0 %v4058_v44  ;;  %2962 = vmatprep.mubr.bf16.mxu1 %v4459_v61  ;;  %v4069_v61 = vld [vmem:[%s5487_s1 + $0x410] ss:$12 sps:$4 sm:$0xff]  }
  0xc6   :  { %2759 = vmatprep.mubr.bf16.mxu0 %v4950_v47  ;;  %v4129_v44 = vld [vmem:[%s5487_s1 + $0x5f0] ss:$12 sps:$4 sm:$0xff]  }
  0xc7   :  { %3609 = vmatpush3.bf16.msra.mxu1 %v4060_v51  ;;  %v5135_v51 = vld [vmem:[%s5488_s0 + $0x18] sm:$0x3f] }
  0xc8   :  { %2730 = vmatpush1.bf16.msra.mxu0 %v4056_v48  ;;  %3610 = vmatprep.subr.bf16.mxu1 %v4064_v16  ;;  %v4130_v48 = vld [vmem:[%s5487_s1 + $0x530] ss:$12 sps:$4 sm:$0xff]   ;;  %v4135_v16 = vld [vmem:[%s5487_s1 + $0x6c8] ss:$12 sps:$4 sm:$0xff]  }
  0xc9   :  { %2731 = vmatprep.subr.bf16.mxu0 %v4063_v52  ;;  %v4134_v52 = vld [vmem:[%s5487_s1 + $0x904] ss:$12 sps:$4 sm:$0xff]  }
  0xcb   :  { %3611 = vmatpush3.bf16.msra.mxu1 %v4065_v55  ;;  %v4132_v55 = vld [vmem:[%s5487_s1 + $0x900] ss:$12 sps:$4 sm:$0xff]  }
  0xcc   :  { %2732 = vmatpush1.bf16.msra.mxu0 %v4061_v53  ;;  %3612 = vmatprep.subr.bf16.mxu1 %v4069_v61  ;;  %v5145_v53 = vrot.slane %v5135_v51, %v4420_v49  ;;  %v4139_v61 = vld [vmem:[%s5487_s1 + $0x91c] ss:$12 sps:$4 sm:$0xff]  }
  0xcd   :  { %2733 = vmatprep.subr.bf16.mxu0 %v4068_v56  ;;  %v4136_v56 = vld [vmem:[%s5487_s1 + $0x608] ss:$12 sps:$4 sm:$0xff]  }
  0xcf   :  { %3613 = vmatpush3.bf16.msra.mxu1 %v4070_v58  ;;  %v4137_v58 = vld [vmem:[%s5487_s1 + $0x918] ss:$12 sps:$4 sm:$0xff]  }
  0xd0   :  { %2734 = vmatpush1.bf16.msra.mxu0 %v4066_v57  ;;  %3614 = vmatprep.subr.bf16.mxu1 %v4074_v63  ;;  %v4140_v57 = vld [vmem:[%s5487_s1 + $0x6e0] ss:$12 sps:$4 sm:$0xff]  }
  0xd1   :  { %2735 = vmatprep.subr.bf16.mxu0 %v4073_v62  ;;  %v5164_v62 = vcombine.high %v5145_v53, %v5145_v53  ;;  %v4141_v63 = vld [vmem:[%s5487_s1 + $0x620] ss:$12 sps:$4 sm:$0xff]  }
  0xd3   :  { %3615 = vmatpush3.bf16.msra.mxu1 %v4075_v1  ;;  %v4145_v1 = vld [vmem:[%s5487_s1 + $0x6f8] ss:$12 sps:$4 sm:$0xff]  }
  0xd4   :  { %2736 = vmatpush1.bf16.msra.mxu0 %v4071_v0  ;;  %3616 = vmatprep.subr.bf16.mxu1 %v4079_v3  ;;  %v4144_v0 = vld [vmem:[%s5487_s1 + $0x934] ss:$12 sps:$4 sm:$0xff]   ;;  %v4149_v3 = vld [vmem:[%s5487_s1 + $0x94c] ss:$12 sps:$4 sm:$0xff]  }
  0xd5   :  { %2737 = vmatprep.subr.bf16.mxu0 %v4078_v2  ;;  %v4146_v2 = vld [vmem:[%s5487_s1 + $0x638] ss:$12 sps:$4 sm:$0xff]  }
  0xd7   :  { %3617 = vmatpush3.bf16.msra.mxu1 %v4080_v5  ;;  %v4151_v5 = vld [vmem:[%s5487_s1 + $0x650] ss:$12 sps:$4 sm:$0xff]  }
  0xd8   :  { %2738 = vmatpush1.bf16.msra.mxu0 %v4076_v4  ;;  %3618 = vmatprep.subr.bf16.mxu1 %v4084_v7  ;;  %v4147_v4 = vld [vmem:[%s5487_s1 + $0x948] ss:$12 sps:$4 sm:$0xff]  }
  0xd9   :  { %2739 = vmatprep.subr.bf16.mxu0 %v4083_v6  ;;  %v4154_v6 = vld [vmem:[%s5487_s1 + $0x964] ss:$12 sps:$4 sm:$0xff]   ;;  %v4155_v7 = vld [vmem:[%s5487_s1 + $0x728] ss:$12 sps:$4 sm:$0xff]  }
  0xdb   :  { %3619 = vmatpush3.bf16.msra.mxu1 %v4085_v9  ;;  %v4156_v9 = vld [vmem:[%s5487_s1 + $0x668] ss:$12 sps:$4 sm:$0xff]  }
  0xdc   :  { %2740 = vmatpush1.bf16.msra.mxu0 %v4081_v8  ;;  %3620 = vmatprep.subr.bf16.mxu1 %v4089_v11  ;;  %v4152_v8 = vld [vmem:[%s5487_s1 + $0x960] ss:$12 sps:$4 sm:$0xff]  }
  0xdd   :  { %2741 = vmatprep.subr.bf16.mxu0 %v4088_v10  ;;  %v4159_v10 = vld [vmem:[%s5487_s1 + $0x97c] ss:$12 sps:$4 sm:$0xff]   ;;  %v4160_v11 = vld [vmem:[%s5487_s1 + $0x740] ss:$12 sps:$4 sm:$0xff]  }
  0xdf   :  { %3621 = vmatpush3.bf16.msra.mxu1 %v4090_v13  ;;  %v4161_v13 = vld [vmem:[%s5487_s1 + $0x680] ss:$12 sps:$4 sm:$0xff]  }
  0xe0   :  { %2742 = vmatpush1.bf16.msra.mxu0 %v4086_v12  ;;  %3628 = vmatprep.subr.bf16.mxu1 %v4094_v14  ;;  %v4157_v12 = vld [vmem:[%s5487_s1 + $0x978] ss:$12 sps:$4 sm:$0xff]  }
  0xe1   :  { %2743 = vmatprep.subr.bf16.mxu0 %v4093_v54  ;;  %v4164_v54 = vld [vmem:[%s5487_s1 + $0x994] ss:$12 sps:$4 sm:$0xff]   ;;  %v4165_v14 = vld [vmem:[%s5487_s1 + $0x758] ss:$12 sps:$4 sm:$0xff]  }
  0xe2   :  { %2963 = vmatmul.mubr.bf16.vlgmr.msra.gmra.mrb[12].mxu1 %v4454_v60  ;;  %v4104_v60 = vld [vmem:[%s5487_s1 + $0x578] ss:$12 sps:$4 sm:$0xff]  }
  0xe3   :  { %3629 = vmatpush3.bf16.msra.mxu1 %v4095_v22  ;;  %3002 = vmatprep.mubr.bf16.mxu1 %v4534_v23  ;;  %v4106_v23 = vld [vmem:[%s5487_s1 + $0x888] ss:$12 sps:$4 sm:$0xff]   ;;  %v4166_v22 = vld [vmem:[%s5487_s1 + $0x698] ss:$12 sps:$4 sm:$0xff]  }
  0xe4   :  { %2744 = vmatpush1.bf16.msra.mxu0 %v4091_v15  ;;  %3630 = vmatprep.subr.bf16.mxu1 %v4099_v19  ;;  %v4162_v15 = vld [vmem:[%s5487_s1 + $0x990] ss:$12 sps:$4 sm:$0xff]  }
  0xe5   :  { %2745 = vmatprep.subr.bf16.mxu0 %v4098_v18  ;;  %v4169_v18 = vld [vmem:[%s5487_s1 + $0x9ac] ss:$12 sps:$4 sm:$0xff]   ;;  %v4170_v19 = vld [vmem:[%s5487_s1 + $0x770] ss:$12 sps:$4 sm:$0xff]  }
  0xe7   :  { %3631 = vmatpush3.bf16.msra.mxu1 %v4100_v21  ;;  %v4171_v21 = vld [vmem:[%s5487_s1 + $0x6b0] ss:$12 sps:$4 sm:$0xff]  }
  0xe8   :  { %2746 = vmatpush1.bf16.msra.mxu0 %v4096_v20  ;;  %3632 = vmatprep.subr.bf16.mxu1 %v4104_v60  ;;  %v4167_v20 = vld [vmem:[%s5487_s1 + $0x9a8] ss:$12 sps:$4 sm:$0xff]  }
  0xe9   :  { %2747 = vmatprep.subr.bf16.mxu0 %v4103_v24  ;;  %v4174_v24 = vld [vmem:[%s5487_s1 + $0x9c4] ss:$12 sps:$4 sm:$0xff]   ;;  %v4175_v60 = vld [vmem:[%s5487_s1 + $0x848] ss:$12 sps:$4 sm:$0xff]  }
  0xeb   :  { %3633 = vmatpush3.bf16.msra.mxu1 %v4105_v26  ;;  %v4176_v26 = vld [vmem:[%s5487_s1 + $0x788] ss:$12 sps:$4 sm:$0xff]  }
  0xec   :  { %2748 = vmatpush1.bf16.msra.mxu0 %v4101_v25  ;;  %3634 = vmatprep.subr.bf16.mxu1 %v4109_v28  ;;  %v4172_v25 = vld [vmem:[%s5487_s1 + $0x9c0] ss:$12 sps:$4 sm:$0xff]  }
  0xed   :  { %2749 = vmatprep.subr.bf16.mxu0 %v4108_v27  ;;  %v4179_v27 = vld [vmem:[%s5487_s1 + $0x9dc] ss:$12 sps:$4 sm:$0xff]   ;;  %v4180_v28 = vld [vmem:[%s5487_s1 + $0x860] ss:$12 sps:$4 sm:$0xff]  }
  0xef   :  { %3635 = vmatpush3.bf16.msra.mxu1 %v4110_v29  ;;  %v4181_v29 = vld [vmem:[%s5487_s1 + $0x7a0] ss:$12 sps:$4 sm:$0xff]  }
  0xf0   :  { %2750 = vmatpush1.bf16.msra.mxu0 %v4106_v23  ;;  %3636 = vmatprep.subr.bf16.mxu1 %v4114_v31  ;;  %v4177_v23 = vld [vmem:[%s5487_s1 + $0x9d8] ss:$12 sps:$4 sm:$0xff]   ;;  %v4182_v31 = vld [vmem:[%s5487_s1 + $0x9f0] ss:$12 sps:$4 sm:$0xff]  }
  0xf1   :  { %2751 = vmatprep.subr.bf16.mxu0 %v4113_v30  ;;  %v4184_v30 = vld [vmem:[%s5487_s1 + $0x9f4] ss:$12 sps:$4 sm:$0xff]  }
  0xf3   :  { %3637 = vmatpush3.bf16.msra.mxu1 %v4115_v33  ;;  %v4189_v33 = vld [vmem:[%s5487_s1 + $0xa0c] ss:$12 sps:$4 sm:$0xff]  }
  0xf4   :  { %2752 = vmatpush1.bf16.msra.mxu0 %v4111_v32  ;;  %3638 = vmatprep.subr.bf16.mxu1 %v4119_v35  ;;  %v4186_v32 = vld [vmem:[%s5487_s1 + $0x7b8] ss:$12 sps:$4 sm:$0xff]   ;;  %v4191_v35 = vld [vmem:[%s5487_s1 + $0x7d0] ss:$12 sps:$4 sm:$0xff]  }
  0xf5   :  { %2753 = vmatprep.subr.bf16.mxu0 %v4118_v34  ;;  %v4187_v34 = vld [vmem:[%s5487_s1 + $0xa08] ss:$12 sps:$4 sm:$0xff]  }
  0xf7   :  { %3639 = vmatpush3.bf16.msra.mxu1 %v4120_v37  ;;  %v4195_v37 = vld [vmem:[%s5487_s1 + $0x8a8] ss:$12 sps:$4 sm:$0xff]  }
  0xf8   :  { %2754 = vmatpush1.bf16.msra.mxu0 %v4116_v36  ;;  %3640 = vmatprep.subr.bf16.mxu1 %v4124_v39  ;;  %v4194_v36 = vld [vmem:[%s5487_s1 + $0xa24] ss:$12 sps:$4 sm:$0xff]   ;;  %v4196_v39 = vld [vmem:[%s5487_s1 + $0x7e8] ss:$12 sps:$4 sm:$0xff]  }
  0xf9   :  { %2755 = vmatprep.subr.bf16.mxu0 %v4123_v38  ;;  %v4192_v38 = vld [vmem:[%s5487_s1 + $0xa20] ss:$12 sps:$4 sm:$0xff]  }
  0xfb   :  { %3641 = vmatpush3.bf16.msra.mxu1 %v4125_v41  ;;  %v4200_v41 = vld [vmem:[%s5487_s1 + $0x8c0] ss:$12 sps:$4 sm:$0xff]  }
  0xfc   :  { %2756 = vmatpush1.bf16.msra.mxu0 %v4121_v40  ;;  %3642 = vmatprep.subr.bf16.mxu1 %v4129_v44  ;;  %v4199_v40 = vld [vmem:[%s5487_s1 + $0xa3c] ss:$12 sps:$4 sm:$0xff]   ;;  %v4201_v44 = vld [vmem:[%s5487_s1 + $0x800] ss:$12 sps:$4 sm:$0xff]  }
  0xfd   :  { %2757 = vmatprep.subr.bf16.mxu0 %v4128_v43  ;;  %v4197_v43 = vld [vmem:[%s5487_s1 + $0xa38] ss:$12 sps:$4 sm:$0xff]  }
  0xff   :  { %3643 = vmatpush3.bf16.msra.mxu1 %v4130_v48  ;;  %v4205_v48 = vld [vmem:[%s5487_s1 + $0x8d8] ss:$12 sps:$4 sm:$0xff]  }
 0x100   :  { %2758 = vmatpush1.bf16.msra.mxu0 %v4126_v45  ;;  %3650 = vmatprep.subr.bf16.mxu1 %v4135_v16  ;;  %v4204_v45 = vld [vmem:[%s5487_s1 + $0xa54] ss:$12 sps:$4 sm:$0xff]   ;;  %v4206_v16 = vld [vmem:[%s5487_s1 + $0x818] ss:$12 sps:$4 sm:$0xff]  }
 0x101   :  { %2768 = vmatprep.subr.bf16.mxu0 %v4134_v52  ;;  %v4202_v52 = vld [vmem:[%s5487_s1 + $0xa50] ss:$12 sps:$4 sm:$0xff]  }
 0x102   :  { %3003 = vmatmul.mubr.bf16.vlgmr.msra.gmra.mrb[16].mxu1 %v4514_v17  ;;  %v4142_v17 = vld [vmem:[%s5487_s1 + $0x930] ss:$12 sps:$4 sm:$0xff]  }
 0x103   :  { %2760 = vmatmul.mubr.bf16.vlgmr.msra.gmra.mrb[0].mxu0 %v4937_v59  ;;  %3651 = vmatpush3.bf16.msra.mxu1 %v4136_v56  ;;  %v4210_v56 = vld [vmem:[%s5487_s1 + $0x8f0] ss:$12 sps:$4 sm:$0xff]  }
 0x104   :  { %2769 = vmatpush1.bf16.msra.mxu0 %v4132_v55  ;;  %3652 = vmatprep.subr.bf16.mxu1 %v4140_v57  ;;  %v4209_v55 = vld [vmem:[%s5487_s1 + $0xa6c] ss:$12 sps:$4 sm:$0xff]   ;;  %v4211_v57 = vld [vmem:[%s5487_s1 + $0x830] ss:$12 sps:$4 sm:$0xff]  }
 0x105   :  { %2770 = vmatprep.subr.bf16.mxu0 %v4139_v61  ;;  %3042 = vmatprep.mubr.bf16.mxu1 %v4785_v50  ;;  %v4150_v50 = vld [vmem:[%s5487_s1 + $0x710] ss:$12 sps:$4 sm:$0xff]   ;;  %v4207_v61 = vld [vmem:[%s5487_s1 + $0xa68] ss:$12 sps:$4 sm:$0xff]  }
 0x106   :  { %2800 = vmatprep.mubr.bf16.mxu0 %v5164_v62 }
 0x107   :  { %3653 = vmatpush3.bf16.msra.mxu1 %v4141_v63  ;;  %v4215_v63 = vld [vmem:[%s5487_s1 + $0x9c8] ss:$12 sps:$4 sm:$0xff]  }
 0x108   :  { %2771 = vmatpush1.bf16.msra.mxu0 %v4137_v58  ;;  %3654 = vmatprep.subr.bf16.mxu1 %v4145_v1  ;;  %v4214_v58 = vld [vmem:[%s5487_s1 + $0xa84] ss:$12 sps:$4 sm:$0xff]   ;;  %v4216_v1 = vld [vmem:[%s5487_s1 + $0x908] ss:$12 sps:$4 sm:$0xff]  }
 0x109   :  { %2772 = vmatprep.subr.bf16.mxu0 %v4144_v0  ;;  %v4212_v0 = vld [vmem:[%s5487_s1 + $0xa80] ss:$12 sps:$4 sm:$0xff]  }
 0x10b   :  { %3655 = vmatpush3.bf16.msra.mxu1 %v4146_v2  ;;  %v4220_v2 = vld [vmem:[%s5487_s1 + $0x9e0] ss:$12 sps:$4 sm:$0xff]  }
 0x10c   :  { %2773 = vmatpush1.bf16.msra.mxu0 %v4142_v17  ;;  %3656 = vmatprep.subr.bf16.mxu1 %v4150_v50  ;;  %v4219_v17 = vld [vmem:[%s5487_s1 + $0xa9c] ss:$12 sps:$4 sm:$0xff]   ;;  %v4221_v50 = vld [vmem:[%s5487_s1 + $0x920] ss:$12 sps:$4 sm:$0xff]  }
 0x10d   :  { %2774 = vmatprep.subr.bf16.mxu0 %v4149_v3  ;;  %v4217_v3 = vld [vmem:[%s5487_s1 + $0xa98] ss:$12 sps:$4 sm:$0xff]  }
 0x10f   :  { %3657 = vmatpush3.bf16.msra.mxu1 %v4151_v5  ;;  %v4262_v5 = vmov 0  }
 0x110   :  { %2775 = vmatpush1.bf16.msra.mxu0 %v4147_v4  ;;  %3658 = vmatprep.subr.bf16.mxu1 %v4155_v7  ;;  %v4224_v4 = vld [vmem:[%s5487_s1 + $0xab4] ss:$12 sps:$4 sm:$0xff]   ;;  %v4226_v7 = vld [vmem:[%s5487_s1 + $0x938] ss:$12 sps:$4 sm:$0xff]  }
 0x111   :  { %2776 = vmatprep.subr.bf16.mxu0 %v4154_v6  ;;  %v4222_v6 = vld [vmem:[%s5487_s1 + $0xab0] ss:$12 sps:$4 sm:$0xff]  }
 0x113   :  { %3659 = vmatpush3.bf16.msra.mxu1 %v4156_v9  ;;  %v4227_v9 = vld [vmem:[%s5487_s1 + $0xac8] ss:$12 sps:$4 sm:$0xff]  }
 0x114   :  { %2777 = vmatpush1.bf16.msra.mxu0 %v4152_v8  ;;  %3660 = vmatprep.subr.bf16.mxu1 %v4160_v11  ;;  %v4229_v8 = vld [vmem:[%s5487_s1 + $0xacc] ss:$12 sps:$4 sm:$0xff]   ;;  %v4234_v11 = vld [vmem:[%s5487_s1 + $0xae4] ss:$12 sps:$4 sm:$0xff]  }
 0x115   :  { %2778 = vmatprep.subr.bf16.mxu0 %v4159_v10  ;;  %v4231_v10 = vld [vmem:[%s5487_s1 + $0x950] ss:$12 sps:$4 sm:$0xff]  }
 0x117   :  { %3661 = vmatpush3.bf16.msra.mxu1 %v4161_v13  ;;  %v4232_v13 = vld [vmem:[%s5487_s1 + $0xae0] ss:$12 sps:$4 sm:$0xff]  }
 0x118   :  { %2779 = vmatpush1.bf16.msra.mxu0 %v4157_v12  ;;  %3662 = vmatprep.subr.bf16.mxu1 %v4165_v14  ;;  %v4235_v12 = vld [vmem:[%s5487_s1 + $0xa28] ss:$12 sps:$4 sm:$0xff]  }
 0x119   :  { %2780 = vmatprep.subr.bf16.mxu0 %v4164_v54  ;;  %v4236_v54 = vld [vmem:[%s5487_s1 + $0x968] ss:$12 sps:$4 sm:$0xff]  }
 0x11a   :  { %v4239_v14 = vld [vmem:[%s5487_s1 + $0xafc] ss:$12 sps:$4 sm:$0xff]  }
 0x11b   :  { %3663 = vmatpush3.bf16.msra.mxu1 %v4166_v22  ;;  %v4237_v22 = vld [vmem:[%s5487_s1 + $0xaf8] ss:$12 sps:$4 sm:$0xff]  }
 0x11c   :  { %2781 = vmatpush1.bf16.msra.mxu0 %v4162_v15  ;;  %3664 = vmatprep.subr.bf16.mxu1 %v4170_v19  ;;  %v4240_v15 = vld [vmem:[%s5487_s1 + $0xa40] ss:$12 sps:$4 sm:$0xff]  }
 0x11d   :  { %2782 = vmatprep.subr.bf16.mxu0 %v4169_v18  ;;  %v4241_v18 = vld [vmem:[%s5487_s1 + $0x980] ss:$12 sps:$4 sm:$0xff]  }
 0x11e   :  { %v4244_v19 = vld [vmem:[%s5487_s1 + $0xb14] ss:$12 sps:$4 sm:$0xff]  }
 0x11f   :  { %3665 = vmatpush3.bf16.msra.mxu1 %v4171_v21 }
 0x120   :  { %2783 = vmatpush1.bf16.msra.mxu0 %v4167_v20  ;;  %3672 = vmatprep.subr.bf16.mxu1 %v4175_v60  ;;  %v4245_v20 = vld [vmem:[%s5487_s1 + $0xa58] ss:$12 sps:$4 sm:$0xff]  }
 0x121   :  { %2784 = vmatprep.subr.bf16.mxu0 %v4174_v24 }
 0x122   :  { %3043 = vmatmul.mubr.bf16.vlgmr.msra.gmra.mrb[20].mxu1 %v4775_v46  ;;  %v4185_v46 = vld [vmem:[%s5487_s1 + $0x878] ss:$12 sps:$4 sm:$0xff]  }
 0x123   :  { %3673 = vmatpush3.bf16.msra.mxu1 %v4176_v26  ;;  %3082 = vmatprep.mubr.bf16.mxu1 %v4950_v47  ;;  %v4190_v47 = vld [vmem:[%s5487_s1 + $0x890] ss:$12 sps:$4 sm:$0xff]   ;;  %v4246_v26 = vld [vmem:[%s5487_s1 + $0x998] ss:$12 sps:$4 sm:$0xff]  }
 0x124   :  { %2785 = vmatpush1.bf16.msra.mxu0 %v4172_v25  ;;  %3674 = vmatprep.subr.bf16.mxu1 %v4180_v28  ;;  %v4242_v25 = vld [vmem:[%s5487_s1 + $0xb10] ss:$12 sps:$4 sm:$0xff]   ;;  %v4249_v28 = vld [vmem:[%s5487_s1 + $0xb2c] ss:$12 sps:$4 sm:$0xff]  }
 0x125   :  { %2786 = vmatprep.subr.bf16.mxu0 %v4179_v27 }
 0x127   :  { %3675 = vmatpush3.bf16.msra.mxu1 %v4181_v29  ;;  %v571_v29 = vcombine.high %v5135_v51, %v5135_v51  ;;  %v4253_v51 = vld [vmem:[%s5487_s1 + $0xa88] ss:$12 sps:$4 sm:$0xff]  }
 0x128   :  { %2787 = vmatpush1.bf16.msra.mxu0 %v4177_v23  ;;  %3676 = vmatprep.subr.bf16.mxu1 %v4185_v46  ;;  %v4250_v23 = vld [vmem:[%s5487_s1 + $0xa70] ss:$12 sps:$4 sm:$0xff]  }
 0x129   :  { %2788 = vmatprep.subr.bf16.mxu0 %v4184_v30  ;;  %v4247_v30 = vld [vmem:[%s5487_s1 + $0xb28] ss:$12 sps:$4 sm:$0xff]   ;;  %v4251_v46 = vld [vmem:[%s5487_s1 + $0x9b0] ss:$12 sps:$4 sm:$0xff]  }
 0x12b   :  { %3677 = vmatpush3.bf16.msra.mxu1 %v4186_v32  ;;  %v4263_v32 = vmov 0.0  }
 0x12c   :  { %2789 = vmatpush1.bf16.msra.mxu0 %v4182_v31  ;;  %3678 = vmatprep.subr.bf16.mxu1 %v4190_v47  ;;  %v585_v31 = vrot.slane %v571_v29, %v4420_v49  ;;  %v4255_v47 = vld [vmem:[%s5487_s1 + $0xab8] ss:$12 sps:$4 sm:$0xff]  }
 0x12d   :  { %2790 = vmatprep.subr.bf16.mxu0 %v4189_v33  ;;  %v4254_v33 = vld [vmem:[%s5487_s1 + $0xaa0] ss:$12 sps:$4 sm:$0xff]  }
 0x12f   :  { %3679 = vmatpush3.bf16.msra.mxu1 %v4191_v35  ;;  %v4258_v35 = vld [vmem:[%s5487_s1 + $0xb00] ss:$12 sps:$4 sm:$0xff]  }
 0x130   :  { %2791 = vmatpush1.bf16.msra.mxu0 %v4187_v34  ;;  %3680 = vmatprep.subr.bf16.mxu1 %v4195_v37  ;;  %v4256_v34 = vld [vmem:[%s5487_s1 + $0xad0] ss:$12 sps:$4 sm:$0xff]  }
 0x131   :  { %2792 = vmatprep.subr.bf16.mxu0 %v4194_v36 }
 0x133   :  { %3681 = vmatpush3.bf16.msra.mxu1 %v4196_v39 }
 0x134   :  { %2793 = vmatpush1.bf16.msra.mxu0 %v4192_v38  ;;  %3682 = vmatprep.subr.bf16.mxu1 %v4200_v41 }
 0x135   :  { %2794 = vmatprep.subr.bf16.mxu0 %v4199_v40  ;;  %v4259_v40 = vld [vmem:[%s5487_s1 + $0xb18] ss:$12 sps:$4 sm:$0xff]  }
 0x137   :  { %3683 = vmatpush3.bf16.msra.mxu1 %v4201_v44  ;;  %v511_v44 = vsub.s32 2, %v4402_v42 }
 0x138   :  { %2795 = vmatpush1.bf16.msra.mxu0 %v4197_v43  ;;  %3684 = vmatprep.subr.bf16.mxu1 %v4205_v48  ;;  %v4260_v43 = vld [vmem:[%s5487_s1 + $0xb30] ss:$12 sps:$4 sm:$0xff]  }
 0x139   :  { %2796 = vmatprep.subr.bf16.mxu0 %v4204_v45  ;;  %v499_v45 = vld [vmem:[%s5489_s2] sm:$0x7] }
 0x13a   :  { %v512_v48 = vrot.slane %v499_v45, %v511_v44 }
 0x13b   :  { %3685 = vmatpush3.bf16.msra.mxu1 %v4206_v16 }
 0x13c   :  { %2797 = vmatpush1.bf16.msra.mxu0 %v4202_v52  ;;  %3686 = vmatprep.subr.bf16.mxu1 %v4210_v56 }
 0x13d   :  { %2798 = vmatprep.subr.bf16.mxu0 %v4209_v55 }
 0x13f   :  { %3687 = vmatpush3.bf16.msra.mxu1 %v4211_v57 }
 0x140   :  { %2799 = vmatpush1.bf16.msra.mxu0 %v4207_v61  ;;  %3694 = vmatprep.subr.bf16.mxu1 %v4215_v63 }
 0x141   :  { %2809 = vmatprep.subr.bf16.mxu0 %v4214_v58 }
 0x142   :  { %3083 = vmatmul.mubr.bf16.vlgmr.msra.gmra.mrb[24].mxu1 %v4937_v59  ;;  %v4225_v59 = vld [vmem:[%s5487_s1 + $0x9f8] ss:$12 sps:$4 sm:$0xff]  }
 0x143   :  { %2801 = vmatmul.mubr.bf16.vlgmr.msra.gmra.mrb[0].mxu0 %v5145_v53  ;;  %3695 = vmatpush3.bf16.msra.mxu1 %v4216_v1 }
 0x144   :  { %2810 = vmatpush1.bf16.msra.mxu0 %v4212_v0  ;;  %3696 = vmatprep.subr.bf16.mxu1 %v4220_v2 }
 0x145   :  { %2811 = vmatprep.subr.bf16.mxu0 %v4219_v17  ;;  %2841 = vmatprep.mubr.bf16.mxu0 %v4262_v5 }
 0x146   :  { %3122 = vmatprep.mubr.bf16.mxu1 %v5164_v62  ;;  %v4230_v62 = vld [vmem:[%s5487_s1 + $0xa10] ss:$12 sps:$4 sm:$0xff]  }
 0x147   :  { %3697 = vmatpush3.bf16.msra.mxu1 %v4221_v50 }
 0x148   :  { %2812 = vmatpush1.bf16.msra.mxu0 %v4217_v3  ;;  %3698 = vmatprep.subr.bf16.mxu1 %v4225_v59 }
 0x149   :  { %2813 = vmatprep.subr.bf16.mxu0 %v4224_v4 }
 0x14b   :  { %3699 = vmatpush3.bf16.msra.mxu1 %v4226_v7 }
 0x14c   :  { %2814 = vmatpush1.bf16.msra.mxu0 %v4222_v6  ;;  %3700 = vmatprep.subr.bf16.mxu1 %v4230_v62 }
 0x14d   :  { %2815 = vmatprep.subr.bf16.mxu0 %v4229_v8 }
 0x14f   :  { %3701 = vmatpush3.bf16.msra.mxu1 %v4231_v10 }
 0x150   :  { %2816 = vmatpush1.bf16.msra.mxu0 %v4227_v9  ;;  %3702 = vmatprep.subr.bf16.mxu1 %v4235_v12 }
 0x151   :  { %2817 = vmatprep.subr.bf16.mxu0 %v4234_v11 }
 0x153   :  { %3703 = vmatpush3.bf16.msra.mxu1 %v4236_v54 }
 0x154   :  { %2818 = vmatpush1.bf16.msra.mxu0 %v4232_v13  ;;  %3704 = vmatprep.subr.bf16.mxu1 %v4240_v15 }
 0x155   :  { %2819 = vmatprep.subr.bf16.mxu0 %v4239_v14  ;;  %v5424_v21 = vpop.f32.mrb[0].mxu1 }
 0x156   :  { %v5426_v24 = vpop.f32.mrb[1].mxu1 }
 0x157   :  { %v2601_v60 = vpop.f32.mrb[2].mxu1  ;;  %3705 = vmatpush3.bf16.msra.mxu1 %v4241_v18 }
 0x158   :  { %2820 = vmatpush1.bf16.msra.mxu0 %v4237_v22  ;;  %v2602_v27 = vpop.f32.mrb[3].mxu1  ;;  %3706 = vmatprep.subr.bf16.mxu1 %v4245_v20  ;;  %v507_v20 = vsub.s32 1, %v4402_v42 }
 0x159   :  { %2821 = vmatprep.subr.bf16.mxu0 %v4244_v19  ;;  %v503_v19 = vsub.s32 0, %v4402_v42 }
 0x15b   :  { %3707 = vmatpush3.bf16.msra.mxu1 %v4246_v26  ;;  %v504_v60 = vrot.slane %v499_v45, %v503_v19 }
 0x15c   :  { %2822 = vmatpush1.bf16.msra.mxu0 %v4242_v25  ;;  %3708 = vmatprep.subr.bf16.mxu1 %v4250_v23  ;;  %v508_v25 = vrot.slane %v499_v45, %v507_v20 }
 0x15d   :  { %2823 = vmatprep.subr.bf16.mxu0 %v4249_v28  ;;  %v3745_v26 = vadd.f32 %v5424_v21, %v504_v60 }
 0x15e   :  { %v3747_v27 = vadd.f32 %v5426_v24, %v508_v25 }
 0x15f   :  { %3709 = vmatpush3.bf16.msra.mxu1 %v4251_v46 }
 0x160   :  { %2824 = vmatpush1.bf16.msra.mxu0 %v4247_v30  ;;  %3725 = vmatprep.subr.bf16.mxu1 %v4263_v32 }
 0x162   :  { %3123 = vmatmul.mubr.bf16.vlgmr.msra.gmra.mrb[28].mxu1 %v5145_v53  ;;  %v4257_v53 = vld [vmem:[%s5487_s1 + $0xae8] ss:$12 sps:$4 sm:$0xff]  }
 0x163   :  { %2842 = vmatmul.mubr.bf16.vlgmr.msra.gmra.mrb[0].mxu0 %v585_v31  ;;  %3726 = vmatpush3.bf16.msra.mxu1 %v4253_v51 }
 0x164   :  { %3741 = vmatprep.mubr.msk.bf16.mxu1 %vm4264_vm0, %v4263_v32  ;;  %3727 = vmatprep.subr.bf16.mxu1 %v4263_v32 }
 0x167   :  { %3728 = vmatpush3.bf16.msra.mxu1 %v4254_v33 }
 0x168   :  { %3729 = vmatprep.subr.bf16.mxu1 %v4263_v32 }
 0x16b   :  { %3730 = vmatpush3.bf16.msra.mxu1 %v4255_v47 }
 0x16c   :  { %3731 = vmatprep.subr.bf16.mxu1 %v4263_v32 }
 0x16f   :  { %3732 = vmatpush3.bf16.msra.mxu1 %v4256_v34 }
 0x170   :  { %3733 = vmatprep.subr.bf16.mxu1 %v4263_v32 }
 0x173   :  { %3734 = vmatpush3.bf16.msra.mxu1 %v4257_v53 }
 0x174   :  { %3735 = vmatprep.subr.bf16.mxu1 %v4263_v32 }
 0x175   :  { %v3578_v36 = vpop.f32.mrb[4].mxu1 }
 0x176   :  { %v3579_v37 = vpop.f32.mrb[5].mxu1 }
 0x177   :  { %v3580_v38 = vadd.f32 %v3579_v37, %v3578_v36  ;;  %v3581_v39 = vpop.f32.mrb[6].mxu1  ;;  %3736 = vmatpush3.bf16.msra.mxu1 %v4258_v35 }
 0x178   :  { %v3582_v41 = vpop.f32.mrb[7].mxu1  ;;  %3737 = vmatprep.subr.bf16.mxu1 %v4263_v32 }
 0x179   :  { %v2885_v55 = vadd.f32 %v3580_v38, %v512_v48 }
 0x17b   :  { %3738 = vmatpush3.bf16.msra.mxu1 %v4259_v40 }
 0x17c   :  { %3739 = vmatprep.subr.bf16.mxu1 %v4263_v32 }
 0x17f   :  { %3740 = vmatpush3.bf16.msra.mxu1 %v4260_v43 }
 0x182   :  { %3742 = vmatmul.mubr.bf16.vlgmr.msra.gmra.mrb[32].mxu1 %v585_v31 }
 0x195   :  { %v3600_v52 = vpop.f32.mrb[8].mxu1 }
 0x196   :  { %v3601_v16 = vpop.f32.mrb[9].mxu1 }
 0x197   :  { %v3602_v56 = vadd.f32 %v3601_v16, %v3600_v52  ;;  %v3603_v61 = vpop.f32.mrb[10].mxu1 }
 0x198   :  { %v3604_v57 = vpop.f32.mrb[11].mxu1 }
 0x199   :  { %v2925_v58 = vadd.f32 %v3602_v56, %v2885_v55 }
 0x1b5   :  { %v3622_v63 = vpop.f32.mrb[12].mxu1 }
 0x1b6   :  { %v3623_v0 = vpop.f32.mrb[13].mxu1 }
 0x1b7   :  { %v3624_v1 = vadd.f32 %v3623_v0, %v3622_v63  ;;  %v3625_v17 = vpop.f32.mrb[14].mxu1 }
 0x1b8   :  { %v3626_v2 = vpop.f32.mrb[15].mxu1 }
 0x1b9   :  { %v2965_v3 = vadd.f32 %v3624_v1, %v2925_v58 }
 0x1d5   :  { %v3644_v50 = vpop.f32.mrb[16].mxu1 }
 0x1d6   :  { %v3645_v4 = vpop.f32.mrb[17].mxu1 }
 0x1d7   :  { %v3646_v59 = vadd.f32 %v3645_v4, %v3644_v50  ;;  %v3647_v5 = vpop.f32.mrb[18].mxu1 }
 0x1d8   :  { %v3648_v6 = vpop.f32.mrb[19].mxu1 }
 0x1d9   :  { %v3005_v7 = vadd.f32 %v3646_v59, %v2965_v3 }
 0x1f5   :  { %v3666_v8 = vpop.f32.mrb[20].mxu1 }
 0x1f6   :  { %v3667_v62 = vpop.f32.mrb[21].mxu1 }
 0x1f7   :  { %v3668_v9 = vadd.f32 %v3667_v62, %v3666_v8  ;;  %v3669_v10 = vpop.f32.mrb[22].mxu1 }
 0x1f8   :  { %v3670_v11 = vpop.f32.mrb[23].mxu1 }
 0x1f9   :  { %v3045_v12 = vadd.f32 %v3668_v9, %v3005_v7 }
 0x215   :  { %v3688_v13 = vpop.f32.mrb[24].mxu1 }
 0x216   :  { %v3689_v54 = vpop.f32.mrb[25].mxu1 }
 0x217   :  { %v3690_v14 = vadd.f32 %v3689_v54, %v3688_v13  ;;  %v3691_v15 = vpop.f32.mrb[26].mxu1 }
 0x218   :  { %v3692_v22 = vpop.f32.mrb[27].mxu1 }
 0x219   :  { %v3085_v18 = vadd.f32 %v3690_v14, %v3045_v12 }
 0x235   :  { %v3710_v23 = vpop.f32.mrb[28].mxu1 }
 0x236   :  { %v2843_v28 = vpop.f32.mrb[0].mxu0  ;;  %v3711_v46 = vpop.f32.mrb[29].mxu1 }
 0x237   :  { %v3746_v29 = vadd.f32 %v3745_v26, %v2843_v28  ;;  %v2845_v30 = vpop.f32.mrb[1].mxu0  ;;  %v3712_v51 = vadd.f32 %v3711_v46, %v3710_v23  ;;  %v3713_v33 = vpop.f32.mrb[30].mxu1 }
 0x238   :  { %v3748_v31 = vadd.f32 %v3747_v27, %v2845_v30  ;;  %v2847_v32 = vpop.f32.mrb[2].mxu0  ;;  %v3714_v53 = vpop.f32.mrb[31].mxu1 }
 0x239   :  { %v3170_v47 = vmax.f32 %v3746_v29, 0.0  ;;  %v2848_v34 = vpop.f32.mrb[3].mxu0  ;;  %v3125_v42 = vadd.f32 %v3712_v51, %v3085_v18 }
 0x23a   :  { %v3171_v35 = vmax.f32 %v3748_v31, 0.0 }
 0x23c   :  { %v3561_v36 = vpack.c.bf16 %v3171_v35, %v3170_v47 }
 0x23e   :  { %v3186_v43 = vrot.slane %v3561_v36, %v4420_v49 }
 0x255   :  { %v3164_v37 = vpop.f32.mrb[32].mxu1 }
 0x256   :  { %v3165_v38 = vadd.f32 %v3164_v37, %v3125_v42  ;;  %v3743_v21 = vpop.f32.mrb[33].mxu1 }
 0x257   :  { %v3167_v39 = vpop.f32.mrb[34].mxu1 }
 0x258   :  { %v3172_v24 = vmax.f32 %v3165_v38, 0.0  ;;  %v3744_v40 = vpop.f32.mrb[35].mxu1 }
 0x25a   :  { %v3175_v41 = vpack.c.bf16 %v3172_v24, %v3172_v24 }
 0x25c   :  { %v3193_v44 = vrot.slane %v3175_v41, %v4420_v49 }
 0x25e   :  { %v3194_v45 = vcombine.low %v3186_v43, %v3193_v44 }
 0x260   :  { %3196 = vst [vmem:[%s5490_s3] sm:$0x3f] %v3194_v45 }

// kernel: autoencoder_perceptual_forward.15
= control target key start
LH: loop header
LB: loop body
LE: loop exit
PB: predicated region body
PF: predicated region fallthrough
CT: control target
= control target key end

     0   :  { %v456_v36 = vlaneseq  ;;  %v4517_v37 = vmov 1983009808   ;;  %s5965_s1 = inlined_call_operand.vmem [shape: bf16[3456,256], index: 1, kind: input, shape index: {}]   ;;  %s5966_s0 = inlined_call_operand.vmem [shape: bf16[4,3456], index: 0, kind: input, shape index: {}]   ;;  %s5967_s2 = inlined_call_operand.vmem [shape: f32[1,256], index: 2, kind: input, shape index: {}]   ;;  %s5968_s3 = inlined_call_operand.vmem [shape: bf16[4,256], index: 3, kind: output, shape index: {}]  }
   0x1   :  { %v3860_v0 = vld [vmem:[%s5965_s1 + $0x4] ss:$8 sps:$4 sm:$0xff]   ;;  %v3864_v2 = vld [vmem:[%s5965_s1] ss:$8 sps:$4 sm:$0xff]   ;;  %v3866_v4 = vld [vmem:[%s5965_s1 + $0x14] ss:$8 sps:$4 sm:$0xff]   ;;  %v475_v38 = vunpack.c.l.s4 %v4517_v37 }
   0x2   :  { %v3862_v1 = vld [vmem:[%s5965_s1 + $0x704] ss:$8 sps:$4 sm:$0xff]   ;;  %2778 = vmatprep.subr.bf16.mxu1 %v3860_v0  ;;  %v3865_v3 = vld [vmem:[%s5965_s1 + $0x700] ss:$8 sps:$4 sm:$0xff]   ;;  %v3868_v5 = vld [vmem:[%s5965_s1 + $0x714] ss:$8 sps:$4 sm:$0xff]  }
   0x3   :  { %3065 = vmatprep.subr.bf16.mxu0 %v3862_v1  ;;  %2779 = vmatpush1.bf16.msra.mxu1 %v3864_v2  ;;  %v3870_v6 = vld [vmem:[%s5965_s1 + $0x10] ss:$8 sps:$4 sm:$0xff]   ;;  %v3872_v8 = vld [vmem:[%s5965_s1 + $0x24] ss:$8 sps:$4 sm:$0xff]   ;;  %v3876_v10 = vld [vmem:[%s5965_s1 + $0x20] ss:$8 sps:$4 sm:$0xff]   ;;  %v476_v43 = vunpack.c.0.s8 %v475_v38 }
   0x4   :  { %3066 = vmatpush1.bf16.msra.mxu0 %v3865_v3  ;;  %2780 = vmatprep.subr.bf16.mxu1 %v3866_v4  ;;  %v3871_v7 = vld [vmem:[%s5965_s1 + $0x710] ss:$8 sps:$4 sm:$0xff]   ;;  %v3874_v9 = vld [vmem:[%s5965_s1 + $0x724] ss:$8 sps:$4 sm:$0xff]   ;;  %v3877_v11 = vld [vmem:[%s5965_s1 + $0x720] ss:$8 sps:$4 sm:$0xff]  }
   0x5   :  { %3067 = vmatprep.subr.bf16.mxu0 %v3868_v5  ;;  %v3878_v12 = vld [vmem:[%s5965_s1 + $0x34] ss:$8 sps:$4 sm:$0xff]   ;;  %v3882_v14 = vld [vmem:[%s5965_s1 + $0x30] ss:$8 sps:$4 sm:$0xff]   ;;  %v3884_v16 = vld [vmem:[%s5965_s1 + $0x44] ss:$8 sps:$4 sm:$0xff]  }
   0x6   :  { %v3880_v13 = vld [vmem:[%s5965_s1 + $0x734] ss:$8 sps:$4 sm:$0xff]   ;;  %v3883_v15 = vld [vmem:[%s5965_s1 + $0x730] ss:$8 sps:$4 sm:$0xff]   ;;  %v3886_v17 = vld [vmem:[%s5965_s1 + $0x744] ss:$8 sps:$4 sm:$0xff]  }
   0x7   :  { %2781 = vmatpush1.bf16.msra.mxu1 %v3870_v6  ;;  %v3888_v18 = vld [vmem:[%s5965_s1 + $0x40] ss:$8 sps:$4 sm:$0xff]   ;;  %v3890_v20 = vld [vmem:[%s5965_s1 + $0x54] ss:$8 sps:$4 sm:$0xff]   ;;  %v3894_v22 = vld [vmem:[%s5965_s1 + $0x50] ss:$8 sps:$4 sm:$0xff]  }
   0x8   :  { %3068 = vmatpush1.bf16.msra.mxu0 %v3871_v7  ;;  %2782 = vmatprep.subr.bf16.mxu1 %v3872_v8  ;;  %v3889_v19 = vld [vmem:[%s5965_s1 + $0x740] ss:$8 sps:$4 sm:$0xff]   ;;  %v3892_v21 = vld [vmem:[%s5965_s1 + $0x754] ss:$8 sps:$4 sm:$0xff]   ;;  %v3895_v23 = vld [vmem:[%s5965_s1 + $0x750] ss:$8 sps:$4 sm:$0xff]  }
   0x9   :  { %3069 = vmatprep.subr.bf16.mxu0 %v3874_v9  ;;  %v3896_v24 = vld [vmem:[%s5965_s1 + $0x64] ss:$8 sps:$4 sm:$0xff]   ;;  %v3900_v26 = vld [vmem:[%s5965_s1 + $0x60] ss:$8 sps:$4 sm:$0xff]   ;;  %v3902_v28 = vld [vmem:[%s5965_s1 + $0x74] ss:$8 sps:$4 sm:$0xff]  }
   0xa   :  { %v3898_v25 = vld [vmem:[%s5965_s1 + $0x764] ss:$8 sps:$4 sm:$0xff]   ;;  %v3901_v27 = vld [vmem:[%s5965_s1 + $0x760] ss:$8 sps:$4 sm:$0xff]   ;;  %v3904_v29 = vld [vmem:[%s5965_s1 + $0x774] ss:$8 sps:$4 sm:$0xff]  }
   0xb   :  { %2783 = vmatpush1.bf16.msra.mxu1 %v3876_v10  ;;  %v3906_v30 = vld [vmem:[%s5965_s1 + $0x70] ss:$8 sps:$4 sm:$0xff]   ;;  %v3908_v32 = vld [vmem:[%s5965_s1 + $0x84] ss:$8 sps:$4 sm:$0xff]   ;;  %v3912_v34 = vld [vmem:[%s5965_s1 + $0x80] ss:$8 sps:$4 sm:$0xff]  }
   0xc   :  { %3070 = vmatpush1.bf16.msra.mxu0 %v3877_v11  ;;  %2784 = vmatprep.subr.bf16.mxu1 %v3878_v12  ;;  %v3907_v31 = vld [vmem:[%s5965_s1 + $0x770] ss:$8 sps:$4 sm:$0xff]   ;;  %v3910_v33 = vld [vmem:[%s5965_s1 + $0x784] ss:$8 sps:$4 sm:$0xff]   ;;  %v3913_v35 = vld [vmem:[%s5965_s1 + $0x780] ss:$8 sps:$4 sm:$0xff]  }
   0xd   :  { %3071 = vmatprep.subr.bf16.mxu0 %v3880_v13  ;;  %v3914_v39 = vld [vmem:[%s5965_s1 + $0x94] ss:$8 sps:$4 sm:$0xff]   ;;  %v3918_v41 = vld [vmem:[%s5965_s1 + $0x90] ss:$8 sps:$4 sm:$0xff]   ;;  %v4656_v42 = vshrl.u32 %v456_v36, 7  ;;  %v15_v52 = vld [vmem:[%s5966_s0] sm:$0xff] }
   0xe   :  { %v3916_v40 = vld [vmem:[%s5965_s1 + $0x794] ss:$8 sps:$4 sm:$0xff]   ;;  %v3919_v44 = vld [vmem:[%s5965_s1 + $0x790] ss:$8 sps:$4 sm:$0xff]   ;;  %v3920_v45 = vld [vmem:[%s5965_s1 + $0xa4] ss:$8 sps:$4 sm:$0xff]   ;;  %v473_v11 = vcombine.high %v15_v52, %v15_v52 }
   0xf   :  { %2785 = vmatpush1.bf16.msra.mxu1 %v3882_v14  ;;  %v3922_v46 = vld [vmem:[%s5965_s1 + $0x7a4] ss:$8 sps:$4 sm:$0xff]   ;;  %v3924_v47 = vld [vmem:[%s5965_s1 + $0xa0] ss:$8 sps:$4 sm:$0xff]   ;;  %v4674_v49 = vsub.s32 %v476_v43, %v4656_v42  ;;  %v3926_v50 = vld [vmem:[%s5965_s1 + $0xb4] ss:$8 sps:$4 sm:$0xff]  }
  0x10   :  { %3072 = vmatpush1.bf16.msra.mxu0 %v3883_v15  ;;  %2786 = vmatprep.subr.bf16.mxu1 %v3884_v16  ;;  %v3925_v48 = vld [vmem:[%s5965_s1 + $0x7a0] ss:$8 sps:$4 sm:$0xff]   ;;  %v3928_v51 = vld [vmem:[%s5965_s1 + $0x7b4] ss:$8 sps:$4 sm:$0xff]   ;;  %v3930_v53 = vld [vmem:[%s5965_s1 + $0xb0] ss:$8 sps:$4 sm:$0xff]  }
  0x11   :  { %3073 = vmatprep.subr.bf16.mxu0 %v3886_v17  ;;  %v480_v54 = vrot.slane %v15_v52, %v4674_v49  ;;  %v3931_v55 = vld [vmem:[%s5965_s1 + $0x7b0] ss:$8 sps:$4 sm:$0xff]   ;;  %v3932_v57 = vld [vmem:[%s5965_s1 + $0xc4] ss:$8 sps:$4 sm:$0xff]   ;;  %v3936_v62 = vld [vmem:[%s5965_s1 + $0xc0] ss:$8 sps:$4 sm:$0xff]   ;;  %v4751_v16 = vrot.slane %v473_v11, %v4674_v49 }
  0x12   :  { %v18_v56 = vld [vmem:[%s5966_s0 + $0x18] sm:$0xff]  ;;  %v3934_v58 = vld [vmem:[%s5965_s1 + $0x7c4] ss:$8 sps:$4 sm:$0xff]   ;;  %v3937_v63 = vld [vmem:[%s5965_s1 + $0x7c0] ss:$8 sps:$4 sm:$0xff]  }
  0x13   :  { %2787 = vmatpush1.bf16.msra.mxu1 %v3888_v18  ;;  %v488_v59 = vcombine.high %v480_v54, %v480_v54  ;;  %v524_v60 = vcombine.high %v18_v56, %v18_v56  ;;  %v3938_v0 = vld [vmem:[%s5965_s1 + $0xd4] ss:$8 sps:$4 sm:$0xff]   ;;  %v3942_v3 = vld [vmem:[%s5965_s1 + $0xd0] ss:$8 sps:$4 sm:$0xff]   ;;  %v3944_v5 = vld [vmem:[%s5965_s1 + $0xe4] ss:$8 sps:$4 sm:$0xff]  }
  0x14   :  { %3074 = vmatpush1.bf16.msra.mxu0 %v3889_v19  ;;  %2788 = vmatprep.subr.bf16.mxu1 %v3890_v20  ;;  %v3940_v1 = vld [vmem:[%s5965_s1 + $0x7d4] ss:$8 sps:$4 sm:$0xff]   ;;  %v3943_v4 = vld [vmem:[%s5965_s1 + $0x7d0] ss:$8 sps:$4 sm:$0xff]   ;;  %v3946_v6 = vld [vmem:[%s5965_s1 + $0x7e4] ss:$8 sps:$4 sm:$0xff]  }
  0x15   :  { %3075 = vmatprep.subr.bf16.mxu0 %v3892_v21  ;;  %2810 = vmatprep.mubr.bf16.mxu1 %v488_v59  ;;  %v538_v61 = vrot.slane %v524_v60, %v4674_v49  ;;  %v3948_v7 = vld [vmem:[%s5965_s1 + $0xe0] ss:$8 sps:$4 sm:$0xff]   ;;  %v3950_v9 = vld [vmem:[%s5965_s1 + $0xf4] ss:$8 sps:$4 sm:$0xff]   ;;  %v3954_v12 = vld [vmem:[%s5965_s1 + $0xf0] ss:$8 sps:$4 sm:$0xff]   ;;  %v489_v21 = vcombine.high %v4751_v16, %v4751_v16 }
  0x16   :  { %v3949_v8 = vld [vmem:[%s5965_s1 + $0x7e0] ss:$8 sps:$4 sm:$0xff]   ;;  %v3952_v10 = vld [vmem:[%s5965_s1 + $0x7f4] ss:$8 sps:$4 sm:$0xff]   ;;  %v3955_v13 = vld [vmem:[%s5965_s1 + $0x7f0] ss:$8 sps:$4 sm:$0xff]  }
  0x17   :  { %2789 = vmatpush1.bf16.msra.mxu1 %v3894_v22  ;;  %v540_v2 = vcombine.high %v538_v61, %v538_v61  ;;  %v3959_v14 = vld [vmem:[%s5965_s1 + $0x104] ss:$8 sps:$4 sm:$0xff]   ;;  %v3957_v17 = vld [vmem:[%s5965_s1 + $0x100] ss:$8 sps:$4 sm:$0xff]   ;;  %v3966_v19 = vld [vmem:[%s5965_s1 + $0x114] ss:$8 sps:$4 sm:$0xff]  }
  0x18   :  { %3076 = vmatpush1.bf16.msra.mxu0 %v3895_v23  ;;  %2790 = vmatprep.subr.bf16.mxu1 %v3896_v24  ;;  %v3963_v15 = vld [vmem:[%s5965_s1 + $0x804] ss:$8 sps:$4 sm:$0xff]   ;;  %v3961_v18 = vld [vmem:[%s5965_s1 + $0x800] ss:$8 sps:$4 sm:$0xff]   ;;  %v3969_v20 = vld [vmem:[%s5965_s1 + $0x814] ss:$8 sps:$4 sm:$0xff]  }
  0x19   :  { %3077 = vmatprep.subr.bf16.mxu0 %v3898_v25  ;;  %3097 = vmatprep.mubr.bf16.mxu0 %v540_v2  ;;  %v3964_v22 = vld [vmem:[%s5965_s1 + $0x110] ss:$8 sps:$4 sm:$0xff]   ;;  %v3972_v24 = vld [vmem:[%s5965_s1 + $0x124] ss:$8 sps:$4 sm:$0xff]   ;;  %v3990_v36 = vld [vmem:[%s5965_s1 + $0x154] ss:$8 sps:$4 sm:$0xff]  }
  0x1a   :  { %v3967_v23 = vld [vmem:[%s5965_s1 + $0x810] ss:$8 sps:$4 sm:$0xff]   ;;  %v3975_v25 = vld [vmem:[%s5965_s1 + $0x824] ss:$8 sps:$4 sm:$0xff]   ;;  %v3993_v37 = vld [vmem:[%s5965_s1 + $0x854] ss:$8 sps:$4 sm:$0xff]  }
  0x1b   :  { %2791 = vmatpush1.bf16.msra.mxu1 %v3900_v26  ;;  %v3970_v26 = vld [vmem:[%s5965_s1 + $0x120] ss:$8 sps:$4 sm:$0xff]   ;;  %v3988_v38 = vld [vmem:[%s5965_s1 + $0x150] ss:$8 sps:$4 sm:$0xff]   ;;  %v4029_v2 = vld [vmem:[%s5965_s1 + $0x8b4] ss:$8 sps:$4 sm:$0xff]  }
  0x1c   :  { %3078 = vmatpush1.bf16.msra.mxu0 %v3901_v27  ;;  %2792 = vmatprep.subr.bf16.mxu1 %v3902_v28  ;;  %v3973_v27 = vld [vmem:[%s5965_s1 + $0x820] ss:$8 sps:$4 sm:$0xff]   ;;  %v3978_v28 = vld [vmem:[%s5965_s1 + $0x134] ss:$8 sps:$4 sm:$0xff]   ;;  %v4003_v52 = vld [vmem:[%s5965_s1 + $0x870] ss:$8 sps:$4 sm:$0xff]  }
  0x1d   :  { %3079 = vmatprep.subr.bf16.mxu0 %v3904_v29  ;;  %v3981_v29 = vld [vmem:[%s5965_s1 + $0x834] ss:$8 sps:$4 sm:$0xff]   ;;  %v3994_v43 = vld [vmem:[%s5965_s1 + $0x160] ss:$8 sps:$4 sm:$0xff]   ;;  %v4012_v59 = vld [vmem:[%s5965_s1 + $0x190] ss:$8 sps:$4 sm:$0xff]  }
  0x1e   :  { %v4009_v56 = vld [vmem:[%s5965_s1 + $0x880] ss:$8 sps:$4 sm:$0xff]   ;;  %v4015_v60 = vld [vmem:[%s5965_s1 + $0x890] ss:$8 sps:$4 sm:$0xff]  }
  0x1f   :  { %2793 = vmatpush1.bf16.msra.mxu1 %v3906_v30  ;;  %v3976_v30 = vld [vmem:[%s5965_s1 + $0x130] ss:$8 sps:$4 sm:$0xff]  }
  0x20   :  { %3080 = vmatpush1.bf16.msra.mxu0 %v3907_v31  ;;  %2794 = vmatprep.subr.bf16.mxu1 %v3908_v32  ;;  %v3979_v31 = vld [vmem:[%s5965_s1 + $0x830] ss:$8 sps:$4 sm:$0xff]   ;;  %v3984_v32 = vld [vmem:[%s5965_s1 + $0x144] ss:$8 sps:$4 sm:$0xff]  }
  0x21   :  { %3081 = vmatprep.subr.bf16.mxu0 %v3910_v33  ;;  %v3987_v33 = vld [vmem:[%s5965_s1 + $0x844] ss:$8 sps:$4 sm:$0xff]   ;;  %v4036_v11 = vld [vmem:[%s5965_s1 + $0x1d0] ss:$8 sps:$4 sm:$0xff]  }
  0x23   :  { %2795 = vmatpush1.bf16.msra.mxu1 %v3912_v34  ;;  %v3982_v34 = vld [vmem:[%s5965_s1 + $0x140] ss:$8 sps:$4 sm:$0xff]  }
  0x24   :  { %3082 = vmatpush1.bf16.msra.mxu0 %v3913_v35  ;;  %2796 = vmatprep.subr.bf16.mxu1 %v3914_v39  ;;  %v3985_v35 = vld [vmem:[%s5965_s1 + $0x840] ss:$8 sps:$4 sm:$0xff]   ;;  %v3991_v39 = vld [vmem:[%s5965_s1 + $0x850] ss:$8 sps:$4 sm:$0xff]  }
  0x25   :  { %3083 = vmatprep.subr.bf16.mxu0 %v3916_v40  ;;  %v3996_v40 = vld [vmem:[%s5965_s1 + $0x164] ss:$8 sps:$4 sm:$0xff]  }
  0x27   :  { %2797 = vmatpush1.bf16.msra.mxu1 %v3918_v41  ;;  %v3999_v41 = vld [vmem:[%s5965_s1 + $0x864] ss:$8 sps:$4 sm:$0xff]  }
  0x28   :  { %3084 = vmatpush1.bf16.msra.mxu0 %v3919_v44  ;;  %2798 = vmatprep.subr.bf16.mxu1 %v3920_v45  ;;  %v4833_v44 = vld [vmem:[%s5966_s0 + $0x20] sm:$0xff] }
  0x29   :  { %3085 = vmatprep.subr.bf16.mxu0 %v3922_v46  ;;  %v3997_v45 = vld [vmem:[%s5965_s1 + $0x860] ss:$8 sps:$4 sm:$0xff]   ;;  %v4002_v46 = vld [vmem:[%s5965_s1 + $0x174] ss:$8 sps:$4 sm:$0xff]  }
  0x2b   :  { %2799 = vmatpush1.bf16.msra.mxu1 %v3924_v47  ;;  %v4843_v47 = vrot.slane %v4833_v44, %v4674_v49 }
  0x2c   :  { %3086 = vmatpush1.bf16.msra.mxu0 %v3925_v48  ;;  %2800 = vmatprep.subr.bf16.mxu1 %v3926_v50  ;;  %v4005_v48 = vld [vmem:[%s5965_s1 + $0x874] ss:$8 sps:$4 sm:$0xff]  }
  0x2d   :  { %3087 = vmatprep.subr.bf16.mxu0 %v3928_v51  ;;  %v556_v50 = vcombine.high %v4843_v47, %v4843_v47  ;;  %v4000_v51 = vld [vmem:[%s5965_s1 + $0x170] ss:$8 sps:$4 sm:$0xff]  }
  0x2f   :  { %2801 = vmatpush1.bf16.msra.mxu1 %v3930_v53  ;;  %v4008_v53 = vld [vmem:[%s5965_s1 + $0x184] ss:$8 sps:$4 sm:$0xff]  }
  0x30   :  { %3088 = vmatpush1.bf16.msra.mxu0 %v3931_v55  ;;  %2802 = vmatprep.subr.bf16.mxu1 %v3932_v57  ;;  %v4006_v55 = vld [vmem:[%s5965_s1 + $0x180] ss:$8 sps:$4 sm:$0xff]   ;;  %v4014_v57 = vld [vmem:[%s5965_s1 + $0x194] ss:$8 sps:$4 sm:$0xff]  }
  0x31   :  { %3089 = vmatprep.subr.bf16.mxu0 %v3934_v58  ;;  %v4017_v58 = vld [vmem:[%s5965_s1 + $0x894] ss:$8 sps:$4 sm:$0xff]  }
  0x33   :  { %2803 = vmatpush1.bf16.msra.mxu1 %v3936_v62  ;;  %v4023_v62 = vld [vmem:[%s5965_s1 + $0x8a4] ss:$8 sps:$4 sm:$0xff]  }
  0x34   :  { %3090 = vmatpush1.bf16.msra.mxu0 %v3937_v63  ;;  %2804 = vmatprep.subr.bf16.mxu1 %v3938_v0  ;;  %v4018_v63 = vld [vmem:[%s5965_s1 + $0x1a0] ss:$8 sps:$4 sm:$0xff]  }
  0x35   :  { %3091 = vmatprep.subr.bf16.mxu0 %v3940_v1  ;;  %v4021_v0 = vld [vmem:[%s5965_s1 + $0x8a0] ss:$8 sps:$4 sm:$0xff]   ;;  %v4026_v1 = vld [vmem:[%s5965_s1 + $0x1b4] ss:$8 sps:$4 sm:$0xff]  }
  0x37   :  { %2805 = vmatpush1.bf16.msra.mxu1 %v3942_v3  ;;  %v4024_v3 = vld [vmem:[%s5965_s1 + $0x1b0] ss:$8 sps:$4 sm:$0xff]  }
  0x38   :  { %3092 = vmatpush1.bf16.msra.mxu0 %v3943_v4  ;;  %2806 = vmatprep.subr.bf16.mxu1 %v3944_v5  ;;  %v4027_v4 = vld [vmem:[%s5965_s1 + $0x8b0] ss:$8 sps:$4 sm:$0xff]   ;;  %v4032_v5 = vld [vmem:[%s5965_s1 + $0x1c4] ss:$8 sps:$4 sm:$0xff]  }
  0x39   :  { %3093 = vmatprep.subr.bf16.mxu0 %v3946_v6  ;;  %v4035_v6 = vld [vmem:[%s5965_s1 + $0x8c4] ss:$8 sps:$4 sm:$0xff]  }
  0x3b   :  { %2807 = vmatpush1.bf16.msra.mxu1 %v3948_v7  ;;  %v4030_v7 = vld [vmem:[%s5965_s1 + $0x1c0] ss:$8 sps:$4 sm:$0xff]  }
  0x3c   :  { %3094 = vmatpush1.bf16.msra.mxu0 %v3949_v8  ;;  %2808 = vmatprep.subr.bf16.mxu1 %v3950_v9  ;;  %v4033_v8 = vld [vmem:[%s5965_s1 + $0x8c0] ss:$8 sps:$4 sm:$0xff]   ;;  %v4038_v9 = vld [vmem:[%s5965_s1 + $0x1d4] ss:$8 sps:$4 sm:$0xff]  }
  0x3d   :  { %3095 = vmatprep.subr.bf16.mxu0 %v3952_v10  ;;  %v4041_v10 = vld [vmem:[%s5965_s1 + $0x8d4] ss:$8 sps:$4 sm:$0xff]  }
  0x3f   :  { %2809 = vmatpush1.bf16.msra.mxu1 %v3954_v12  ;;  %v4039_v12 = vld [vmem:[%s5965_s1 + $0x8d0] ss:$8 sps:$4 sm:$0xff]  }
  0x40   :  { %3096 = vmatpush1.bf16.msra.mxu0 %v3955_v13  ;;  %2819 = vmatprep.subr.bf16.mxu1 %v3959_v14  ;;  %v4044_v13 = vld [vmem:[%s5965_s1 + $0x1e4] ss:$8 sps:$4 sm:$0xff]  }
  0x41   :  { %3106 = vmatprep.subr.bf16.mxu0 %v3963_v15  ;;  %v4047_v14 = vld [vmem:[%s5965_s1 + $0x8e4] ss:$8 sps:$4 sm:$0xff]   ;;  %v4042_v15 = vld [vmem:[%s5965_s1 + $0x1e0] ss:$8 sps:$4 sm:$0xff]  }
  0x42   :  { %2811 = vmatmul.mubr.bf16.vlgmr.msra.gmra.mrb[0].mxu1 %v480_v54  ;;  %v4011_v54 = vld [vmem:[%s5965_s1 + $0x884] ss:$8 sps:$4 sm:$0xff]  }
  0x43   :  { %3098 = vmatmul.mubr.bf16.vlgmr.msra.gmra.mrb[0].mxu0 %v538_v61  ;;  %2820 = vmatpush1.bf16.msra.mxu1 %v3957_v17  ;;  %v4020_v61 = vld [vmem:[%s5965_s1 + $0x1a4] ss:$8 sps:$4 sm:$0xff]   ;;  %v4045_v17 = vld [vmem:[%s5965_s1 + $0x8e0] ss:$8 sps:$4 sm:$0xff]  }
  0x44   :  { %3107 = vmatpush1.bf16.msra.mxu0 %v3961_v18  ;;  %2821 = vmatprep.subr.bf16.mxu1 %v3966_v19  ;;  %v4050_v18 = vld [vmem:[%s5965_s1 + $0x1f4] ss:$8 sps:$4 sm:$0xff]  }
  0x45   :  { %3108 = vmatprep.subr.bf16.mxu0 %v3969_v20  ;;  %2851 = vmatprep.mubr.bf16.mxu1 %v489_v21  ;;  %v4053_v19 = vld [vmem:[%s5965_s1 + $0x8f4] ss:$8 sps:$4 sm:$0xff]   ;;  %v541_v20 = vcombine.high %v4833_v44, %v4833_v44  ;;  %v4048_v21 = vld [vmem:[%s5965_s1 + $0x1f0] ss:$8 sps:$4 sm:$0xff]   ;;  %v4080_v44 = vld [vmem:[%s5965_s1 + $0x244] ss:$8 sps:$4 sm:$0xff]  }
  0x46   :  { %3138 = vmatprep.mubr.bf16.mxu0 %v556_v50  ;;  %v4089_v50 = vld [vmem:[%s5965_s1 + $0x954] ss:$8 sps:$4 sm:$0xff]  }
  0x47   :  { %2822 = vmatpush1.bf16.msra.mxu1 %v3964_v22  ;;  %v4051_v22 = vld [vmem:[%s5965_s1 + $0x8f0] ss:$8 sps:$4 sm:$0xff]  }
  0x48   :  { %3109 = vmatpush1.bf16.msra.mxu0 %v3967_v23  ;;  %2823 = vmatprep.subr.bf16.mxu1 %v3972_v24  ;;  %v4056_v23 = vld [vmem:[%s5965_s1 + $0x204] ss:$8 sps:$4 sm:$0xff]  }
  0x49   :  { %3110 = vmatprep.subr.bf16.mxu0 %v3975_v25  ;;  %v4059_v24 = vld [vmem:[%s5965_s1 + $0x904] ss:$8 sps:$4 sm:$0xff]   ;;  %v4961_v25 = vrot.slane %v541_v20, %v4674_v49  ;;  %v4132_v20 = vld [vmem:[%s5965_s1 + $0x2d0] ss:$8 sps:$4 sm:$0xff]  }
  0x4b   :  { %2824 = vmatpush1.bf16.msra.mxu1 %v3970_v26  ;;  %v4054_v26 = vld [vmem:[%s5965_s1 + $0x200] ss:$8 sps:$4 sm:$0xff]  }
  0x4c   :  { %3111 = vmatpush1.bf16.msra.mxu0 %v3973_v27  ;;  %2825 = vmatprep.subr.bf16.mxu1 %v3978_v28  ;;  %v4057_v27 = vld [vmem:[%s5965_s1 + $0x900] ss:$8 sps:$4 sm:$0xff]   ;;  %v4062_v28 = vld [vmem:[%s5965_s1 + $0x214] ss:$8 sps:$4 sm:$0xff]  }
  0x4d   :  { %3112 = vmatprep.subr.bf16.mxu0 %v3981_v29  ;;  %v4065_v29 = vld [vmem:[%s5965_s1 + $0x914] ss:$8 sps:$4 sm:$0xff]  }
  0x4f   :  { %2826 = vmatpush1.bf16.msra.mxu1 %v3976_v30  ;;  %v4978_v30 = vld [vmem:[%s5966_s0 + $0x8] sm:$0xff] }
  0x50   :  { %3113 = vmatpush1.bf16.msra.mxu0 %v3979_v31  ;;  %2827 = vmatprep.subr.bf16.mxu1 %v3984_v32  ;;  %v4982_v31 = vrot.slane %v4978_v30, %v4674_v49  ;;  %v557_v32 = vcombine.high %v4961_v25, %v4961_v25 }
  0x51   :  { %3114 = vmatprep.subr.bf16.mxu0 %v3987_v33  ;;  %v4060_v33 = vld [vmem:[%s5965_s1 + $0x210] ss:$8 sps:$4 sm:$0xff]  }
  0x53   :  { %2828 = vmatpush1.bf16.msra.mxu1 %v3982_v34  ;;  %v4063_v34 = vld [vmem:[%s5965_s1 + $0x910] ss:$8 sps:$4 sm:$0xff]  }
  0x54   :  { %3115 = vmatpush1.bf16.msra.mxu0 %v3985_v35  ;;  %2829 = vmatprep.subr.bf16.mxu1 %v3990_v36  ;;  %v4068_v35 = vld [vmem:[%s5965_s1 + $0x224] ss:$8 sps:$4 sm:$0xff]   ;;  %v505_v36 = vcombine.high %v4982_v31, %v4982_v31 }
  0x55   :  { %3116 = vmatprep.subr.bf16.mxu0 %v3993_v37  ;;  %v4066_v37 = vld [vmem:[%s5965_s1 + $0x220] ss:$8 sps:$4 sm:$0xff]  }
  0x57   :  { %2830 = vmatpush1.bf16.msra.mxu1 %v3988_v38  ;;  %v4069_v38 = vld [vmem:[%s5965_s1 + $0x920] ss:$8 sps:$4 sm:$0xff]  }
  0x58   :  { %3117 = vmatpush1.bf16.msra.mxu0 %v3991_v39  ;;  %2831 = vmatprep.subr.bf16.mxu1 %v3996_v40  ;;  %v4074_v39 = vld [vmem:[%s5965_s1 + $0x234] ss:$8 sps:$4 sm:$0xff]  }
  0x59   :  { %3118 = vmatprep.subr.bf16.mxu0 %v3999_v41  ;;  %v4077_v40 = vld [vmem:[%s5965_s1 + $0x934] ss:$8 sps:$4 sm:$0xff]   ;;  %v4072_v41 = vld [vmem:[%s5965_s1 + $0x230] ss:$8 sps:$4 sm:$0xff]  }
  0x5b   :  { %2832 = vmatpush1.bf16.msra.mxu1 %v3994_v43  ;;  %v4075_v43 = vld [vmem:[%s5965_s1 + $0x930] ss:$8 sps:$4 sm:$0xff]  }
  0x5c   :  { %3119 = vmatpush1.bf16.msra.mxu0 %v3997_v45  ;;  %2833 = vmatprep.subr.bf16.mxu1 %v4002_v46  ;;  %v4083_v45 = vld [vmem:[%s5965_s1 + $0x944] ss:$8 sps:$4 sm:$0xff]   ;;  %v4078_v46 = vld [vmem:[%s5965_s1 + $0x240] ss:$8 sps:$4 sm:$0xff]  }
  0x5d   :  { %3120 = vmatprep.subr.bf16.mxu0 %v4005_v48  ;;  %v4086_v48 = vld [vmem:[%s5965_s1 + $0x254] ss:$8 sps:$4 sm:$0xff]  }
  0x5f   :  { %2834 = vmatpush1.bf16.msra.mxu1 %v4000_v51  ;;  %v4084_v51 = vld [vmem:[%s5965_s1 + $0x250] ss:$8 sps:$4 sm:$0xff]  }
  0x60   :  { %3121 = vmatpush1.bf16.msra.mxu0 %v4003_v52  ;;  %2835 = vmatprep.subr.bf16.mxu1 %v4008_v53  ;;  %v4087_v52 = vld [vmem:[%s5965_s1 + $0x950] ss:$8 sps:$4 sm:$0xff]   ;;  %v4092_v53 = vld [vmem:[%s5965_s1 + $0x264] ss:$8 sps:$4 sm:$0xff]  }
  0x61   :  { %3122 = vmatprep.subr.bf16.mxu0 %v4011_v54  ;;  %v4095_v54 = vld [vmem:[%s5965_s1 + $0x964] ss:$8 sps:$4 sm:$0xff]  }
  0x63   :  { %2836 = vmatpush1.bf16.msra.mxu1 %v4006_v55  ;;  %v4090_v55 = vld [vmem:[%s5965_s1 + $0x260] ss:$8 sps:$4 sm:$0xff]  }
  0x64   :  { %3123 = vmatpush1.bf16.msra.mxu0 %v4009_v56  ;;  %2837 = vmatprep.subr.bf16.mxu1 %v4014_v57  ;;  %v4093_v56 = vld [vmem:[%s5965_s1 + $0x960] ss:$8 sps:$4 sm:$0xff]   ;;  %v4098_v57 = vld [vmem:[%s5965_s1 + $0x274] ss:$8 sps:$4 sm:$0xff]  }
  0x65   :  { %3124 = vmatprep.subr.bf16.mxu0 %v4017_v58  ;;  %v4101_v58 = vld [vmem:[%s5965_s1 + $0x974] ss:$8 sps:$4 sm:$0xff]  }
  0x67   :  { %2838 = vmatpush1.bf16.msra.mxu1 %v4012_v59  ;;  %v4096_v59 = vld [vmem:[%s5965_s1 + $0x270] ss:$8 sps:$4 sm:$0xff]  }
  0x68   :  { %3125 = vmatpush1.bf16.msra.mxu0 %v4015_v60  ;;  %2839 = vmatprep.subr.bf16.mxu1 %v4020_v61  ;;  %v4099_v60 = vld [vmem:[%s5965_s1 + $0x970] ss:$8 sps:$4 sm:$0xff]   ;;  %v4104_v61 = vld [vmem:[%s5965_s1 + $0x284] ss:$8 sps:$4 sm:$0xff]  }
  0x69   :  { %3126 = vmatprep.subr.bf16.mxu0 %v4023_v62  ;;  %v4107_v62 = vld [vmem:[%s5965_s1 + $0x984] ss:$8 sps:$4 sm:$0xff]  }
  0x6b   :  { %2840 = vmatpush1.bf16.msra.mxu1 %v4018_v63  ;;  %v4102_v63 = vld [vmem:[%s5965_s1 + $0x280] ss:$8 sps:$4 sm:$0xff]  }
  0x6c   :  { %3127 = vmatpush1.bf16.msra.mxu0 %v4021_v0  ;;  %2841 = vmatprep.subr.bf16.mxu1 %v4026_v1  ;;  %v4105_v0 = vld [vmem:[%s5965_s1 + $0x980] ss:$8 sps:$4 sm:$0xff]   ;;  %v4110_v1 = vld [vmem:[%s5965_s1 + $0x294] ss:$8 sps:$4 sm:$0xff]  }
  0x6d   :  { %3128 = vmatprep.subr.bf16.mxu0 %v4029_v2  ;;  %v4113_v2 = vld [vmem:[%s5965_s1 + $0x994] ss:$8 sps:$4 sm:$0xff]  }
  0x6f   :  { %2842 = vmatpush1.bf16.msra.mxu1 %v4024_v3  ;;  %v4108_v3 = vld [vmem:[%s5965_s1 + $0x290] ss:$8 sps:$4 sm:$0xff]  }
  0x70   :  { %3129 = vmatpush1.bf16.msra.mxu0 %v4027_v4  ;;  %2843 = vmatprep.subr.bf16.mxu1 %v4032_v5  ;;  %v4111_v4 = vld [vmem:[%s5965_s1 + $0x990] ss:$8 sps:$4 sm:$0xff]   ;;  %v4116_v5 = vld [vmem:[%s5965_s1 + $0x2a4] ss:$8 sps:$4 sm:$0xff]  }
  0x71   :  { %3130 = vmatprep.subr.bf16.mxu0 %v4035_v6  ;;  %v4119_v6 = vld [vmem:[%s5965_s1 + $0x9a4] ss:$8 sps:$4 sm:$0xff]  }
  0x73   :  { %2844 = vmatpush1.bf16.msra.mxu1 %v4030_v7  ;;  %v4114_v7 = vld [vmem:[%s5965_s1 + $0x2a0] ss:$8 sps:$4 sm:$0xff]  }
  0x74   :  { %3131 = vmatpush1.bf16.msra.mxu0 %v4033_v8  ;;  %2845 = vmatprep.subr.bf16.mxu1 %v4038_v9  ;;  %v4117_v8 = vld [vmem:[%s5965_s1 + $0x9a0] ss:$8 sps:$4 sm:$0xff]   ;;  %v4122_v9 = vld [vmem:[%s5965_s1 + $0x2b4] ss:$8 sps:$4 sm:$0xff]  }
  0x75   :  { %3132 = vmatprep.subr.bf16.mxu0 %v4041_v10  ;;  %v4125_v10 = vld [vmem:[%s5965_s1 + $0x9b4] ss:$8 sps:$4 sm:$0xff]  }
  0x77   :  { %2846 = vmatpush1.bf16.msra.mxu1 %v4036_v11  ;;  %v4120_v11 = vld [vmem:[%s5965_s1 + $0x2b0] ss:$8 sps:$4 sm:$0xff]  }
  0x78   :  { %3133 = vmatpush1.bf16.msra.mxu0 %v4039_v12  ;;  %2847 = vmatprep.subr.bf16.mxu1 %v4044_v13  ;;  %v4123_v12 = vld [vmem:[%s5965_s1 + $0x9b0] ss:$8 sps:$4 sm:$0xff]   ;;  %v4128_v13 = vld [vmem:[%s5965_s1 + $0x2c4] ss:$8 sps:$4 sm:$0xff]  }
  0x79   :  { %3134 = vmatprep.subr.bf16.mxu0 %v4047_v14  ;;  %v4131_v14 = vld [vmem:[%s5965_s1 + $0x9c4] ss:$8 sps:$4 sm:$0xff]  }
  0x7b   :  { %2848 = vmatpush1.bf16.msra.mxu1 %v4042_v15  ;;  %v4126_v15 = vld [vmem:[%s5965_s1 + $0x2c0] ss:$8 sps:$4 sm:$0xff]  }
  0x7c   :  { %3135 = vmatpush1.bf16.msra.mxu0 %v4045_v17  ;;  %2849 = vmatprep.subr.bf16.mxu1 %v4050_v18  ;;  %v4129_v17 = vld [vmem:[%s5965_s1 + $0x9c0] ss:$8 sps:$4 sm:$0xff]   ;;  %v4134_v18 = vld [vmem:[%s5965_s1 + $0x2d4] ss:$8 sps:$4 sm:$0xff]  }
  0x7d   :  { %3136 = vmatprep.subr.bf16.mxu0 %v4053_v19  ;;  %v4137_v19 = vld [vmem:[%s5965_s1 + $0x9d4] ss:$8 sps:$4 sm:$0xff]  }
  0x7f   :  { %2850 = vmatpush1.bf16.msra.mxu1 %v4048_v21  ;;  %v4135_v21 = vld [vmem:[%s5965_s1 + $0x9d0] ss:$8 sps:$4 sm:$0xff]  }
  0x80   :  { %3137 = vmatpush1.bf16.msra.mxu0 %v4051_v22  ;;  %2860 = vmatprep.subr.bf16.mxu1 %v4056_v23  ;;  %v4140_v22 = vld [vmem:[%s5965_s1 + $0x2e4] ss:$8 sps:$4 sm:$0xff]  }
  0x81   :  { %3147 = vmatprep.subr.bf16.mxu0 %v4059_v24  ;;  %v4143_v23 = vld [vmem:[%s5965_s1 + $0x9e4] ss:$8 sps:$4 sm:$0xff]   ;;  %v4138_v24 = vld [vmem:[%s5965_s1 + $0x2e0] ss:$8 sps:$4 sm:$0xff]  }
  0x82   :  { %2852 = vmatmul.mubr.bf16.vlgmr.msra.gmra.mrb[0].mxu1 %v4751_v16  ;;  %v4071_v16 = vld [vmem:[%s5965_s1 + $0x924] ss:$8 sps:$4 sm:$0xff]  }
  0x83   :  { %3139 = vmatmul.mubr.bf16.vlgmr.msra.gmra.mrb[0].mxu0 %v4843_v47  ;;  %2861 = vmatpush1.bf16.msra.mxu1 %v4054_v26  ;;  %v4081_v47 = vld [vmem:[%s5965_s1 + $0x940] ss:$8 sps:$4 sm:$0xff]  }
  0x84   :  { %3148 = vmatpush1.bf16.msra.mxu0 %v4057_v27  ;;  %2862 = vmatprep.subr.bf16.mxu1 %v4062_v28  ;;  %v4141_v26 = vld [vmem:[%s5965_s1 + $0x9e0] ss:$8 sps:$4 sm:$0xff]   ;;  %v4146_v27 = vld [vmem:[%s5965_s1 + $0x2f4] ss:$8 sps:$4 sm:$0xff]  }
  0x85   :  { %3149 = vmatprep.subr.bf16.mxu0 %v4065_v29  ;;  %2892 = vmatprep.mubr.bf16.mxu1 %v505_v36  ;;  %v4149_v28 = vld [vmem:[%s5965_s1 + $0x9f4] ss:$8 sps:$4 sm:$0xff]   ;;  %v4144_v29 = vld [vmem:[%s5965_s1 + $0x2f0] ss:$8 sps:$4 sm:$0xff]  }
  0x86   :  { %3179 = vmatprep.mubr.bf16.mxu0 %v557_v32  ;;  %v490_v32 = vcombine.high %v4978_v30, %v4978_v30  ;;  %v4156_v30 = vld [vmem:[%s5965_s1 + $0xa04] ss:$8 sps:$4 sm:$0xff]  }
  0x87   :  { %2863 = vmatpush1.bf16.msra.mxu1 %v4060_v33  ;;  %v5166_v33 = vld [vmem:[%s5966_s0 + $0x28] sm:$0xff] }
  0x88   :  { %3150 = vmatpush1.bf16.msra.mxu0 %v4063_v34  ;;  %2864 = vmatprep.subr.bf16.mxu1 %v4068_v35  ;;  %v4147_v34 = vld [vmem:[%s5965_s1 + $0x9f0] ss:$8 sps:$4 sm:$0xff]   ;;  %v4152_v35 = vld [vmem:[%s5965_s1 + $0x304] ss:$8 sps:$4 sm:$0xff]   ;;  %v5178_v36 = vrot.slane %v490_v32, %v4674_v49 }
  0x89   :  { %3151 = vmatprep.subr.bf16.mxu0 %v4071_v16  ;;  %v5182_v16 = vrot.slane %v5166_v33, %v4674_v49  ;;  %v4232_v32 = vld [vmem:[%s5965_s1 + $0xad0] ss:$8 sps:$4 sm:$0xff]  }
  0x8b   :  { %2865 = vmatpush1.bf16.msra.mxu1 %v4066_v37  ;;  %v4150_v37 = vld [vmem:[%s5965_s1 + $0x300] ss:$8 sps:$4 sm:$0xff]  }
  0x8c   :  { %3152 = vmatpush1.bf16.msra.mxu0 %v4069_v38  ;;  %2866 = vmatprep.subr.bf16.mxu1 %v4074_v39  ;;  %v4154_v38 = vld [vmem:[%s5965_s1 + $0xa00] ss:$8 sps:$4 sm:$0xff]   ;;  %v4159_v39 = vld [vmem:[%s5965_s1 + $0x314] ss:$8 sps:$4 sm:$0xff]  }
  0x8d   :  { %3153 = vmatprep.subr.bf16.mxu0 %v4077_v40  ;;  %v4162_v40 = vld [vmem:[%s5965_s1 + $0xa14] ss:$8 sps:$4 sm:$0xff]  }
  0x8f   :  { %2867 = vmatpush1.bf16.msra.mxu1 %v4072_v41  ;;  %v506_v41 = vcombine.high %v5178_v36, %v5178_v36 }
  0x90   :  { %3154 = vmatpush1.bf16.msra.mxu0 %v4075_v43  ;;  %2868 = vmatprep.subr.bf16.mxu1 %v4080_v44  ;;  %v573_v43 = vcombine.high %v5182_v16, %v5182_v16  ;;  %v4157_v44 = vld [vmem:[%s5965_s1 + $0x310] ss:$8 sps:$4 sm:$0xff]  }
  0x91   :  { %3155 = vmatprep.subr.bf16.mxu0 %v4083_v45  ;;  %v4160_v45 = vld [vmem:[%s5965_s1 + $0xa10] ss:$8 sps:$4 sm:$0xff]  }
  0x93   :  { %2869 = vmatpush1.bf16.msra.mxu1 %v4078_v46  ;;  %v4165_v46 = vld [vmem:[%s5965_s1 + $0x324] ss:$8 sps:$4 sm:$0xff]  }
  0x94   :  { %3156 = vmatpush1.bf16.msra.mxu0 %v4081_v47  ;;  %2870 = vmatprep.subr.bf16.mxu1 %v4086_v48  ;;  %v4166_v47 = vld [vmem:[%s5965_s1 + $0xa20] ss:$8 sps:$4 sm:$0xff]   ;;  %v4171_v48 = vld [vmem:[%s5965_s1 + $0x334] ss:$8 sps:$4 sm:$0xff]  }
  0x95   :  { %3157 = vmatprep.subr.bf16.mxu0 %v4089_v50  ;;  %v4174_v50 = vld [vmem:[%s5965_s1 + $0xa34] ss:$8 sps:$4 sm:$0xff]  }
  0x97   :  { %2871 = vmatpush1.bf16.msra.mxu1 %v4084_v51  ;;  %v4169_v51 = vld [vmem:[%s5965_s1 + $0x330] ss:$8 sps:$4 sm:$0xff]  }
  0x98   :  { %3158 = vmatpush1.bf16.msra.mxu0 %v4087_v52  ;;  %2872 = vmatprep.subr.bf16.mxu1 %v4092_v53  ;;  %v4172_v52 = vld [vmem:[%s5965_s1 + $0xa30] ss:$8 sps:$4 sm:$0xff]   ;;  %v4177_v53 = vld [vmem:[%s5965_s1 + $0x344] ss:$8 sps:$4 sm:$0xff]  }
  0x99   :  { %3159 = vmatprep.subr.bf16.mxu0 %v4095_v54  ;;  %v4180_v54 = vld [vmem:[%s5965_s1 + $0xa44] ss:$8 sps:$4 sm:$0xff]  }
  0x9b   :  { %2873 = vmatpush1.bf16.msra.mxu1 %v4090_v55  ;;  %v4175_v55 = vld [vmem:[%s5965_s1 + $0x340] ss:$8 sps:$4 sm:$0xff]  }
  0x9c   :  { %3160 = vmatpush1.bf16.msra.mxu0 %v4093_v56  ;;  %2874 = vmatprep.subr.bf16.mxu1 %v4098_v57  ;;  %v4178_v56 = vld [vmem:[%s5965_s1 + $0xa40] ss:$8 sps:$4 sm:$0xff]   ;;  %v4183_v57 = vld [vmem:[%s5965_s1 + $0x354] ss:$8 sps:$4 sm:$0xff]  }
  0x9d   :  { %3161 = vmatprep.subr.bf16.mxu0 %v4101_v58  ;;  %v4186_v58 = vld [vmem:[%s5965_s1 + $0xa54] ss:$8 sps:$4 sm:$0xff]  }
  0x9f   :  { %2875 = vmatpush1.bf16.msra.mxu1 %v4096_v59  ;;  %v4181_v59 = vld [vmem:[%s5965_s1 + $0x350] ss:$8 sps:$4 sm:$0xff]  }
  0xa0   :  { %3162 = vmatpush1.bf16.msra.mxu0 %v4099_v60  ;;  %2876 = vmatprep.subr.bf16.mxu1 %v4104_v61  ;;  %v4184_v60 = vld [vmem:[%s5965_s1 + $0xa50] ss:$8 sps:$4 sm:$0xff]   ;;  %v4189_v61 = vld [vmem:[%s5965_s1 + $0x364] ss:$8 sps:$4 sm:$0xff]  }
  0xa1   :  { %3163 = vmatprep.subr.bf16.mxu0 %v4107_v62  ;;  %v4192_v62 = vld [vmem:[%s5965_s1 + $0xa64] ss:$8 sps:$4 sm:$0xff]  }
  0xa3   :  { %2877 = vmatpush1.bf16.msra.mxu1 %v4102_v63  ;;  %v4187_v63 = vld [vmem:[%s5965_s1 + $0x360] ss:$8 sps:$4 sm:$0xff]  }
  0xa4   :  { %3164 = vmatpush1.bf16.msra.mxu0 %v4105_v0  ;;  %2878 = vmatprep.subr.bf16.mxu1 %v4110_v1  ;;  %v4190_v0 = vld [vmem:[%s5965_s1 + $0xa60] ss:$8 sps:$4 sm:$0xff]   ;;  %v4195_v1 = vld [vmem:[%s5965_s1 + $0x374] ss:$8 sps:$4 sm:$0xff]  }
  0xa5   :  { %3165 = vmatprep.subr.bf16.mxu0 %v4113_v2  ;;  %v4198_v2 = vld [vmem:[%s5965_s1 + $0xa74] ss:$8 sps:$4 sm:$0xff]  }
  0xa7   :  { %2879 = vmatpush1.bf16.msra.mxu1 %v4108_v3  ;;  %v4193_v3 = vld [vmem:[%s5965_s1 + $0x370] ss:$8 sps:$4 sm:$0xff]  }
  0xa8   :  { %3166 = vmatpush1.bf16.msra.mxu0 %v4111_v4  ;;  %2880 = vmatprep.subr.bf16.mxu1 %v4116_v5  ;;  %v4196_v4 = vld [vmem:[%s5965_s1 + $0xa70] ss:$8 sps:$4 sm:$0xff]   ;;  %v4201_v5 = vld [vmem:[%s5965_s1 + $0x384] ss:$8 sps:$4 sm:$0xff]  }
  0xa9   :  { %3167 = vmatprep.subr.bf16.mxu0 %v4119_v6  ;;  %v4204_v6 = vld [vmem:[%s5965_s1 + $0xa84] ss:$8 sps:$4 sm:$0xff]  }
  0xab   :  { %2881 = vmatpush1.bf16.msra.mxu1 %v4114_v7  ;;  %v4199_v7 = vld [vmem:[%s5965_s1 + $0x380] ss:$8 sps:$4 sm:$0xff]  }
  0xac   :  { %3168 = vmatpush1.bf16.msra.mxu0 %v4117_v8  ;;  %2882 = vmatprep.subr.bf16.mxu1 %v4122_v9  ;;  %v4202_v8 = vld [vmem:[%s5965_s1 + $0xa80] ss:$8 sps:$4 sm:$0xff]   ;;  %v4207_v9 = vld [vmem:[%s5965_s1 + $0x394] ss:$8 sps:$4 sm:$0xff]  }
  0xad   :  { %3169 = vmatprep.subr.bf16.mxu0 %v4125_v10  ;;  %v4210_v10 = vld [vmem:[%s5965_s1 + $0xa94] ss:$8 sps:$4 sm:$0xff]  }
  0xaf   :  { %2883 = vmatpush1.bf16.msra.mxu1 %v4120_v11  ;;  %v4205_v11 = vld [vmem:[%s5965_s1 + $0x390] ss:$8 sps:$4 sm:$0xff]  }
  0xb0   :  { %3170 = vmatpush1.bf16.msra.mxu0 %v4123_v12  ;;  %2884 = vmatprep.subr.bf16.mxu1 %v4128_v13  ;;  %v4208_v12 = vld [vmem:[%s5965_s1 + $0xa90] ss:$8 sps:$4 sm:$0xff]   ;;  %v4213_v13 = vld [vmem:[%s5965_s1 + $0x3a4] ss:$8 sps:$4 sm:$0xff]  }
  0xb1   :  { %3171 = vmatprep.subr.bf16.mxu0 %v4131_v14  ;;  %v4216_v14 = vld [vmem:[%s5965_s1 + $0xaa4] ss:$8 sps:$4 sm:$0xff]  }
  0xb3   :  { %2885 = vmatpush1.bf16.msra.mxu1 %v4126_v15  ;;  %v4211_v15 = vld [vmem:[%s5965_s1 + $0x3a0] ss:$8 sps:$4 sm:$0xff]  }
  0xb4   :  { %3172 = vmatpush1.bf16.msra.mxu0 %v4129_v17  ;;  %2886 = vmatprep.subr.bf16.mxu1 %v4134_v18  ;;  %v4214_v17 = vld [vmem:[%s5965_s1 + $0xaa0] ss:$8 sps:$4 sm:$0xff]   ;;  %v4219_v18 = vld [vmem:[%s5965_s1 + $0x3b4] ss:$8 sps:$4 sm:$0xff]  }
  0xb5   :  { %3173 = vmatprep.subr.bf16.mxu0 %v4137_v19  ;;  %v4222_v19 = vld [vmem:[%s5965_s1 + $0xab4] ss:$8 sps:$4 sm:$0xff]  }
  0xb7   :  { %2887 = vmatpush1.bf16.msra.mxu1 %v4132_v20  ;;  %v4217_v20 = vld [vmem:[%s5965_s1 + $0x3b0] ss:$8 sps:$4 sm:$0xff]  }
  0xb8   :  { %3174 = vmatpush1.bf16.msra.mxu0 %v4135_v21  ;;  %2888 = vmatprep.subr.bf16.mxu1 %v4140_v22  ;;  %v4220_v21 = vld [vmem:[%s5965_s1 + $0xab0] ss:$8 sps:$4 sm:$0xff]   ;;  %v4225_v22 = vld [vmem:[%s5965_s1 + $0x3c4] ss:$8 sps:$4 sm:$0xff]  }
  0xb9   :  { %3175 = vmatprep.subr.bf16.mxu0 %v4143_v23  ;;  %v4228_v23 = vld [vmem:[%s5965_s1 + $0xac4] ss:$8 sps:$4 sm:$0xff]  }
  0xbb   :  { %2889 = vmatpush1.bf16.msra.mxu1 %v4138_v24  ;;  %v4223_v24 = vld [vmem:[%s5965_s1 + $0x3c0] ss:$8 sps:$4 sm:$0xff]  }
  0xbc   :  { %3176 = vmatpush1.bf16.msra.mxu0 %v4141_v26  ;;  %2890 = vmatprep.subr.bf16.mxu1 %v4146_v27  ;;  %v4226_v26 = vld [vmem:[%s5965_s1 + $0xac0] ss:$8 sps:$4 sm:$0xff]   ;;  %v4231_v27 = vld [vmem:[%s5965_s1 + $0x3d4] ss:$8 sps:$4 sm:$0xff]  }
  0xbd   :  { %3177 = vmatprep.subr.bf16.mxu0 %v4149_v28  ;;  %v4234_v28 = vld [vmem:[%s5965_s1 + $0xad4] ss:$8 sps:$4 sm:$0xff]  }
  0xbf   :  { %2891 = vmatpush1.bf16.msra.mxu1 %v4144_v29  ;;  %v4229_v29 = vld [vmem:[%s5965_s1 + $0x3d0] ss:$8 sps:$4 sm:$0xff]  }
  0xc0   :  { %3178 = vmatpush1.bf16.msra.mxu0 %v4147_v34  ;;  %2901 = vmatprep.subr.bf16.mxu1 %v4152_v35  ;;  %v4237_v34 = vld [vmem:[%s5965_s1 + $0x3e4] ss:$8 sps:$4 sm:$0xff]  }
  0xc1   :  { %3188 = vmatprep.subr.bf16.mxu0 %v4156_v30  ;;  %v4240_v35 = vld [vmem:[%s5965_s1 + $0xae4] ss:$8 sps:$4 sm:$0xff]   ;;  %v4235_v30 = vld [vmem:[%s5965_s1 + $0x3e0] ss:$8 sps:$4 sm:$0xff]  }
  0xc2   :  { %2893 = vmatmul.mubr.bf16.vlgmr.msra.gmra.mrb[0].mxu1 %v4982_v31  ;;  %v4163_v31 = vld [vmem:[%s5965_s1 + $0x320] ss:$8 sps:$4 sm:$0xff]  }
  0xc3   :  { %3180 = vmatmul.mubr.bf16.vlgmr.msra.gmra.mrb[0].mxu0 %v4961_v25  ;;  %2902 = vmatpush1.bf16.msra.mxu1 %v4150_v37  ;;  %v4168_v25 = vld [vmem:[%s5965_s1 + $0xa24] ss:$8 sps:$4 sm:$0xff]   ;;  %v4238_v37 = vld [vmem:[%s5965_s1 + $0xae0] ss:$8 sps:$4 sm:$0xff]  }
  0xc4   :  { %3189 = vmatpush1.bf16.msra.mxu0 %v4154_v38  ;;  %2903 = vmatprep.subr.bf16.mxu1 %v4159_v39  ;;  %v4243_v38 = vld [vmem:[%s5965_s1 + $0x3f4] ss:$8 sps:$4 sm:$0xff]  }
  0xc5   :  { %3190 = vmatprep.subr.bf16.mxu0 %v4162_v40  ;;  %2933 = vmatprep.mubr.bf16.mxu1 %v506_v41  ;;  %v4246_v39 = vld [vmem:[%s5965_s1 + $0xaf4] ss:$8 sps:$4 sm:$0xff]   ;;  %v558_v40 = vcombine.high %v5166_v33, %v5166_v33  ;;  %v4250_v33 = vld [vmem:[%s5965_s1 + $0x404] ss:$8 sps:$4 sm:$0xff]  }
  0xc6   :  { %3220 = vmatprep.mubr.bf16.mxu0 %v573_v43  ;;  %v5375_v41 = vld [vmem:[%s5966_s0 + $0x10] sm:$0xff] }
  0xc7   :  { %2904 = vmatpush1.bf16.msra.mxu1 %v4157_v44  ;;  %v4241_v43 = vld [vmem:[%s5965_s1 + $0x3f0] ss:$8 sps:$4 sm:$0xff]  }
  0xc8   :  { %3191 = vmatpush1.bf16.msra.mxu0 %v4160_v45  ;;  %2905 = vmatprep.subr.bf16.mxu1 %v4165_v46  ;;  %v4244_v44 = vld [vmem:[%s5965_s1 + $0xaf0] ss:$8 sps:$4 sm:$0xff]   ;;  %v4253_v45 = vld [vmem:[%s5965_s1 + $0xb04] ss:$8 sps:$4 sm:$0xff]   ;;  %v5391_v46 = vrot.slane %v5375_v41, %v4674_v49 }
  0xc9   :  { %3192 = vmatprep.subr.bf16.mxu0 %v4168_v25  ;;  %v5394_v25 = vrot.slane %v558_v40, %v4674_v49  ;;  %v4326_v40 = vld [vmem:[%s5965_s1 + $0x4d0] ss:$8 sps:$4 sm:$0xff]  }
  0xcb   :  { %2906 = vmatpush1.bf16.msra.mxu1 %v4163_v31  ;;  %v4248_v31 = vld [vmem:[%s5965_s1 + $0x400] ss:$8 sps:$4 sm:$0xff]  }
  0xcc   :  { %3193 = vmatpush1.bf16.msra.mxu0 %v4166_v47  ;;  %2907 = vmatprep.subr.bf16.mxu1 %v4171_v48  ;;  %v4251_v47 = vld [vmem:[%s5965_s1 + $0xb00] ss:$8 sps:$4 sm:$0xff]   ;;  %v4256_v48 = vld [vmem:[%s5965_s1 + $0x414] ss:$8 sps:$4 sm:$0xff]  }
  0xcd   :  { %3194 = vmatprep.subr.bf16.mxu0 %v4174_v50  ;;  %v4259_v50 = vld [vmem:[%s5965_s1 + $0xb14] ss:$8 sps:$4 sm:$0xff]  }
  0xcf   :  { %2908 = vmatpush1.bf16.msra.mxu1 %v4169_v51  ;;  %v522_v51 = vcombine.high %v5391_v46, %v5391_v46 }
  0xd0   :  { %3195 = vmatpush1.bf16.msra.mxu0 %v4172_v52  ;;  %2909 = vmatprep.subr.bf16.mxu1 %v4177_v53  ;;  %v574_v52 = vcombine.high %v5394_v25, %v5394_v25  ;;  %v4254_v53 = vld [vmem:[%s5965_s1 + $0x410] ss:$8 sps:$4 sm:$0xff]  }
  0xd1   :  { %3196 = vmatprep.subr.bf16.mxu0 %v4180_v54  ;;  %v4257_v54 = vld [vmem:[%s5965_s1 + $0xb10] ss:$8 sps:$4 sm:$0xff]  }
  0xd3   :  { %2910 = vmatpush1.bf16.msra.mxu1 %v4175_v55  ;;  %v4262_v55 = vld [vmem:[%s5965_s1 + $0x424] ss:$8 sps:$4 sm:$0xff]  }
  0xd4   :  { %3197 = vmatpush1.bf16.msra.mxu0 %v4178_v56  ;;  %2911 = vmatprep.subr.bf16.mxu1 %v4183_v57  ;;  %v4263_v56 = vld [vmem:[%s5965_s1 + $0xb20] ss:$8 sps:$4 sm:$0xff]   ;;  %v4268_v57 = vld [vmem:[%s5965_s1 + $0x434] ss:$8 sps:$4 sm:$0xff]  }
  0xd5   :  { %3198 = vmatprep.subr.bf16.mxu0 %v4186_v58  ;;  %v4271_v58 = vld [vmem:[%s5965_s1 + $0xb34] ss:$8 sps:$4 sm:$0xff]  }
  0xd7   :  { %2912 = vmatpush1.bf16.msra.mxu1 %v4181_v59  ;;  %v4266_v59 = vld [vmem:[%s5965_s1 + $0x430] ss:$8 sps:$4 sm:$0xff]  }
  0xd8   :  { %3199 = vmatpush1.bf16.msra.mxu0 %v4184_v60  ;;  %2913 = vmatprep.subr.bf16.mxu1 %v4189_v61  ;;  %v4269_v60 = vld [vmem:[%s5965_s1 + $0xb30] ss:$8 sps:$4 sm:$0xff]   ;;  %v4274_v61 = vld [vmem:[%s5965_s1 + $0x444] ss:$8 sps:$4 sm:$0xff]  }
  0xd9   :  { %3200 = vmatprep.subr.bf16.mxu0 %v4192_v62  ;;  %v4277_v62 = vld [vmem:[%s5965_s1 + $0xb44] ss:$8 sps:$4 sm:$0xff]  }
  0xdb   :  { %2914 = vmatpush1.bf16.msra.mxu1 %v4187_v63  ;;  %v4272_v63 = vld [vmem:[%s5965_s1 + $0x440] ss:$8 sps:$4 sm:$0xff]  }
  0xdc   :  { %3201 = vmatpush1.bf16.msra.mxu0 %v4190_v0  ;;  %2915 = vmatprep.subr.bf16.mxu1 %v4195_v1  ;;  %v4275_v0 = vld [vmem:[%s5965_s1 + $0xb40] ss:$8 sps:$4 sm:$0xff]   ;;  %v4280_v1 = vld [vmem:[%s5965_s1 + $0x454] ss:$8 sps:$4 sm:$0xff]  }
  0xdd   :  { %3202 = vmatprep.subr.bf16.mxu0 %v4198_v2  ;;  %v4283_v2 = vld [vmem:[%s5965_s1 + $0xb54] ss:$8 sps:$4 sm:$0xff]  }
  0xdf   :  { %2916 = vmatpush1.bf16.msra.mxu1 %v4193_v3  ;;  %v4278_v3 = vld [vmem:[%s5965_s1 + $0x450] ss:$8 sps:$4 sm:$0xff]  }
  0xe0   :  { %3203 = vmatpush1.bf16.msra.mxu0 %v4196_v4  ;;  %2917 = vmatprep.subr.bf16.mxu1 %v4201_v5  ;;  %v4281_v4 = vld [vmem:[%s5965_s1 + $0xb50] ss:$8 sps:$4 sm:$0xff]   ;;  %v4286_v5 = vld [vmem:[%s5965_s1 + $0x464] ss:$8 sps:$4 sm:$0xff]  }
  0xe1   :  { %3204 = vmatprep.subr.bf16.mxu0 %v4204_v6  ;;  %v4289_v6 = vld [vmem:[%s5965_s1 + $0xb64] ss:$8 sps:$4 sm:$0xff]  }
  0xe3   :  { %2918 = vmatpush1.bf16.msra.mxu1 %v4199_v7  ;;  %v4284_v7 = vld [vmem:[%s5965_s1 + $0x460] ss:$8 sps:$4 sm:$0xff]  }
  0xe4   :  { %3205 = vmatpush1.bf16.msra.mxu0 %v4202_v8  ;;  %2919 = vmatprep.subr.bf16.mxu1 %v4207_v9  ;;  %v4287_v8 = vld [vmem:[%s5965_s1 + $0xb60] ss:$8 sps:$4 sm:$0xff]   ;;  %v4292_v9 = vld [vmem:[%s5965_s1 + $0x474] ss:$8 sps:$4 sm:$0xff]  }
  0xe5   :  { %3206 = vmatprep.subr.bf16.mxu0 %v4210_v10  ;;  %v4295_v10 = vld [vmem:[%s5965_s1 + $0xb74] ss:$8 sps:$4 sm:$0xff]  }
  0xe7   :  { %2920 = vmatpush1.bf16.msra.mxu1 %v4205_v11  ;;  %v4290_v11 = vld [vmem:[%s5965_s1 + $0x470] ss:$8 sps:$4 sm:$0xff]  }
  0xe8   :  { %3207 = vmatpush1.bf16.msra.mxu0 %v4208_v12  ;;  %2921 = vmatprep.subr.bf16.mxu1 %v4213_v13  ;;  %v4293_v12 = vld [vmem:[%s5965_s1 + $0xb70] ss:$8 sps:$4 sm:$0xff]   ;;  %v4298_v13 = vld [vmem:[%s5965_s1 + $0x484] ss:$8 sps:$4 sm:$0xff]  }
  0xe9   :  { %3208 = vmatprep.subr.bf16.mxu0 %v4216_v14  ;;  %v4301_v14 = vld [vmem:[%s5965_s1 + $0xb84] ss:$8 sps:$4 sm:$0xff]  }
  0xeb   :  { %2922 = vmatpush1.bf16.msra.mxu1 %v4211_v15  ;;  %v4296_v15 = vld [vmem:[%s5965_s1 + $0x480] ss:$8 sps:$4 sm:$0xff]  }
  0xec   :  { %3209 = vmatpush1.bf16.msra.mxu0 %v4214_v17  ;;  %2923 = vmatprep.subr.bf16.mxu1 %v4219_v18  ;;  %v4299_v17 = vld [vmem:[%s5965_s1 + $0xb80] ss:$8 sps:$4 sm:$0xff]   ;;  %v4304_v18 = vld [vmem:[%s5965_s1 + $0x494] ss:$8 sps:$4 sm:$0xff]  }
  0xed   :  { %3210 = vmatprep.subr.bf16.mxu0 %v4222_v19  ;;  %v4307_v19 = vld [vmem:[%s5965_s1 + $0xb94] ss:$8 sps:$4 sm:$0xff]  }
  0xef   :  { %2924 = vmatpush1.bf16.msra.mxu1 %v4217_v20  ;;  %v4302_v20 = vld [vmem:[%s5965_s1 + $0x490] ss:$8 sps:$4 sm:$0xff]  }
  0xf0   :  { %3211 = vmatpush1.bf16.msra.mxu0 %v4220_v21  ;;  %2925 = vmatprep.subr.bf16.mxu1 %v4225_v22  ;;  %v4305_v21 = vld [vmem:[%s5965_s1 + $0xb90] ss:$8 sps:$4 sm:$0xff]   ;;  %v4310_v22 = vld [vmem:[%s5965_s1 + $0x4a4] ss:$8 sps:$4 sm:$0xff]  }
  0xf1   :  { %3212 = vmatprep.subr.bf16.mxu0 %v4228_v23  ;;  %v4313_v23 = vld [vmem:[%s5965_s1 + $0xba4] ss:$8 sps:$4 sm:$0xff]  }
  0xf3   :  { %2926 = vmatpush1.bf16.msra.mxu1 %v4223_v24  ;;  %v4308_v24 = vld [vmem:[%s5965_s1 + $0x4a0] ss:$8 sps:$4 sm:$0xff]  }
  0xf4   :  { %3213 = vmatpush1.bf16.msra.mxu0 %v4226_v26  ;;  %2927 = vmatprep.subr.bf16.mxu1 %v4231_v27  ;;  %v4311_v26 = vld [vmem:[%s5965_s1 + $0xba0] ss:$8 sps:$4 sm:$0xff]   ;;  %v4316_v27 = vld [vmem:[%s5965_s1 + $0x4b4] ss:$8 sps:$4 sm:$0xff]  }
  0xf5   :  { %3214 = vmatprep.subr.bf16.mxu0 %v4234_v28  ;;  %v4319_v28 = vld [vmem:[%s5965_s1 + $0xbb4] ss:$8 sps:$4 sm:$0xff]  }
  0xf7   :  { %2928 = vmatpush1.bf16.msra.mxu1 %v4229_v29  ;;  %v4314_v29 = vld [vmem:[%s5965_s1 + $0x4b0] ss:$8 sps:$4 sm:$0xff]  }
  0xf8   :  { %3215 = vmatpush1.bf16.msra.mxu0 %v4232_v32  ;;  %2929 = vmatprep.subr.bf16.mxu1 %v4237_v34  ;;  %v4317_v32 = vld [vmem:[%s5965_s1 + $0xbb0] ss:$8 sps:$4 sm:$0xff]   ;;  %v4322_v34 = vld [vmem:[%s5965_s1 + $0x4c4] ss:$8 sps:$4 sm:$0xff]  }
  0xf9   :  { %3216 = vmatprep.subr.bf16.mxu0 %v4240_v35  ;;  %v4325_v35 = vld [vmem:[%s5965_s1 + $0xbc4] ss:$8 sps:$4 sm:$0xff]  }
  0xfb   :  { %2930 = vmatpush1.bf16.msra.mxu1 %v4235_v30  ;;  %v4320_v30 = vld [vmem:[%s5965_s1 + $0x4c0] ss:$8 sps:$4 sm:$0xff]  }
  0xfc   :  { %3217 = vmatpush1.bf16.msra.mxu0 %v4238_v37  ;;  %2931 = vmatprep.subr.bf16.mxu1 %v4243_v38  ;;  %v4323_v37 = vld [vmem:[%s5965_s1 + $0xbc0] ss:$8 sps:$4 sm:$0xff]   ;;  %v4328_v38 = vld [vmem:[%s5965_s1 + $0x4d4] ss:$8 sps:$4 sm:$0xff]  }
  0xfd   :  { %3218 = vmatprep.subr.bf16.mxu0 %v4246_v39  ;;  %v4331_v39 = vld [vmem:[%s5965_s1 + $0xbd4] ss:$8 sps:$4 sm:$0xff]  }
  0xff   :  { %2932 = vmatpush1.bf16.msra.mxu1 %v4241_v43  ;;  %v4329_v43 = vld [vmem:[%s5965_s1 + $0xbd0] ss:$8 sps:$4 sm:$0xff]  }
 0x100   :  { %3219 = vmatpush1.bf16.msra.mxu0 %v4244_v44  ;;  %2942 = vmatprep.subr.bf16.mxu1 %v4250_v33  ;;  %v4334_v44 = vld [vmem:[%s5965_s1 + $0x4e4] ss:$8 sps:$4 sm:$0xff]  }
 0x101   :  { %3229 = vmatprep.subr.bf16.mxu0 %v4253_v45  ;;  %v4337_v33 = vld [vmem:[%s5965_s1 + $0xbe4] ss:$8 sps:$4 sm:$0xff]   ;;  %v4332_v45 = vld [vmem:[%s5965_s1 + $0x4e0] ss:$8 sps:$4 sm:$0xff]  }
 0x102   :  { %2934 = vmatmul.mubr.bf16.vlgmr.msra.gmra.mrb[0].mxu1 %v5178_v36  ;;  %v4265_v36 = vld [vmem:[%s5965_s1 + $0xb24] ss:$8 sps:$4 sm:$0xff]  }
 0x103   :  { %3221 = vmatmul.mubr.bf16.vlgmr.msra.gmra.mrb[0].mxu0 %v5182_v16  ;;  %2943 = vmatpush1.bf16.msra.mxu1 %v4248_v31  ;;  %v4260_v16 = vld [vmem:[%s5965_s1 + $0x420] ss:$8 sps:$4 sm:$0xff]  }
 0x104   :  { %3230 = vmatpush1.bf16.msra.mxu0 %v4251_v47  ;;  %2944 = vmatprep.subr.bf16.mxu1 %v4256_v48  ;;  %v4335_v31 = vld [vmem:[%s5965_s1 + $0xbe0] ss:$8 sps:$4 sm:$0xff]   ;;  %v4340_v47 = vld [vmem:[%s5965_s1 + $0x4f4] ss:$8 sps:$4 sm:$0xff]  }
 0x105   :  { %3231 = vmatprep.subr.bf16.mxu0 %v4259_v50  ;;  %2974 = vmatprep.mubr.bf16.mxu1 %v522_v51  ;;  %v4343_v48 = vld [vmem:[%s5965_s1 + $0xbf4] ss:$8 sps:$4 sm:$0xff]   ;;  %v507_v50 = vcombine.high %v5375_v41, %v5375_v41  ;;  %v4346_v41 = vld [vmem:[%s5965_s1 + $0x504] ss:$8 sps:$4 sm:$0xff]  }
 0x106   :  { %3261 = vmatprep.mubr.bf16.mxu0 %v574_v52  ;;  %v5587_v51 = vld [vmem:[%s5966_s0 + $0x30] sm:$0x3f] }
 0x107   :  { %2945 = vmatpush1.bf16.msra.mxu1 %v4254_v53  ;;  %v4338_v52 = vld [vmem:[%s5965_s1 + $0x4f0] ss:$8 sps:$4 sm:$0xff]  }
 0x108   :  { %3232 = vmatpush1.bf16.msra.mxu0 %v4257_v54  ;;  %2946 = vmatprep.subr.bf16.mxu1 %v4262_v55  ;;  %v4341_v53 = vld [vmem:[%s5965_s1 + $0xbf0] ss:$8 sps:$4 sm:$0xff]   ;;  %v4350_v54 = vld [vmem:[%s5965_s1 + $0xc04] ss:$8 sps:$4 sm:$0xff]   ;;  %v5602_v55 = vrot.slane %v507_v50, %v4674_v49 }
 0x109   :  { %3233 = vmatprep.subr.bf16.mxu0 %v4265_v36  ;;  %v5606_v36 = vrot.slane %v5587_v51, %v4674_v49  ;;  %v4423_v50 = vld [vmem:[%s5965_s1 + $0x5d0] ss:$8 sps:$4 sm:$0xff]  }
 0x10b   :  { %2947 = vmatpush1.bf16.msra.mxu1 %v4260_v16  ;;  %v4344_v16 = vld [vmem:[%s5965_s1 + $0x500] ss:$8 sps:$4 sm:$0xff]  }
 0x10c   :  { %3234 = vmatpush1.bf16.msra.mxu0 %v4263_v56  ;;  %2948 = vmatprep.subr.bf16.mxu1 %v4268_v57  ;;  %v4348_v56 = vld [vmem:[%s5965_s1 + $0xc00] ss:$8 sps:$4 sm:$0xff]   ;;  %v4353_v57 = vld [vmem:[%s5965_s1 + $0x514] ss:$8 sps:$4 sm:$0xff]  }
 0x10d   :  { %3235 = vmatprep.subr.bf16.mxu0 %v4271_v58  ;;  %v4356_v58 = vld [vmem:[%s5965_s1 + $0xc14] ss:$8 sps:$4 sm:$0xff]  }
 0x10f   :  { %2949 = vmatpush1.bf16.msra.mxu1 %v4266_v59  ;;  %v523_v59 = vcombine.high %v5602_v55, %v5602_v55 }
 0x110   :  { %3236 = vmatpush1.bf16.msra.mxu0 %v4269_v60  ;;  %2950 = vmatprep.subr.bf16.mxu1 %v4274_v61  ;;  %v590_v60 = vcombine.high %v5606_v36, %v5606_v36  ;;  %v4351_v61 = vld [vmem:[%s5965_s1 + $0x510] ss:$8 sps:$4 sm:$0xff]  }
 0x111   :  { %3237 = vmatprep.subr.bf16.mxu0 %v4277_v62  ;;  %v4354_v62 = vld [vmem:[%s5965_s1 + $0xc10] ss:$8 sps:$4 sm:$0xff]  }
 0x113   :  { %2951 = vmatpush1.bf16.msra.mxu1 %v4272_v63  ;;  %v4359_v63 = vld [vmem:[%s5965_s1 + $0x524] ss:$8 sps:$4 sm:$0xff]  }
 0x114   :  { %3238 = vmatpush1.bf16.msra.mxu0 %v4275_v0  ;;  %2952 = vmatprep.subr.bf16.mxu1 %v4280_v1  ;;  %v4360_v0 = vld [vmem:[%s5965_s1 + $0xc20] ss:$8 sps:$4 sm:$0xff]   ;;  %v4365_v1 = vld [vmem:[%s5965_s1 + $0x534] ss:$8 sps:$4 sm:$0xff]  }
 0x115   :  { %3239 = vmatprep.subr.bf16.mxu0 %v4283_v2  ;;  %v4368_v2 = vld [vmem:[%s5965_s1 + $0xc34] ss:$8 sps:$4 sm:$0xff]  }
 0x117   :  { %2953 = vmatpush1.bf16.msra.mxu1 %v4278_v3  ;;  %v4363_v3 = vld [vmem:[%s5965_s1 + $0x530] ss:$8 sps:$4 sm:$0xff]  }
 0x118   :  { %3240 = vmatpush1.bf16.msra.mxu0 %v4281_v4  ;;  %2954 = vmatprep.subr.bf16.mxu1 %v4286_v5  ;;  %v4366_v4 = vld [vmem:[%s5965_s1 + $0xc30] ss:$8 sps:$4 sm:$0xff]   ;;  %v4371_v5 = vld [vmem:[%s5965_s1 + $0x544] ss:$8 sps:$4 sm:$0xff]  }
 0x119   :  { %3241 = vmatprep.subr.bf16.mxu0 %v4289_v6  ;;  %v4374_v6 = vld [vmem:[%s5965_s1 + $0xc44] ss:$8 sps:$4 sm:$0xff]  }
 0x11b   :  { %2955 = vmatpush1.bf16.msra.mxu1 %v4284_v7  ;;  %v4369_v7 = vld [vmem:[%s5965_s1 + $0x540] ss:$8 sps:$4 sm:$0xff]  }
 0x11c   :  { %3242 = vmatpush1.bf16.msra.mxu0 %v4287_v8  ;;  %2956 = vmatprep.subr.bf16.mxu1 %v4292_v9  ;;  %v4372_v8 = vld [vmem:[%s5965_s1 + $0xc40] ss:$8 sps:$4 sm:$0xff]   ;;  %v4377_v9 = vld [vmem:[%s5965_s1 + $0x554] ss:$8 sps:$4 sm:$0xff]  }
 0x11d   :  { %3243 = vmatprep.subr.bf16.mxu0 %v4295_v10  ;;  %v4380_v10 = vld [vmem:[%s5965_s1 + $0xc54] ss:$8 sps:$4 sm:$0xff]  }
 0x11f   :  { %2957 = vmatpush1.bf16.msra.mxu1 %v4290_v11  ;;  %v4375_v11 = vld [vmem:[%s5965_s1 + $0x550] ss:$8 sps:$4 sm:$0xff]  }
 0x120   :  { %3244 = vmatpush1.bf16.msra.mxu0 %v4293_v12  ;;  %2958 = vmatprep.subr.bf16.mxu1 %v4298_v13  ;;  %v4378_v12 = vld [vmem:[%s5965_s1 + $0xc50] ss:$8 sps:$4 sm:$0xff]   ;;  %v4383_v13 = vld [vmem:[%s5965_s1 + $0x564] ss:$8 sps:$4 sm:$0xff]  }
 0x121   :  { %3245 = vmatprep.subr.bf16.mxu0 %v4301_v14  ;;  %v4386_v14 = vld [vmem:[%s5965_s1 + $0xc64] ss:$8 sps:$4 sm:$0xff]  }
 0x123   :  { %2959 = vmatpush1.bf16.msra.mxu1 %v4296_v15  ;;  %v4381_v15 = vld [vmem:[%s5965_s1 + $0x560] ss:$8 sps:$4 sm:$0xff]  }
 0x124   :  { %3246 = vmatpush1.bf16.msra.mxu0 %v4299_v17  ;;  %2960 = vmatprep.subr.bf16.mxu1 %v4304_v18  ;;  %v4384_v17 = vld [vmem:[%s5965_s1 + $0xc60] ss:$8 sps:$4 sm:$0xff]   ;;  %v4389_v18 = vld [vmem:[%s5965_s1 + $0x574] ss:$8 sps:$4 sm:$0xff]  }
 0x125   :  { %3247 = vmatprep.subr.bf16.mxu0 %v4307_v19  ;;  %v4392_v19 = vld [vmem:[%s5965_s1 + $0xc74] ss:$8 sps:$4 sm:$0xff]  }
 0x127   :  { %2961 = vmatpush1.bf16.msra.mxu1 %v4302_v20  ;;  %v4387_v20 = vld [vmem:[%s5965_s1 + $0x570] ss:$8 sps:$4 sm:$0xff]  }
 0x128   :  { %3248 = vmatpush1.bf16.msra.mxu0 %v4305_v21  ;;  %2962 = vmatprep.subr.bf16.mxu1 %v4310_v22  ;;  %v4390_v21 = vld [vmem:[%s5965_s1 + $0xc70] ss:$8 sps:$4 sm:$0xff]   ;;  %v4395_v22 = vld [vmem:[%s5965_s1 + $0x584] ss:$8 sps:$4 sm:$0xff]  }
 0x129   :  { %3249 = vmatprep.subr.bf16.mxu0 %v4313_v23  ;;  %v4398_v23 = vld [vmem:[%s5965_s1 + $0xc84] ss:$8 sps:$4 sm:$0xff]  }
 0x12b   :  { %2963 = vmatpush1.bf16.msra.mxu1 %v4308_v24  ;;  %v4393_v24 = vld [vmem:[%s5965_s1 + $0x580] ss:$8 sps:$4 sm:$0xff]  }
 0x12c   :  { %3250 = vmatpush1.bf16.msra.mxu0 %v4311_v26  ;;  %2964 = vmatprep.subr.bf16.mxu1 %v4316_v27  ;;  %v4396_v26 = vld [vmem:[%s5965_s1 + $0xc80] ss:$8 sps:$4 sm:$0xff]   ;;  %v4401_v27 = vld [vmem:[%s5965_s1 + $0x594] ss:$8 sps:$4 sm:$0xff]  }
 0x12d   :  { %3251 = vmatprep.subr.bf16.mxu0 %v4319_v28  ;;  %v4404_v28 = vld [vmem:[%s5965_s1 + $0xc94] ss:$8 sps:$4 sm:$0xff]  }
 0x12f   :  { %2965 = vmatpush1.bf16.msra.mxu1 %v4314_v29  ;;  %v4399_v29 = vld [vmem:[%s5965_s1 + $0x590] ss:$8 sps:$4 sm:$0xff]  }
 0x130   :  { %3252 = vmatpush1.bf16.msra.mxu0 %v4317_v32  ;;  %2966 = vmatprep.subr.bf16.mxu1 %v4322_v34  ;;  %v4402_v32 = vld [vmem:[%s5965_s1 + $0xc90] ss:$8 sps:$4 sm:$0xff]   ;;  %v4407_v34 = vld [vmem:[%s5965_s1 + $0x5a4] ss:$8 sps:$4 sm:$0xff]  }
 0x131   :  { %3253 = vmatprep.subr.bf16.mxu0 %v4325_v35  ;;  %v4410_v35 = vld [vmem:[%s5965_s1 + $0xca4] ss:$8 sps:$4 sm:$0xff]  }
 0x133   :  { %2967 = vmatpush1.bf16.msra.mxu1 %v4320_v30  ;;  %v4405_v30 = vld [vmem:[%s5965_s1 + $0x5a0] ss:$8 sps:$4 sm:$0xff]  }
 0x134   :  { %3254 = vmatpush1.bf16.msra.mxu0 %v4323_v37  ;;  %2968 = vmatprep.subr.bf16.mxu1 %v4328_v38  ;;  %v4408_v37 = vld [vmem:[%s5965_s1 + $0xca0] ss:$8 sps:$4 sm:$0xff]   ;;  %v4413_v38 = vld [vmem:[%s5965_s1 + $0x5b4] ss:$8 sps:$4 sm:$0xff]  }
 0x135   :  { %3255 = vmatprep.subr.bf16.mxu0 %v4331_v39  ;;  %v4416_v39 = vld [vmem:[%s5965_s1 + $0xcb4] ss:$8 sps:$4 sm:$0xff]  }
 0x137   :  { %2969 = vmatpush1.bf16.msra.mxu1 %v4326_v40  ;;  %v4411_v40 = vld [vmem:[%s5965_s1 + $0x5b0] ss:$8 sps:$4 sm:$0xff]  }
 0x138   :  { %3256 = vmatpush1.bf16.msra.mxu0 %v4329_v43  ;;  %2970 = vmatprep.subr.bf16.mxu1 %v4334_v44  ;;  %v4414_v43 = vld [vmem:[%s5965_s1 + $0xcb0] ss:$8 sps:$4 sm:$0xff]   ;;  %v4419_v44 = vld [vmem:[%s5965_s1 + $0x5c4] ss:$8 sps:$4 sm:$0xff]  }
 0x139   :  { %3257 = vmatprep.subr.bf16.mxu0 %v4337_v33  ;;  %v4422_v33 = vld [vmem:[%s5965_s1 + $0xcc4] ss:$8 sps:$4 sm:$0xff]  }
 0x13b   :  { %2971 = vmatpush1.bf16.msra.mxu1 %v4332_v45  ;;  %v4417_v45 = vld [vmem:[%s5965_s1 + $0x5c0] ss:$8 sps:$4 sm:$0xff]  }
 0x13c   :  { %3258 = vmatpush1.bf16.msra.mxu0 %v4335_v31  ;;  %2972 = vmatprep.subr.bf16.mxu1 %v4340_v47  ;;  %v4420_v31 = vld [vmem:[%s5965_s1 + $0xcc0] ss:$8 sps:$4 sm:$0xff]   ;;  %v4425_v47 = vld [vmem:[%s5965_s1 + $0x5d4] ss:$8 sps:$4 sm:$0xff]  }
 0x13d   :  { %3259 = vmatprep.subr.bf16.mxu0 %v4343_v48  ;;  %v4428_v48 = vld [vmem:[%s5965_s1 + $0xcd4] ss:$8 sps:$4 sm:$0xff]  }
 0x13f   :  { %2973 = vmatpush1.bf16.msra.mxu1 %v4338_v52  ;;  %v4426_v52 = vld [vmem:[%s5965_s1 + $0xcd0] ss:$8 sps:$4 sm:$0xff]  }
 0x140   :  { %3260 = vmatpush1.bf16.msra.mxu0 %v4341_v53  ;;  %2983 = vmatprep.subr.bf16.mxu1 %v4346_v41  ;;  %v4431_v53 = vld [vmem:[%s5965_s1 + $0x5e4] ss:$8 sps:$4 sm:$0xff]  }
 0x141   :  { %3270 = vmatprep.subr.bf16.mxu0 %v4350_v54  ;;  %v4434_v41 = vld [vmem:[%s5965_s1 + $0xce4] ss:$8 sps:$4 sm:$0xff]   ;;  %v4429_v54 = vld [vmem:[%s5965_s1 + $0x5e0] ss:$8 sps:$4 sm:$0xff]  }
 0x142   :  { %2975 = vmatmul.mubr.bf16.vlgmr.msra.gmra.mrb[0].mxu1 %v5391_v46  ;;  %v4362_v46 = vld [vmem:[%s5965_s1 + $0xc24] ss:$8 sps:$4 sm:$0xff]  }
 0x143   :  { %3262 = vmatmul.mubr.bf16.vlgmr.msra.gmra.mrb[0].mxu0 %v5394_v25  ;;  %2984 = vmatpush1.bf16.msra.mxu1 %v4344_v16  ;;  %v4357_v25 = vld [vmem:[%s5965_s1 + $0x520] ss:$8 sps:$4 sm:$0xff]  }
 0x144   :  { %3271 = vmatpush1.bf16.msra.mxu0 %v4348_v56  ;;  %2985 = vmatprep.subr.bf16.mxu1 %v4353_v57  ;;  %v4432_v16 = vld [vmem:[%s5965_s1 + $0xce0] ss:$8 sps:$4 sm:$0xff]   ;;  %v4437_v56 = vld [vmem:[%s5965_s1 + $0x5f4] ss:$8 sps:$4 sm:$0xff]  }
 0x145   :  { %3272 = vmatprep.subr.bf16.mxu0 %v4356_v58  ;;  %3015 = vmatprep.mubr.bf16.mxu1 %v523_v59  ;;  %v4440_v57 = vld [vmem:[%s5965_s1 + $0xcf4] ss:$8 sps:$4 sm:$0xff]   ;;  %v4435_v58 = vld [vmem:[%s5965_s1 + $0x5f0] ss:$8 sps:$4 sm:$0xff]  }
 0x146   :  { %3302 = vmatprep.mubr.bf16.mxu0 %v590_v60  ;;  %v4438_v59 = vld [vmem:[%s5965_s1 + $0xcf0] ss:$8 sps:$4 sm:$0xff]   ;;  %v4444_v60 = vld [vmem:[%s5965_s1 + $0x604] ss:$8 sps:$4 sm:$0xff]  }
 0x147   :  { %2986 = vmatpush1.bf16.msra.mxu1 %v4351_v61  ;;  %v4448_v61 = vld [vmem:[%s5965_s1 + $0xd04] ss:$8 sps:$4 sm:$0xff]  }
 0x148   :  { %3273 = vmatpush1.bf16.msra.mxu0 %v4354_v62  ;;  %2987 = vmatprep.subr.bf16.mxu1 %v4359_v63  ;;  %v5809_v62 = vld.sshfl [vmem:[%s5966_s0 + $0x18] sm:$0xff pattern:$0x76325410]  ;;  %v4442_v63 = vld [vmem:[%s5965_s1 + $0x600] ss:$8 sps:$4 sm:$0xff]  }
 0x149   :  { %3274 = vmatprep.subr.bf16.mxu0 %v4362_v46  ;;  %v4446_v46 = vld [vmem:[%s5965_s1 + $0xd00] ss:$8 sps:$4 sm:$0xff]  }
 0x14b   :  { %2988 = vmatpush1.bf16.msra.mxu1 %v4357_v25  ;;  %v4451_v25 = vld [vmem:[%s5965_s1 + $0x614] ss:$8 sps:$4 sm:$0xff]  }
 0x14c   :  { %3275 = vmatpush1.bf16.msra.mxu0 %v4360_v0  ;;  %2989 = vmatprep.subr.bf16.mxu1 %v4365_v1  ;;  %v4454_v0 = vld [vmem:[%s5965_s1 + $0xd14] ss:$8 sps:$4 sm:$0xff]   ;;  %v539_v1 = vcombine.high %v5809_v62, %v5809_v62 }
 0x14d   :  { %3276 = vmatprep.subr.bf16.mxu0 %v4368_v2  ;;  %v4449_v2 = vld [vmem:[%s5965_s1 + $0x610] ss:$8 sps:$4 sm:$0xff]  }
 0x14f   :  { %2990 = vmatpush1.bf16.msra.mxu1 %v4363_v3  ;;  %v4452_v3 = vld [vmem:[%s5965_s1 + $0xd10] ss:$8 sps:$4 sm:$0xff]  }
 0x150   :  { %3277 = vmatpush1.bf16.msra.mxu0 %v4366_v4  ;;  %2991 = vmatprep.subr.bf16.mxu1 %v4371_v5  ;;  %v4457_v4 = vld [vmem:[%s5965_s1 + $0x624] ss:$8 sps:$4 sm:$0xff]   ;;  %v4455_v5 = vld [vmem:[%s5965_s1 + $0x620] ss:$8 sps:$4 sm:$0xff]  }
 0x151   :  { %3278 = vmatprep.subr.bf16.mxu0 %v4374_v6  ;;  %v4458_v6 = vld [vmem:[%s5965_s1 + $0xd20] ss:$8 sps:$4 sm:$0xff]  }
 0x153   :  { %2992 = vmatpush1.bf16.msra.mxu1 %v4369_v7  ;;  %v4463_v7 = vld [vmem:[%s5965_s1 + $0x634] ss:$8 sps:$4 sm:$0xff]  }
 0x154   :  { %3279 = vmatpush1.bf16.msra.mxu0 %v4372_v8  ;;  %2993 = vmatprep.subr.bf16.mxu1 %v4377_v9  ;;  %v4466_v8 = vld [vmem:[%s5965_s1 + $0xd34] ss:$8 sps:$4 sm:$0xff]   ;;  %v4461_v9 = vld [vmem:[%s5965_s1 + $0x630] ss:$8 sps:$4 sm:$0xff]  }
 0x155   :  { %3280 = vmatprep.subr.bf16.mxu0 %v4380_v10  ;;  %v4464_v10 = vld [vmem:[%s5965_s1 + $0xd30] ss:$8 sps:$4 sm:$0xff]  }
 0x157   :  { %2994 = vmatpush1.bf16.msra.mxu1 %v4375_v11  ;;  %v4469_v11 = vld [vmem:[%s5965_s1 + $0x644] ss:$8 sps:$4 sm:$0xff]  }
 0x158   :  { %3281 = vmatpush1.bf16.msra.mxu0 %v4378_v12  ;;  %2995 = vmatprep.subr.bf16.mxu1 %v4383_v13  ;;  %v4472_v12 = vld [vmem:[%s5965_s1 + $0xd44] ss:$8 sps:$4 sm:$0xff]   ;;  %v4467_v13 = vld [vmem:[%s5965_s1 + $0x640] ss:$8 sps:$4 sm:$0xff]  }
 0x159   :  { %3282 = vmatprep.subr.bf16.mxu0 %v4386_v14  ;;  %v4470_v14 = vld [vmem:[%s5965_s1 + $0xd40] ss:$8 sps:$4 sm:$0xff]  }
 0x15b   :  { %2996 = vmatpush1.bf16.msra.mxu1 %v4381_v15  ;;  %v4475_v15 = vld [vmem:[%s5965_s1 + $0x654] ss:$8 sps:$4 sm:$0xff]  }
 0x15c   :  { %3283 = vmatpush1.bf16.msra.mxu0 %v4384_v17  ;;  %2997 = vmatprep.subr.bf16.mxu1 %v4389_v18  ;;  %v4478_v17 = vld [vmem:[%s5965_s1 + $0xd54] ss:$8 sps:$4 sm:$0xff]   ;;  %v4473_v18 = vld [vmem:[%s5965_s1 + $0x650] ss:$8 sps:$4 sm:$0xff]  }
 0x15d   :  { %3284 = vmatprep.subr.bf16.mxu0 %v4392_v19  ;;  %v4476_v19 = vld [vmem:[%s5965_s1 + $0xd50] ss:$8 sps:$4 sm:$0xff]  }
 0x15f   :  { %2998 = vmatpush1.bf16.msra.mxu1 %v4387_v20  ;;  %v4481_v20 = vld [vmem:[%s5965_s1 + $0x664] ss:$8 sps:$4 sm:$0xff]  }
 0x160   :  { %3285 = vmatpush1.bf16.msra.mxu0 %v4390_v21  ;;  %2999 = vmatprep.subr.bf16.mxu1 %v4395_v22  ;;  %v4484_v21 = vld [vmem:[%s5965_s1 + $0xd64] ss:$8 sps:$4 sm:$0xff]   ;;  %v4479_v22 = vld [vmem:[%s5965_s1 + $0x660] ss:$8 sps:$4 sm:$0xff]  }
 0x161   :  { %3286 = vmatprep.subr.bf16.mxu0 %v4398_v23  ;;  %v4482_v23 = vld [vmem:[%s5965_s1 + $0xd60] ss:$8 sps:$4 sm:$0xff]  }
 0x163   :  { %3000 = vmatpush1.bf16.msra.mxu1 %v4393_v24  ;;  %v4487_v24 = vld [vmem:[%s5965_s1 + $0x674] ss:$8 sps:$4 sm:$0xff]  }
 0x164   :  { %3287 = vmatpush1.bf16.msra.mxu0 %v4396_v26  ;;  %3001 = vmatprep.subr.bf16.mxu1 %v4401_v27  ;;  %v4490_v26 = vld [vmem:[%s5965_s1 + $0xd74] ss:$8 sps:$4 sm:$0xff]   ;;  %v575_v27 = vcombine.high %v5587_v51, %v5587_v51  ;;  %v4491_v51 = vld [vmem:[%s5965_s1 + $0x680] ss:$8 sps:$4 sm:$0xff]  }
 0x165   :  { %3288 = vmatprep.subr.bf16.mxu0 %v4404_v28  ;;  %v4485_v28 = vld [vmem:[%s5965_s1 + $0x670] ss:$8 sps:$4 sm:$0xff]  }
 0x167   :  { %3002 = vmatpush1.bf16.msra.mxu1 %v4399_v29  ;;  %v4488_v29 = vld [vmem:[%s5965_s1 + $0xd70] ss:$8 sps:$4 sm:$0xff]  }
 0x168   :  { %3289 = vmatpush1.bf16.msra.mxu0 %v4402_v32  ;;  %3003 = vmatprep.subr.bf16.mxu1 %v4407_v34  ;;  %v4493_v32 = vld [vmem:[%s5965_s1 + $0x684] ss:$8 sps:$4 sm:$0xff]   ;;  %v589_v34 = vrot.slane %v575_v27, %v4674_v49 }
 0x169   :  { %3290 = vmatprep.subr.bf16.mxu0 %v4410_v35  ;;  %v4496_v35 = vld [vmem:[%s5965_s1 + $0x694] ss:$8 sps:$4 sm:$0xff]   ;;  %v4499_v49 = vld [vmem:[%s5965_s1 + $0x6a4] ss:$8 sps:$4 sm:$0xff]  }
 0x16b   :  { %3004 = vmatpush1.bf16.msra.mxu1 %v4405_v30  ;;  %v4494_v30 = vld [vmem:[%s5965_s1 + $0x690] ss:$8 sps:$4 sm:$0xff]  }
 0x16c   :  { %3291 = vmatpush1.bf16.msra.mxu0 %v4408_v37  ;;  %3005 = vmatprep.subr.bf16.mxu1 %v4413_v38  ;;  %v4497_v37 = vld [vmem:[%s5965_s1 + $0x6a0] ss:$8 sps:$4 sm:$0xff]   ;;  %v4502_v38 = vld [vmem:[%s5965_s1 + $0x6b4] ss:$8 sps:$4 sm:$0xff]  }
 0x16d   :  { %3292 = vmatprep.subr.bf16.mxu0 %v4416_v39  ;;  %v4500_v39 = vld [vmem:[%s5965_s1 + $0x6b0] ss:$8 sps:$4 sm:$0xff]  }
 0x16f   :  { %3006 = vmatpush1.bf16.msra.mxu1 %v4411_v40  ;;  %v4505_v40 = vld [vmem:[%s5965_s1 + $0x6c4] ss:$8 sps:$4 sm:$0xff]  }
 0x170   :  { %3293 = vmatpush1.bf16.msra.mxu0 %v4414_v43  ;;  %3007 = vmatprep.subr.bf16.mxu1 %v4419_v44  ;;  %v4503_v43 = vld [vmem:[%s5965_s1 + $0x6c0] ss:$8 sps:$4 sm:$0xff]   ;;  %v4508_v44 = vld [vmem:[%s5965_s1 + $0x6d4] ss:$8 sps:$4 sm:$0xff]  }
 0x171   :  { %3294 = vmatprep.subr.bf16.mxu0 %v4422_v33  ;;  %v4506_v33 = vld [vmem:[%s5965_s1 + $0x6d0] ss:$8 sps:$4 sm:$0xff]  }
 0x173   :  { %3008 = vmatpush1.bf16.msra.mxu1 %v4417_v45  ;;  %v4511_v45 = vld [vmem:[%s5965_s1 + $0x6e4] ss:$8 sps:$4 sm:$0xff]  }
 0x174   :  { %3295 = vmatpush1.bf16.msra.mxu0 %v4420_v31  ;;  %3009 = vmatprep.subr.bf16.mxu1 %v4425_v47  ;;  %v4509_v31 = vld [vmem:[%s5965_s1 + $0x6e0] ss:$8 sps:$4 sm:$0xff]   ;;  %v4514_v47 = vld [vmem:[%s5965_s1 + $0x6f4] ss:$8 sps:$4 sm:$0xff]  }
 0x175   :  { %3296 = vmatprep.subr.bf16.mxu0 %v4428_v48  ;;  %v4512_v48 = vld [vmem:[%s5965_s1 + $0x6f0] ss:$8 sps:$4 sm:$0xff]  }
 0x177   :  { %3010 = vmatpush1.bf16.msra.mxu1 %v4423_v50 }
 0x178   :  { %3297 = vmatpush1.bf16.msra.mxu0 %v4426_v52  ;;  %3011 = vmatprep.subr.bf16.mxu1 %v4431_v53 }
 0x179   :  { %3298 = vmatprep.subr.bf16.mxu0 %v4434_v41 }
 0x17b   :  { %3012 = vmatpush1.bf16.msra.mxu1 %v4429_v54  ;;  %v458_v54 = vsub.s32 0, %v4656_v42 }
 0x17c   :  { %3299 = vmatpush1.bf16.msra.mxu0 %v4432_v16  ;;  %3013 = vmatprep.subr.bf16.mxu1 %v4437_v56  ;;  %v454_v16 = vld [vmem:[%s5967_s2] sm:$0x3]  ;;  %v462_v56 = vsub.s32 1, %v4656_v42 }
 0x17d   :  { %3300 = vmatprep.subr.bf16.mxu0 %v4440_v57  ;;  %v459_v57 = vrot.slane %v454_v16, %v458_v54 }
 0x17f   :  { %3014 = vmatpush1.bf16.msra.mxu1 %v4435_v58  ;;  %v463_v58 = vrot.slane %v454_v16, %v462_v56 }
 0x180   :  { %3301 = vmatpush1.bf16.msra.mxu0 %v4438_v59  ;;  %3024 = vmatprep.subr.bf16.mxu1 %v4444_v60 }
 0x181   :  { %3311 = vmatprep.subr.bf16.mxu0 %v4448_v61 }
 0x182   :  { %3016 = vmatmul.mubr.bf16.vlgmr.msra.gmra.mrb[0].mxu1 %v5602_v55  ;;  %v4460_v55 = vld [vmem:[%s5965_s1 + $0xd24] ss:$8 sps:$4 sm:$0xff]  }
 0x183   :  { %3303 = vmatmul.mubr.bf16.vlgmr.msra.gmra.mrb[0].mxu0 %v5606_v36  ;;  %3025 = vmatpush1.bf16.msra.mxu1 %v4442_v63  ;;  %v4518_v36 = vmov 0  }
 0x184   :  { %3312 = vmatpush1.bf16.msra.mxu0 %v4446_v46  ;;  %3026 = vmatprep.subr.bf16.mxu1 %v4451_v25 }
 0x185   :  { %3313 = vmatprep.subr.bf16.mxu0 %v4454_v0  ;;  %3343 = vmatprep.mubr.bf16.mxu0 %v4518_v36 }
 0x186   :  { %3056 = vmatprep.mubr.bf16.mxu1 %v539_v1 }
 0x187   :  { %3027 = vmatpush1.bf16.msra.mxu1 %v4449_v2 }
 0x188   :  { %3314 = vmatpush1.bf16.msra.mxu0 %v4452_v3  ;;  %3028 = vmatprep.subr.bf16.mxu1 %v4457_v4 }
 0x189   :  { %3315 = vmatprep.subr.bf16.mxu0 %v4460_v55 }
 0x18b   :  { %3029 = vmatpush1.bf16.msra.mxu1 %v4455_v5 }
 0x18c   :  { %3316 = vmatpush1.bf16.msra.mxu0 %v4458_v6  ;;  %3030 = vmatprep.subr.bf16.mxu1 %v4463_v7 }
 0x18d   :  { %3317 = vmatprep.subr.bf16.mxu0 %v4466_v8 }
 0x18f   :  { %3031 = vmatpush1.bf16.msra.mxu1 %v4461_v9 }
 0x190   :  { %3318 = vmatpush1.bf16.msra.mxu0 %v4464_v10  ;;  %3032 = vmatprep.subr.bf16.mxu1 %v4469_v11 }
 0x191   :  { %3319 = vmatprep.subr.bf16.mxu0 %v4472_v12 }
 0x193   :  { %3033 = vmatpush1.bf16.msra.mxu1 %v4467_v13 }
 0x194   :  { %3320 = vmatpush1.bf16.msra.mxu0 %v4470_v14  ;;  %3034 = vmatprep.subr.bf16.mxu1 %v4475_v15 }
 0x195   :  { %3321 = vmatprep.subr.bf16.mxu0 %v4478_v17 }
 0x197   :  { %3035 = vmatpush1.bf16.msra.mxu1 %v4473_v18 }
 0x198   :  { %3322 = vmatpush1.bf16.msra.mxu0 %v4476_v19  ;;  %3036 = vmatprep.subr.bf16.mxu1 %v4481_v20 }
 0x199   :  { %3323 = vmatprep.subr.bf16.mxu0 %v4484_v21 }
 0x19b   :  { %3037 = vmatpush1.bf16.msra.mxu1 %v4479_v22 }
 0x19c   :  { %3324 = vmatpush1.bf16.msra.mxu0 %v4482_v23  ;;  %3038 = vmatprep.subr.bf16.mxu1 %v4487_v24 }
 0x19d   :  { %3325 = vmatprep.subr.bf16.mxu0 %v4490_v26 }
 0x19f   :  { %3039 = vmatpush1.bf16.msra.mxu1 %v4485_v28 }
 0x1a0   :  { %3326 = vmatpush1.bf16.msra.mxu0 %v4488_v29  ;;  %3040 = vmatprep.subr.bf16.mxu1 %v4493_v32 }
 0x1a3   :  { %3344 = vmatmul.mubr.bf16.vlgmr.msra.gmra.mrb[0].mxu0 %v589_v34  ;;  %3041 = vmatpush1.bf16.msra.mxu1 %v4491_v51 }
 0x1a4   :  { %3042 = vmatprep.subr.bf16.mxu1 %v4496_v35 }
 0x1a7   :  { %3043 = vmatpush1.bf16.msra.mxu1 %v4494_v30 }
 0x1a8   :  { %3044 = vmatprep.subr.bf16.mxu1 %v4499_v49 }
 0x1ab   :  { %3045 = vmatpush1.bf16.msra.mxu1 %v4497_v37 }
 0x1ac   :  { %3046 = vmatprep.subr.bf16.mxu1 %v4502_v38 }
 0x1af   :  { %3047 = vmatpush1.bf16.msra.mxu1 %v4500_v39 }
 0x1b0   :  { %3048 = vmatprep.subr.bf16.mxu1 %v4505_v40 }
 0x1b3   :  { %3049 = vmatpush1.bf16.msra.mxu1 %v4503_v43 }
 0x1b4   :  { %3050 = vmatprep.subr.bf16.mxu1 %v4508_v44 }
 0x1b7   :  { %3051 = vmatpush1.bf16.msra.mxu1 %v4506_v33 }
 0x1b8   :  { %3052 = vmatprep.subr.bf16.mxu1 %v4511_v45 }
 0x1bb   :  { %3053 = vmatpush1.bf16.msra.mxu1 %v4509_v31 }
 0x1bc   :  { %3054 = vmatprep.subr.bf16.mxu1 %v4514_v47 }
 0x1bf   :  { %3055 = vmatpush1.bf16.msra.mxu1 %v4512_v48 }
 0x1c2   :  { %3057 = vmatmul.mubr.bf16.vlgmr.msra.gmra.mrb[0].mxu1 %v5809_v62 }
 0x276   :  { %v3345_v50 = vpop.f32.mrb[0].mxu0 }
 0x277   :  { %v3347_v52 = vpop.f32.mrb[1].mxu0 }
 0x278   :  { %v3349_v53 = vpop.f32.mrb[2].mxu0 }
 0x279   :  { %v3350_v41 = vpop.f32.mrb[3].mxu0 }
 0x295   :  { %v3058_v59 = vpop.f32.mrb[0].mxu1 }
 0x296   :  { %v3806_v60 = vadd.f32 %v3058_v59, %v459_v57  ;;  %v3060_v61 = vpop.f32.mrb[1].mxu1 }
 0x297   :  { %v3808_v63 = vadd.f32 %v3060_v61, %v463_v58  ;;  %v3062_v46 = vpop.f32.mrb[2].mxu1 }
 0x298   :  { %v3807_v62 = vadd.f32 %v3806_v60, %v3345_v50  ;;  %v3063_v25 = vpop.f32.mrb[3].mxu1 }
 0x299   :  { %v3809_v0 = vadd.f32 %v3808_v63, %v3347_v52 }
 0x29a   :  { %v3352_v1 = vmax.f32 %v3807_v62, 0.0 }
 0x29b   :  { %v3353_v2 = vmax.f32 %v3809_v0, 0.0 }
 0x29d   :  { %v3804_v3 = vpack.c.bf16 %v3353_v2, %v3352_v1 }
 0x29f   :  { %3805 = vst.sshfl [vmem:[%s5968_s3] sm:$0x33 pattern:$0x76325410] %v3804_v3 }

// kernel: autoencoder_perceptual_forward.21
= control target key start
LH: loop header
LB: loop body
LE: loop exit
PB: predicated region body
PF: predicated region fallthrough
CT: control target
= control target key end

     0   :  { %s476_s12 = smov 0   ;;  %s478_s13 = smov 0   ;;  %s525_s0 = inlined_call_operand.vmem [shape: bf16[4,8,256], index: 0, kind: input, shape index: {}, may-alias: {0,1}]   ;;  %s526_s1 = inlined_call_operand.vmem [shape: bf16[4,8,256], index: 1, kind: input, shape index: {}, may-alias: {0,1}]   ;;  %s527_s2 = inlined_call_operand.vmem [shape: f32[1,1,256], index: 2, kind: input, shape index: {}]   ;;  %s528_s3 = inlined_call_operand.vmem [shape: f32[2,1,1], index: 3, kind: output, shape index: {}]  }
   0x1   :  { %s480_s14 = smov 0  }
   0x2 LB: > { %s25_s15 = sadd.s32 1, %s449_s13  ;;  %p391_p0 = scmp.ge.s32.totalorder %s453_s14, 1  ;;  %s453_s14 = sphi %s480_s14, %s13_s14   ;;  %s449_s13 = sphi %s478_s13, %s530_s13   ;;  %s445_s12 = sphi %s476_s12, %s529_s12  }
   0x3   : > { %p27_p1 = scmp.ge.s32.totalorder %s25_s15, 2  ;;  %p175_p2 = scmp.lt.s32.totalorder %s453_s14, 3 }
   0x5   : > { %s532_s15 = smov (%p27_p1, %s25_s15), 0  ;;  %p176_p3 = pnand %p391_p0, %p175_p2 }
   0x6   : > { %p211_p4 = scmp.lt.s32.totalorder (!%p176_p3), %s445_s12, 3  ;;  %s220_s16 = sadd.s32 (!%p176_p3), 2, %s445_s12  ;;  %v270_v16 = vlaneseq (!%p176_p3)  ;;  %v268_v22 = vld [vmem:[%s527_s2] sm:$0x3] (!%p176_p3)  ;;  %vm238_vm0 = vcmask (!%p176_p3), 0   ;;  %v455_v36 = vmov (!%p176_p3), 0.0  }
   0x7   : > { %179 = sbr.rel (%p176_p3) target bundleno = 410 (0x19a), region = 32  ;;  %p221_p5 = scmp.lt.s32.totalorder (!%p176_p3), %s220_s16, 3  ;;  %239 = vst.msk [vmem:[#allocation2] sm:$0x1] (!%p176_p3), %vm238_vm0, %v455_v36 }
   0x8   : > { %v271_v17 = vshrl.u32 (!%p176_p3), %v270_v16, 7  ;;  %p231_p6 = scmp.lt.s32.totalorder (!%p176_p3), %s445_s12, 1 }
   0xa   : > { %v272_v19 = vsub.s32 (!%p176_p3), 0, %v271_v17  ;;  %v276_v20 = vsub.s32 (!%p176_p3), 1, %v271_v17 }
   0xc   : > { %v273_v29 = vrot.slane (!%p176_p3), %v268_v22, %v272_v19  ;;  %v277_v30 = vrot.slane (!%p176_p3), %v268_v22, %v276_v20 }
   0xe   : > { %s212_s17 = scalar_select %p211_p4, %s445_s12, 3  ;;  %v282_v44 = vld [vmem:[#allocation2] sm:$0x1] }
   0xf   : > { %s534_s16 = smov (!%p221_p5, %s220_s16), 3  ;;  %s536_s12 = smov (!%p231_p6, %s445_s12), 1 }
  0x10   : > { %s398_s18 = sshll.u32 %s212_s17, 3  ;;  %s399_s22 = sshll.u32 %s534_s16, 3 }
  0x11   : > { %s219_s21 = scalar_lea.vmem %s525_s0, %s398_s18  ;;  %s229_s25 = scalar_lea.vmem %s526_s1, %s399_s22 }
  0x12   : > { %v240_v0 = vld [vmem:[%s219_s21] sm:$0xff]  ;;  %s233_s4 = scalar_lea.vmem %s528_s3, %s536_s12 }
  0x13   : > { %v241_v1 = vunpack.c.l.bf16 %v240_v0  ;;  %v242_v2 = vunpack.c.h.bf16 %v240_v0  ;;  %v243_v3 = vld [vmem:[%s229_s25] sm:$0xff] }
  0x14   : > { %v244_v4 = vunpack.c.l.bf16 %v243_v3  ;;  %v245_v5 = vunpack.c.h.bf16 %v243_v3 }
  0x15   : > { %v246_v6 = vmul.f32 %v241_v1, %v241_v1  ;;  %v247_v7 = vmul.f32 %v242_v2, %v242_v2 }
  0x16   : > { %v255_v8 = vmul.f32 %v244_v4, %v244_v4  ;;  %v256_v9 = vmul.f32 %v245_v5, %v245_v5 }
  0x17   : > { %v248_v10 = vadd.f32 %v247_v7, %v246_v6 }
  0x18   : > { %v257_v11 = vadd.f32 %v256_v9, %v255_v8 }
  0x19   : > { %249 = vadd.xlane.f32.xlu0 %v248_v10 }
  0x1d   : > { %258 = vadd.xlane.f32.xlu0 %v257_v11 }
  0xa6   : > { %v250_v12 = vpop.xlane.xlu0 %249 }
  0xa7   : > { %v251_v13 = vadd.f32 1e-20, %v250_v12 }
  0xa9   : > { %427 = vrsqrt.f32 %v251_v13 }
  0xaa   : > { %v259_v14 = vpop.xlane.xlu0 %258 }
  0xab   : > { %v260_v15 = vadd.f32 1e-20, %v259_v14 }
  0xad   : > { %429 = vrsqrt.f32 %v260_v15 }
  0xb3   : > { %v428_v18 = vpop.eup %427 }
  0xb4   : > { %v253_v23 = vmul.f32 %v428_v18, %v241_v1  ;;  %v254_v24 = vmul.f32 %v428_v18, %v242_v2 }
  0xb7   : > { %v430_v21 = vpop.eup %429 }
  0xb8   : > { %v262_v25 = vmul.f32 %v430_v21, %v244_v4  ;;  %v263_v26 = vmul.f32 %v430_v21, %v245_v5 }
  0xba   : > { %v264_v27 = vsub.f32 %v253_v23, %v262_v25  ;;  %v265_v28 = vsub.f32 %v254_v24, %v263_v26 }
  0xbc   : > { %v266_v31 = vmul.f32 %v264_v27, %v264_v27  ;;  %v267_v32 = vmul.f32 %v265_v28, %v265_v28 }
  0xbe   : > { %v280_v33 = vmul.f32 %v273_v29, %v266_v31  ;;  %v281_v34 = vmul.f32 %v277_v30, %v267_v32 }
  0xc0   : > { %v283_v35 = vadd.f32 %v281_v34, %v280_v33 }
  0xc2   : > { %284 = vadd.xlane.f32.xlu1 %v283_v35 }
 0x14f   : > { %v285_v37 = vpop.xlane.xlu1 %284 }
 0x150   : > { %v286_v38 = vrot.slane %v285_v37, 4 }
 0x152   : > { %v287_v39 = vadd.f32 %v286_v38, %v285_v37 }
 0x154   : > { %v288_v40 = vrot.slane %v287_v39, 2 }
 0x156   : > { %v289_v41 = vadd.f32 %v288_v40, %v287_v39 }
 0x158   : > { %v290_v42 = vrot.slane %v289_v41, 1 }
 0x15a   : > { %v291_v43 = vadd.f32 %v290_v42, %v289_v41 }
 0x15c   : > { %400 = vpush %v291_v43 }
 0x18d   : > { %s401_s28 = spop %400 }
 0x18e   : > { %v293_v45 = vstv %s401_s28 }
 0x18f   : > { %v294_v46 = vadd.f32 %v293_v45, %v282_v44 }
 0x191   : > { %296 = vst.msk [vmem:[#allocation2] sm:$0x1] %vm238_vm0, %v294_v46 }
 0x198   : > { %v300_v47 = vld [vmem:[#allocation2] sm:$0x1] }
 0x199   : > { %301 = vst.msk [vmem:[%s233_s4] sm:$0x1] %vm238_vm0, %v300_v47 }
 0x19a PF: > { %s13_s14 = sadd.s32 1, %s453_s14   ;;  %s529_s12 = smov %s449_s13 }
 0x19b   : > { %p10_p7 = scmp.ge.s32.totalorder %s13_s14, 4   ;;  %s530_s13 = smov %s532_s15 }
 0x19d   :  { %12 = sbr.rel (!%p10_p7) target bundleno = 2 (0x2), region = 73 }

// kernel: autoencoder_perceptual_forward.19
= control target key start
LH: loop header
LB: loop body
LE: loop exit
PB: predicated region body
PF: predicated region fallthrough
CT: control target
= control target key end

     0   :  { %s493_s12 = smov 0   ;;  %s495_s13 = smov 0   ;;  %s542_s0 = inlined_call_operand.vmem [shape: bf16[4,8,384], index: 0, kind: input, shape index: {}, may-alias: {0,1}]   ;;  %s543_s1 = inlined_call_operand.vmem [shape: bf16[4,8,384], index: 1, kind: input, shape index: {}, may-alias: {0,1}]   ;;  %s544_s2 = inlined_call_operand.vmem [shape: f32[1,1,384], index: 2, kind: input, shape index: {}]   ;;  %s545_s3 = inlined_call_operand.vmem [shape: f32[2,1,1], index: 3, kind: output, shape index: {}]  }
   0x1   :  { %s497_s14 = smov 0  }
   0x2 LB: > { %s25_s15 = sadd.s32 1, %s466_s13  ;;  %p410_p0 = scmp.ge.s32.totalorder %s470_s14, 1  ;;  %s470_s14 = sphi %s497_s14, %s13_s14   ;;  %s466_s13 = sphi %s495_s13, %s547_s13   ;;  %s462_s12 = sphi %s493_s12, %s546_s12  }
   0x3   : > { %p27_p1 = scmp.ge.s32.totalorder %s25_s15, 2  ;;  %p175_p2 = scmp.lt.s32.totalorder %s470_s14, 3 }
   0x5   : > { %s549_s15 = smov (%p27_p1, %s25_s15), 0  ;;  %p176_p3 = pnand %p410_p0, %p175_p2 }
   0x6   : > { %p211_p4 = scmp.lt.s32.totalorder (!%p176_p3), %s462_s12, 3  ;;  %s220_s16 = sadd.s32 (!%p176_p3), 2, %s462_s12  ;;  %v282_v24 = vlaneseq (!%p176_p3)  ;;  %v280_v28 = vld [vmem:[%s544_s2] sm:$0x7] (!%p176_p3)  ;;  %vm238_vm0 = vcmask (!%p176_p3), 0   ;;  %v472_v52 = vmov (!%p176_p3), 0.0  }
   0x7   : > { %179 = sbr.rel (%p176_p3) target bundleno = 415 (0x19f), region = 32  ;;  %p221_p5 = scmp.lt.s32.totalorder (!%p176_p3), %s220_s16, 3  ;;  %239 = vst.msk [vmem:[#allocation2] sm:$0x1] (!%p176_p3), %vm238_vm0, %v472_v52 }
   0x8   : > { %v283_v25 = vshrl.u32 (!%p176_p3), %v282_v24, 7  ;;  %p231_p6 = scmp.lt.s32.totalorder (!%p176_p3), %s462_s12, 1 }
   0xa   : > { %v284_v27 = vsub.s32 (!%p176_p3), 0, %v283_v25  ;;  %v288_v29 = vsub.s32 (!%p176_p3), 1, %v283_v25  ;;  %v292_v33 = vsub.s32 (!%p176_p3), 2, %v283_v25 }
   0xc   : > { %v285_v38 = vrot.slane (!%p176_p3), %v280_v28, %v284_v27  ;;  %v289_v42 = vrot.slane (!%p176_p3), %v280_v28, %v288_v29  ;;  %v293_v46 = vrot.slane (!%p176_p3), %v280_v28, %v292_v33 }
   0xe   : > { %s212_s17 = scalar_select %p211_p4, %s462_s12, 3  ;;  %v300_v60 = vld [vmem:[#allocation2] sm:$0x1] }
   0xf   : > { %s551_s16 = smov (!%p221_p5, %s220_s16), 3  ;;  %s553_s12 = smov (!%p231_p6, %s462_s12), 1 }
  0x10   : > { %s415_s18 = smul.u32 12, %s212_s17  ;;  %s233_s4 = scalar_lea.vmem %s545_s3, %s553_s12 }
  0x11   : > { %s416_s19 = smul.u32 12, %s551_s16 }
  0x12   : > { %s219_s22 = scalar_lea.vmem %s542_s0, %s415_s18 }
  0x13   : > { %v240_v0 = vld [vmem:[%s219_s22] sm:$0xff]  ;;  %v241_v1 = vld [vmem:[%s219_s22 + $0x8] sm:$0xf]  ;;  %s229_s25 = scalar_lea.vmem %s543_s1, %s416_s19 }
  0x14   : > { %v242_v2 = vunpack.c.l.bf16 %v240_v0  ;;  %v243_v3 = vunpack.c.h.bf16 %v240_v0  ;;  %v244_v4 = vunpack.c.l.bf16 %v241_v1  ;;  %v245_v5 = vld [vmem:[%s229_s25] sm:$0xff]  ;;  %v246_v6 = vld [vmem:[%s229_s25 + $0x8] sm:$0xf] }
  0x15   : > { %v247_v7 = vunpack.c.l.bf16 %v245_v5  ;;  %v248_v8 = vunpack.c.h.bf16 %v245_v5  ;;  %v249_v9 = vunpack.c.l.bf16 %v246_v6 }
  0x16   : > { %v250_v10 = vmul.f32 %v242_v2, %v242_v2  ;;  %v251_v11 = vmul.f32 %v243_v3, %v243_v3  ;;  %v252_v12 = vmul.f32 %v244_v4, %v244_v4 }
  0x17   : > { %v262_v13 = vmul.f32 %v247_v7, %v247_v7  ;;  %v263_v14 = vmul.f32 %v248_v8, %v248_v8  ;;  %v264_v16 = vmul.f32 %v249_v9, %v249_v9 }
  0x18   : > { %v253_v15 = vadd.f32 %v251_v11, %v250_v10 }
  0x19   : > { %v265_v17 = vadd.f32 %v263_v14, %v262_v13 }
  0x1a   : > { %v254_v18 = vadd.f32 %v253_v15, %v252_v12 }
  0x1b   : > { %v266_v19 = vadd.f32 %v265_v17, %v264_v16 }
  0x1c   : > { %255 = vadd.xlane.f32.xlu0 %v254_v18 }
  0x20   : > { %267 = vadd.xlane.f32.xlu0 %v266_v19 }
  0xa9   : > { %v256_v20 = vpop.xlane.xlu0 %255 }
  0xaa   : > { %v257_v21 = vadd.f32 1e-20, %v256_v20 }
  0xac   : > { %444 = vrsqrt.f32 %v257_v21 }
  0xad   : > { %v268_v22 = vpop.xlane.xlu0 %267 }
  0xae   : > { %v269_v23 = vadd.f32 1e-20, %v268_v22 }
  0xb0   : > { %446 = vrsqrt.f32 %v269_v23 }
  0xb6   : > { %v445_v26 = vpop.eup %444 }
  0xb7   : > { %v259_v31 = vmul.f32 %v445_v26, %v242_v2  ;;  %v260_v32 = vmul.f32 %v445_v26, %v243_v3  ;;  %v261_v34 = vmul.f32 %v445_v26, %v244_v4 }
  0xba   : > { %v447_v30 = vpop.eup %446 }
  0xbb   : > { %v271_v35 = vmul.f32 %v447_v30, %v247_v7  ;;  %v272_v36 = vmul.f32 %v447_v30, %v248_v8  ;;  %v273_v37 = vmul.f32 %v447_v30, %v249_v9 }
  0xbd   : > { %v274_v39 = vsub.f32 %v259_v31, %v271_v35  ;;  %v275_v40 = vsub.f32 %v260_v32, %v272_v36  ;;  %v276_v41 = vsub.f32 %v261_v34, %v273_v37 }
  0xbf   : > { %v277_v43 = vmul.f32 %v274_v39, %v274_v39  ;;  %v278_v44 = vmul.f32 %v275_v40, %v275_v40  ;;  %v279_v45 = vmul.f32 %v276_v41, %v276_v41 }
  0xc1   : > { %v297_v47 = vmul.f32 %v285_v38, %v277_v43  ;;  %v298_v48 = vmul.f32 %v289_v42, %v278_v44  ;;  %v299_v49 = vmul.f32 %v293_v46, %v279_v45 }
  0xc3   : > { %v301_v50 = vadd.f32 %v298_v48, %v297_v47 }
  0xc5   : > { %v302_v51 = vadd.f32 %v301_v50, %v299_v49 }
  0xc7   : > { %303 = vadd.xlane.f32.xlu1 %v302_v51 }
 0x154   : > { %v304_v53 = vpop.xlane.xlu1 %303 }
 0x155   : > { %v305_v54 = vrot.slane %v304_v53, 4 }
 0x157   : > { %v306_v55 = vadd.f32 %v305_v54, %v304_v53 }
 0x159   : > { %v307_v56 = vrot.slane %v306_v55, 2 }
 0x15b   : > { %v308_v57 = vadd.f32 %v307_v56, %v306_v55 }
 0x15d   : > { %v309_v58 = vrot.slane %v308_v57, 1 }
 0x15f   : > { %v310_v59 = vadd.f32 %v309_v58, %v308_v57 }
 0x161   : > { %417 = vpush %v310_v59 }
 0x192   : > { %s418_s28 = spop %417 }
 0x193   : > { %v312_v61 = vstv %s418_s28 }
 0x194   : > { %v313_v62 = vadd.f32 %v312_v61, %v300_v60 }
 0x196   : > { %315 = vst.msk [vmem:[#allocation2] sm:$0x1] %vm238_vm0, %v313_v62 }
 0x19d   : > { %v319_v63 = vld [vmem:[#allocation2] sm:$0x1] }
 0x19e   : > { %320 = vst.msk [vmem:[%s233_s4] sm:$0x1] %vm238_vm0, %v319_v63 }
 0x19f PF: > { %s13_s14 = sadd.s32 1, %s470_s14   ;;  %s546_s12 = smov %s466_s13 }
 0x1a0   : > { %p10_p7 = scmp.ge.s32.totalorder %s13_s14, 4   ;;  %s547_s13 = smov %s549_s15 }
 0x1a2   :  { %12 = sbr.rel (!%p10_p7) target bundleno = 2 (0x2), region = 73 }

// kernel: autoencoder_perceptual_forward.16
= control target key start
LH: loop header
LB: loop body
LE: loop exit
PB: predicated region body
PF: predicated region fallthrough
CT: control target
= control target key end

     0   :  { %v309_v36 = vlaneseq  ;;  %v3007_v37 = vmov 1983009808   ;;  %s3973_s1 = inlined_call_operand.vmem [shape: bf16[2304,256], index: 1, kind: input, shape index: {}]   ;;  %s3974_s0 = inlined_call_operand.vmem [shape: bf16[4,2304], index: 0, kind: input, shape index: {}]   ;;  %s3975_s2 = inlined_call_operand.vmem [shape: f32[1,256], index: 2, kind: input, shape index: {}]   ;;  %s3976_s3 = inlined_call_operand.vmem [shape: bf16[4,256], index: 3, kind: output, shape index: {}]  }
   0x1   :  { %v2571_v0 = vld [vmem:[%s3973_s1 + $0x4] ss:$8 sps:$4 sm:$0xff]   ;;  %v2575_v2 = vld [vmem:[%s3973_s1] ss:$8 sps:$4 sm:$0xff]   ;;  %v2577_v4 = vld [vmem:[%s3973_s1 + $0x14] ss:$8 sps:$4 sm:$0xff]   ;;  %v326_v38 = vunpack.c.l.s4 %v3007_v37 }
   0x2   :  { %v2573_v1 = vld [vmem:[%s3973_s1 + $0x404] ss:$8 sps:$4 sm:$0xff]   ;;  %1858 = vmatprep.subr.bf16.mxu1 %v2571_v0  ;;  %v2576_v3 = vld [vmem:[%s3973_s1 + $0x400] ss:$8 sps:$4 sm:$0xff]   ;;  %v2579_v5 = vld [vmem:[%s3973_s1 + $0x414] ss:$8 sps:$4 sm:$0xff]  }
   0x3   :  { %2022 = vmatprep.subr.bf16.mxu0 %v2573_v1  ;;  %1859 = vmatpush1.bf16.msra.mxu1 %v2575_v2  ;;  %v2581_v6 = vld [vmem:[%s3973_s1 + $0x10] ss:$8 sps:$4 sm:$0xff]   ;;  %v2583_v8 = vld [vmem:[%s3973_s1 + $0x24] ss:$8 sps:$4 sm:$0xff]   ;;  %v2587_v10 = vld [vmem:[%s3973_s1 + $0x20] ss:$8 sps:$4 sm:$0xff]   ;;  %v327_v43 = vunpack.c.0.s8 %v326_v38 }
   0x4   :  { %2023 = vmatpush1.bf16.msra.mxu0 %v2576_v3  ;;  %1860 = vmatprep.subr.bf16.mxu1 %v2577_v4  ;;  %v2582_v7 = vld [vmem:[%s3973_s1 + $0x410] ss:$8 sps:$4 sm:$0xff]   ;;  %v2585_v9 = vld [vmem:[%s3973_s1 + $0x424] ss:$8 sps:$4 sm:$0xff]   ;;  %v2588_v11 = vld [vmem:[%s3973_s1 + $0x420] ss:$8 sps:$4 sm:$0xff]  }
   0x5   :  { %2024 = vmatprep.subr.bf16.mxu0 %v2579_v5  ;;  %v2589_v12 = vld [vmem:[%s3973_s1 + $0x34] ss:$8 sps:$4 sm:$0xff]   ;;  %v2593_v14 = vld [vmem:[%s3973_s1 + $0x30] ss:$8 sps:$4 sm:$0xff]   ;;  %v2595_v16 = vld [vmem:[%s3973_s1 + $0x44] ss:$8 sps:$4 sm:$0xff]  }
   0x6   :  { %v2591_v13 = vld [vmem:[%s3973_s1 + $0x434] ss:$8 sps:$4 sm:$0xff]   ;;  %v2594_v15 = vld [vmem:[%s3973_s1 + $0x430] ss:$8 sps:$4 sm:$0xff]   ;;  %v2597_v17 = vld [vmem:[%s3973_s1 + $0x444] ss:$8 sps:$4 sm:$0xff]  }
   0x7   :  { %1861 = vmatpush1.bf16.msra.mxu1 %v2581_v6  ;;  %v2599_v18 = vld [vmem:[%s3973_s1 + $0x40] ss:$8 sps:$4 sm:$0xff]   ;;  %v2601_v20 = vld [vmem:[%s3973_s1 + $0x54] ss:$8 sps:$4 sm:$0xff]   ;;  %v2605_v22 = vld [vmem:[%s3973_s1 + $0x50] ss:$8 sps:$4 sm:$0xff]  }
   0x8   :  { %2025 = vmatpush1.bf16.msra.mxu0 %v2582_v7  ;;  %1862 = vmatprep.subr.bf16.mxu1 %v2583_v8  ;;  %v2600_v19 = vld [vmem:[%s3973_s1 + $0x440] ss:$8 sps:$4 sm:$0xff]   ;;  %v2603_v21 = vld [vmem:[%s3973_s1 + $0x454] ss:$8 sps:$4 sm:$0xff]   ;;  %v2606_v23 = vld [vmem:[%s3973_s1 + $0x450] ss:$8 sps:$4 sm:$0xff]  }
   0x9   :  { %2026 = vmatprep.subr.bf16.mxu0 %v2585_v9  ;;  %v2607_v24 = vld [vmem:[%s3973_s1 + $0x64] ss:$8 sps:$4 sm:$0xff]   ;;  %v2611_v26 = vld [vmem:[%s3973_s1 + $0x60] ss:$8 sps:$4 sm:$0xff]   ;;  %v2613_v28 = vld [vmem:[%s3973_s1 + $0x74] ss:$8 sps:$4 sm:$0xff]  }
   0xa   :  { %v2609_v25 = vld [vmem:[%s3973_s1 + $0x464] ss:$8 sps:$4 sm:$0xff]   ;;  %v2612_v27 = vld [vmem:[%s3973_s1 + $0x460] ss:$8 sps:$4 sm:$0xff]   ;;  %v2615_v29 = vld [vmem:[%s3973_s1 + $0x474] ss:$8 sps:$4 sm:$0xff]  }
   0xb   :  { %1863 = vmatpush1.bf16.msra.mxu1 %v2587_v10  ;;  %v2617_v30 = vld [vmem:[%s3973_s1 + $0x70] ss:$8 sps:$4 sm:$0xff]   ;;  %v2619_v32 = vld [vmem:[%s3973_s1 + $0x84] ss:$8 sps:$4 sm:$0xff]   ;;  %v2623_v34 = vld [vmem:[%s3973_s1 + $0x80] ss:$8 sps:$4 sm:$0xff]  }
   0xc   :  { %2027 = vmatpush1.bf16.msra.mxu0 %v2588_v11  ;;  %1864 = vmatprep.subr.bf16.mxu1 %v2589_v12  ;;  %v2618_v31 = vld [vmem:[%s3973_s1 + $0x470] ss:$8 sps:$4 sm:$0xff]   ;;  %v2621_v33 = vld [vmem:[%s3973_s1 + $0x484] ss:$8 sps:$4 sm:$0xff]   ;;  %v2624_v35 = vld [vmem:[%s3973_s1 + $0x480] ss:$8 sps:$4 sm:$0xff]  }
   0xd   :  { %2028 = vmatprep.subr.bf16.mxu0 %v2591_v13  ;;  %v2625_v39 = vld [vmem:[%s3973_s1 + $0x94] ss:$8 sps:$4 sm:$0xff]   ;;  %v2629_v41 = vld [vmem:[%s3973_s1 + $0x90] ss:$8 sps:$4 sm:$0xff]   ;;  %v3145_v42 = vshrl.u32 %v309_v36, 7  ;;  %v14_v52 = vld [vmem:[%s3974_s0] sm:$0xff] }
   0xe   :  { %v2627_v40 = vld [vmem:[%s3973_s1 + $0x494] ss:$8 sps:$4 sm:$0xff]   ;;  %v2630_v44 = vld [vmem:[%s3973_s1 + $0x490] ss:$8 sps:$4 sm:$0xff]   ;;  %v2631_v45 = vld [vmem:[%s3973_s1 + $0xa4] ss:$8 sps:$4 sm:$0xff]   ;;  %v324_v10 = vcombine.high %v14_v52, %v14_v52 }
   0xf   :  { %1865 = vmatpush1.bf16.msra.mxu1 %v2593_v14  ;;  %v2633_v46 = vld [vmem:[%s3973_s1 + $0x4a4] ss:$8 sps:$4 sm:$0xff]   ;;  %v2635_v47 = vld [vmem:[%s3973_s1 + $0xa0] ss:$8 sps:$4 sm:$0xff]   ;;  %v3163_v49 = vsub.s32 %v327_v43, %v3145_v42  ;;  %v2637_v50 = vld [vmem:[%s3973_s1 + $0xb4] ss:$8 sps:$4 sm:$0xff]  }
  0x10   :  { %2029 = vmatpush1.bf16.msra.mxu0 %v2594_v15  ;;  %1866 = vmatprep.subr.bf16.mxu1 %v2595_v16  ;;  %v2636_v48 = vld [vmem:[%s3973_s1 + $0x4a0] ss:$8 sps:$4 sm:$0xff]   ;;  %v2639_v51 = vld [vmem:[%s3973_s1 + $0x4b4] ss:$8 sps:$4 sm:$0xff]   ;;  %v2641_v53 = vld [vmem:[%s3973_s1 + $0xb0] ss:$8 sps:$4 sm:$0xff]  }
  0x11   :  { %2030 = vmatprep.subr.bf16.mxu0 %v2597_v17  ;;  %v331_v54 = vrot.slane %v14_v52, %v3163_v49  ;;  %v2642_v55 = vld [vmem:[%s3973_s1 + $0x4b0] ss:$8 sps:$4 sm:$0xff]   ;;  %v2643_v57 = vld [vmem:[%s3973_s1 + $0xc4] ss:$8 sps:$4 sm:$0xff]   ;;  %v2647_v62 = vld [vmem:[%s3973_s1 + $0xc0] ss:$8 sps:$4 sm:$0xff]   ;;  %v3240_v16 = vrot.slane %v324_v10, %v3163_v49 }
  0x12   :  { %v16_v56 = vld [vmem:[%s3974_s0 + $0x10] sm:$0xff]  ;;  %v2645_v58 = vld [vmem:[%s3973_s1 + $0x4c4] ss:$8 sps:$4 sm:$0xff]   ;;  %v2648_v63 = vld [vmem:[%s3973_s1 + $0x4c0] ss:$8 sps:$4 sm:$0xff]  }
  0x13   :  { %1867 = vmatpush1.bf16.msra.mxu1 %v2599_v18  ;;  %v339_v59 = vcombine.high %v331_v54, %v331_v54  ;;  %v365_v60 = vrot.slane %v16_v56, %v3163_v49  ;;  %v2649_v0 = vld [vmem:[%s3973_s1 + $0xd4] ss:$8 sps:$4 sm:$0xff]   ;;  %v2653_v2 = vld [vmem:[%s3973_s1 + $0xd0] ss:$8 sps:$4 sm:$0xff]   ;;  %v2655_v4 = vld [vmem:[%s3973_s1 + $0xe4] ss:$8 sps:$4 sm:$0xff]   ;;  %v358_v11 = vcombine.high %v16_v56, %v16_v56 }
  0x14   :  { %2031 = vmatpush1.bf16.msra.mxu0 %v2600_v19  ;;  %1868 = vmatprep.subr.bf16.mxu1 %v2601_v20  ;;  %v2651_v1 = vld [vmem:[%s3973_s1 + $0x4d4] ss:$8 sps:$4 sm:$0xff]   ;;  %v2654_v3 = vld [vmem:[%s3973_s1 + $0x4d0] ss:$8 sps:$4 sm:$0xff]   ;;  %v2657_v5 = vld [vmem:[%s3973_s1 + $0x4e4] ss:$8 sps:$4 sm:$0xff]  }
  0x15   :  { %2032 = vmatprep.subr.bf16.mxu0 %v2603_v21  ;;  %1890 = vmatprep.mubr.bf16.mxu1 %v339_v59  ;;  %v373_v61 = vcombine.high %v365_v60, %v365_v60  ;;  %v2659_v6 = vld [vmem:[%s3973_s1 + $0xe0] ss:$8 sps:$4 sm:$0xff]   ;;  %v2661_v8 = vld [vmem:[%s3973_s1 + $0xf4] ss:$8 sps:$4 sm:$0xff]   ;;  %v2665_v12 = vld [vmem:[%s3973_s1 + $0xf0] ss:$8 sps:$4 sm:$0xff]   ;;  %v3243_v17 = vrot.slane %v358_v11, %v3163_v49 }
  0x16   :  { %v2660_v7 = vld [vmem:[%s3973_s1 + $0x4e0] ss:$8 sps:$4 sm:$0xff]   ;;  %v2663_v9 = vld [vmem:[%s3973_s1 + $0x4f4] ss:$8 sps:$4 sm:$0xff]   ;;  %v2666_v13 = vld [vmem:[%s3973_s1 + $0x4f0] ss:$8 sps:$4 sm:$0xff]  }
  0x17   :  { %1869 = vmatpush1.bf16.msra.mxu1 %v2605_v22  ;;  %2054 = vmatprep.mubr.bf16.mxu0 %v373_v61  ;;  %v2670_v14 = vld [vmem:[%s3973_s1 + $0x104] ss:$8 sps:$4 sm:$0xff]   ;;  %v2668_v18 = vld [vmem:[%s3973_s1 + $0x100] ss:$8 sps:$4 sm:$0xff]   ;;  %v2677_v20 = vld [vmem:[%s3973_s1 + $0x114] ss:$8 sps:$4 sm:$0xff]   ;;  %v340_v22 = vcombine.high %v3240_v16, %v3240_v16 }
  0x18   :  { %2033 = vmatpush1.bf16.msra.mxu0 %v2606_v23  ;;  %1870 = vmatprep.subr.bf16.mxu1 %v2607_v24  ;;  %v2674_v15 = vld [vmem:[%s3973_s1 + $0x504] ss:$8 sps:$4 sm:$0xff]   ;;  %v2672_v19 = vld [vmem:[%s3973_s1 + $0x500] ss:$8 sps:$4 sm:$0xff]   ;;  %v2680_v21 = vld [vmem:[%s3973_s1 + $0x514] ss:$8 sps:$4 sm:$0xff]   ;;  %v374_v23 = vcombine.high %v3243_v17, %v3243_v17 }
  0x19   :  { %2034 = vmatprep.subr.bf16.mxu0 %v2609_v25  ;;  %v2675_v24 = vld [vmem:[%s3973_s1 + $0x110] ss:$8 sps:$4 sm:$0xff]   ;;  %v2693_v36 = vld [vmem:[%s3973_s1 + $0x140] ss:$8 sps:$4 sm:$0xff]   ;;  %v2701_v38 = vld [vmem:[%s3973_s1 + $0x154] ss:$8 sps:$4 sm:$0xff]  }
  0x1a   :  { %v2678_v25 = vld [vmem:[%s3973_s1 + $0x510] ss:$8 sps:$4 sm:$0xff]   ;;  %v2696_v37 = vld [vmem:[%s3973_s1 + $0x540] ss:$8 sps:$4 sm:$0xff]   ;;  %v2707_v43 = vld [vmem:[%s3973_s1 + $0x164] ss:$8 sps:$4 sm:$0xff]  }
  0x1b   :  { %1871 = vmatpush1.bf16.msra.mxu1 %v2611_v26  ;;  %v2683_v26 = vld [vmem:[%s3973_s1 + $0x124] ss:$8 sps:$4 sm:$0xff]   ;;  %v2725_v56 = vld [vmem:[%s3973_s1 + $0x194] ss:$8 sps:$4 sm:$0xff]   ;;  %v2726_v59 = vld [vmem:[%s3973_s1 + $0x590] ss:$8 sps:$4 sm:$0xff]  }
  0x1c   :  { %2035 = vmatpush1.bf16.msra.mxu0 %v2612_v27  ;;  %1872 = vmatprep.subr.bf16.mxu1 %v2613_v28  ;;  %v2686_v27 = vld [vmem:[%s3973_s1 + $0x524] ss:$8 sps:$4 sm:$0xff]   ;;  %v2681_v28 = vld [vmem:[%s3973_s1 + $0x120] ss:$8 sps:$4 sm:$0xff]   ;;  %v2747_v10 = vld [vmem:[%s3973_s1 + $0x1d0] ss:$8 sps:$4 sm:$0xff]  }
  0x1d   :  { %2036 = vmatprep.subr.bf16.mxu0 %v2615_v29  ;;  %v2684_v29 = vld [vmem:[%s3973_s1 + $0x520] ss:$8 sps:$4 sm:$0xff]   ;;  %v2719_v52 = vld [vmem:[%s3973_s1 + $0x184] ss:$8 sps:$4 sm:$0xff]   ;;  %v2750_v11 = vld [vmem:[%s3973_s1 + $0x5d0] ss:$8 sps:$4 sm:$0xff]  }
  0x1e   :  { %v2734_v61 = vld [vmem:[%s3973_s1 + $0x5a4] ss:$8 sps:$4 sm:$0xff]  }
  0x1f   :  { %1873 = vmatpush1.bf16.msra.mxu1 %v2617_v30  ;;  %v2689_v30 = vld [vmem:[%s3973_s1 + $0x134] ss:$8 sps:$4 sm:$0xff]  }
  0x20   :  { %2037 = vmatpush1.bf16.msra.mxu0 %v2618_v31  ;;  %1874 = vmatprep.subr.bf16.mxu1 %v2619_v32  ;;  %v2692_v31 = vld [vmem:[%s3973_s1 + $0x534] ss:$8 sps:$4 sm:$0xff]   ;;  %v2687_v32 = vld [vmem:[%s3973_s1 + $0x130] ss:$8 sps:$4 sm:$0xff]  }
  0x21   :  { %2038 = vmatprep.subr.bf16.mxu0 %v2621_v33  ;;  %v2690_v33 = vld [vmem:[%s3973_s1 + $0x530] ss:$8 sps:$4 sm:$0xff]  }
  0x23   :  { %1875 = vmatpush1.bf16.msra.mxu1 %v2623_v34  ;;  %v2695_v34 = vld [vmem:[%s3973_s1 + $0x144] ss:$8 sps:$4 sm:$0xff]  }
  0x24   :  { %2039 = vmatpush1.bf16.msra.mxu0 %v2624_v35  ;;  %1876 = vmatprep.subr.bf16.mxu1 %v2625_v39  ;;  %v2698_v35 = vld [vmem:[%s3973_s1 + $0x544] ss:$8 sps:$4 sm:$0xff]   ;;  %v2704_v39 = vld [vmem:[%s3973_s1 + $0x554] ss:$8 sps:$4 sm:$0xff]  }
  0x25   :  { %2040 = vmatprep.subr.bf16.mxu0 %v2627_v40  ;;  %v2699_v40 = vld [vmem:[%s3973_s1 + $0x150] ss:$8 sps:$4 sm:$0xff]  }
  0x27   :  { %1877 = vmatpush1.bf16.msra.mxu1 %v2629_v41  ;;  %v2702_v41 = vld [vmem:[%s3973_s1 + $0x550] ss:$8 sps:$4 sm:$0xff]  }
  0x28   :  { %2041 = vmatpush1.bf16.msra.mxu0 %v2630_v44  ;;  %1878 = vmatprep.subr.bf16.mxu1 %v2631_v45  ;;  %v2710_v44 = vld [vmem:[%s3973_s1 + $0x564] ss:$8 sps:$4 sm:$0xff]   ;;  %v2705_v45 = vld [vmem:[%s3973_s1 + $0x160] ss:$8 sps:$4 sm:$0xff]  }
  0x29   :  { %2042 = vmatprep.subr.bf16.mxu0 %v2633_v46  ;;  %v2708_v46 = vld [vmem:[%s3973_s1 + $0x560] ss:$8 sps:$4 sm:$0xff]  }
  0x2b   :  { %1879 = vmatpush1.bf16.msra.mxu1 %v2635_v47  ;;  %v2713_v47 = vld [vmem:[%s3973_s1 + $0x174] ss:$8 sps:$4 sm:$0xff]  }
  0x2c   :  { %2043 = vmatpush1.bf16.msra.mxu0 %v2636_v48  ;;  %1880 = vmatprep.subr.bf16.mxu1 %v2637_v50  ;;  %v2716_v48 = vld [vmem:[%s3973_s1 + $0x574] ss:$8 sps:$4 sm:$0xff]   ;;  %v2711_v50 = vld [vmem:[%s3973_s1 + $0x170] ss:$8 sps:$4 sm:$0xff]  }
  0x2d   :  { %2044 = vmatprep.subr.bf16.mxu0 %v2639_v51  ;;  %v2714_v51 = vld [vmem:[%s3973_s1 + $0x570] ss:$8 sps:$4 sm:$0xff]  }
  0x2f   :  { %1881 = vmatpush1.bf16.msra.mxu1 %v2641_v53  ;;  %v2722_v53 = vld [vmem:[%s3973_s1 + $0x584] ss:$8 sps:$4 sm:$0xff]  }
  0x30   :  { %2045 = vmatpush1.bf16.msra.mxu0 %v2642_v55  ;;  %1882 = vmatprep.subr.bf16.mxu1 %v2643_v57  ;;  %v2720_v55 = vld [vmem:[%s3973_s1 + $0x580] ss:$8 sps:$4 sm:$0xff]   ;;  %v2728_v57 = vld [vmem:[%s3973_s1 + $0x594] ss:$8 sps:$4 sm:$0xff]  }
  0x31   :  { %2046 = vmatprep.subr.bf16.mxu0 %v2645_v58  ;;  %v2723_v58 = vld [vmem:[%s3973_s1 + $0x190] ss:$8 sps:$4 sm:$0xff]  }
  0x33   :  { %1883 = vmatpush1.bf16.msra.mxu1 %v2647_v62  ;;  %v2729_v62 = vld [vmem:[%s3973_s1 + $0x1a0] ss:$8 sps:$4 sm:$0xff]  }
  0x34   :  { %2047 = vmatpush1.bf16.msra.mxu0 %v2648_v63  ;;  %1884 = vmatprep.subr.bf16.mxu1 %v2649_v0  ;;  %v2732_v63 = vld [vmem:[%s3973_s1 + $0x5a0] ss:$8 sps:$4 sm:$0xff]   ;;  %v2737_v0 = vld [vmem:[%s3973_s1 + $0x1b4] ss:$8 sps:$4 sm:$0xff]  }
  0x35   :  { %2048 = vmatprep.subr.bf16.mxu0 %v2651_v1  ;;  %v2740_v1 = vld [vmem:[%s3973_s1 + $0x5b4] ss:$8 sps:$4 sm:$0xff]  }
  0x37   :  { %1885 = vmatpush1.bf16.msra.mxu1 %v2653_v2  ;;  %v2735_v2 = vld [vmem:[%s3973_s1 + $0x1b0] ss:$8 sps:$4 sm:$0xff]  }
  0x38   :  { %2049 = vmatpush1.bf16.msra.mxu0 %v2654_v3  ;;  %1886 = vmatprep.subr.bf16.mxu1 %v2655_v4  ;;  %v2738_v3 = vld [vmem:[%s3973_s1 + $0x5b0] ss:$8 sps:$4 sm:$0xff]   ;;  %v2743_v4 = vld [vmem:[%s3973_s1 + $0x1c4] ss:$8 sps:$4 sm:$0xff]  }
  0x39   :  { %2050 = vmatprep.subr.bf16.mxu0 %v2657_v5  ;;  %v2746_v5 = vld [vmem:[%s3973_s1 + $0x5c4] ss:$8 sps:$4 sm:$0xff]  }
  0x3b   :  { %1887 = vmatpush1.bf16.msra.mxu1 %v2659_v6  ;;  %v2741_v6 = vld [vmem:[%s3973_s1 + $0x1c0] ss:$8 sps:$4 sm:$0xff]  }
  0x3c   :  { %2051 = vmatpush1.bf16.msra.mxu0 %v2660_v7  ;;  %1888 = vmatprep.subr.bf16.mxu1 %v2661_v8  ;;  %v2744_v7 = vld [vmem:[%s3973_s1 + $0x5c0] ss:$8 sps:$4 sm:$0xff]   ;;  %v2749_v8 = vld [vmem:[%s3973_s1 + $0x1d4] ss:$8 sps:$4 sm:$0xff]  }
  0x3d   :  { %2052 = vmatprep.subr.bf16.mxu0 %v2663_v9  ;;  %v2752_v9 = vld [vmem:[%s3973_s1 + $0x5d4] ss:$8 sps:$4 sm:$0xff]  }
  0x3f   :  { %1889 = vmatpush1.bf16.msra.mxu1 %v2665_v12  ;;  %v2755_v12 = vld [vmem:[%s3973_s1 + $0x1e4] ss:$8 sps:$4 sm:$0xff]  }
  0x40   :  { %2053 = vmatpush1.bf16.msra.mxu0 %v2666_v13  ;;  %1899 = vmatprep.subr.bf16.mxu1 %v2670_v14  ;;  %v2758_v13 = vld [vmem:[%s3973_s1 + $0x5e4] ss:$8 sps:$4 sm:$0xff]   ;;  %v2753_v14 = vld [vmem:[%s3973_s1 + $0x1e0] ss:$8 sps:$4 sm:$0xff]  }
  0x41   :  { %2063 = vmatprep.subr.bf16.mxu0 %v2674_v15  ;;  %v2756_v15 = vld [vmem:[%s3973_s1 + $0x5e0] ss:$8 sps:$4 sm:$0xff]  }
  0x42   :  { %1891 = vmatmul.mubr.bf16.vlgmr.msra.gmra.mrb[0].mxu1 %v331_v54  ;;  %v2717_v54 = vld [vmem:[%s3973_s1 + $0x180] ss:$8 sps:$4 sm:$0xff]  }
  0x43   :  { %2055 = vmatmul.mubr.bf16.vlgmr.msra.gmra.mrb[0].mxu0 %v365_v60  ;;  %1900 = vmatpush1.bf16.msra.mxu1 %v2668_v18  ;;  %v2731_v60 = vld [vmem:[%s3973_s1 + $0x1a4] ss:$8 sps:$4 sm:$0xff]   ;;  %v2761_v18 = vld [vmem:[%s3973_s1 + $0x1f4] ss:$8 sps:$4 sm:$0xff]  }
  0x44   :  { %2064 = vmatpush1.bf16.msra.mxu0 %v2672_v19  ;;  %1901 = vmatprep.subr.bf16.mxu1 %v2677_v20  ;;  %v2764_v19 = vld [vmem:[%s3973_s1 + $0x5f4] ss:$8 sps:$4 sm:$0xff]   ;;  %v2759_v20 = vld [vmem:[%s3973_s1 + $0x1f0] ss:$8 sps:$4 sm:$0xff]  }
  0x45   :  { %2065 = vmatprep.subr.bf16.mxu0 %v2680_v21  ;;  %1931 = vmatprep.mubr.bf16.mxu1 %v340_v22  ;;  %v2762_v21 = vld [vmem:[%s3973_s1 + $0x5f0] ss:$8 sps:$4 sm:$0xff]   ;;  %v2767_v22 = vld [vmem:[%s3973_s1 + $0x204] ss:$8 sps:$4 sm:$0xff]  }
  0x46   :  { %2095 = vmatprep.mubr.bf16.mxu0 %v374_v23  ;;  %v2770_v23 = vld [vmem:[%s3973_s1 + $0x604] ss:$8 sps:$4 sm:$0xff]  }
  0x47   :  { %1902 = vmatpush1.bf16.msra.mxu1 %v2675_v24  ;;  %v2765_v24 = vld [vmem:[%s3973_s1 + $0x200] ss:$8 sps:$4 sm:$0xff]  }
  0x48   :  { %2066 = vmatpush1.bf16.msra.mxu0 %v2678_v25  ;;  %1903 = vmatprep.subr.bf16.mxu1 %v2683_v26  ;;  %v2768_v25 = vld [vmem:[%s3973_s1 + $0x600] ss:$8 sps:$4 sm:$0xff]   ;;  %v2773_v26 = vld [vmem:[%s3973_s1 + $0x214] ss:$8 sps:$4 sm:$0xff]  }
  0x49   :  { %2067 = vmatprep.subr.bf16.mxu0 %v2686_v27  ;;  %v3453_v27 = vld [vmem:[%s3974_s0 + $0x8] sm:$0xff] }
  0x4b   :  { %1904 = vmatpush1.bf16.msra.mxu1 %v2681_v28  ;;  %v2776_v28 = vld [vmem:[%s3973_s1 + $0x614] ss:$8 sps:$4 sm:$0xff]  }
  0x4c   :  { %2068 = vmatpush1.bf16.msra.mxu0 %v2684_v29  ;;  %1905 = vmatprep.subr.bf16.mxu1 %v2689_v30  ;;  %v3460_v29 = vrot.slane %v3453_v27, %v3163_v49  ;;  %v3465_v30 = vld [vmem:[%s3974_s0 + $0x18] sm:$0xff] }
  0x4d   :  { %2069 = vmatprep.subr.bf16.mxu0 %v2692_v31  ;;  %v2771_v31 = vld [vmem:[%s3973_s1 + $0x210] ss:$8 sps:$4 sm:$0xff]  }
  0x4f   :  { %1906 = vmatpush1.bf16.msra.mxu1 %v2687_v32  ;;  %v2774_v32 = vld [vmem:[%s3973_s1 + $0x610] ss:$8 sps:$4 sm:$0xff]  }
  0x50   :  { %2070 = vmatpush1.bf16.msra.mxu0 %v2690_v33  ;;  %1907 = vmatprep.subr.bf16.mxu1 %v2695_v34  ;;  %v356_v33 = vcombine.high %v3460_v29, %v3460_v29  ;;  %v3479_v34 = vrot.slane %v3465_v30, %v3163_v49 }
  0x51   :  { %2071 = vmatprep.subr.bf16.mxu0 %v2698_v35 }
  0x52   :  { %v390_v35 = vcombine.high %v3479_v34, %v3479_v34 }
  0x53   :  { %1908 = vmatpush1.bf16.msra.mxu1 %v2693_v36  ;;  %v2777_v36 = vld [vmem:[%s3973_s1 + $0x220] ss:$8 sps:$4 sm:$0xff]  }
  0x54   :  { %2072 = vmatpush1.bf16.msra.mxu0 %v2696_v37  ;;  %1909 = vmatprep.subr.bf16.mxu1 %v2701_v38  ;;  %v2780_v37 = vld [vmem:[%s3973_s1 + $0x620] ss:$8 sps:$4 sm:$0xff]   ;;  %v2785_v38 = vld [vmem:[%s3973_s1 + $0x234] ss:$8 sps:$4 sm:$0xff]  }
  0x55   :  { %2073 = vmatprep.subr.bf16.mxu0 %v2704_v39  ;;  %v2788_v39 = vld [vmem:[%s3973_s1 + $0x634] ss:$8 sps:$4 sm:$0xff]  }
  0x57   :  { %1910 = vmatpush1.bf16.msra.mxu1 %v2699_v40  ;;  %v2783_v40 = vld [vmem:[%s3973_s1 + $0x230] ss:$8 sps:$4 sm:$0xff]  }
  0x58   :  { %2074 = vmatpush1.bf16.msra.mxu0 %v2702_v41  ;;  %1911 = vmatprep.subr.bf16.mxu1 %v2707_v43  ;;  %v2786_v41 = vld [vmem:[%s3973_s1 + $0x630] ss:$8 sps:$4 sm:$0xff]   ;;  %v2791_v43 = vld [vmem:[%s3973_s1 + $0x244] ss:$8 sps:$4 sm:$0xff]  }
  0x59   :  { %2075 = vmatprep.subr.bf16.mxu0 %v2710_v44  ;;  %v2794_v44 = vld [vmem:[%s3973_s1 + $0x644] ss:$8 sps:$4 sm:$0xff]  }
  0x5b   :  { %1912 = vmatpush1.bf16.msra.mxu1 %v2705_v45  ;;  %v2789_v45 = vld [vmem:[%s3973_s1 + $0x240] ss:$8 sps:$4 sm:$0xff]  }
  0x5c   :  { %2076 = vmatpush1.bf16.msra.mxu0 %v2708_v46  ;;  %1913 = vmatprep.subr.bf16.mxu1 %v2713_v47  ;;  %v2792_v46 = vld [vmem:[%s3973_s1 + $0x640] ss:$8 sps:$4 sm:$0xff]   ;;  %v2797_v47 = vld [vmem:[%s3973_s1 + $0x254] ss:$8 sps:$4 sm:$0xff]  }
  0x5d   :  { %2077 = vmatprep.subr.bf16.mxu0 %v2716_v48  ;;  %v2800_v48 = vld [vmem:[%s3973_s1 + $0x654] ss:$8 sps:$4 sm:$0xff]  }
  0x5f   :  { %1914 = vmatpush1.bf16.msra.mxu1 %v2711_v50  ;;  %v2795_v50 = vld [vmem:[%s3973_s1 + $0x250] ss:$8 sps:$4 sm:$0xff]  }
  0x60   :  { %2078 = vmatpush1.bf16.msra.mxu0 %v2714_v51  ;;  %1915 = vmatprep.subr.bf16.mxu1 %v2719_v52  ;;  %v2798_v51 = vld [vmem:[%s3973_s1 + $0x650] ss:$8 sps:$4 sm:$0xff]   ;;  %v2803_v52 = vld [vmem:[%s3973_s1 + $0x264] ss:$8 sps:$4 sm:$0xff]  }
  0x61   :  { %2079 = vmatprep.subr.bf16.mxu0 %v2722_v53  ;;  %v2806_v53 = vld [vmem:[%s3973_s1 + $0x664] ss:$8 sps:$4 sm:$0xff]  }
  0x63   :  { %1916 = vmatpush1.bf16.msra.mxu1 %v2717_v54  ;;  %v2801_v54 = vld [vmem:[%s3973_s1 + $0x260] ss:$8 sps:$4 sm:$0xff]  }
  0x64   :  { %2080 = vmatpush1.bf16.msra.mxu0 %v2720_v55  ;;  %1917 = vmatprep.subr.bf16.mxu1 %v2725_v56  ;;  %v2804_v55 = vld [vmem:[%s3973_s1 + $0x660] ss:$8 sps:$4 sm:$0xff]   ;;  %v2809_v56 = vld [vmem:[%s3973_s1 + $0x274] ss:$8 sps:$4 sm:$0xff]  }
  0x65   :  { %2081 = vmatprep.subr.bf16.mxu0 %v2728_v57  ;;  %v2812_v57 = vld [vmem:[%s3973_s1 + $0x674] ss:$8 sps:$4 sm:$0xff]  }
  0x67   :  { %1918 = vmatpush1.bf16.msra.mxu1 %v2723_v58  ;;  %v2807_v58 = vld [vmem:[%s3973_s1 + $0x270] ss:$8 sps:$4 sm:$0xff]  }
  0x68   :  { %2082 = vmatpush1.bf16.msra.mxu0 %v2726_v59  ;;  %1919 = vmatprep.subr.bf16.mxu1 %v2731_v60  ;;  %v2810_v59 = vld [vmem:[%s3973_s1 + $0x670] ss:$8 sps:$4 sm:$0xff]   ;;  %v2815_v60 = vld [vmem:[%s3973_s1 + $0x284] ss:$8 sps:$4 sm:$0xff]  }
  0x69   :  { %2083 = vmatprep.subr.bf16.mxu0 %v2734_v61  ;;  %v2818_v61 = vld [vmem:[%s3973_s1 + $0x684] ss:$8 sps:$4 sm:$0xff]  }
  0x6b   :  { %1920 = vmatpush1.bf16.msra.mxu1 %v2729_v62  ;;  %v2813_v62 = vld [vmem:[%s3973_s1 + $0x280] ss:$8 sps:$4 sm:$0xff]  }
  0x6c   :  { %2084 = vmatpush1.bf16.msra.mxu0 %v2732_v63  ;;  %1921 = vmatprep.subr.bf16.mxu1 %v2737_v0  ;;  %v2816_v63 = vld [vmem:[%s3973_s1 + $0x680] ss:$8 sps:$4 sm:$0xff]   ;;  %v2821_v0 = vld [vmem:[%s3973_s1 + $0x294] ss:$8 sps:$4 sm:$0xff]  }
  0x6d   :  { %2085 = vmatprep.subr.bf16.mxu0 %v2740_v1  ;;  %v2824_v1 = vld [vmem:[%s3973_s1 + $0x694] ss:$8 sps:$4 sm:$0xff]  }
  0x6f   :  { %1922 = vmatpush1.bf16.msra.mxu1 %v2735_v2  ;;  %v2819_v2 = vld [vmem:[%s3973_s1 + $0x290] ss:$8 sps:$4 sm:$0xff]  }
  0x70   :  { %2086 = vmatpush1.bf16.msra.mxu0 %v2738_v3  ;;  %1923 = vmatprep.subr.bf16.mxu1 %v2743_v4  ;;  %v2822_v3 = vld [vmem:[%s3973_s1 + $0x690] ss:$8 sps:$4 sm:$0xff]   ;;  %v2827_v4 = vld [vmem:[%s3973_s1 + $0x2a4] ss:$8 sps:$4 sm:$0xff]  }
  0x71   :  { %2087 = vmatprep.subr.bf16.mxu0 %v2746_v5  ;;  %v2830_v5 = vld [vmem:[%s3973_s1 + $0x6a4] ss:$8 sps:$4 sm:$0xff]  }
  0x73   :  { %1924 = vmatpush1.bf16.msra.mxu1 %v2741_v6  ;;  %v2825_v6 = vld [vmem:[%s3973_s1 + $0x2a0] ss:$8 sps:$4 sm:$0xff]  }
  0x74   :  { %2088 = vmatpush1.bf16.msra.mxu0 %v2744_v7  ;;  %1925 = vmatprep.subr.bf16.mxu1 %v2749_v8  ;;  %v2828_v7 = vld [vmem:[%s3973_s1 + $0x6a0] ss:$8 sps:$4 sm:$0xff]   ;;  %v2833_v8 = vld [vmem:[%s3973_s1 + $0x2b4] ss:$8 sps:$4 sm:$0xff]  }
  0x75   :  { %2089 = vmatprep.subr.bf16.mxu0 %v2752_v9  ;;  %v2836_v9 = vld [vmem:[%s3973_s1 + $0x6b4] ss:$8 sps:$4 sm:$0xff]  }
  0x77   :  { %1926 = vmatpush1.bf16.msra.mxu1 %v2747_v10  ;;  %v2831_v10 = vld [vmem:[%s3973_s1 + $0x2b0] ss:$8 sps:$4 sm:$0xff]  }
  0x78   :  { %2090 = vmatpush1.bf16.msra.mxu0 %v2750_v11  ;;  %1927 = vmatprep.subr.bf16.mxu1 %v2755_v12  ;;  %v2834_v11 = vld [vmem:[%s3973_s1 + $0x6b0] ss:$8 sps:$4 sm:$0xff]   ;;  %v2839_v12 = vld [vmem:[%s3973_s1 + $0x2c4] ss:$8 sps:$4 sm:$0xff]  }
  0x79   :  { %2091 = vmatprep.subr.bf16.mxu0 %v2758_v13  ;;  %v2842_v13 = vld [vmem:[%s3973_s1 + $0x6c4] ss:$8 sps:$4 sm:$0xff]  }
  0x7b   :  { %1928 = vmatpush1.bf16.msra.mxu1 %v2753_v14  ;;  %v2837_v14 = vld [vmem:[%s3973_s1 + $0x2c0] ss:$8 sps:$4 sm:$0xff]  }
  0x7c   :  { %2092 = vmatpush1.bf16.msra.mxu0 %v2756_v15  ;;  %1929 = vmatprep.subr.bf16.mxu1 %v2761_v18  ;;  %v2840_v15 = vld [vmem:[%s3973_s1 + $0x6c0] ss:$8 sps:$4 sm:$0xff]   ;;  %v2845_v18 = vld [vmem:[%s3973_s1 + $0x2d4] ss:$8 sps:$4 sm:$0xff]  }
  0x7d   :  { %2093 = vmatprep.subr.bf16.mxu0 %v2764_v19  ;;  %v2848_v19 = vld [vmem:[%s3973_s1 + $0x6d4] ss:$8 sps:$4 sm:$0xff]  }
  0x7f   :  { %1930 = vmatpush1.bf16.msra.mxu1 %v2759_v20  ;;  %v2843_v20 = vld [vmem:[%s3973_s1 + $0x2d0] ss:$8 sps:$4 sm:$0xff]  }
  0x80   :  { %2094 = vmatpush1.bf16.msra.mxu0 %v2762_v21  ;;  %1940 = vmatprep.subr.bf16.mxu1 %v2767_v22  ;;  %v2846_v21 = vld [vmem:[%s3973_s1 + $0x6d0] ss:$8 sps:$4 sm:$0xff]   ;;  %v2851_v22 = vld [vmem:[%s3973_s1 + $0x2e4] ss:$8 sps:$4 sm:$0xff]  }
  0x81   :  { %2104 = vmatprep.subr.bf16.mxu0 %v2770_v23  ;;  %v2854_v23 = vld [vmem:[%s3973_s1 + $0x6e4] ss:$8 sps:$4 sm:$0xff]  }
  0x82   :  { %1932 = vmatmul.mubr.bf16.vlgmr.msra.gmra.mrb[0].mxu1 %v3240_v16  ;;  %v2779_v16 = vld [vmem:[%s3973_s1 + $0x224] ss:$8 sps:$4 sm:$0xff]  }
  0x83   :  { %2096 = vmatmul.mubr.bf16.vlgmr.msra.gmra.mrb[0].mxu0 %v3243_v17  ;;  %1941 = vmatpush1.bf16.msra.mxu1 %v2765_v24  ;;  %v2782_v17 = vld [vmem:[%s3973_s1 + $0x624] ss:$8 sps:$4 sm:$0xff]   ;;  %v2849_v24 = vld [vmem:[%s3973_s1 + $0x2e0] ss:$8 sps:$4 sm:$0xff]  }
  0x84   :  { %2105 = vmatpush1.bf16.msra.mxu0 %v2768_v25  ;;  %1942 = vmatprep.subr.bf16.mxu1 %v2773_v26  ;;  %v2852_v25 = vld [vmem:[%s3973_s1 + $0x6e0] ss:$8 sps:$4 sm:$0xff]   ;;  %v2857_v26 = vld [vmem:[%s3973_s1 + $0x2f4] ss:$8 sps:$4 sm:$0xff]  }
  0x85   :  { %2106 = vmatprep.subr.bf16.mxu0 %v2776_v28  ;;  %1972 = vmatprep.mubr.bf16.mxu1 %v356_v33  ;;  %v2860_v28 = vld [vmem:[%s3973_s1 + $0x6f4] ss:$8 sps:$4 sm:$0xff]   ;;  %v2855_v33 = vld [vmem:[%s3973_s1 + $0x2f0] ss:$8 sps:$4 sm:$0xff]  }
  0x86   :  { %2136 = vmatprep.mubr.bf16.mxu0 %v390_v35 }
  0x87   :  { %1943 = vmatpush1.bf16.msra.mxu1 %v2771_v31  ;;  %v341_v31 = vcombine.high %v3453_v27, %v3453_v27  ;;  %v2866_v27 = vld [vmem:[%s3973_s1 + $0x704] ss:$8 sps:$4 sm:$0xff]  }
  0x88   :  { %2107 = vmatpush1.bf16.msra.mxu0 %v2774_v32  ;;  %1944 = vmatprep.subr.bf16.mxu1 %v2779_v16  ;;  %v375_v32 = vcombine.high %v3465_v30, %v3465_v30  ;;  %v2858_v16 = vld [vmem:[%s3973_s1 + $0x6f0] ss:$8 sps:$4 sm:$0xff]  }
  0x89   :  { %2108 = vmatprep.subr.bf16.mxu0 %v2782_v17  ;;  %v2863_v17 = vld [vmem:[%s3973_s1 + $0x304] ss:$8 sps:$4 sm:$0xff]   ;;  %v3662_v30 = vrot.slane %v341_v31, %v3163_v49  ;;  %v2942_v31 = vld [vmem:[%s3973_s1 + $0x7d0] ss:$8 sps:$4 sm:$0xff]  }
  0x8a   :  { %v3665_v35 = vrot.slane %v375_v32, %v3163_v49  ;;  %v2872_v49 = vld [vmem:[%s3973_s1 + $0x714] ss:$8 sps:$4 sm:$0xff]   ;;  %v2947_v32 = vld [vmem:[%s3973_s1 + $0x3e4] ss:$8 sps:$4 sm:$0xff]  }
  0x8b   :  { %1945 = vmatpush1.bf16.msra.mxu1 %v2777_v36  ;;  %v2861_v36 = vld [vmem:[%s3973_s1 + $0x300] ss:$8 sps:$4 sm:$0xff]  }
  0x8c   :  { %2109 = vmatpush1.bf16.msra.mxu0 %v2780_v37  ;;  %1946 = vmatprep.subr.bf16.mxu1 %v2785_v38  ;;  %v2864_v37 = vld [vmem:[%s3973_s1 + $0x700] ss:$8 sps:$4 sm:$0xff]   ;;  %v2869_v38 = vld [vmem:[%s3973_s1 + $0x314] ss:$8 sps:$4 sm:$0xff]  }
  0x8d   :  { %2110 = vmatprep.subr.bf16.mxu0 %v2788_v39  ;;  %v357_v39 = vcombine.high %v3662_v30, %v3662_v30 }
  0x8f   :  { %1947 = vmatpush1.bf16.msra.mxu1 %v2783_v40  ;;  %v391_v40 = vcombine.high %v3665_v35, %v3665_v35 }
  0x90   :  { %2111 = vmatpush1.bf16.msra.mxu0 %v2786_v41  ;;  %1948 = vmatprep.subr.bf16.mxu1 %v2791_v43  ;;  %v2867_v41 = vld [vmem:[%s3973_s1 + $0x310] ss:$8 sps:$4 sm:$0xff]  }
  0x91   :  { %2112 = vmatprep.subr.bf16.mxu0 %v2794_v44  ;;  %v2870_v43 = vld [vmem:[%s3973_s1 + $0x710] ss:$8 sps:$4 sm:$0xff]   ;;  %v2875_v44 = vld [vmem:[%s3973_s1 + $0x324] ss:$8 sps:$4 sm:$0xff]  }
  0x93   :  { %1949 = vmatpush1.bf16.msra.mxu1 %v2789_v45  ;;  %v2876_v45 = vld [vmem:[%s3973_s1 + $0x720] ss:$8 sps:$4 sm:$0xff]  }
  0x94   :  { %2113 = vmatpush1.bf16.msra.mxu0 %v2792_v46  ;;  %1950 = vmatprep.subr.bf16.mxu1 %v2797_v47  ;;  %v2881_v46 = vld [vmem:[%s3973_s1 + $0x334] ss:$8 sps:$4 sm:$0xff]  }
  0x95   :  { %2114 = vmatprep.subr.bf16.mxu0 %v2800_v48  ;;  %v2884_v47 = vld [vmem:[%s3973_s1 + $0x734] ss:$8 sps:$4 sm:$0xff]   ;;  %v2879_v48 = vld [vmem:[%s3973_s1 + $0x330] ss:$8 sps:$4 sm:$0xff]  }
  0x97   :  { %1951 = vmatpush1.bf16.msra.mxu1 %v2795_v50  ;;  %v2882_v50 = vld [vmem:[%s3973_s1 + $0x730] ss:$8 sps:$4 sm:$0xff]  }
  0x98   :  { %2115 = vmatpush1.bf16.msra.mxu0 %v2798_v51  ;;  %1952 = vmatprep.subr.bf16.mxu1 %v2803_v52  ;;  %v2887_v51 = vld [vmem:[%s3973_s1 + $0x344] ss:$8 sps:$4 sm:$0xff]  }
  0x99   :  { %2116 = vmatprep.subr.bf16.mxu0 %v2806_v53  ;;  %v2890_v52 = vld [vmem:[%s3973_s1 + $0x744] ss:$8 sps:$4 sm:$0xff]   ;;  %v2885_v53 = vld [vmem:[%s3973_s1 + $0x340] ss:$8 sps:$4 sm:$0xff]  }
  0x9b   :  { %1953 = vmatpush1.bf16.msra.mxu1 %v2801_v54  ;;  %v2888_v54 = vld [vmem:[%s3973_s1 + $0x740] ss:$8 sps:$4 sm:$0xff]  }
  0x9c   :  { %2117 = vmatpush1.bf16.msra.mxu0 %v2804_v55  ;;  %1954 = vmatprep.subr.bf16.mxu1 %v2809_v56  ;;  %v2893_v55 = vld [vmem:[%s3973_s1 + $0x354] ss:$8 sps:$4 sm:$0xff]  }
  0x9d   :  { %2118 = vmatprep.subr.bf16.mxu0 %v2812_v57  ;;  %v2896_v56 = vld [vmem:[%s3973_s1 + $0x754] ss:$8 sps:$4 sm:$0xff]   ;;  %v2891_v57 = vld [vmem:[%s3973_s1 + $0x350] ss:$8 sps:$4 sm:$0xff]  }
  0x9f   :  { %1955 = vmatpush1.bf16.msra.mxu1 %v2807_v58  ;;  %v2894_v58 = vld [vmem:[%s3973_s1 + $0x750] ss:$8 sps:$4 sm:$0xff]  }
  0xa0   :  { %2119 = vmatpush1.bf16.msra.mxu0 %v2810_v59  ;;  %1956 = vmatprep.subr.bf16.mxu1 %v2815_v60  ;;  %v2899_v59 = vld [vmem:[%s3973_s1 + $0x364] ss:$8 sps:$4 sm:$0xff]  }
  0xa1   :  { %2120 = vmatprep.subr.bf16.mxu0 %v2818_v61  ;;  %v2902_v60 = vld [vmem:[%s3973_s1 + $0x764] ss:$8 sps:$4 sm:$0xff]   ;;  %v2897_v61 = vld [vmem:[%s3973_s1 + $0x360] ss:$8 sps:$4 sm:$0xff]  }
  0xa3   :  { %1957 = vmatpush1.bf16.msra.mxu1 %v2813_v62  ;;  %v2900_v62 = vld [vmem:[%s3973_s1 + $0x760] ss:$8 sps:$4 sm:$0xff]  }
  0xa4   :  { %2121 = vmatpush1.bf16.msra.mxu0 %v2816_v63  ;;  %1958 = vmatprep.subr.bf16.mxu1 %v2821_v0  ;;  %v2905_v63 = vld [vmem:[%s3973_s1 + $0x374] ss:$8 sps:$4 sm:$0xff]  }
  0xa5   :  { %2122 = vmatprep.subr.bf16.mxu0 %v2824_v1  ;;  %v2908_v0 = vld [vmem:[%s3973_s1 + $0x774] ss:$8 sps:$4 sm:$0xff]   ;;  %v2903_v1 = vld [vmem:[%s3973_s1 + $0x370] ss:$8 sps:$4 sm:$0xff]  }
  0xa7   :  { %1959 = vmatpush1.bf16.msra.mxu1 %v2819_v2  ;;  %v2906_v2 = vld [vmem:[%s3973_s1 + $0x770] ss:$8 sps:$4 sm:$0xff]  }
  0xa8   :  { %2123 = vmatpush1.bf16.msra.mxu0 %v2822_v3  ;;  %1960 = vmatprep.subr.bf16.mxu1 %v2827_v4  ;;  %v2911_v3 = vld [vmem:[%s3973_s1 + $0x384] ss:$8 sps:$4 sm:$0xff]  }
  0xa9   :  { %2124 = vmatprep.subr.bf16.mxu0 %v2830_v5  ;;  %v2914_v4 = vld [vmem:[%s3973_s1 + $0x784] ss:$8 sps:$4 sm:$0xff]   ;;  %v2909_v5 = vld [vmem:[%s3973_s1 + $0x380] ss:$8 sps:$4 sm:$0xff]  }
  0xab   :  { %1961 = vmatpush1.bf16.msra.mxu1 %v2825_v6  ;;  %v2912_v6 = vld [vmem:[%s3973_s1 + $0x780] ss:$8 sps:$4 sm:$0xff]  }
  0xac   :  { %2125 = vmatpush1.bf16.msra.mxu0 %v2828_v7  ;;  %1962 = vmatprep.subr.bf16.mxu1 %v2833_v8  ;;  %v2917_v7 = vld [vmem:[%s3973_s1 + $0x394] ss:$8 sps:$4 sm:$0xff]  }
  0xad   :  { %2126 = vmatprep.subr.bf16.mxu0 %v2836_v9  ;;  %v2920_v8 = vld [vmem:[%s3973_s1 + $0x794] ss:$8 sps:$4 sm:$0xff]   ;;  %v2915_v9 = vld [vmem:[%s3973_s1 + $0x390] ss:$8 sps:$4 sm:$0xff]  }
  0xaf   :  { %1963 = vmatpush1.bf16.msra.mxu1 %v2831_v10  ;;  %v2918_v10 = vld [vmem:[%s3973_s1 + $0x790] ss:$8 sps:$4 sm:$0xff]  }
  0xb0   :  { %2127 = vmatpush1.bf16.msra.mxu0 %v2834_v11  ;;  %1964 = vmatprep.subr.bf16.mxu1 %v2839_v12  ;;  %v2923_v11 = vld [vmem:[%s3973_s1 + $0x3a4] ss:$8 sps:$4 sm:$0xff]  }
  0xb1   :  { %2128 = vmatprep.subr.bf16.mxu0 %v2842_v13  ;;  %v2926_v12 = vld [vmem:[%s3973_s1 + $0x7a4] ss:$8 sps:$4 sm:$0xff]   ;;  %v2921_v13 = vld [vmem:[%s3973_s1 + $0x3a0] ss:$8 sps:$4 sm:$0xff]  }
  0xb3   :  { %1965 = vmatpush1.bf16.msra.mxu1 %v2837_v14  ;;  %v2924_v14 = vld [vmem:[%s3973_s1 + $0x7a0] ss:$8 sps:$4 sm:$0xff]  }
  0xb4   :  { %2129 = vmatpush1.bf16.msra.mxu0 %v2840_v15  ;;  %1966 = vmatprep.subr.bf16.mxu1 %v2845_v18  ;;  %v2929_v15 = vld [vmem:[%s3973_s1 + $0x3b4] ss:$8 sps:$4 sm:$0xff]  }
  0xb5   :  { %2130 = vmatprep.subr.bf16.mxu0 %v2848_v19  ;;  %v2932_v18 = vld [vmem:[%s3973_s1 + $0x7b4] ss:$8 sps:$4 sm:$0xff]   ;;  %v2927_v19 = vld [vmem:[%s3973_s1 + $0x3b0] ss:$8 sps:$4 sm:$0xff]  }
  0xb7   :  { %1967 = vmatpush1.bf16.msra.mxu1 %v2843_v20  ;;  %v2930_v20 = vld [vmem:[%s3973_s1 + $0x7b0] ss:$8 sps:$4 sm:$0xff]  }
  0xb8   :  { %2131 = vmatpush1.bf16.msra.mxu0 %v2846_v21  ;;  %1968 = vmatprep.subr.bf16.mxu1 %v2851_v22  ;;  %v2935_v21 = vld [vmem:[%s3973_s1 + $0x3c4] ss:$8 sps:$4 sm:$0xff]  }
  0xb9   :  { %2132 = vmatprep.subr.bf16.mxu0 %v2854_v23  ;;  %v2938_v22 = vld [vmem:[%s3973_s1 + $0x7c4] ss:$8 sps:$4 sm:$0xff]   ;;  %v2933_v23 = vld [vmem:[%s3973_s1 + $0x3c0] ss:$8 sps:$4 sm:$0xff]  }
  0xbb   :  { %1969 = vmatpush1.bf16.msra.mxu1 %v2849_v24  ;;  %v2936_v24 = vld [vmem:[%s3973_s1 + $0x7c0] ss:$8 sps:$4 sm:$0xff]  }
  0xbc   :  { %2133 = vmatpush1.bf16.msra.mxu0 %v2852_v25  ;;  %1970 = vmatprep.subr.bf16.mxu1 %v2857_v26  ;;  %v2941_v25 = vld [vmem:[%s3973_s1 + $0x3d4] ss:$8 sps:$4 sm:$0xff]  }
  0xbd   :  { %2134 = vmatprep.subr.bf16.mxu0 %v2860_v28  ;;  %v2944_v26 = vld [vmem:[%s3973_s1 + $0x7d4] ss:$8 sps:$4 sm:$0xff]   ;;  %v2939_v28 = vld [vmem:[%s3973_s1 + $0x3d0] ss:$8 sps:$4 sm:$0xff]  }
  0xbf   :  { %1971 = vmatpush1.bf16.msra.mxu1 %v2855_v33  ;;  %v2950_v33 = vld [vmem:[%s3973_s1 + $0x7e4] ss:$8 sps:$4 sm:$0xff]  }
  0xc0   :  { %2135 = vmatpush1.bf16.msra.mxu0 %v2858_v16  ;;  %1981 = vmatprep.subr.bf16.mxu1 %v2863_v17  ;;  %v2945_v16 = vld [vmem:[%s3973_s1 + $0x3e0] ss:$8 sps:$4 sm:$0xff]  }
  0xc1   :  { %2145 = vmatprep.subr.bf16.mxu0 %v2866_v27  ;;  %v2948_v17 = vld [vmem:[%s3973_s1 + $0x7e0] ss:$8 sps:$4 sm:$0xff]   ;;  %v2953_v27 = vld [vmem:[%s3973_s1 + $0x3f4] ss:$8 sps:$4 sm:$0xff]  }
  0xc2   :  { %1973 = vmatmul.mubr.bf16.vlgmr.msra.gmra.mrb[0].mxu1 %v3460_v29  ;;  %v2878_v29 = vld [vmem:[%s3973_s1 + $0x724] ss:$8 sps:$4 sm:$0xff]  }
  0xc3   :  { %2137 = vmatmul.mubr.bf16.vlgmr.msra.gmra.mrb[0].mxu0 %v3479_v34  ;;  %1982 = vmatpush1.bf16.msra.mxu1 %v2861_v36  ;;  %v2873_v34 = vld [vmem:[%s3973_s1 + $0x320] ss:$8 sps:$4 sm:$0xff]   ;;  %v2956_v36 = vld [vmem:[%s3973_s1 + $0x7f4] ss:$8 sps:$4 sm:$0xff]  }
  0xc4   :  { %2146 = vmatpush1.bf16.msra.mxu0 %v2864_v37  ;;  %1983 = vmatprep.subr.bf16.mxu1 %v2869_v38  ;;  %v2951_v37 = vld [vmem:[%s3973_s1 + $0x3f0] ss:$8 sps:$4 sm:$0xff]  }
  0xc5   :  { %2147 = vmatprep.subr.bf16.mxu0 %v2872_v49  ;;  %2013 = vmatprep.mubr.bf16.mxu1 %v357_v39  ;;  %v2954_v38 = vld [vmem:[%s3973_s1 + $0x7f0] ss:$8 sps:$4 sm:$0xff]   ;;  %v2961_v49 = vld [vmem:[%s3973_s1 + $0x804] ss:$8 sps:$4 sm:$0xff]  }
  0xc6   :  { %2177 = vmatprep.mubr.bf16.mxu0 %v391_v40  ;;  %v3865_v39 = vld.sshfl [vmem:[%s3974_s0 + $0x20] sm:$0x33 pattern:$0x76325410] }
  0xc7   :  { %1984 = vmatpush1.bf16.msra.mxu1 %v2867_v41  ;;  %v2959_v40 = vld [vmem:[%s3973_s1 + $0x800] ss:$8 sps:$4 sm:$0xff]   ;;  %v399_v41 = vcombine.high %v3865_v39, %v3865_v39 }
  0xc8   :  { %2148 = vmatpush1.bf16.msra.mxu0 %v2870_v43  ;;  %1985 = vmatprep.subr.bf16.mxu1 %v2875_v44  ;;  %v2964_v43 = vld [vmem:[%s3973_s1 + $0x814] ss:$8 sps:$4 sm:$0xff]   ;;  %v2962_v44 = vld [vmem:[%s3973_s1 + $0x810] ss:$8 sps:$4 sm:$0xff]  }
  0xc9   :  { %2149 = vmatprep.subr.bf16.mxu0 %v2878_v29  ;;  %v2967_v29 = vld [vmem:[%s3973_s1 + $0x824] ss:$8 sps:$4 sm:$0xff]  }
  0xcb   :  { %1986 = vmatpush1.bf16.msra.mxu1 %v2873_v34  ;;  %v2965_v34 = vld [vmem:[%s3973_s1 + $0x820] ss:$8 sps:$4 sm:$0xff]  }
  0xcc   :  { %2150 = vmatpush1.bf16.msra.mxu0 %v2876_v45  ;;  %1987 = vmatprep.subr.bf16.mxu1 %v2881_v46  ;;  %v2973_v45 = vld [vmem:[%s3973_s1 + $0x844] ss:$8 sps:$4 sm:$0xff]   ;;  %v2971_v46 = vld [vmem:[%s3973_s1 + $0x840] ss:$8 sps:$4 sm:$0xff]  }
  0xcd   :  { %2151 = vmatprep.subr.bf16.mxu0 %v2884_v47  ;;  %v2976_v47 = vld [vmem:[%s3973_s1 + $0x854] ss:$8 sps:$4 sm:$0xff]  }
  0xcf   :  { %1988 = vmatpush1.bf16.msra.mxu1 %v2879_v48  ;;  %v2974_v48 = vld [vmem:[%s3973_s1 + $0x850] ss:$8 sps:$4 sm:$0xff]  }
  0xd0   :  { %2152 = vmatpush1.bf16.msra.mxu0 %v2882_v50  ;;  %1989 = vmatprep.subr.bf16.mxu1 %v2887_v51  ;;  %v2979_v50 = vld [vmem:[%s3973_s1 + $0x864] ss:$8 sps:$4 sm:$0xff]   ;;  %v2977_v51 = vld [vmem:[%s3973_s1 + $0x860] ss:$8 sps:$4 sm:$0xff]  }
  0xd1   :  { %2153 = vmatprep.subr.bf16.mxu0 %v2890_v52  ;;  %v2982_v52 = vld [vmem:[%s3973_s1 + $0x874] ss:$8 sps:$4 sm:$0xff]  }
  0xd3   :  { %1990 = vmatpush1.bf16.msra.mxu1 %v2885_v53  ;;  %v2980_v53 = vld [vmem:[%s3973_s1 + $0x870] ss:$8 sps:$4 sm:$0xff]  }
  0xd4   :  { %2154 = vmatpush1.bf16.msra.mxu0 %v2888_v54  ;;  %1991 = vmatprep.subr.bf16.mxu1 %v2893_v55  ;;  %v2985_v54 = vld [vmem:[%s3973_s1 + $0x884] ss:$8 sps:$4 sm:$0xff]   ;;  %v2983_v55 = vld [vmem:[%s3973_s1 + $0x880] ss:$8 sps:$4 sm:$0xff]  }
  0xd5   :  { %2155 = vmatprep.subr.bf16.mxu0 %v2896_v56  ;;  %v2988_v56 = vld [vmem:[%s3973_s1 + $0x894] ss:$8 sps:$4 sm:$0xff]  }
  0xd7   :  { %1992 = vmatpush1.bf16.msra.mxu1 %v2891_v57  ;;  %v2986_v57 = vld [vmem:[%s3973_s1 + $0x890] ss:$8 sps:$4 sm:$0xff]  }
  0xd8   :  { %2156 = vmatpush1.bf16.msra.mxu0 %v2894_v58  ;;  %1993 = vmatprep.subr.bf16.mxu1 %v2899_v59  ;;  %v2991_v58 = vld [vmem:[%s3973_s1 + $0x8a4] ss:$8 sps:$4 sm:$0xff]   ;;  %v2989_v59 = vld [vmem:[%s3973_s1 + $0x8a0] ss:$8 sps:$4 sm:$0xff]  }
  0xd9   :  { %2157 = vmatprep.subr.bf16.mxu0 %v2902_v60  ;;  %v2994_v60 = vld [vmem:[%s3973_s1 + $0x8b4] ss:$8 sps:$4 sm:$0xff]  }
  0xdb   :  { %1994 = vmatpush1.bf16.msra.mxu1 %v2897_v61  ;;  %v2992_v61 = vld [vmem:[%s3973_s1 + $0x8b0] ss:$8 sps:$4 sm:$0xff]  }
  0xdc   :  { %2158 = vmatpush1.bf16.msra.mxu0 %v2900_v62  ;;  %1995 = vmatprep.subr.bf16.mxu1 %v2905_v63  ;;  %v2997_v62 = vld [vmem:[%s3973_s1 + $0x8c4] ss:$8 sps:$4 sm:$0xff]   ;;  %v2995_v63 = vld [vmem:[%s3973_s1 + $0x8c0] ss:$8 sps:$4 sm:$0xff]  }
  0xdd   :  { %2159 = vmatprep.subr.bf16.mxu0 %v2908_v0  ;;  %v3000_v0 = vld [vmem:[%s3973_s1 + $0x8d4] ss:$8 sps:$4 sm:$0xff]  }
  0xdf   :  { %1996 = vmatpush1.bf16.msra.mxu1 %v2903_v1  ;;  %v2998_v1 = vld [vmem:[%s3973_s1 + $0x8d0] ss:$8 sps:$4 sm:$0xff]  }
  0xe0   :  { %2160 = vmatpush1.bf16.msra.mxu0 %v2906_v2  ;;  %1997 = vmatprep.subr.bf16.mxu1 %v2911_v3  ;;  %v3003_v2 = vld [vmem:[%s3973_s1 + $0x8e4] ss:$8 sps:$4 sm:$0xff]   ;;  %v3001_v3 = vld [vmem:[%s3973_s1 + $0x8e0] ss:$8 sps:$4 sm:$0xff]  }
  0xe1   :  { %2161 = vmatprep.subr.bf16.mxu0 %v2914_v4  ;;  %v3006_v4 = vld [vmem:[%s3973_s1 + $0x8f4] ss:$8 sps:$4 sm:$0xff]  }
  0xe3   :  { %1998 = vmatpush1.bf16.msra.mxu1 %v2909_v5  ;;  %v3004_v5 = vld [vmem:[%s3973_s1 + $0x8f0] ss:$8 sps:$4 sm:$0xff]  }
  0xe4   :  { %2162 = vmatpush1.bf16.msra.mxu0 %v2912_v6  ;;  %1999 = vmatprep.subr.bf16.mxu1 %v2917_v7 }
  0xe5   :  { %2163 = vmatprep.subr.bf16.mxu0 %v2920_v8 }
  0xe7   :  { %2000 = vmatpush1.bf16.msra.mxu1 %v2915_v9 }
  0xe8   :  { %2164 = vmatpush1.bf16.msra.mxu0 %v2918_v10  ;;  %2001 = vmatprep.subr.bf16.mxu1 %v2923_v11  ;;  %v311_v10 = vsub.s32 0, %v3145_v42  ;;  %v307_v11 = vld [vmem:[%s3975_s2] sm:$0x3] }
  0xe9   :  { %2165 = vmatprep.subr.bf16.mxu0 %v2926_v12  ;;  %v315_v12 = vsub.s32 1, %v3145_v42 }
  0xeb   :  { %2002 = vmatpush1.bf16.msra.mxu1 %v2921_v13  ;;  %v312_v13 = vrot.slane %v307_v11, %v311_v10 }
  0xec   :  { %2166 = vmatpush1.bf16.msra.mxu0 %v2924_v14  ;;  %2003 = vmatprep.subr.bf16.mxu1 %v2929_v15  ;;  %v316_v14 = vrot.slane %v307_v11, %v315_v12 }
  0xed   :  { %2167 = vmatprep.subr.bf16.mxu0 %v2932_v18 }
  0xef   :  { %2004 = vmatpush1.bf16.msra.mxu1 %v2927_v19 }
  0xf0   :  { %2168 = vmatpush1.bf16.msra.mxu0 %v2930_v20  ;;  %2005 = vmatprep.subr.bf16.mxu1 %v2935_v21 }
  0xf1   :  { %2169 = vmatprep.subr.bf16.mxu0 %v2938_v22 }
  0xf3   :  { %2006 = vmatpush1.bf16.msra.mxu1 %v2933_v23 }
  0xf4   :  { %2170 = vmatpush1.bf16.msra.mxu0 %v2936_v24  ;;  %2007 = vmatprep.subr.bf16.mxu1 %v2941_v25 }
  0xf5   :  { %2171 = vmatprep.subr.bf16.mxu0 %v2944_v26 }
  0xf7   :  { %2008 = vmatpush1.bf16.msra.mxu1 %v2939_v28 }
  0xf8   :  { %2172 = vmatpush1.bf16.msra.mxu0 %v2942_v31  ;;  %2009 = vmatprep.subr.bf16.mxu1 %v2947_v32 }
  0xf9   :  { %2173 = vmatprep.subr.bf16.mxu0 %v2950_v33 }
  0xfb   :  { %2010 = vmatpush1.bf16.msra.mxu1 %v2945_v16 }
  0xfc   :  { %2174 = vmatpush1.bf16.msra.mxu0 %v2948_v17  ;;  %2011 = vmatprep.subr.bf16.mxu1 %v2953_v27 }
  0xfd   :  { %2175 = vmatprep.subr.bf16.mxu0 %v2956_v36 }
  0xff   :  { %2012 = vmatpush1.bf16.msra.mxu1 %v2951_v37 }
 0x100   :  { %2176 = vmatpush1.bf16.msra.mxu0 %v2954_v38 }
 0x101   :  { %2186 = vmatprep.subr.bf16.mxu0 %v2961_v49 }
 0x102   :  { %2014 = vmatmul.mubr.bf16.vlgmr.msra.gmra.mrb[0].mxu1 %v3662_v30  ;;  %v2970_v30 = vld [vmem:[%s3973_s1 + $0x834] ss:$8 sps:$4 sm:$0xff]  }
 0x103   :  { %2178 = vmatmul.mubr.bf16.vlgmr.msra.gmra.mrb[0].mxu0 %v3665_v35  ;;  %v2968_v35 = vld [vmem:[%s3973_s1 + $0x830] ss:$8 sps:$4 sm:$0xff]  }
 0x104   :  { %2187 = vmatpush1.bf16.msra.mxu0 %v2959_v40  ;;  %2218 = vmatprep.mubr.bf16.mxu0 %v399_v41 }
 0x105   :  { %2188 = vmatprep.subr.bf16.mxu0 %v2964_v43 }
 0x108   :  { %2189 = vmatpush1.bf16.msra.mxu0 %v2962_v44 }
 0x109   :  { %2190 = vmatprep.subr.bf16.mxu0 %v2967_v29 }
 0x10c   :  { %2191 = vmatpush1.bf16.msra.mxu0 %v2965_v34 }
 0x10d   :  { %2192 = vmatprep.subr.bf16.mxu0 %v2970_v30 }
 0x110   :  { %2193 = vmatpush1.bf16.msra.mxu0 %v2968_v35 }
 0x111   :  { %2194 = vmatprep.subr.bf16.mxu0 %v2973_v45 }
 0x114   :  { %2195 = vmatpush1.bf16.msra.mxu0 %v2971_v46 }
 0x115   :  { %2196 = vmatprep.subr.bf16.mxu0 %v2976_v47 }
 0x118   :  { %2197 = vmatpush1.bf16.msra.mxu0 %v2974_v48 }
 0x119   :  { %2198 = vmatprep.subr.bf16.mxu0 %v2979_v50 }
 0x11c   :  { %2199 = vmatpush1.bf16.msra.mxu0 %v2977_v51 }
 0x11d   :  { %2200 = vmatprep.subr.bf16.mxu0 %v2982_v52 }
 0x120   :  { %2201 = vmatpush1.bf16.msra.mxu0 %v2980_v53 }
 0x121   :  { %2202 = vmatprep.subr.bf16.mxu0 %v2985_v54 }
 0x124   :  { %2203 = vmatpush1.bf16.msra.mxu0 %v2983_v55 }
 0x125   :  { %2204 = vmatprep.subr.bf16.mxu0 %v2988_v56 }
 0x128   :  { %2205 = vmatpush1.bf16.msra.mxu0 %v2986_v57 }
 0x129   :  { %2206 = vmatprep.subr.bf16.mxu0 %v2991_v58 }
 0x12c   :  { %2207 = vmatpush1.bf16.msra.mxu0 %v2989_v59 }
 0x12d   :  { %2208 = vmatprep.subr.bf16.mxu0 %v2994_v60 }
 0x130   :  { %2209 = vmatpush1.bf16.msra.mxu0 %v2992_v61 }
 0x131   :  { %2210 = vmatprep.subr.bf16.mxu0 %v2997_v62 }
 0x134   :  { %2211 = vmatpush1.bf16.msra.mxu0 %v2995_v63 }
 0x135   :  { %2212 = vmatprep.subr.bf16.mxu0 %v3000_v0 }
 0x138   :  { %2213 = vmatpush1.bf16.msra.mxu0 %v2998_v1 }
 0x139   :  { %2214 = vmatprep.subr.bf16.mxu0 %v3003_v2 }
 0x13c   :  { %2215 = vmatpush1.bf16.msra.mxu0 %v3001_v3 }
 0x13d   :  { %2216 = vmatprep.subr.bf16.mxu0 %v3006_v4 }
 0x140   :  { %2217 = vmatpush1.bf16.msra.mxu0 %v3004_v5 }
 0x143   :  { %2219 = vmatmul.mubr.bf16.vlgmr.msra.gmra.mrb[0].mxu0 %v3865_v39 }
 0x1d5   :  { %v2015_v6 = vpop.f32.mrb[0].mxu1 }
 0x1d6   :  { %v2017_v7 = vpop.f32.mrb[1].mxu1  ;;  %v2538_v15 = vadd.f32 %v2015_v6, %v312_v13 }
 0x1d7   :  { %v2019_v8 = vpop.f32.mrb[2].mxu1  ;;  %v2540_v18 = vadd.f32 %v2017_v7, %v316_v14 }
 0x1d8   :  { %v2020_v9 = vpop.f32.mrb[3].mxu1 }
 0x216   :  { %v2220_v19 = vpop.f32.mrb[0].mxu0 }
 0x217   :  { %v2539_v20 = vadd.f32 %v2538_v15, %v2220_v19  ;;  %v2222_v21 = vpop.f32.mrb[1].mxu0 }
 0x218   :  { %v2541_v22 = vadd.f32 %v2540_v18, %v2222_v21  ;;  %v2224_v23 = vpop.f32.mrb[2].mxu0 }
 0x219   :  { %v2227_v24 = vmax.f32 %v2539_v20, 0.0  ;;  %v2225_v25 = vpop.f32.mrb[3].mxu0 }
 0x21a   :  { %v2228_v26 = vmax.f32 %v2541_v22, 0.0 }
 0x21c   :  { %v2536_v28 = vpack.c.bf16 %v2228_v26, %v2227_v24 }
 0x21e   :  { %2537 = vst.sshfl [vmem:[%s3976_s3] sm:$0x33 pattern:$0x76325410] %v2536_v28 }

// kernel: autoencoder_perceptual_forward.18
= control target key start
LH: loop header
LB: loop body
LE: loop exit
PB: predicated region body
PF: predicated region fallthrough
CT: control target
= control target key end

     0   :  { %s523_s12 = smov 0   ;;  %s525_s13 = smov 0   ;;  %s572_s0 = inlined_call_operand.vmem [shape: bf16[4,16,256], index: 0, kind: input, shape index: {}, may-alias: {0,1}]   ;;  %s573_s1 = inlined_call_operand.vmem [shape: bf16[4,16,256], index: 1, kind: input, shape index: {}, may-alias: {0,1}]   ;;  %s574_s2 = inlined_call_operand.vmem [shape: f32[1,1,256], index: 2, kind: input, shape index: {}]   ;;  %s575_s3 = inlined_call_operand.vmem [shape: f32[2,1,1], index: 3, kind: output, shape index: {}]  }
   0x1   :  { %s527_s14 = smov 0  }
   0x2 LB: > { %s25_s15 = sadd.s32 1, %s496_s13  ;;  %p434_p0 = scmp.ge.s32.totalorder %s500_s14, 1  ;;  %s500_s14 = sphi %s527_s14, %s13_s14   ;;  %s496_s13 = sphi %s525_s13, %s577_s13   ;;  %s492_s12 = sphi %s523_s12, %s576_s12  }
   0x3   : > { %p27_p1 = scmp.ge.s32.totalorder %s25_s15, 2  ;;  %p179_p2 = scmp.lt.s32.totalorder %s500_s14, 3 }
   0x5   : > { %s579_s15 = smov (%p27_p1, %s25_s15), 0  ;;  %p180_p3 = pnand %p434_p0, %p179_p2 }
   0x6   : > { %p218_p4 = scmp.lt.s32.totalorder (!%p180_p3), %s492_s12, 3  ;;  %s228_s16 = sadd.s32 (!%p180_p3), 2, %s492_s12  ;;  %v308_v32 = vlaneseq (!%p180_p3)  ;;  %v306_v38 = vld [vmem:[%s574_s2] sm:$0x3] (!%p180_p3)  ;;  %vm248_vm0 = vcmask (!%p180_p3), 0  }
   0x7   : > { %183 = sbr.rel (%p180_p3) target bundleno = 417 (0x1a1), region = 32  ;;  %p230_p5 = scmp.lt.s32.totalorder (!%p180_p3), %s228_s16, 3 }
   0x8   : > { %v309_v33 = vshrl.u32 (!%p180_p3), %v308_v32, 7  ;;  %p241_p6 = scmp.lt.s32.totalorder (!%p180_p3), %s492_s12, 1 }
   0xa   : > { %v310_v36 = vsub.s32 (!%p180_p3), 0, %v309_v33  ;;  %v314_v39 = vsub.s32 (!%p180_p3), 1, %v309_v33 }
   0xc   : > { %v311_v50 = vrot.slane (!%p180_p3), %v306_v38, %v310_v36  ;;  %v315_v54 = vrot.slane (!%p180_p3), %v306_v38, %v314_v39 }
   0xe   : > { %s219_s17 = scalar_select %p218_p4, %s492_s12, 3 }
   0xf   : > { %s581_s16 = smov (!%p230_p5, %s228_s16), 3  ;;  %s583_s12 = smov (!%p241_p6, %s492_s12), 1 }
  0x10   : > { %s441_s18 = sshll.u32 %s219_s17, 4  ;;  %s442_s22 = sshll.u32 %s581_s16, 4 }
  0x11   : > { %s226_s21 = scalar_lea.vmem %s572_s0, %s441_s18  ;;  %s238_s25 = scalar_lea.vmem %s573_s1, %s442_s22 }
  0x12   : > { %v251_v0 = vld [vmem:[%s226_s21 + $0x8] sm:$0xff]  ;;  %v250_v1 = vld [vmem:[%s226_s21] sm:$0xff]  ;;  %s243_s4 = scalar_lea.vmem %s575_s3, %s583_s12 }
  0x13   : > { %v254_v2 = vunpack.c.l.bf16 %v251_v0  ;;  %v255_v3 = vunpack.c.h.bf16 %v251_v0  ;;  %v252_v4 = vunpack.c.l.bf16 %v250_v1  ;;  %v253_v5 = vunpack.c.h.bf16 %v250_v1  ;;  %v257_v6 = vld [vmem:[%s238_s25 + $0x8] sm:$0xff]  ;;  %v256_v7 = vld [vmem:[%s238_s25] sm:$0xff] }
  0x14   : > { %v260_v8 = vunpack.c.l.bf16 %v257_v6  ;;  %v261_v9 = vunpack.c.h.bf16 %v257_v6  ;;  %v258_v10 = vunpack.c.l.bf16 %v256_v7  ;;  %v259_v11 = vunpack.c.h.bf16 %v256_v7 }
  0x15   : > { %v264_v12 = vmul.f32 %v254_v2, %v254_v2  ;;  %v265_v13 = vmul.f32 %v255_v3, %v255_v3  ;;  %v262_v14 = vmul.f32 %v252_v4, %v252_v4  ;;  %v263_v15 = vmul.f32 %v253_v5, %v253_v5 }
  0x16   : > { %v282_v16 = vmul.f32 %v260_v8, %v260_v8  ;;  %v283_v17 = vmul.f32 %v261_v9, %v261_v9  ;;  %v280_v18 = vmul.f32 %v258_v10, %v258_v10  ;;  %v281_v19 = vmul.f32 %v259_v11, %v259_v11 }
  0x17   : > { %v269_v20 = vadd.f32 %v265_v13, %v264_v12  ;;  %v266_v21 = vadd.f32 %v263_v15, %v262_v14 }
  0x18   : > { %v287_v22 = vadd.f32 %v283_v17, %v282_v16  ;;  %v284_v23 = vadd.f32 %v281_v19, %v280_v18 }
  0x19   : > { %270 = vadd.xlane.f32.xlu1 %v269_v20  ;;  %267 = vadd.xlane.f32.xlu0 %v266_v21 }
  0x1d   : > { %288 = vadd.xlane.f32.xlu1 %v287_v22  ;;  %285 = vadd.xlane.f32.xlu0 %v284_v23 }
  0xa6   : > { %v271_v24 = vpop.xlane.xlu1 %270  ;;  %v268_v25 = vpop.xlane.xlu0 %267 }
  0xa7   : > { %v273_v26 = vadd.f32 1e-20, %v271_v24  ;;  %v272_v27 = vadd.f32 1e-20, %v268_v25 }
  0xa9   : > { %470 = vrsqrt.f32 %v273_v26 }
  0xaa   : > { %v289_v28 = vpop.xlane.xlu1 %288  ;;  %v286_v29 = vpop.xlane.xlu0 %285  ;;  %472 = vrsqrt.f32 %v272_v27 }
  0xab   : > { %v291_v30 = vadd.f32 1e-20, %v289_v28  ;;  %v290_v31 = vadd.f32 1e-20, %v286_v29 }
  0xad   : > { %474 = vrsqrt.f32 %v291_v30 }
  0xae   : > { %476 = vrsqrt.f32 %v290_v31 }
  0xb3   : > { %v471_v34 = vpop.eup %470 }
  0xb4   : > { %v473_v35 = vpop.eup %472  ;;  %v278_v41 = vmul.f32 %v471_v34, %v254_v2  ;;  %v279_v42 = vmul.f32 %v471_v34, %v255_v3  ;;  %v502_v2 = vmov 0.0  }
  0xb5   : > { %v276_v45 = vmul.f32 %v473_v35, %v252_v4  ;;  %v277_v46 = vmul.f32 %v473_v35, %v253_v5  ;;  %249 = vst.msk [vmem:[#allocation2] sm:$0x1] %vm248_vm0, %v502_v2 }
  0xb7   : > { %v475_v37 = vpop.eup %474 }
  0xb8   : > { %v477_v40 = vpop.eup %476  ;;  %v296_v43 = vmul.f32 %v475_v37, %v260_v8  ;;  %v297_v44 = vmul.f32 %v475_v37, %v261_v9 }
  0xb9   : > { %v294_v47 = vmul.f32 %v477_v40, %v258_v10  ;;  %v295_v48 = vmul.f32 %v477_v40, %v259_v11 }
  0xba   : > { %v300_v49 = vsub.f32 %v278_v41, %v296_v43  ;;  %v301_v53 = vsub.f32 %v279_v42, %v297_v44 }
  0xbb   : > { %v298_v51 = vsub.f32 %v276_v45, %v294_v47  ;;  %v299_v52 = vsub.f32 %v277_v46, %v295_v48 }
  0xbc   : > { %v304_v57 = vmul.f32 %v300_v49, %v300_v49  ;;  %v305_v58 = vmul.f32 %v301_v53, %v301_v53  ;;  %v322_v10 = vld [vmem:[#allocation2] sm:$0x1] }
  0xbd   : > { %v302_v55 = vmul.f32 %v298_v51, %v298_v51  ;;  %v303_v56 = vmul.f32 %v299_v52, %v299_v52 }
  0xbe   : > { %v320_v61 = vmul.f32 %v311_v50, %v304_v57  ;;  %v321_v63 = vmul.f32 %v315_v54, %v305_v58 }
  0xbf   : > { %v318_v59 = vmul.f32 %v311_v50, %v302_v55  ;;  %v319_v60 = vmul.f32 %v315_v54, %v303_v56 }
  0xc1   : > { %v323_v62 = vadd.f32 %v319_v60, %v318_v59 }
  0xc3   : > { %v324_v0 = vadd.f32 %v323_v62, %v320_v61 }
  0xc5   : > { %v325_v1 = vadd.f32 %v324_v0, %v321_v63 }
  0xc7   : > { %326 = vadd.xlane.f32.xlu0 %v325_v1 }
 0x154   : > { %v327_v3 = vpop.xlane.xlu0 %326 }
 0x155   : > { %v328_v4 = vrot.slane %v327_v3, 4 }
 0x157   : > { %v329_v5 = vadd.f32 %v328_v4, %v327_v3 }
 0x159   : > { %v330_v6 = vrot.slane %v329_v5, 2 }
 0x15b   : > { %v331_v7 = vadd.f32 %v330_v6, %v329_v5 }
 0x15d   : > { %v332_v8 = vrot.slane %v331_v7, 1 }
 0x15f   : > { %v333_v9 = vadd.f32 %v332_v8, %v331_v7 }
 0x161   : > { %443 = vpush %v333_v9 }
 0x192   : > { %s444_s28 = spop %443 }
 0x193   : > { %v335_v11 = vstv %s444_s28 }
 0x194   : > { %v336_v12 = vadd.f32 %v335_v11, %v322_v10 }
 0x196   : > { %338 = vst.msk [vmem:[#allocation2] sm:$0x1] %vm248_vm0, %v336_v12 }
 0x19d   : > { %v342_v13 = vld [vmem:[#allocation2] sm:$0x1] }
 0x19e   : > { %v343_v14 = vmul.f32 0.11111111, %v342_v13 }
 0x1a0   : > { %344 = vst.msk [vmem:[%s243_s4] sm:$0x1] %vm248_vm0, %v343_v14 }
 0x1a1 PF: > { %s13_s14 = sadd.s32 1, %s500_s14   ;;  %s576_s12 = smov %s496_s13 }
 0x1a2   : > { %p10_p7 = scmp.ge.s32.totalorder %s13_s14, 4   ;;  %s577_s13 = smov %s579_s15 }
 0x1a4   :  { %12 = sbr.rel (!%p10_p7) target bundleno = 2 (0x2), region = 73 }

// kernel: autoencoder_perceptual_forward.17
= control target key start
LH: loop header
LB: loop body
LE: loop exit
PB: predicated region body
PF: predicated region fallthrough
CT: control target
= control target key end

     0   :  { %s629_s12 = smov 0   ;;  %s631_s13 = smov 0   ;;  %s760_s0 = inlined_call_operand.vmem [shape: bf16[4,56,128], index: 0, kind: input, shape index: {}, may-alias: {0,1}]   ;;  %s761_s1 = inlined_call_operand.vmem [shape: bf16[4,56,128], index: 1, kind: input, shape index: {}, may-alias: {0,1}]   ;;  %s762_s2 = inlined_call_operand.vmem [shape: f32[1,1,128], index: 2, kind: input, shape index: {}]   ;;  %s763_s3 = inlined_call_operand.vmem [shape: f32[2,1,1], index: 3, kind: output, shape index: {}]  }
   0x1   :  { %s633_s14 = smov 0  }
   0x2 LB: > { %s25_s15 = sadd.s32 1, %s602_s13  ;;  %p493_p0 = scmp.ge.s32.totalorder %s606_s14, 1  ;;  %s606_s14 = sphi %s633_s14, %s13_s14   ;;  %s602_s13 = sphi %s631_s13, %s765_s13   ;;  %s598_s12 = sphi %s629_s12, %s764_s12  }
   0x3   : > { %p27_p1 = scmp.ge.s32.totalorder %s25_s15, 2  ;;  %p177_p2 = scmp.lt.s32.totalorder %s606_s14, 3 }
   0x5   : > { %s767_s15 = smov (%p27_p1, %s25_s15), 0  ;;  %p178_p3 = pnand %p493_p0, %p177_p2 }
   0x6   : > { %s223_s16 = sadd.s32 (!%p178_p3), 2, %s598_s12  ;;  %p214_p4 = scmp.lt.s32.totalorder (!%p178_p3), %s598_s12, 3  ;;  %vm242_vm0 = vcmask (!%p178_p3), 0  }
   0x7   : > { %181 = sbr.rel (%p178_p3) target bundleno = 432 (0x1b0), region = 32  ;;  %p225_p5 = scmp.lt.s32.totalorder (!%p178_p3), %s223_s16, 3 }
   0x8   : > { %p235_p6 = scmp.lt.s32.totalorder (!%p178_p3), %s598_s12, 1 }
   0xe   : > { %s215_s17 = scalar_select %p214_p4, %s598_s12, 3 }
   0xf   : > { %s769_s16 = smov (!%p225_p5, %s223_s16), 3  ;;  %s771_s12 = smov (!%p235_p6, %s598_s12), 1 }
  0x10   : > { %s527_s18 = smul.u32 28, %s215_s17  ;;  %s237_s4 = scalar_lea.vmem %s763_s3, %s771_s12 }
  0x11   : > { %s528_s19 = smul.u32 28, %s769_s16 }
  0x12   : > { %s655_s22 = scalar_lea.vmem %s760_s0, %s527_s18 }
  0x13   : > { %s660_s25 = scalar_lea.vmem %s761_s1, %s528_s19  ;;  %v500_v0 = vld [vmem:[%s655_s22] sm:$0xff]   ;;  %v523_v6 = vld [vmem:[%s655_s22 + $0x8] sm:$0xff]   ;;  %v524_v18 = vld [vmem:[%s655_s22 + $0x10] sm:$0xff]  }
  0x14   : > { %v512_v1 = vld [vmem:[%s660_s25] sm:$0xff]   ;;  %v664_v2 = vunpack.c.l.bf16 %v500_v0  ;;  %v666_v3 = vunpack.c.h.bf16 %v500_v0  ;;  %v525_v8 = vld [vmem:[%s660_s25 + $0x8] sm:$0xff]   ;;  %v680_v11 = vunpack.c.l.bf16 %v523_v6  ;;  %v688_v15 = vunpack.c.h.bf16 %v523_v6  ;;  %v526_v19 = vld [vmem:[%s660_s25 + $0x10] sm:$0xff]  }
  0x15   : > { %v668_v4 = vunpack.c.l.bf16 %v512_v1  ;;  %v670_v5 = vunpack.c.h.bf16 %v512_v1  ;;  %v684_v13 = vunpack.c.l.bf16 %v525_v8  ;;  %v692_v17 = vunpack.c.h.bf16 %v525_v8  ;;  %v250_v28 = vld [vmem:[%s655_s22 + $0x18] sm:$0xf] }
  0x16   : > { %v272_v7 = vmul.f32 %v664_v2, %v664_v2  ;;  %v273_v10 = vmul.f32 %v666_v3, %v666_v3  ;;  %v274_v14 = vmul.f32 %v680_v11, %v680_v11  ;;  %v275_v20 = vmul.f32 %v688_v15, %v688_v15  ;;  %v264_v29 = vld [vmem:[%s660_s25 + $0x18] sm:$0xf] }
  0x17   : > { %v314_v9 = vmul.f32 %v668_v4, %v668_v4  ;;  %v315_v12 = vmul.f32 %v670_v5, %v670_v5  ;;  %v316_v16 = vmul.f32 %v684_v13, %v684_v13  ;;  %v698_v21 = vunpack.c.l.bf16 %v524_v18 }
  0x18   : > { %279 = vadd.xlane.f32.xlu0 %v272_v7  ;;  %v317_v22 = vmul.f32 %v692_v17, %v692_v17  ;;  %v702_v23 = vunpack.c.l.bf16 %v526_v19  ;;  %v706_v25 = vunpack.c.h.bf16 %v524_v18  ;;  %v710_v27 = vunpack.c.h.bf16 %v526_v19 }
  0x19   : > { %321 = vadd.xlane.f32.xlu1 %v314_v9  ;;  %v276_v24 = vmul.f32 %v698_v21, %v698_v21  ;;  %v716_v31 = vunpack.c.l.bf16 %v250_v28  ;;  %v720_v33 = vunpack.c.l.bf16 %v264_v29 }
  0x1a   : > { %v318_v26 = vmul.f32 %v702_v23, %v702_v23  ;;  %v277_v30 = vmul.f32 %v706_v25, %v706_v25  ;;  %v319_v32 = vmul.f32 %v710_v27, %v710_v27 }
  0x1b   : > { %v278_v34 = vmul.f32 %v716_v31, %v716_v31  ;;  %v320_v35 = vmul.f32 %v720_v33, %v720_v33 }
  0x1c   : > { %281 = vadd.xlane.f32.xlu0 %v273_v10 }
  0x1d   : > { %323 = vadd.xlane.f32.xlu1 %v315_v12 }
  0x20   : > { %283 = vadd.xlane.f32.xlu0 %v274_v14 }
  0x21   : > { %325 = vadd.xlane.f32.xlu1 %v316_v16 }
  0x24   : > { %285 = vadd.xlane.f32.xlu0 %v275_v20 }
  0x25   : > { %327 = vadd.xlane.f32.xlu1 %v317_v22 }
  0x28   : > { %287 = vadd.xlane.f32.xlu0 %v276_v24 }
  0x29   : > { %329 = vadd.xlane.f32.xlu1 %v318_v26 }
  0x2c   : > { %289 = vadd.xlane.f32.xlu0 %v277_v30 }
  0x2d   : > { %331 = vadd.xlane.f32.xlu1 %v319_v32 }
  0x30   : > { %291 = vadd.xlane.f32.xlu0 %v278_v34 }
  0x31   : > { %333 = vadd.xlane.f32.xlu1 %v320_v35 }
  0xa5   : > { %v280_v36 = vpop.xlane.xlu0 %279 }
  0xa6   : > { %v322_v37 = vpop.xlane.xlu1 %321  ;;  %v293_v39 = vadd.f32 1e-20, %v280_v36 }
  0xa7   : > { %v335_v42 = vadd.f32 1e-20, %v322_v37 }
  0xa9   : > { %v282_v38 = vpop.xlane.xlu0 %281 }
  0xaa   : > { %v324_v40 = vpop.xlane.xlu1 %323  ;;  %v294_v41 = vadd.f32 1e-20, %v282_v38 }
  0xab   : > { %v336_v43 = vadd.f32 1e-20, %v324_v40 }
  0xac   : > { %556 = vrsqrt.f32 %v294_v41 }
  0xad   : > { %558 = vrsqrt.f32 %v336_v43  ;;  %v284_v44 = vpop.xlane.xlu0 %283 }
  0xae   : > { %560 = vrsqrt.f32 %v293_v39  ;;  %v326_v45 = vpop.xlane.xlu1 %325  ;;  %v295_v46 = vadd.f32 1e-20, %v284_v44 }
  0xaf   : > { %562 = vrsqrt.f32 %v335_v42  ;;  %v337_v47 = vadd.f32 1e-20, %v326_v45 }
  0xb0   : > { %564 = vrsqrt.f32 %v295_v46 }
  0xb1   : > { %566 = vrsqrt.f32 %v337_v47  ;;  %v286_v48 = vpop.xlane.xlu0 %285 }
  0xb2   : > { %v328_v49 = vpop.xlane.xlu1 %327  ;;  %v296_v50 = vadd.f32 1e-20, %v286_v48 }
  0xb3   : > { %v338_v51 = vadd.f32 1e-20, %v328_v49 }
  0xb4   : > { %568 = vrsqrt.f32 %v296_v50 }
  0xb5   : > { %570 = vrsqrt.f32 %v338_v51  ;;  %v288_v52 = vpop.xlane.xlu0 %287 }
  0xb6   : > { %v557_v53 = vpop.eup %556  ;;  %v330_v54 = vpop.xlane.xlu1 %329  ;;  %v297_v55 = vadd.f32 1e-20, %v288_v52 }
  0xb7   : > { %v559_v56 = vpop.eup %558  ;;  %v339_v57 = vadd.f32 1e-20, %v330_v54  ;;  %v308_v63 = vmul.f32 %v557_v53, %v666_v3 }
  0xb8   : > { %v561_v58 = vpop.eup %560  ;;  %572 = vrsqrt.f32 %v297_v55  ;;  %v350_v62 = vmul.f32 %v559_v56, %v670_v5 }
  0xb9   : > { %v563_v59 = vpop.eup %562  ;;  %574 = vrsqrt.f32 %v339_v57  ;;  %v290_v60 = vpop.xlane.xlu0 %289  ;;  %v307_v7 = vmul.f32 %v561_v58, %v664_v2  ;;  %v608_v58 = vmov 0.0  }
  0xba   : > { %v565_v61 = vpop.eup %564  ;;  %v332_v0 = vpop.xlane.xlu1 %331  ;;  %v298_v1 = vadd.f32 1e-20, %v290_v60  ;;  %v349_v9 = vmul.f32 %v563_v59, %v668_v4  ;;  %v357_v18 = vsub.f32 %v308_v63, %v350_v62  ;;  %243 = vst.msk [vmem:[#allocation2] sm:$0x1] %vm242_vm0, %v608_v58 }
  0xbb   : > { %v567_v6 = vpop.eup %566  ;;  %v340_v8 = vadd.f32 1e-20, %v332_v0  ;;  %v309_v12 = vmul.f32 %v565_v61, %v680_v11 }
  0xbc   : > { %v351_v10 = vmul.f32 %v567_v6, %v684_v13  ;;  %576 = vrsqrt.f32 %v298_v1  ;;  %v356_v24 = vsub.f32 %v307_v7, %v349_v9  ;;  %v364_v26 = vmul.f32 %v357_v18, %v357_v18 }
  0xbd   : > { %578 = vrsqrt.f32 %v340_v8  ;;  %v292_v14 = vpop.xlane.xlu0 %291 }
  0xbe   : > { %v569_v16 = vpop.eup %568  ;;  %v334_v5 = vpop.xlane.xlu1 %333  ;;  %v299_v19 = vadd.f32 1e-20, %v292_v14  ;;  %v358_v4 = vsub.f32 %v309_v12, %v351_v10  ;;  %v363_v30 = vmul.f32 %v356_v24, %v356_v24 }
  0xbf   : > { %v571_v3 = vpop.eup %570  ;;  %v310_v20 = vmul.f32 %v569_v16, %v688_v15  ;;  %v341_v22 = vadd.f32 1e-20, %v334_v5  ;;  %v496_v15 = vld [vmem:[%s762_s2] ss:$0 sm:$0xff] }
  0xc0   : > { %v352_v2 = vmul.f32 %v571_v3, %v692_v17  ;;  %580 = vrsqrt.f32 %v299_v19  ;;  %v365_v34 = vmul.f32 %v358_v4, %v358_v4  ;;  %v378_v37 = vmul.f32 %v496_v15, %v364_v26 }
  0xc1   : > { %582 = vrsqrt.f32 %v341_v22  ;;  %v377_v42 = vmul.f32 %v496_v15, %v363_v30  ;;  %v384_v0 = vld [vmem:[#allocation2] sm:$0x1] }
  0xc2   : > { %v573_v13 = vpop.eup %572  ;;  %v359_v11 = vsub.f32 %v310_v20, %v352_v2 }
  0xc3   : > { %v575_v28 = vpop.eup %574  ;;  %v311_v29 = vmul.f32 %v573_v13, %v698_v21  ;;  %v379_v21 = vmul.f32 %v496_v15, %v365_v34  ;;  %v385_v45 = vadd.f32 %v378_v37, %v377_v42 }
  0xc4   : > { %v353_v32 = vmul.f32 %v575_v28, %v702_v23  ;;  %v366_v17 = vmul.f32 %v359_v11, %v359_v11 }
  0xc5   : > { %v386_v51 = vadd.f32 %v385_v45, %v379_v21 }
  0xc6   : > { %v577_v35 = vpop.eup %576  ;;  %v360_v36 = vsub.f32 %v311_v29, %v353_v32  ;;  %v380_v23 = vmul.f32 %v496_v15, %v366_v17 }
  0xc7   : > { %v579_v38 = vpop.eup %578  ;;  %v312_v39 = vmul.f32 %v577_v35, %v706_v25 }
  0xc8   : > { %v354_v40 = vmul.f32 %v579_v38, %v710_v27  ;;  %v367_v41 = vmul.f32 %v360_v36, %v360_v36  ;;  %v387_v25 = vadd.f32 %v386_v51, %v380_v23 }
  0xca   : > { %v581_v43 = vpop.eup %580  ;;  %v361_v44 = vsub.f32 %v312_v39, %v354_v40  ;;  %v381_v50 = vmul.f32 %v496_v15, %v367_v41 }
  0xcb   : > { %v583_v46 = vpop.eup %582  ;;  %v313_v47 = vmul.f32 %v581_v43, %v716_v31 }
  0xcc   : > { %v355_v48 = vmul.f32 %v583_v46, %v720_v33  ;;  %v368_v49 = vmul.f32 %v361_v44, %v361_v44  ;;  %v388_v27 = vadd.f32 %v387_v25, %v381_v50 }
  0xce   : > { %v362_v52 = vsub.f32 %v313_v47, %v355_v48  ;;  %v382_v53 = vmul.f32 %v496_v15, %v368_v49 }
  0xd0   : > { %v369_v54 = vmul.f32 %v362_v52, %v362_v52  ;;  %v389_v56 = vadd.f32 %v388_v27, %v382_v53 }
  0xd2   : > { %v383_v55 = vmul.f32 %v496_v15, %v369_v54 }
  0xd4   : > { %v390_v57 = vadd.f32 %v389_v56, %v383_v55 }
  0xd6   : > { %391 = vadd.xlane.f32.xlu0 %v390_v57 }
 0x163   : > { %v392_v31 = vpop.xlane.xlu0 %391 }
 0x164   : > { %v393_v33 = vrot.slane %v392_v31, 4 }
 0x166   : > { %v394_v59 = vadd.f32 %v393_v33, %v392_v31 }
 0x168   : > { %v395_v60 = vrot.slane %v394_v59, 2 }
 0x16a   : > { %v396_v61 = vadd.f32 %v395_v60, %v394_v59 }
 0x16c   : > { %v397_v62 = vrot.slane %v396_v61, 1 }
 0x16e   : > { %v398_v63 = vadd.f32 %v397_v62, %v396_v61 }
 0x170   : > { %529 = vpush %v398_v63 }
 0x1a1   : > { %s530_s28 = spop %529 }
 0x1a2   : > { %v400_v1 = vstv %s530_s28 }
 0x1a3   : > { %v401_v6 = vadd.f32 %v400_v1, %v384_v0 }
 0x1a5   : > { %403 = vst.msk [vmem:[#allocation2] sm:$0x1] %vm242_vm0, %v401_v6 }
 0x1ac   : > { %v407_v7 = vld [vmem:[#allocation2] sm:$0x1] }
 0x1ad   : > { %v408_v8 = vmul.f32 0.020408163, %v407_v7 }
 0x1af   : > { %409 = vst.msk [vmem:[%s237_s4] sm:$0x1] %vm242_vm0, %v408_v8 }
 0x1b0 PF: > { %s13_s14 = sadd.s32 1, %s606_s14   ;;  %s764_s12 = smov %s602_s13 }
 0x1b1   : > { %p10_p7 = scmp.ge.s32.totalorder %s13_s14, 4   ;;  %s765_s13 = smov %s767_s15 }
 0x1b3   :  { %12 = sbr.rel (!%p10_p7) target bundleno = 2 (0x2), region = 73 }

// kernel: autoencoder_perceptual_forward.11
= control target key start
LH: loop header
LB: loop body
LE: loop exit
PB: predicated region body
PF: predicated region fallthrough
CT: control target
= control target key end

     0   :  { %s418_s9 = smov 0   ;;  %s420_s10 = smov 0   ;;  %s461_s0 = inlined_call_operand.vmem [shape: f32[2,24,128], index: 0, kind: input, shape index: {}]   ;;  %s462_s1 = inlined_call_operand.vmem [shape: f32[2,24,128], index: 1, kind: input, shape index: {}]   ;;  %s463_s2 = inlined_call_operand.vmem [shape: f32[2,1,1], index: 2, kind: output, shape index: {}]  }
   0x1   :  { %s422_s11 = smov 0  }
   0x2 LB: > { %s24_s12 = sadd.s32 1, %s396_s10  ;;  %p339_p0 = scmp.ge.s32.totalorder %s400_s11, 1  ;;  %s400_s11 = sphi %s422_s11, %s12_s11   ;;  %s396_s10 = sphi %s420_s10, %s465_s10   ;;  %s392_s9 = sphi %s418_s9, %s464_s9  }
   0x3   : > { %p26_p1 = scmp.ge.s32.totalorder %s24_s12, 2  ;;  %p148_p2 = scmp.lt.s32.totalorder %s400_s11, 3 }
   0x5   : > { %s467_s12 = smov (%p26_p1, %s24_s12), 0  ;;  %p149_p3 = pnand %p339_p0, %p148_p2 }
   0x6   : > { %p182_p4 = scmp.lt.s32.totalorder (!%p149_p3), %s392_s9, 1  ;;  %vm208_vm0 = vcmask (!%p149_p3), 0   ;;  %v402_v20 = vmov (!%p149_p3), 0.0  }
   0x7   : > { %152 = sbr.rel (%p149_p3) target bundleno = 248 (0xf8), region = 28  ;;  %209 = vst.msk [vmem:[#allocation2] sm:$0x1] (!%p149_p3), %vm208_vm0, %v402_v20 }
   0xe   : > { %s469_s9 = smov (!%p182_p4, %s392_s9), 1  ;;  %v228_v28 = vld [vmem:[#allocation2] sm:$0x1] }
   0xf   : > { %s350_s13 = smul.u32 24, %s469_s9  ;;  %s203_s23 = scalar_lea.vmem %s463_s2, %s469_s9 }
  0x11   : > { %s189_s16 = scalar_lea.vmem %s461_s0, %s350_s13  ;;  %s199_s19 = scalar_lea.vmem %s462_s1, %s350_s13 }
  0x12   : > { %v210_v0 = vld [vmem:[%s189_s16] sm:$0xff]  ;;  %v211_v1 = vld [vmem:[%s189_s16 + $0x8] sm:$0xff]  ;;  %v212_v2 = vld [vmem:[%s189_s16 + $0x10] sm:$0xff] }
  0x13   : > { %v342_v3 = vclamps-f32 %v210_v0, 1.0  ;;  %v343_v4 = vclamps-f32 %v211_v1, 1.0  ;;  %v344_v5 = vclamps-f32 %v212_v2, 1.0  ;;  %v219_v6 = vld [vmem:[%s199_s19] sm:$0xff]  ;;  %v220_v7 = vld [vmem:[%s199_s19 + $0x8] sm:$0xff]  ;;  %v221_v8 = vld [vmem:[%s199_s19 + $0x10] sm:$0xff] }
  0x14   : > { %v345_v9 = vclamps-f32 %v219_v6, 1.0  ;;  %v346_v10 = vclamps-f32 %v220_v7, 1.0  ;;  %v347_v11 = vclamps-f32 %v221_v8, 1.0 }
  0x16   : > { %v229_v12 = vsub.f32 %v342_v3, %v345_v9  ;;  %v230_v13 = vsub.f32 %v343_v4, %v346_v10  ;;  %v231_v14 = vsub.f32 %v344_v5, %v347_v11 }
  0x18   : > { %v232_v15 = vand.u32 2147483647, %v229_v12  ;;  %v233_v16 = vand.u32 2147483647, %v230_v13  ;;  %v234_v17 = vand.u32 2147483647, %v231_v14 }
  0x1a   : > { %v235_v18 = vadd.f32 %v233_v16, %v232_v15 }
  0x1c   : > { %v236_v19 = vadd.f32 %v235_v18, %v234_v17 }
  0x1e   : > { %237 = vadd.xlane.f32.xlu0 %v236_v19 }
  0xab   : > { %v238_v21 = vpop.xlane.xlu0 %237 }
  0xac   : > { %v239_v22 = vrot.slane %v238_v21, 4 }
  0xae   : > { %v240_v23 = vadd.f32 %v239_v22, %v238_v21 }
  0xb0   : > { %v241_v24 = vrot.slane %v240_v23, 2 }
  0xb2   : > { %v242_v25 = vadd.f32 %v241_v24, %v240_v23 }
  0xb4   : > { %v243_v26 = vrot.slane %v242_v25, 1 }
  0xb6   : > { %v244_v27 = vadd.f32 %v243_v26, %v242_v25 }
  0xb8   : > { %351 = vpush %v244_v27 }
  0xe9   : > { %s352_s20 = spop %351 }
  0xea   : > { %v246_v29 = vstv %s352_s20 }
  0xeb   : > { %v247_v30 = vadd.f32 %v246_v29, %v228_v28 }
  0xed   : > { %249 = vst.msk [vmem:[#allocation2] sm:$0x1] %vm208_vm0, %v247_v30 }
  0xf4   : > { %v253_v31 = vld [vmem:[#allocation2] sm:$0x1] }
  0xf5   : > { %v254_v32 = vmul.f32 0.00032552084, %v253_v31 }
  0xf7   : > { %255 = vst.msk [vmem:[%s203_s23] sm:$0x1] %vm208_vm0, %v254_v32 }
  0xf8 PF: > { %s12_s11 = sadd.s32 1, %s400_s11   ;;  %s464_s9 = smov %s396_s10 }
  0xf9   : > { %p9_p5 = scmp.ge.s32.totalorder %s12_s11, 4   ;;  %s465_s10 = smov %s467_s12 }
  0xfb   :  { %11 = sbr.rel (!%p9_p5) target bundleno = 2 (0x2), region = 69 }

</bundles_post_ra>
